<compile_context>
chip_gen: v7x
topology: tpu7x:2x2x1
jax: 0.10.0
libtpu: 0.0.40
codegen_flags: <defaults>
</compile_context>

<pallas_src>
import functools

import numpy as np

import jax
import jax.numpy as jnp
from jax.experimental import pallas as pl
from jax.experimental.pallas import tpu as pltpu

_EPS = 1e-5


# ---------------------------------------------------------------------------
# One-time parameter repacking (PyTorch layouts -> kernel-friendly layouts).
# ---------------------------------------------------------------------------
def prepare_params(params, batch_size):
    B = batch_size

    def width_toeplitz(wt, stride, padding, w_in, w_out):
        # WT[kh, iw*Cin + ci, ow*Cout + co] = wt[ci, co, kh, ow - stride*iw + padding]
        cin, cout, k, _ = wt.shape
        wt_np = np.asarray(wt, np.float32)
        toep = np.zeros((k, w_in * cin, w_out * cout), np.float32)
        for iw in range(w_in):
            for kw in range(k):
                ow = stride * iw - padding + kw
                if 0 <= ow < w_out:
                    toep[:, iw * cin:(iw + 1) * cin, ow * cout:(ow + 1) * cout] = \
                        np.transpose(wt_np[:, :, :, kw], (2, 0, 1))
        return jnp.asarray(toep, jnp.bfloat16)

    def h_scatter(k, stride, padding, h_in, h_out):
        # Hb[kh, b*Hout + oh, b*Hin + ih] = 1  iff  oh == stride*ih - padding + kh
        hb = np.zeros((k, B * h_out, B * h_in), np.float32)
        for kh in range(k):
            for ih in range(h_in):
                oh = stride * ih - padding + kh
                if 0 <= oh < h_out:
                    for b in range(B):
                        hb[kh, b * h_out + oh, b * h_in + ih] = 1.0
        return jnp.asarray(hb)

    def chan_tile(cout, w_out):
        # T[co, ow*Cout + co] = 1 : per-channel vectors <-> (w, c) lane layout
        t = np.zeros((cout, w_out * cout), np.float32)
        for ow in range(w_out):
            t[:, ow * cout:(ow + 1) * cout] = np.eye(cout, dtype=np.float32)
        return jnp.asarray(t), jnp.asarray(np.ascontiguousarray(t.T))

    w1 = np.asarray(params["w1"], np.float32)      # (2048, latent)
    b1 = np.asarray(params["b1"], np.float32)      # (2048,)
    latent = w1.shape[1]
    # Fold Unflatten(1, (128, 4, 4)) + the NCHW -> (b,ih)x(iw,ci) permutation
    # into the Linear weight so the kernel never transposes activations.
    w1p = np.ascontiguousarray(
        w1.reshape(128, 4, 4, latent).transpose(1, 2, 0, 3)
          .reshape(128 * 4 * 4, latent).T)
    b1p = b1.reshape(128, 4, 4).transpose(1, 2, 0).reshape(1, 128 * 4 * 4)

    out_channels = int(params["wt3"].shape[1])
    t1, t1t = chan_tile(64, 7)
    t2, t2t = chan_tile(32, 14)
    b3row = np.tile(np.asarray(params["bt3"], np.float32), 28)
    b3row = np.ascontiguousarray(b3row.reshape(1, 28 * out_channels))

    return {
        "w1p": jnp.asarray(w1p, jnp.bfloat16),
        "b1p": jnp.asarray(b1p),
        "wt1": width_toeplitz(params["wt1"], 2, 2, 4, 7),
        "hb1": h_scatter(5, 2, 2, 4, 7),
        "g1": jnp.asarray(np.asarray(params["g1"], np.float32).reshape(1, 64)),
        "be1": jnp.asarray(np.asarray(params["be1"], np.float32).reshape(1, 64)),
        "t1": t1, "t1t": t1t,
        "wt2": width_toeplitz(params["wt2"], 2, 2, 7, 14),
        "hb2": h_scatter(5, 2, 2, 7, 14),
        "g2": jnp.asarray(np.asarray(params["g2"], np.float32).reshape(1, 32)),
        "be2": jnp.asarray(np.asarray(params["be2"], np.float32).reshape(1, 32)),
        "t2": t2, "t2t": t2t,
        "wt3": width_toeplitz(params["wt3"], 2, 1, 14, 28),
        "hb3": h_scatter(4, 2, 1, 14, 28),
        "b3row": jnp.asarray(b3row),
    }


# ---------------------------------------------------------------------------
# Fused forward kernel
# ---------------------------------------------------------------------------
def _fused_decoder_kernel(h_ref, w1_ref, b1_ref,
                          wt1_ref, hb1_ref, g1_ref, be1_ref, t1_ref, t1t_ref,
                          wt2_ref, hb2_ref, g2_ref, be2_ref, t2_ref, t2t_ref,
                          wt3_ref, hb3_ref, b3_ref,
                          o_ref, x0_ref, *, batch):
    f32 = jnp.float32
    bf16 = jnp.bfloat16

    def deconv(x, wt_ref, hb_ref):
        # ConvTranspose2d:  out = sum_kh  H_kh @ (x @ WT_kh)   (bf16 in, f32 acc)
        x16 = x.astype(bf16)
        acc = None
        for kh in range(wt_ref.shape[0]):
            c = jnp.dot(x16, wt_ref[kh], preferred_element_type=f32)
            contrib = jnp.dot(hb_ref[kh], c, preferred_element_type=f32)
            acc = contrib if acc is None else acc + contrib
        return acc

    def bn_relu(pre, n, g_ref, be_ref, t_ref, tt_ref):
        # training-mode BatchNorm2d (biased batch stats), single reduction pass
        inv_n = 1.0 / float(n)
        s1 = jnp.sum(pre, axis=0, keepdims=True)            # per (ow, co)
        s2 = jnp.sum(pre * pre, axis=0, keepdims=True)
        mean = jnp.dot(s1, tt_ref[...], preferred_element_type=f32) * inv_n
        ex2 = jnp.dot(s2, tt_ref[...], preferred_element_type=f32) * inv_n
        var = ex2 - mean * mean
        scale = g_ref[...] * jax.lax.rsqrt(var + _EPS)       # (1, Cout)
        shift = be_ref[...] - mean * scale
        scale_row = jnp.dot(scale, t_ref[...], preferred_element_type=f32)
        shift_row = jnp.dot(shift, t_ref[...], preferred_element_type=f32)
        return jnp.maximum(pre * scale_row + shift_row, 0.0)

    # ---- Linear(latent, 128*4*4) + ReLU (unflatten folded into weights) -----
    y1 = jnp.dot(h_ref[...].astype(bf16), w1_ref[...],
                 preferred_element_type=f32) + b1_ref[...]
    y1 = jnp.maximum(y1, 0.0)
    # lay out as rows (b, ih) x lanes (iw, ci): (B*4, 4*128)
    for b in range(batch):
        for ih in range(4):
            x0_ref[pl.ds(b * 4 + ih, 1), :] = y1[b:b + 1, ih * 512:(ih + 1) * 512]
    x0 = x0_ref[...]

    # ---- ConvTranspose2d(128, 64, 5, s=2, p=2) + BN + ReLU   (4x4 -> 7x7) ---
    x1 = bn_relu(deconv(x0, wt1_ref, hb1_ref), batch * 7 * 7,
                 g1_ref, be1_ref, t1_ref, t1t_ref)
    # ---- ConvTranspose2d(64, 32, 5, s=2, p=2, op=1) + BN + ReLU (7 -> 14) ---
    x2 = bn_relu(deconv(x1, wt2_ref, hb2_ref), batch * 14 * 14,
                 g2_ref, be2_ref, t2_ref, t2t_ref)
    # ---- ConvTranspose2d(32, Cout, 4, s=2, p=1) + bias + Tanh  (14 -> 28) ---
    pre3 = deconv(x2, wt3_ref, hb3_ref)
    o_ref[...] = jnp.tanh(pre3 + b3_ref[...])


@jax.jit
def auto_decoder_mnist(h, prepared):
    B = h.shape[0]
    cout = prepared["b3row"].shape[1] // 28
    kernel = functools.partial(_fused_decoder_kernel, batch=B)
    vmem = pl.BlockSpec(memory_space=pltpu.MemorySpace.VMEM)
    args = (h, prepared["w1p"], prepared["b1p"],
            prepared["wt1"], prepared["hb1"], prepared["g1"], prepared["be1"],
            prepared["t1"], prepared["t1t"],
            prepared["wt2"], prepared["hb2"], prepared["g2"], prepared["be2"],
            prepared["t2"], prepared["t2t"],
            prepared["wt3"], prepared["hb3"], prepared["b3row"])
    out2d = pl.pallas_call(
        kernel,
        out_shape=jax.ShapeDtypeStruct((B * 28, 28 * cout), jnp.float32),
        in_specs=[vmem] * len(args),
        out_specs=vmem,
        scratch_shapes=[pltpu.VMEM((B * 4, 4 * 128), jnp.float32)],
    )(*args)
    # (B*28, 28*Cout) -> NCHW; for Cout == 1 this is metadata-only in XLA.
    return out2d.reshape(B, 28, 28, cout).transpose(0, 3, 1, 2)


# ---------------------------------------------------------------------------
# Pure-JAX reference (NCHW, mirrors the PyTorch module) for a sanity check
# ---------------------------------------------------------------------------
def _ref_conv_transpose(x, wt, b, stride, padding, output_padding):
    K = wt.shape[2]
    w = jnp.flip(wt, axis=(2, 3)).transpose(1, 0, 2, 3)  # (Cout, Cin, K, K)
    lo = K - 1 - padding
    hi = K - 1 - padding + output_padding
    y = jax.lax.conv_general_dilated(
        x, w, window_strides=(1, 1), padding=[(lo, hi), (lo, hi)],
        lhs_dilation=(stride, stride),
        dimension_numbers=("NCHW", "OIHW", "NCHW"))
    return y + b.reshape(1, -1, 1, 1)


def _ref_bn(x, g, b):
    mean = x.mean(axis=(0, 2, 3), keepdims=True)
    var = ((x - mean) ** 2).mean(axis=(0, 2, 3), keepdims=True)
    xn = (x - mean) / jnp.sqrt(var + _EPS)
    return xn * g.reshape(1, -1, 1, 1) + b.reshape(1, -1, 1, 1)


def auto_decoder_mnist_ref(h, params):
    B = h.shape[0]
    y = jnp.maximum(h @ params["w1"].T + params["b1"], 0.0)
    x = y.reshape(B, 128, 4, 4)
    x = _ref_conv_transpose(x, params["wt1"], params["bt1"], 2, 2, 0)
    x = jnp.maximum(_ref_bn(x, params["g1"], params["be1"]), 0.0)
    x = _ref_conv_transpose(x, params["wt2"], params["bt2"], 2, 2, 1)
    x = jnp.maximum(_ref_bn(x, params["g2"], params["be2"]), 0.0)
    x = _ref_conv_transpose(x, params["wt3"], params["bt3"], 2, 1, 0)
    return jnp.tanh(x)


if __name__ == "__main__":
    latent_dim = 32
    out_channels = 1
    B = 2

    key = jax.random.PRNGKey(0)
    ks = jax.random.split(key, 16)
    s = 0.05
    params = {
        "w1": s * jax.random.normal(ks[0], (128 * 4 * 4, latent_dim), jnp.float32),
        "b1": s * jax.random.normal(ks[1], (128 * 4 * 4,), jnp.float32),
        "wt1": s * jax.random.normal(ks[2], (128, 64, 5, 5), jnp.float32),
        "bt1": s * jax.random.normal(ks[3], (64,), jnp.float32),
        "g1": 1.0 + s * jax.random.normal(ks[4], (64,), jnp.float32),
        "be1": s * jax.random.normal(ks[5], (64,), jnp.float32),
        "wt2": s * jax.random.normal(ks[6], (64, 32, 5, 5), jnp.float32),
        "bt2": s * jax.random.normal(ks[7], (32,), jnp.float32),
        "g2": 1.0 + s * jax.random.normal(ks[8], (32,), jnp.float32),
        "be2": s * jax.random.normal(ks[9], (32,), jnp.float32),
        "wt3": s * jax.random.normal(ks[10], (32, out_channels, 4, 4), jnp.float32),
        "bt3": s * jax.random.normal(ks[11], (out_channels,), jnp.float32),
    }
    h = jax.random.normal(ks[12], (B, latent_dim), jnp.float32)

    prepared = prepare_params(params, B)

    out = jax.block_until_ready(auto_decoder_mnist(h, prepared))
    assert out.shape == (B, out_channels, 28, 28), out.shape

    ref = jax.block_until_ready(auto_decoder_mnist_ref(h, params))
    max_err = float(jnp.max(jnp.abs(out - ref)))
    assert jnp.allclose(out, ref, atol=5e-2, rtol=5e-2), max_err

    print("KERNEL_OK")
</pallas_src>

<mosaic_0001>
module attributes {stable_mosaic.version = 11 : i64} {
  func.func @_fused_decoder_kernel(%arg0: memref<2x32xf32, #tpu.memory_space<vmem>>, %arg1: memref<32x2048xbf16, #tpu.memory_space<vmem>>, %arg2: memref<1x2048xf32, #tpu.memory_space<vmem>>, %arg3: memref<5x512x448xbf16, #tpu.memory_space<vmem>>, %arg4: memref<5x14x8xf32, #tpu.memory_space<vmem>>, %arg5: memref<1x64xf32, #tpu.memory_space<vmem>>, %arg6: memref<1x64xf32, #tpu.memory_space<vmem>>, %arg7: memref<64x448xf32, #tpu.memory_space<vmem>>, %arg8: memref<448x64xf32, #tpu.memory_space<vmem>>, %arg9: memref<5x448x448xbf16, #tpu.memory_space<vmem>>, %arg10: memref<5x28x14xf32, #tpu.memory_space<vmem>>, %arg11: memref<1x32xf32, #tpu.memory_space<vmem>>, %arg12: memref<1x32xf32, #tpu.memory_space<vmem>>, %arg13: memref<32x448xf32, #tpu.memory_space<vmem>>, %arg14: memref<448x32xf32, #tpu.memory_space<vmem>>, %arg15: memref<4x448x28xbf16, #tpu.memory_space<vmem>>, %arg16: memref<4x56x28xf32, #tpu.memory_space<vmem>>, %arg17: memref<1x28xf32, #tpu.memory_space<vmem>>, %arg18: memref<56x28xf32, #tpu.memory_space<vmem>>, %arg19: memref<8x512xf32, #tpu.memory_space<vmem>>) attributes {dimension_semantics = [], scalar_prefetch = 0 : i64, scratch_operands = 1 : i64, tpu.core_type = #tpu.core_type<tc>} {
    %c0 = arith.constant 0 : index
    %c0_0 = arith.constant 0 : index
    %0 = vector.load %arg0[%c0, %c0_0] : memref<2x32xf32, #tpu.memory_space<vmem>>, vector<2x32xf32>
    %1 = arith.truncf %0 : vector<2x32xf32> to vector<2x32xbf16>
    %c0_1 = arith.constant 0 : index
    %c0_2 = arith.constant 0 : index
    %2 = vector.load %arg1[%c0_1, %c0_2] : memref<32x2048xbf16, #tpu.memory_space<vmem>>, vector<32x2048xbf16>
    %cst = arith.constant dense<0.000000e+00> : vector<2x2048xf32>
    %3 = tpu.matmul %1, %2, %cst {dimension_numbers = #tpu.dot_dimension_numbers<[1], [0], [0], [1], [0, 0, 1, 1], [], []>} : vector<2x32xbf16>, vector<32x2048xbf16>, vector<2x2048xf32> -> vector<2x2048xf32>
    %c0_3 = arith.constant 0 : index
    %c0_4 = arith.constant 0 : index
    %4 = vector.load %arg2[%c0_3, %c0_4] : memref<1x2048xf32, #tpu.memory_space<vmem>>, vector<1x2048xf32>
    %5 = vector.broadcast %4 : vector<1x2048xf32> to vector<2x2048xf32>
    %6 = arith.addf %3, %5 : vector<2x2048xf32>
    %cst_5 = arith.constant 0.000000e+00 : f32
    %7 = vector.broadcast %cst_5 : f32 to vector<2x2048xf32>
    %8 = arith.maximumf %6, %7 : vector<2x2048xf32>
    %9 = vector.extract_strided_slice %8 {offsets = [0, 0], sizes = [1, 512], strides = [1, 1]} : vector<2x2048xf32> to vector<1x512xf32>
    %c0_6 = arith.constant 0 : index
    %c0_7 = arith.constant 0 : index
    %10 = vector.load %arg19[%c0_6, %c0_7] : memref<8x512xf32, #tpu.memory_space<vmem>>, vector<1x512xf32>
    tpu.vector_store %arg19[%c0_6, %c0_7], %9 {strides = array<i32>} : memref<8x512xf32, #tpu.memory_space<vmem>>, vector<1x512xf32>,
    %11 = vector.extract_strided_slice %8 {offsets = [0, 512], sizes = [1, 512], strides = [1, 1]} : vector<2x2048xf32> to vector<1x512xf32>
    %c1 = arith.constant 1 : index
    %c0_8 = arith.constant 0 : index
    %12 = vector.load %arg19[%c1, %c0_8] : memref<8x512xf32, #tpu.memory_space<vmem>>, vector<1x512xf32>
    tpu.vector_store %arg19[%c1, %c0_8], %11 {strides = array<i32>} : memref<8x512xf32, #tpu.memory_space<vmem>>, vector<1x512xf32>,
    %13 = vector.extract_strided_slice %8 {offsets = [0, 1024], sizes = [1, 512], strides = [1, 1]} : vector<2x2048xf32> to vector<1x512xf32>
    %c2 = arith.constant 2 : index
    %c0_9 = arith.constant 0 : index
    %14 = vector.load %arg19[%c2, %c0_9] : memref<8x512xf32, #tpu.memory_space<vmem>>, vector<1x512xf32>
    tpu.vector_store %arg19[%c2, %c0_9], %13 {strides = array<i32>} : memref<8x512xf32, #tpu.memory_space<vmem>>, vector<1x512xf32>,
    %15 = vector.extract_strided_slice %8 {offsets = [0, 1536], sizes = [1, 512], strides = [1, 1]} : vector<2x2048xf32> to vector<1x512xf32>
    %c3 = arith.constant 3 : index
    %c0_10 = arith.constant 0 : index
    %16 = vector.load %arg19[%c3, %c0_10] : memref<8x512xf32, #tpu.memory_space<vmem>>, vector<1x512xf32>
    tpu.vector_store %arg19[%c3, %c0_10], %15 {strides = array<i32>} : memref<8x512xf32, #tpu.memory_space<vmem>>, vector<1x512xf32>,
    %17 = vector.extract_strided_slice %8 {offsets = [1, 0], sizes = [1, 512], strides = [1, 1]} : vector<2x2048xf32> to vector<1x512xf32>
    %c4 = arith.constant 4 : index
    %c0_11 = arith.constant 0 : index
    %18 = vector.load %arg19[%c4, %c0_11] : memref<8x512xf32, #tpu.memory_space<vmem>>, vector<1x512xf32>
    tpu.vector_store %arg19[%c4, %c0_11], %17 {strides = array<i32>} : memref<8x512xf32, #tpu.memory_space<vmem>>, vector<1x512xf32>,
    %19 = vector.extract_strided_slice %8 {offsets = [1, 512], sizes = [1, 512], strides = [1, 1]} : vector<2x2048xf32> to vector<1x512xf32>
    %c5 = arith.constant 5 : index
    %c0_12 = arith.constant 0 : index
    %20 = vector.load %arg19[%c5, %c0_12] : memref<8x512xf32, #tpu.memory_space<vmem>>, vector<1x512xf32>
    tpu.vector_store %arg19[%c5, %c0_12], %19 {strides = array<i32>} : memref<8x512xf32, #tpu.memory_space<vmem>>, vector<1x512xf32>,
    %21 = vector.extract_strided_slice %8 {offsets = [1, 1024], sizes = [1, 512], strides = [1, 1]} : vector<2x2048xf32> to vector<1x512xf32>
    %c6 = arith.constant 6 : index
    %c0_13 = arith.constant 0 : index
    %22 = vector.load %arg19[%c6, %c0_13] : memref<8x512xf32, #tpu.memory_space<vmem>>, vector<1x512xf32>
    tpu.vector_store %arg19[%c6, %c0_13], %21 {strides = array<i32>} : memref<8x512xf32, #tpu.memory_space<vmem>>, vector<1x512xf32>,
    %23 = vector.extract_strided_slice %8 {offsets = [1, 1536], sizes = [1, 512], strides = [1, 1]} : vector<2x2048xf32> to vector<1x512xf32>
    %c7 = arith.constant 7 : index
    %c0_14 = arith.constant 0 : index
    %24 = vector.load %arg19[%c7, %c0_14] : memref<8x512xf32, #tpu.memory_space<vmem>>, vector<1x512xf32>
    tpu.vector_store %arg19[%c7, %c0_14], %23 {strides = array<i32>} : memref<8x512xf32, #tpu.memory_space<vmem>>, vector<1x512xf32>,
    %c0_15 = arith.constant 0 : index
    %c0_16 = arith.constant 0 : index
    %25 = vector.load %arg19[%c0_15, %c0_16] : memref<8x512xf32, #tpu.memory_space<vmem>>, vector<8x512xf32>
    %26 = arith.truncf %25 : vector<8x512xf32> to vector<8x512xbf16>
    %c0_17 = arith.constant 0 : index
    %c0_18 = arith.constant 0 : index
    %c0_19 = arith.constant 0 : index
    %27 = vector.load %arg3[%c0_17, %c0_18, %c0_19] : memref<5x512x448xbf16, #tpu.memory_space<vmem>>, vector<1x512x448xbf16>
    %28 = vector.shape_cast %27 : vector<1x512x448xbf16> to vector<512x448xbf16>
    %cst_20 = arith.constant dense<0.000000e+00> : vector<8x448xf32>
    %29 = tpu.matmul %26, %28, %cst_20 {dimension_numbers = #tpu.dot_dimension_numbers<[1], [0], [0], [1], [0, 0, 1, 1], [], []>} : vector<8x512xbf16>, vector<512x448xbf16>, vector<8x448xf32> -> vector<8x448xf32>
    %c0_21 = arith.constant 0 : index
    %c0_22 = arith.constant 0 : index
    %c0_23 = arith.constant 0 : index
    %30 = vector.load %arg4[%c0_21, %c0_22, %c0_23] : memref<5x14x8xf32, #tpu.memory_space<vmem>>, vector<1x14x8xf32>
    %31 = vector.shape_cast %30 : vector<1x14x8xf32> to vector<14x8xf32>
    %cst_24 = arith.constant dense<0.000000e+00> : vector<14x448xf32>
    %32 = tpu.matmul %31, %29, %cst_24 {dimension_numbers = #tpu.dot_dimension_numbers<[1], [0], [0], [1], [0, 0, 1, 1], [], []>} : vector<14x8xf32>, vector<8x448xf32>, vector<14x448xf32> -> vector<14x448xf32>
    %c1_25 = arith.constant 1 : index
    %c0_26 = arith.constant 0 : index
    %c0_27 = arith.constant 0 : index
    %33 = vector.load %arg3[%c1_25, %c0_26, %c0_27] : memref<5x512x448xbf16, #tpu.memory_space<vmem>>, vector<1x512x448xbf16>
    %34 = vector.shape_cast %33 : vector<1x512x448xbf16> to vector<512x448xbf16>
    %cst_28 = arith.constant dense<0.000000e+00> : vector<8x448xf32>
    %35 = tpu.matmul %26, %34, %cst_28 {dimension_numbers = #tpu.dot_dimension_numbers<[1], [0], [0], [1], [0, 0, 1, 1], [], []>} : vector<8x512xbf16>, vector<512x448xbf16>, vector<8x448xf32> -> vector<8x448xf32>
    %c1_29 = arith.constant 1 : index
    %c0_30 = arith.constant 0 : index
    %c0_31 = arith.constant 0 : index
    %36 = vector.load %arg4[%c1_29, %c0_30, %c0_31] : memref<5x14x8xf32, #tpu.memory_space<vmem>>, vector<1x14x8xf32>
    %37 = vector.shape_cast %36 : vector<1x14x8xf32> to vector<14x8xf32>
    %cst_32 = arith.constant dense<0.000000e+00> : vector<14x448xf32>
    %38 = tpu.matmul %37, %35, %cst_32 {dimension_numbers = #tpu.dot_dimension_numbers<[1], [0], [0], [1], [0, 0, 1, 1], [], []>} : vector<14x8xf32>, vector<8x448xf32>, vector<14x448xf32> -> vector<14x448xf32>
    %39 = arith.addf %32, %38 : vector<14x448xf32>
    %c2_33 = arith.constant 2 : index
    %c0_34 = arith.constant 0 : index
    %c0_35 = arith.constant 0 : index
    %40 = vector.load %arg3[%c2_33, %c0_34, %c0_35] : memref<5x512x448xbf16, #tpu.memory_space<vmem>>, vector<1x512x448xbf16>
    %41 = vector.shape_cast %40 : vector<1x512x448xbf16> to vector<512x448xbf16>
    %cst_36 = arith.constant dense<0.000000e+00> : vector<8x448xf32>
    %42 = tpu.matmul %26, %41, %cst_36 {dimension_numbers = #tpu.dot_dimension_numbers<[1], [0], [0], [1], [0, 0, 1, 1], [], []>} : vector<8x512xbf16>, vector<512x448xbf16>, vector<8x448xf32> -> vector<8x448xf32>
    %c2_37 = arith.constant 2 : index
    %c0_38 = arith.constant 0 : index
    %c0_39 = arith.constant 0 : index
    %43 = vector.load %arg4[%c2_37, %c0_38, %c0_39] : memref<5x14x8xf32, #tpu.memory_space<vmem>>, vector<1x14x8xf32>
    %44 = vector.shape_cast %43 : vector<1x14x8xf32> to vector<14x8xf32>
    %cst_40 = arith.constant dense<0.000000e+00> : vector<14x448xf32>
    %45 = tpu.matmul %44, %42, %cst_40 {dimension_numbers = #tpu.dot_dimension_numbers<[1], [0], [0], [1], [0, 0, 1, 1], [], []>} : vector<14x8xf32>, vector<8x448xf32>, vector<14x448xf32> -> vector<14x448xf32>
    %46 = arith.addf %39, %45 : vector<14x448xf32>
    %c3_41 = arith.constant 3 : index
    %c0_42 = arith.constant 0 : index
    %c0_43 = arith.constant 0 : index
    %47 = vector.load %arg3[%c3_41, %c0_42, %c0_43] : memref<5x512x448xbf16, #tpu.memory_space<vmem>>, vector<1x512x448xbf16>
    %48 = vector.shape_cast %47 : vector<1x512x448xbf16> to vector<512x448xbf16>
    %cst_44 = arith.constant dense<0.000000e+00> : vector<8x448xf32>
    %49 = tpu.matmul %26, %48, %cst_44 {dimension_numbers = #tpu.dot_dimension_numbers<[1], [0], [0], [1], [0, 0, 1, 1], [], []>} : vector<8x512xbf16>, vector<512x448xbf16>, vector<8x448xf32> -> vector<8x448xf32>
    %c3_45 = arith.constant 3 : index
    %c0_46 = arith.constant 0 : index
    %c0_47 = arith.constant 0 : index
    %50 = vector.load %arg4[%c3_45, %c0_46, %c0_47] : memref<5x14x8xf32, #tpu.memory_space<vmem>>, vector<1x14x8xf32>
    %51 = vector.shape_cast %50 : vector<1x14x8xf32> to vector<14x8xf32>
    %cst_48 = arith.constant dense<0.000000e+00> : vector<14x448xf32>
    %52 = tpu.matmul %51, %49, %cst_48 {dimension_numbers = #tpu.dot_dimension_numbers<[1], [0], [0], [1], [0, 0, 1, 1], [], []>} : vector<14x8xf32>, vector<8x448xf32>, vector<14x448xf32> -> vector<14x448xf32>
    %53 = arith.addf %46, %52 : vector<14x448xf32>
    %c4_49 = arith.constant 4 : index
    %c0_50 = arith.constant 0 : index
    %c0_51 = arith.constant 0 : index
    %54 = vector.load %arg3[%c4_49, %c0_50, %c0_51] : memref<5x512x448xbf16, #tpu.memory_space<vmem>>, vector<1x512x448xbf16>
    %55 = vector.shape_cast %54 : vector<1x512x448xbf16> to vector<512x448xbf16>
    %cst_52 = arith.constant dense<0.000000e+00> : vector<8x448xf32>
    %56 = tpu.matmul %26, %55, %cst_52 {dimension_numbers = #tpu.dot_dimension_numbers<[1], [0], [0], [1], [0, 0, 1, 1], [], []>} : vector<8x512xbf16>, vector<512x448xbf16>, vector<8x448xf32> -> vector<8x448xf32>
    %c4_53 = arith.constant 4 : index
    %c0_54 = arith.constant 0 : index
    %c0_55 = arith.constant 0 : index
    %57 = vector.load %arg4[%c4_53, %c0_54, %c0_55] : memref<5x14x8xf32, #tpu.memory_space<vmem>>, vector<1x14x8xf32>
    %58 = vector.shape_cast %57 : vector<1x14x8xf32> to vector<14x8xf32>
    %cst_56 = arith.constant dense<0.000000e+00> : vector<14x448xf32>
    %59 = tpu.matmul %58, %56, %cst_56 {dimension_numbers = #tpu.dot_dimension_numbers<[1], [0], [0], [1], [0, 0, 1, 1], [], []>} : vector<14x8xf32>, vector<8x448xf32>, vector<14x448xf32> -> vector<14x448xf32>
    %60 = arith.addf %53, %59 : vector<14x448xf32>
    %cst_57 = arith.constant dense<0.000000e+00> : vector<448xf32>
    %61 = vector.multi_reduction <add>, %60, %cst_57 [0] : vector<14x448xf32> to vector<448xf32>
    %62 = vector.shape_cast %61 : vector<448xf32> to vector<1x448xf32>
    %63 = arith.mulf %60, %60 : vector<14x448xf32>
    %cst_58 = arith.constant dense<0.000000e+00> : vector<448xf32>
    %64 = vector.multi_reduction <add>, %63, %cst_58 [0] : vector<14x448xf32> to vector<448xf32>
    %65 = vector.shape_cast %64 : vector<448xf32> to vector<1x448xf32>
    %c0_59 = arith.constant 0 : index
    %c0_60 = arith.constant 0 : index
    %66 = vector.load %arg8[%c0_59, %c0_60] : memref<448x64xf32, #tpu.memory_space<vmem>>, vector<448x64xf32>
    %cst_61 = arith.constant dense<0.000000e+00> : vector<1x64xf32>
    %67 = tpu.matmul %62, %66, %cst_61 {dimension_numbers = #tpu.dot_dimension_numbers<[1], [0], [0], [1], [0, 0, 1, 1], [], []>} : vector<1x448xf32>, vector<448x64xf32>, vector<1x64xf32> -> vector<1x64xf32>
    %cst_62 = arith.constant 0.0102040814 : f32
    %68 = vector.broadcast %cst_62 : f32 to vector<1x64xf32>
    %69 = arith.mulf %67, %68 : vector<1x64xf32>
    %c0_63 = arith.constant 0 : index
    %c0_64 = arith.constant 0 : index
    %70 = vector.load %arg8[%c0_63, %c0_64] : memref<448x64xf32, #tpu.memory_space<vmem>>, vector<448x64xf32>
    %cst_65 = arith.constant dense<0.000000e+00> : vector<1x64xf32>
    %71 = tpu.matmul %65, %70, %cst_65 {dimension_numbers = #tpu.dot_dimension_numbers<[1], [0], [0], [1], [0, 0, 1, 1], [], []>} : vector<1x448xf32>, vector<448x64xf32>, vector<1x64xf32> -> vector<1x64xf32>
    %cst_66 = arith.constant 0.0102040814 : f32
    %72 = vector.broadcast %cst_66 : f32 to vector<1x64xf32>
    %73 = arith.mulf %71, %72 : vector<1x64xf32>
    %74 = arith.mulf %69, %69 : vector<1x64xf32>
    %75 = arith.subf %73, %74 : vector<1x64xf32>
    %c0_67 = arith.constant 0 : index
    %c0_68 = arith.constant 0 : index
    %76 = vector.load %arg5[%c0_67, %c0_68] : memref<1x64xf32, #tpu.memory_space<vmem>>, vector<1x64xf32>
    %cst_69 = arith.constant 9.99999974E-6 : f32
    %77 = vector.broadcast %cst_69 : f32 to vector<1x64xf32>
    %78 = arith.addf %75, %77 : vector<1x64xf32>
    %79 = math.rsqrt %78 : vector<1x64xf32>
    %80 = arith.mulf %76, %79 : vector<1x64xf32>
    %c0_70 = arith.constant 0 : index
    %c0_71 = arith.constant 0 : index
    %81 = vector.load %arg6[%c0_70, %c0_71] : memref<1x64xf32, #tpu.memory_space<vmem>>, vector<1x64xf32>
    %82 = arith.mulf %69, %80 : vector<1x64xf32>
    %83 = arith.subf %81, %82 : vector<1x64xf32>
    %c0_72 = arith.constant 0 : index
    %c0_73 = arith.constant 0 : index
    %84 = vector.load %arg7[%c0_72, %c0_73] : memref<64x448xf32, #tpu.memory_space<vmem>>, vector<64x448xf32>
    %cst_74 = arith.constant dense<0.000000e+00> : vector<1x448xf32>
    %85 = tpu.matmul %80, %84, %cst_74 {dimension_numbers = #tpu.dot_dimension_numbers<[1], [0], [0], [1], [0, 0, 1, 1], [], []>} : vector<1x64xf32>, vector<64x448xf32>, vector<1x448xf32> -> vector<1x448xf32>
    %c0_75 = arith.constant 0 : index
    %c0_76 = arith.constant 0 : index
    %86 = vector.load %arg7[%c0_75, %c0_76] : memref<64x448xf32, #tpu.memory_space<vmem>>, vector<64x448xf32>
    %cst_77 = arith.constant dense<0.000000e+00> : vector<1x448xf32>
    %87 = tpu.matmul %83, %86, %cst_77 {dimension_numbers = #tpu.dot_dimension_numbers<[1], [0], [0], [1], [0, 0, 1, 1], [], []>} : vector<1x64xf32>, vector<64x448xf32>, vector<1x448xf32> -> vector<1x448xf32>
    %88 = vector.broadcast %85 : vector<1x448xf32> to vector<14x448xf32>
    %89 = arith.mulf %60, %88 : vector<14x448xf32>
    %90 = vector.broadcast %87 : vector<1x448xf32> to vector<14x448xf32>
    %91 = arith.addf %89, %90 : vector<14x448xf32>
    %cst_78 = arith.constant 0.000000e+00 : f32
    %92 = vector.broadcast %cst_78 : f32 to vector<14x448xf32>
    %93 = arith.maximumf %91, %92 : vector<14x448xf32>
    %94 = arith.truncf %93 : vector<14x448xf32> to vector<14x448xbf16>
    %c0_79 = arith.constant 0 : index
    %c0_80 = arith.constant 0 : index
    %c0_81 = arith.constant 0 : index
    %95 = vector.load %arg9[%c0_79, %c0_80, %c0_81] : memref<5x448x448xbf16, #tpu.memory_space<vmem>>, vector<1x448x448xbf16>
    %96 = vector.shape_cast %95 : vector<1x448x448xbf16> to vector<448x448xbf16>
    %cst_82 = arith.constant dense<0.000000e+00> : vector<14x448xf32>
    %97 = tpu.matmul %94, %96, %cst_82 {dimension_numbers = #tpu.dot_dimension_numbers<[1], [0], [0], [1], [0, 0, 1, 1], [], []>} : vector<14x448xbf16>, vector<448x448xbf16>, vector<14x448xf32> -> vector<14x448xf32>
    %c0_83 = arith.constant 0 : index
    %c0_84 = arith.constant 0 : index
    %c0_85 = arith.constant 0 : index
    %98 = vector.load %arg10[%c0_83, %c0_84, %c0_85] : memref<5x28x14xf32, #tpu.memory_space<vmem>>, vector<1x28x14xf32>
    %99 = vector.shape_cast %98 : vector<1x28x14xf32> to vector<28x14xf32>
    %cst_86 = arith.constant dense<0.000000e+00> : vector<28x448xf32>
    %100 = tpu.matmul %99, %97, %cst_86 {dimension_numbers = #tpu.dot_dimension_numbers<[1], [0], [0], [1], [0, 0, 1, 1], [], []>} : vector<28x14xf32>, vector<14x448xf32>, vector<28x448xf32> -> vector<28x448xf32>
    %c1_87 = arith.constant 1 : index
    %c0_88 = arith.constant 0 : index
    %c0_89 = arith.constant 0 : index
    %101 = vector.load %arg9[%c1_87, %c0_88, %c0_89] : memref<5x448x448xbf16, #tpu.memory_space<vmem>>, vector<1x448x448xbf16>
    %102 = vector.shape_cast %101 : vector<1x448x448xbf16> to vector<448x448xbf16>
    %cst_90 = arith.constant dense<0.000000e+00> : vector<14x448xf32>
    %103 = tpu.matmul %94, %102, %cst_90 {dimension_numbers = #tpu.dot_dimension_numbers<[1], [0], [0], [1], [0, 0, 1, 1], [], []>} : vector<14x448xbf16>, vector<448x448xbf16>, vector<14x448xf32> -> vector<14x448xf32>
    %c1_91 = arith.constant 1 : index
    %c0_92 = arith.constant 0 : index
    %c0_93 = arith.constant 0 : index
    %104 = vector.load %arg10[%c1_91, %c0_92, %c0_93] : memref<5x28x14xf32, #tpu.memory_space<vmem>>, vector<1x28x14xf32>
    %105 = vector.shape_cast %104 : vector<1x28x14xf32> to vector<28x14xf32>
    %cst_94 = arith.constant dense<0.000000e+00> : vector<28x448xf32>
    %106 = tpu.matmul %105, %103, %cst_94 {dimension_numbers = #tpu.dot_dimension_numbers<[1], [0], [0], [1], [0, 0, 1, 1], [], []>} : vector<28x14xf32>, vector<14x448xf32>, vector<28x448xf32> -> vector<28x448xf32>
    %107 = arith.addf %100, %106 : vector<28x448xf32>
    %c2_95 = arith.constant 2 : index
    %c0_96 = arith.constant 0 : index
    %c0_97 = arith.constant 0 : index
    %108 = vector.load %arg9[%c2_95, %c0_96, %c0_97] : memref<5x448x448xbf16, #tpu.memory_space<vmem>>, vector<1x448x448xbf16>
    %109 = vector.shape_cast %108 : vector<1x448x448xbf16> to vector<448x448xbf16>
    %cst_98 = arith.constant dense<0.000000e+00> : vector<14x448xf32>
    %110 = tpu.matmul %94, %109, %cst_98 {dimension_numbers = #tpu.dot_dimension_numbers<[1], [0], [0], [1], [0, 0, 1, 1], [], []>} : vector<14x448xbf16>, vector<448x448xbf16>, vector<14x448xf32> -> vector<14x448xf32>
    %c2_99 = arith.constant 2 : index
    %c0_100 = arith.constant 0 : index
    %c0_101 = arith.constant 0 : index
    %111 = vector.load %arg10[%c2_99, %c0_100, %c0_101] : memref<5x28x14xf32, #tpu.memory_space<vmem>>, vector<1x28x14xf32>
    %112 = vector.shape_cast %111 : vector<1x28x14xf32> to vector<28x14xf32>
    %cst_102 = arith.constant dense<0.000000e+00> : vector<28x448xf32>
    %113 = tpu.matmul %112, %110, %cst_102 {dimension_numbers = #tpu.dot_dimension_numbers<[1], [0], [0], [1], [0, 0, 1, 1], [], []>} : vector<28x14xf32>, vector<14x448xf32>, vector<28x448xf32> -> vector<28x448xf32>
    %114 = arith.addf %107, %113 : vector<28x448xf32>
    %c3_103 = arith.constant 3 : index
    %c0_104 = arith.constant 0 : index
    %c0_105 = arith.constant 0 : index
    %115 = vector.load %arg9[%c3_103, %c0_104, %c0_105] : memref<5x448x448xbf16, #tpu.memory_space<vmem>>, vector<1x448x448xbf16>
    %116 = vector.shape_cast %115 : vector<1x448x448xbf16> to vector<448x448xbf16>
    %cst_106 = arith.constant dense<0.000000e+00> : vector<14x448xf32>
    %117 = tpu.matmul %94, %116, %cst_106 {dimension_numbers = #tpu.dot_dimension_numbers<[1], [0], [0], [1], [0, 0, 1, 1], [], []>} : vector<14x448xbf16>, vector<448x448xbf16>, vector<14x448xf32> -> vector<14x448xf32>
    %c3_107 = arith.constant 3 : index
    %c0_108 = arith.constant 0 : index
    %c0_109 = arith.constant 0 : index
    %118 = vector.load %arg10[%c3_107, %c0_108, %c0_109] : memref<5x28x14xf32, #tpu.memory_space<vmem>>, vector<1x28x14xf32>
    %119 = vector.shape_cast %118 : vector<1x28x14xf32> to vector<28x14xf32>
    %cst_110 = arith.constant dense<0.000000e+00> : vector<28x448xf32>
    %120 = tpu.matmul %119, %117, %cst_110 {dimension_numbers = #tpu.dot_dimension_numbers<[1], [0], [0], [1], [0, 0, 1, 1], [], []>} : vector<28x14xf32>, vector<14x448xf32>, vector<28x448xf32> -> vector<28x448xf32>
    %121 = arith.addf %114, %120 : vector<28x448xf32>
    %c4_111 = arith.constant 4 : index
    %c0_112 = arith.constant 0 : index
    %c0_113 = arith.constant 0 : index
    %122 = vector.load %arg9[%c4_111, %c0_112, %c0_113] : memref<5x448x448xbf16, #tpu.memory_space<vmem>>, vector<1x448x448xbf16>
    %123 = vector.shape_cast %122 : vector<1x448x448xbf16> to vector<448x448xbf16>
    %cst_114 = arith.constant dense<0.000000e+00> : vector<14x448xf32>
    %124 = tpu.matmul %94, %123, %cst_114 {dimension_numbers = #tpu.dot_dimension_numbers<[1], [0], [0], [1], [0, 0, 1, 1], [], []>} : vector<14x448xbf16>, vector<448x448xbf16>, vector<14x448xf32> -> vector<14x448xf32>
    %c4_115 = arith.constant 4 : index
    %c0_116 = arith.constant 0 : index
    %c0_117 = arith.constant 0 : index
    %125 = vector.load %arg10[%c4_115, %c0_116, %c0_117] : memref<5x28x14xf32, #tpu.memory_space<vmem>>, vector<1x28x14xf32>
    %126 = vector.shape_cast %125 : vector<1x28x14xf32> to vector<28x14xf32>
    %cst_118 = arith.constant dense<0.000000e+00> : vector<28x448xf32>
    %127 = tpu.matmul %126, %124, %cst_118 {dimension_numbers = #tpu.dot_dimension_numbers<[1], [0], [0], [1], [0, 0, 1, 1], [], []>} : vector<28x14xf32>, vector<14x448xf32>, vector<28x448xf32> -> vector<28x448xf32>
    %128 = arith.addf %121, %127 : vector<28x448xf32>
    %cst_119 = arith.constant dense<0.000000e+00> : vector<448xf32>
    %129 = vector.multi_reduction <add>, %128, %cst_119 [0] : vector<28x448xf32> to vector<448xf32>
    %130 = vector.shape_cast %129 : vector<448xf32> to vector<1x448xf32>
    %131 = arith.mulf %128, %128 : vector<28x448xf32>
    %cst_120 = arith.constant dense<0.000000e+00> : vector<448xf32>
    %132 = vector.multi_reduction <add>, %131, %cst_120 [0] : vector<28x448xf32> to vector<448xf32>
    %133 = vector.shape_cast %132 : vector<448xf32> to vector<1x448xf32>
    %c0_121 = arith.constant 0 : index
    %c0_122 = arith.constant 0 : index
    %134 = vector.load %arg14[%c0_121, %c0_122] : memref<448x32xf32, #tpu.memory_space<vmem>>, vector<448x32xf32>
    %cst_123 = arith.constant dense<0.000000e+00> : vector<1x32xf32>
    %135 = tpu.matmul %130, %134, %cst_123 {dimension_numbers = #tpu.dot_dimension_numbers<[1], [0], [0], [1], [0, 0, 1, 1], [], []>} : vector<1x448xf32>, vector<448x32xf32>, vector<1x32xf32> -> vector<1x32xf32>
    %cst_124 = arith.constant 0.00255102036 : f32
    %136 = vector.broadcast %cst_124 : f32 to vector<1x32xf32>
    %137 = arith.mulf %135, %136 : vector<1x32xf32>
    %c0_125 = arith.constant 0 : index
    %c0_126 = arith.constant 0 : index
    %138 = vector.load %arg14[%c0_125, %c0_126] : memref<448x32xf32, #tpu.memory_space<vmem>>, vector<448x32xf32>
    %cst_127 = arith.constant dense<0.000000e+00> : vector<1x32xf32>
    %139 = tpu.matmul %133, %138, %cst_127 {dimension_numbers = #tpu.dot_dimension_numbers<[1], [0], [0], [1], [0, 0, 1, 1], [], []>} : vector<1x448xf32>, vector<448x32xf32>, vector<1x32xf32> -> vector<1x32xf32>
    %cst_128 = arith.constant 0.00255102036 : f32
    %140 = vector.broadcast %cst_128 : f32 to vector<1x32xf32>
    %141 = arith.mulf %139, %140 : vector<1x32xf32>
    %142 = arith.mulf %137, %137 : vector<1x32xf32>
    %143 = arith.subf %141, %142 : vector<1x32xf32>
    %c0_129 = arith.constant 0 : index
    %c0_130 = arith.constant 0 : index
    %144 = vector.load %arg11[%c0_129, %c0_130] : memref<1x32xf32, #tpu.memory_space<vmem>>, vector<1x32xf32>
    %cst_131 = arith.constant 9.99999974E-6 : f32
    %145 = vector.broadcast %cst_131 : f32 to vector<1x32xf32>
    %146 = arith.addf %143, %145 : vector<1x32xf32>
    %147 = math.rsqrt %146 : vector<1x32xf32>
    %148 = arith.mulf %144, %147 : vector<1x32xf32>
    %c0_132 = arith.constant 0 : index
    %c0_133 = arith.constant 0 : index
    %149 = vector.load %arg12[%c0_132, %c0_133] : memref<1x32xf32, #tpu.memory_space<vmem>>, vector<1x32xf32>
    %150 = arith.mulf %137, %148 : vector<1x32xf32>
    %151 = arith.subf %149, %150 : vector<1x32xf32>
    %c0_134 = arith.constant 0 : index
    %c0_135 = arith.constant 0 : index
    %152 = vector.load %arg13[%c0_134, %c0_135] : memref<32x448xf32, #tpu.memory_space<vmem>>, vector<32x448xf32>
    %cst_136 = arith.constant dense<0.000000e+00> : vector<1x448xf32>
    %153 = tpu.matmul %148, %152, %cst_136 {dimension_numbers = #tpu.dot_dimension_numbers<[1], [0], [0], [1], [0, 0, 1, 1], [], []>} : vector<1x32xf32>, vector<32x448xf32>, vector<1x448xf32> -> vector<1x448xf32>
    %c0_137 = arith.constant 0 : index
    %c0_138 = arith.constant 0 : index
    %154 = vector.load %arg13[%c0_137, %c0_138] : memref<32x448xf32, #tpu.memory_space<vmem>>, vector<32x448xf32>
    %cst_139 = arith.constant dense<0.000000e+00> : vector<1x448xf32>
    %155 = tpu.matmul %151, %154, %cst_139 {dimension_numbers = #tpu.dot_dimension_numbers<[1], [0], [0], [1], [0, 0, 1, 1], [], []>} : vector<1x32xf32>, vector<32x448xf32>, vector<1x448xf32> -> vector<1x448xf32>
    %156 = vector.broadcast %153 : vector<1x448xf32> to vector<28x448xf32>
    %157 = arith.mulf %128, %156 : vector<28x448xf32>
    %158 = vector.broadcast %155 : vector<1x448xf32> to vector<28x448xf32>
    %159 = arith.addf %157, %158 : vector<28x448xf32>
    %cst_140 = arith.constant 0.000000e+00 : f32
    %160 = vector.broadcast %cst_140 : f32 to vector<28x448xf32>
    %161 = arith.maximumf %159, %160 : vector<28x448xf32>
    %162 = arith.truncf %161 : vector<28x448xf32> to vector<28x448xbf16>
    %c0_141 = arith.constant 0 : index
    %c0_142 = arith.constant 0 : index
    %c0_143 = arith.constant 0 : index
    %163 = vector.load %arg15[%c0_141, %c0_142, %c0_143] : memref<4x448x28xbf16, #tpu.memory_space<vmem>>, vector<1x448x28xbf16>
    %164 = vector.shape_cast %163 : vector<1x448x28xbf16> to vector<448x28xbf16>
    %cst_144 = arith.constant dense<0.000000e+00> : vector<28x28xf32>
    %165 = tpu.matmul %162, %164, %cst_144 {dimension_numbers = #tpu.dot_dimension_numbers<[1], [0], [0], [1], [0, 0, 1, 1], [], []>} : vector<28x448xbf16>, vector<448x28xbf16>, vector<28x28xf32> -> vector<28x28xf32>
    %c0_145 = arith.constant 0 : index
    %c0_146 = arith.constant 0 : index
    %c0_147 = arith.constant 0 : index
    %166 = vector.load %arg16[%c0_145, %c0_146, %c0_147] : memref<4x56x28xf32, #tpu.memory_space<vmem>>, vector<1x56x28xf32>
    %167 = vector.shape_cast %166 : vector<1x56x28xf32> to vector<56x28xf32>
    %cst_148 = arith.constant dense<0.000000e+00> : vector<56x28xf32>
    %168 = tpu.matmul %167, %165, %cst_148 {dimension_numbers = #tpu.dot_dimension_numbers<[1], [0], [0], [1], [0, 0, 1, 1], [], []>} : vector<56x28xf32>, vector<28x28xf32>, vector<56x28xf32> -> vector<56x28xf32>
    %c1_149 = arith.constant 1 : index
    %c0_150 = arith.constant 0 : index
    %c0_151 = arith.constant 0 : index
    %169 = vector.load %arg15[%c1_149, %c0_150, %c0_151] : memref<4x448x28xbf16, #tpu.memory_space<vmem>>, vector<1x448x28xbf16>
    %170 = vector.shape_cast %169 : vector<1x448x28xbf16> to vector<448x28xbf16>
    %cst_152 = arith.constant dense<0.000000e+00> : vector<28x28xf32>
    %171 = tpu.matmul %162, %170, %cst_152 {dimension_numbers = #tpu.dot_dimension_numbers<[1], [0], [0], [1], [0, 0, 1, 1], [], []>} : vector<28x448xbf16>, vector<448x28xbf16>, vector<28x28xf32> -> vector<28x28xf32>
    %c1_153 = arith.constant 1 : index
    %c0_154 = arith.constant 0 : index
    %c0_155 = arith.constant 0 : index
    %172 = vector.load %arg16[%c1_153, %c0_154, %c0_155] : memref<4x56x28xf32, #tpu.memory_space<vmem>>, vector<1x56x28xf32>
    %173 = vector.shape_cast %172 : vector<1x56x28xf32> to vector<56x28xf32>
    %cst_156 = arith.constant dense<0.000000e+00> : vector<56x28xf32>
    %174 = tpu.matmul %173, %171, %cst_156 {dimension_numbers = #tpu.dot_dimension_numbers<[1], [0], [0], [1], [0, 0, 1, 1], [], []>} : vector<56x28xf32>, vector<28x28xf32>, vector<56x28xf32> -> vector<56x28xf32>
    %175 = arith.addf %168, %174 : vector<56x28xf32>
    %c2_157 = arith.constant 2 : index
    %c0_158 = arith.constant 0 : index
    %c0_159 = arith.constant 0 : index
    %176 = vector.load %arg15[%c2_157, %c0_158, %c0_159] : memref<4x448x28xbf16, #tpu.memory_space<vmem>>, vector<1x448x28xbf16>
    %177 = vector.shape_cast %176 : vector<1x448x28xbf16> to vector<448x28xbf16>
    %cst_160 = arith.constant dense<0.000000e+00> : vector<28x28xf32>
    %178 = tpu.matmul %162, %177, %cst_160 {dimension_numbers = #tpu.dot_dimension_numbers<[1], [0], [0], [1], [0, 0, 1, 1], [], []>} : vector<28x448xbf16>, vector<448x28xbf16>, vector<28x28xf32> -> vector<28x28xf32>
    %c2_161 = arith.constant 2 : index
    %c0_162 = arith.constant 0 : index
    %c0_163 = arith.constant 0 : index
    %179 = vector.load %arg16[%c2_161, %c0_162, %c0_163] : memref<4x56x28xf32, #tpu.memory_space<vmem>>, vector<1x56x28xf32>
    %180 = vector.shape_cast %179 : vector<1x56x28xf32> to vector<56x28xf32>
    %cst_164 = arith.constant dense<0.000000e+00> : vector<56x28xf32>
    %181 = tpu.matmul %180, %178, %cst_164 {dimension_numbers = #tpu.dot_dimension_numbers<[1], [0], [0], [1], [0, 0, 1, 1], [], []>} : vector<56x28xf32>, vector<28x28xf32>, vector<56x28xf32> -> vector<56x28xf32>
    %182 = arith.addf %175, %181 : vector<56x28xf32>
    %c3_165 = arith.constant 3 : index
    %c0_166 = arith.constant 0 : index
    %c0_167 = arith.constant 0 : index
    %183 = vector.load %arg15[%c3_165, %c0_166, %c0_167] : memref<4x448x28xbf16, #tpu.memory_space<vmem>>, vector<1x448x28xbf16>
    %184 = vector.shape_cast %183 : vector<1x448x28xbf16> to vector<448x28xbf16>
    %cst_168 = arith.constant dense<0.000000e+00> : vector<28x28xf32>
    %185 = tpu.matmul %162, %184, %cst_168 {dimension_numbers = #tpu.dot_dimension_numbers<[1], [0], [0], [1], [0, 0, 1, 1], [], []>} : vector<28x448xbf16>, vector<448x28xbf16>, vector<28x28xf32> -> vector<28x28xf32>
    %c3_169 = arith.constant 3 : index
    %c0_170 = arith.constant 0 : index
    %c0_171 = arith.constant 0 : index
    %186 = vector.load %arg16[%c3_169, %c0_170, %c0_171] : memref<4x56x28xf32, #tpu.memory_space<vmem>>, vector<1x56x28xf32>
    %187 = vector.shape_cast %186 : vector<1x56x28xf32> to vector<56x28xf32>
    %cst_172 = arith.constant dense<0.000000e+00> : vector<56x28xf32>
    %188 = tpu.matmul %187, %185, %cst_172 {dimension_numbers = #tpu.dot_dimension_numbers<[1], [0], [0], [1], [0, 0, 1, 1], [], []>} : vector<56x28xf32>, vector<28x28xf32>, vector<56x28xf32> -> vector<56x28xf32>
    %189 = arith.addf %182, %188 : vector<56x28xf32>
    %c0_173 = arith.constant 0 : index
    %c0_174 = arith.constant 0 : index
    %190 = vector.load %arg17[%c0_173, %c0_174] : memref<1x28xf32, #tpu.memory_space<vmem>>, vector<1x28xf32>
    %191 = vector.broadcast %190 : vector<1x28xf32> to vector<56x28xf32>
    %192 = arith.addf %189, %191 : vector<56x28xf32>
    %193 = math.tanh %192 : vector<56x28xf32>
    %c0_175 = arith.constant 0 : index
    %c0_176 = arith.constant 0 : index
    %194 = vector.load %arg18[%c0_175, %c0_176] : memref<56x28xf32, #tpu.memory_space<vmem>>, vector<56x28xf32>
    tpu.vector_store %arg18[%c0_175, %c0_176], %193 {strides = array<i32>} : memref<56x28xf32, #tpu.memory_space<vmem>>, vector<56x28xf32>,
    return
  }
}

</mosaic_0001>

<bundles_post_ra>
// kernel: auto_decoder_mnist.1
= control target key start
LH: loop header
LB: loop body
LE: loop exit
PB: predicated region body
PF: predicated region fallthrough
CT: control target
= control target key end

     0   :  { %s26924_s0 = inlined_call_operand.vmem [shape: f32[2,32], index: 0, kind: input, shape index: {}]   ;;  %s26925_s1 = inlined_call_operand.vmem [shape: bf16[32,2048], index: 1, kind: input, shape index: {}]   ;;  %s26926_s2 = inlined_call_operand.vmem [shape: f32[1,2048], index: 2, kind: input, shape index: {}]   ;;  %s26927_s3 = inlined_call_operand.vmem [shape: bf16[5,512,448], index: 3, kind: input, shape index: {}]   ;;  %s26928_s4 = inlined_call_operand.vmem [shape: f32[5,14,8], index: 4, kind: input, shape index: {}]   ;;  %s26929_s5 = inlined_call_operand.vmem [shape: f32[1,64], index: 5, kind: input, shape index: {}]   ;;  %s26930_s6 = inlined_call_operand.vmem [shape: f32[1,64], index: 6, kind: input, shape index: {}]   ;;  %s26931_s7 = inlined_call_operand.vmem [shape: f32[64,448], index: 7, kind: input, shape index: {}]   ;;  %s26932_s8 = inlined_call_operand.vmem [shape: f32[448,64], index: 8, kind: input, shape index: {}]   ;;  %s26933_s9 = inlined_call_operand.vmem [shape: bf16[5,448,448], index: 9, kind: input, shape index: {}]   ;;  %s26934_s10 = inlined_call_operand.vmem [shape: f32[5,28,14], index: 10, kind: input, shape index: {}]   ;;  %s26935_s11 = inlined_call_operand.vmem [shape: f32[1,32], index: 11, kind: input, shape index: {}]   ;;  %s26936_s12 = inlined_call_operand.vmem [shape: f32[1,32], index: 12, kind: input, shape index: {}]   ;;  %s26937_s13 = inlined_call_operand.vmem [shape: f32[32,448], index: 13, kind: input, shape index: {}]   ;;  %s26938_s14 = inlined_call_operand.vmem [shape: f32[448,32], index: 14, kind: input, shape index: {}]   ;;  %s26939_s15 = inlined_call_operand.vmem [shape: bf16[4,448,28], index: 15, kind: input, shape index: {}]   ;;  %s26940_s16 = inlined_call_operand.vmem [shape: f32[4,56,28], index: 16, kind: input, shape index: {}]   ;;  %s26941_s17 = inlined_call_operand.vmem [shape: f32[1,28], index: 17, kind: input, shape index: {}]   ;;  %s26942_s18 = inlined_call_operand.hbm [shape: f32[56,28], index: 18, kind: output, shape index: {}]  }
   0x1   :  { %26971 = sst [smem:[#allocation21_spill]] %s26924_s0 }
   0x2   :  { %26972 = sst [smem:[#allocation22_spill]] %s26925_s1 }
   0x3   :  { %26973 = sst [smem:[#allocation23_spill]] %s26926_s2 }
   0x4   :  { %s26974_s29 = sld [smem:[#allocation22_spill]]  ;;  %v26945_v8 = vmov 0   ;;  %s26975_s23 = sld [smem:[#allocation21_spill]]  ;;  %vm339_vm0 = vcmask 261120  }
   0x5   :  { %375 = vmatprep.mubr.bf16.mxu0 %v26945_v8  ;;  %416 = vmatprep.mubr.bf16.mxu1 %v26945_v8 }
   0xa   :  { %v63_v0 = vld [vmem:[%s26974_s29] sm:$0xff]  ;;  %v64_v2 = vld [vmem:[%s26974_s29 + $0x8] sm:$0xff]  ;;  %v65_v15 = vld [vmem:[%s26974_s29 + $0x10] sm:$0xff] }
   0xb   :  { %v71_v1 = vld [vmem:[%s26974_s29 + $0x40] sm:$0xff]  ;;  %v72_v4 = vld [vmem:[%s26974_s29 + $0x48] sm:$0xff]  ;;  %v73_v16 = vld [vmem:[%s26974_s29 + $0x50] sm:$0xff] }
   0xc   :  { %v15234_v3 = vcombine.high %v63_v0, %v71_v1  ;;  %v15233_v5 = vcombine.low %v63_v0, %v71_v1  ;;  %v79_v6 = vld [vmem:[%s26974_s29 + $0x80] sm:$0xff]  ;;  %v15236_v9 = vcombine.high %v64_v2, %v72_v4  ;;  %v15235_v10 = vcombine.low %v64_v2, %v72_v4  ;;  %v80_v12 = vld [vmem:[%s26974_s29 + $0x88] sm:$0xff]  ;;  %v66_v17 = vld [vmem:[%s26974_s29 + $0x18] sm:$0xff] }
   0xd   :  { %v87_v7 = vld [vmem:[%s26974_s29 + $0xc0] sm:$0xff]  ;;  %v88_v13 = vld [vmem:[%s26974_s29 + $0xc8] sm:$0xff]  ;;  %v74_v20 = vld [vmem:[%s26974_s29 + $0x58] sm:$0xff]  ;;  %v15238_v22 = vcombine.high %v65_v15, %v73_v16  ;;  %v15237_v29 = vcombine.low %v65_v15, %v73_v16 }
   0xe   :  { %v15250_v11 = vcombine.high %v79_v6, %v87_v7  ;;  %343 = vmatprep.subr.bf16.mxu0 %v15234_v3  ;;  %v15252_v14 = vcombine.high %v80_v12, %v88_v13  ;;  %384 = vmatprep.subr.bf16.mxu1 %v15236_v9  ;;  %v15249_v18 = vcombine.low %v79_v6, %v87_v7  ;;  %v61_v19 = vld [vmem:[%s26975_s23] sm:$0x3]  ;;  %v81_v24 = vld [vmem:[%s26974_s29 + $0x90] sm:$0xff]  ;;  %v82_v27 = vld [vmem:[%s26974_s29 + $0x98] sm:$0xff]  ;;  %s26976_s23 = sld [smem:[#allocation23_spill]] }
   0xf   :  { %344 = vmatpush1.bf16.msra.mxu0 %v15233_v5  ;;  %385 = vmatpush1.bf16.msra.mxu1 %v15235_v10  ;;  %v15251_v21 = vcombine.low %v80_v12, %v88_v13  ;;  %v15240_v23 = vcombine.high %v66_v17, %v74_v20  ;;  %v89_v25 = vld [vmem:[%s26974_s29 + $0xd0] sm:$0xff]  ;;  %v21059_v26 = vpack.c.bf16 %v61_v19, %v61_v19  ;;  %v90_v28 = vld [vmem:[%s26974_s29 + $0xd8] sm:$0xff]  ;;  %v67_v33 = vld [vmem:[%s26974_s29 + $0x20] sm:$0xff] }
  0x10   :  { %345 = vmatprep.subr.bf16.mxu0 %v15250_v11  ;;  %386 = vmatprep.subr.bf16.mxu1 %v15252_v14  ;;  %v15239_v30 = vcombine.low %v66_v17, %v74_v20  ;;  %v15254_v31 = vcombine.high %v81_v24, %v89_v25  ;;  %v15256_v32 = vcombine.high %v82_v27, %v90_v28  ;;  %v75_v34 = vld [vmem:[%s26974_s29 + $0x60] sm:$0xff]  ;;  %v68_v35 = vld [vmem:[%s26974_s29 + $0x28] sm:$0xff]  ;;  %v69_v48 = vld [vmem:[%s26974_s29 + $0x30] sm:$0xff] }
  0x11   :  { %v76_v36 = vld [vmem:[%s26974_s29 + $0x68] sm:$0xff]  ;;  %v15253_v37 = vcombine.low %v81_v24, %v89_v25  ;;  %v15255_v38 = vcombine.low %v82_v27, %v90_v28  ;;  %v15242_v39 = vcombine.high %v67_v33, %v75_v34  ;;  %v83_v40 = vld [vmem:[%s26974_s29 + $0xa0] sm:$0xff]  ;;  %v15241_v45 = vcombine.low %v67_v33, %v75_v34  ;;  %v77_v50 = vld [vmem:[%s26974_s29 + $0x70] sm:$0xff] }
  0x12   :  { %v15244_v41 = vcombine.high %v68_v35, %v76_v36  ;;  %v91_v42 = vld [vmem:[%s26974_s29 + $0xe0] sm:$0xff]  ;;  %v84_v43 = vld [vmem:[%s26974_s29 + $0xa8] sm:$0xff]  ;;  %v15243_v46 = vcombine.low %v68_v35, %v76_v36  ;;  %v70_v51 = vld [vmem:[%s26974_s29 + $0x38] sm:$0xff]  ;;  %v15246_v56 = vcombine.high %v69_v48, %v77_v50  ;;  %v15245_v61 = vcombine.low %v69_v48, %v77_v50 }
  0x13   :  { %346 = vmatpush1.bf16.msra.mxu0 %v15249_v18  ;;  %387 = vmatpush1.bf16.msra.mxu1 %v15251_v21  ;;  %v92_v44 = vld [vmem:[%s26974_s29 + $0xe8] sm:$0xff]  ;;  %v15258_v47 = vcombine.high %v83_v40, %v91_v42  ;;  %v78_v52 = vld [vmem:[%s26974_s29 + $0x78] sm:$0xff]  ;;  %v15257_v53 = vcombine.low %v83_v40, %v91_v42  ;;  %v85_v54 = vld [vmem:[%s26974_s29 + $0xb0] sm:$0xff] }
  0x14   :  { %425 = vmatprep.subr.bf16.mxu0 %v15238_v22  ;;  %466 = vmatprep.subr.bf16.mxu1 %v15240_v23  ;;  %v15260_v49 = vcombine.high %v84_v43, %v92_v44  ;;  %v15259_v55 = vcombine.low %v84_v43, %v92_v44  ;;  %v93_v57 = vld [vmem:[%s26974_s29 + $0xf0] sm:$0xff]  ;;  %v86_v58 = vld [vmem:[%s26974_s29 + $0xb8] sm:$0xff]  ;;  %v15248_v60 = vcombine.high %v70_v51, %v78_v52 }
  0x15   :  { %v94_v59 = vld [vmem:[%s26974_s29 + $0xf8] sm:$0xff]  ;;  %v15247_v62 = vcombine.low %v70_v51, %v78_v52  ;;  %v15262_v63 = vcombine.high %v85_v54, %v93_v57  ;;  %v18956_v1 = vld [vmem:[%s26927_s3 + $0x4] ss:$16 sps:$4 sm:$0xff]   ;;  %v15261_v2 = vcombine.low %v85_v54, %v93_v57  ;;  %v18954_v5 = vld [vmem:[%s26927_s3] ss:$16 sps:$4 sm:$0xff]  }
  0x16   :  { %15265 = vmatmul.mubr.msk.bf16.vlgmr.msra.gmra.mrb[0].mxu0 %vm339_vm0, %v21059_v26  ;;  %15266 = vmatmul.mubr.msk.bf16.vlgmr.msra.gmra.mrb[0].mxu1 %vm339_vm0, %v21059_v26  ;;  %v15264_v0 = vcombine.high %v86_v58, %v94_v59  ;;  %v18959_v3 = vld [vmem:[%s26927_s3 + $0xc] ss:$16 sps:$4 sm:$0xff]   ;;  %v15263_v4 = vcombine.low %v86_v58, %v94_v59  ;;  %v18957_v6 = vld [vmem:[%s26927_s3 + $0x8] ss:$16 sps:$4 sm:$0xff]   ;;  %v18962_v7 = vld [vmem:[%s26927_s3 + $0x24] ss:$16 sps:$4 sm:$0xff]  }
  0x17   :  { %426 = vmatpush1.bf16.msra.mxu0 %v15237_v29  ;;  %467 = vmatpush1.bf16.msra.mxu1 %v15239_v30  ;;  %v18965_v9 = vld [vmem:[%s26927_s3 + $0x2c] ss:$16 sps:$4 sm:$0xff]   ;;  %v18960_v10 = vld [vmem:[%s26927_s3 + $0x20] ss:$16 sps:$4 sm:$0xff]   ;;  %v18963_v11 = vld [vmem:[%s26927_s3 + $0x28] ss:$16 sps:$4 sm:$0xff]  }
  0x18   :  { %427 = vmatprep.subr.bf16.mxu0 %v15254_v31  ;;  %468 = vmatprep.subr.bf16.mxu1 %v15256_v32  ;;  %v18968_v12 = vld [vmem:[%s26927_s3 + $0x44] ss:$16 sps:$4 sm:$0xff]   ;;  %v18971_v13 = vld [vmem:[%s26927_s3 + $0x4c] ss:$16 sps:$4 sm:$0xff]   ;;  %v18966_v14 = vld [vmem:[%s26927_s3 + $0x40] ss:$16 sps:$4 sm:$0xff]  }
  0x19   :  { %457 = vmatprep.mubr.bf16.mxu0 %v26945_v8  ;;  %498 = vmatprep.mubr.bf16.mxu1 %v26945_v8  ;;  %v18969_v15 = vld [vmem:[%s26927_s3 + $0x48] ss:$16 sps:$4 sm:$0xff]   ;;  %v18974_v16 = vld [vmem:[%s26927_s3 + $0x64] ss:$16 sps:$4 sm:$0xff]   ;;  %v18977_v17 = vld [vmem:[%s26927_s3 + $0x6c] ss:$16 sps:$4 sm:$0xff]  }
  0x1a   :  { %v18972_v18 = vld [vmem:[%s26927_s3 + $0x60] ss:$16 sps:$4 sm:$0xff]   ;;  %v18975_v19 = vld [vmem:[%s26927_s3 + $0x68] ss:$16 sps:$4 sm:$0xff]   ;;  %v18980_v20 = vld [vmem:[%s26927_s3 + $0x84] ss:$16 sps:$4 sm:$0xff]  }
  0x1b   :  { %428 = vmatpush1.bf16.msra.mxu0 %v15253_v37  ;;  %469 = vmatpush1.bf16.msra.mxu1 %v15255_v38  ;;  %v18983_v21 = vld [vmem:[%s26927_s3 + $0x8c] ss:$16 sps:$4 sm:$0xff]   ;;  %v18978_v22 = vld [vmem:[%s26927_s3 + $0x80] ss:$16 sps:$4 sm:$0xff]   ;;  %v18981_v23 = vld [vmem:[%s26927_s3 + $0x88] ss:$16 sps:$4 sm:$0xff]  }
  0x1c   :  { %507 = vmatprep.subr.bf16.mxu0 %v15242_v39  ;;  %548 = vmatprep.subr.bf16.mxu1 %v15244_v41  ;;  %v18986_v24 = vld [vmem:[%s26927_s3 + $0xa4] ss:$16 sps:$4 sm:$0xff]   ;;  %v18989_v25 = vld [vmem:[%s26927_s3 + $0xac] ss:$16 sps:$4 sm:$0xff]   ;;  %v18987_v27 = vld [vmem:[%s26927_s3 + $0xa8] ss:$16 sps:$4 sm:$0xff]  }
  0x1d   :  { %v18992_v28 = vld [vmem:[%s26927_s3 + $0xc4] ss:$16 sps:$4 sm:$0xff]   ;;  %v18995_v29 = vld [vmem:[%s26927_s3 + $0xcc] ss:$16 sps:$4 sm:$0xff]   ;;  %v18990_v30 = vld [vmem:[%s26927_s3 + $0xc0] ss:$16 sps:$4 sm:$0xff]  }
  0x1e   :  { %15267 = vmatmul.mubr.msk.bf16.vlgmr.msra.gmra.mrb[4].mxu0 %vm339_vm0, %v21059_v26  ;;  %15268 = vmatmul.mubr.msk.bf16.vlgmr.msra.gmra.mrb[4].mxu1 %vm339_vm0, %v21059_v26  ;;  %v18993_v31 = vld [vmem:[%s26927_s3 + $0xc8] ss:$16 sps:$4 sm:$0xff]   ;;  %v18998_v32 = vld [vmem:[%s26927_s3 + $0xe4] ss:$16 sps:$4 sm:$0xff]   ;;  %v19001_v33 = vld [vmem:[%s26927_s3 + $0xec] ss:$16 sps:$4 sm:$0xff]  }
  0x1f   :  { %508 = vmatpush1.bf16.msra.mxu0 %v15241_v45  ;;  %549 = vmatpush1.bf16.msra.mxu1 %v15243_v46  ;;  %v18996_v34 = vld [vmem:[%s26927_s3 + $0xe0] ss:$16 sps:$4 sm:$0xff]   ;;  %v18999_v35 = vld [vmem:[%s26927_s3 + $0xe8] ss:$16 sps:$4 sm:$0xff]   ;;  %v19004_v36 = vld [vmem:[%s26927_s3 + $0x104] ss:$16 sps:$4 sm:$0xff]  }
  0x20   :  { %509 = vmatprep.subr.bf16.mxu0 %v15258_v47  ;;  %550 = vmatprep.subr.bf16.mxu1 %v15260_v49  ;;  %v19007_v37 = vld [vmem:[%s26927_s3 + $0x10c] ss:$16 sps:$4 sm:$0xff]   ;;  %v19002_v38 = vld [vmem:[%s26927_s3 + $0x100] ss:$16 sps:$4 sm:$0xff]   ;;  %v19005_v39 = vld [vmem:[%s26927_s3 + $0x108] ss:$16 sps:$4 sm:$0xff]  }
  0x21   :  { %539 = vmatprep.mubr.bf16.mxu0 %v26945_v8  ;;  %580 = vmatprep.mubr.bf16.mxu1 %v26945_v8  ;;  %v19010_v40 = vld [vmem:[%s26927_s3 + $0x124] ss:$16 sps:$4 sm:$0xff]   ;;  %v19013_v41 = vld [vmem:[%s26927_s3 + $0x12c] ss:$16 sps:$4 sm:$0xff]   ;;  %v19008_v42 = vld [vmem:[%s26927_s3 + $0x120] ss:$16 sps:$4 sm:$0xff]  }
  0x22   :  { %v19011_v43 = vld [vmem:[%s26927_s3 + $0x128] ss:$16 sps:$4 sm:$0xff]   ;;  %v19016_v44 = vld [vmem:[%s26927_s3 + $0x144] ss:$16 sps:$4 sm:$0xff]   ;;  %v19019_v45 = vld [vmem:[%s26927_s3 + $0x14c] ss:$16 sps:$4 sm:$0xff]  }
  0x23   :  { %510 = vmatpush1.bf16.msra.mxu0 %v15257_v53  ;;  %551 = vmatpush1.bf16.msra.mxu1 %v15259_v55  ;;  %v19014_v46 = vld [vmem:[%s26927_s3 + $0x140] ss:$16 sps:$4 sm:$0xff]   ;;  %v19017_v47 = vld [vmem:[%s26927_s3 + $0x148] ss:$16 sps:$4 sm:$0xff]   ;;  %v19022_v48 = vld [vmem:[%s26927_s3 + $0x164] ss:$16 sps:$4 sm:$0xff]  }
  0x24   :  { %589 = vmatprep.subr.bf16.mxu0 %v15246_v56  ;;  %630 = vmatprep.subr.bf16.mxu1 %v15248_v60  ;;  %v19025_v49 = vld [vmem:[%s26927_s3 + $0x16c] ss:$16 sps:$4 sm:$0xff]   ;;  %v19020_v50 = vld [vmem:[%s26927_s3 + $0x160] ss:$16 sps:$4 sm:$0xff]   ;;  %v19023_v51 = vld [vmem:[%s26927_s3 + $0x168] ss:$16 sps:$4 sm:$0xff]  }
  0x25   :  { %v19028_v52 = vld [vmem:[%s26927_s3 + $0x184] ss:$16 sps:$4 sm:$0xff]   ;;  %v19031_v53 = vld [vmem:[%s26927_s3 + $0x18c] ss:$16 sps:$4 sm:$0xff]   ;;  %v19026_v54 = vld [vmem:[%s26927_s3 + $0x180] ss:$16 sps:$4 sm:$0xff]  }
  0x26   :  { %15269 = vmatmul.mubr.msk.bf16.vlgmr.msra.gmra.mrb[8].mxu0 %vm339_vm0, %v21059_v26  ;;  %15270 = vmatmul.mubr.msk.bf16.vlgmr.msra.gmra.mrb[8].mxu1 %vm339_vm0, %v21059_v26  ;;  %v19029_v55 = vld [vmem:[%s26927_s3 + $0x188] ss:$16 sps:$4 sm:$0xff]   ;;  %v19034_v56 = vld [vmem:[%s26927_s3 + $0x1a4] ss:$16 sps:$4 sm:$0xff]   ;;  %v19037_v57 = vld [vmem:[%s26927_s3 + $0x1ac] ss:$16 sps:$4 sm:$0xff]  }
  0x27   :  { %590 = vmatpush1.bf16.msra.mxu0 %v15245_v61  ;;  %631 = vmatpush1.bf16.msra.mxu1 %v15247_v62  ;;  %v19032_v58 = vld [vmem:[%s26927_s3 + $0x1a0] ss:$16 sps:$4 sm:$0xff]   ;;  %v19035_v59 = vld [vmem:[%s26927_s3 + $0x1a8] ss:$16 sps:$4 sm:$0xff]   ;;  %v19040_v60 = vld [vmem:[%s26927_s3 + $0x1c4] ss:$16 sps:$4 sm:$0xff]  }
  0x28   :  { %591 = vmatprep.subr.bf16.mxu0 %v15262_v63  ;;  %632 = vmatprep.subr.bf16.mxu1 %v15264_v0  ;;  %v19043_v61 = vld [vmem:[%s26927_s3 + $0x1cc] ss:$16 sps:$4 sm:$0xff]   ;;  %v19038_v62 = vld [vmem:[%s26927_s3 + $0x1c0] ss:$16 sps:$4 sm:$0xff]   ;;  %v19041_v63 = vld [vmem:[%s26927_s3 + $0x1c8] ss:$16 sps:$4 sm:$0xff]  }
  0x29   :  { %621 = vmatprep.mubr.bf16.mxu0 %v26945_v8  ;;  %662 = vmatprep.mubr.bf16.mxu1 %v26945_v8  ;;  %v19046_v0 = vld [vmem:[%s26927_s3 + $0x1e4] ss:$16 sps:$4 sm:$0xff]  }
  0x2b   :  { %592 = vmatpush1.bf16.msra.mxu0 %v15261_v2  ;;  %633 = vmatpush1.bf16.msra.mxu1 %v15263_v4  ;;  %v19044_v2 = vld [vmem:[%s26927_s3 + $0x1e0] ss:$16 sps:$4 sm:$0xff]   ;;  %v19052_v4 = vld [vmem:[%s26927_s3 + $0x204] ss:$16 sps:$4 sm:$0xff]  }
  0x2c   :  { %1642 = vmatprep.subr.bf16.mxu0 %v18956_v1  ;;  %1724 = vmatprep.subr.bf16.mxu1 %v18959_v3  ;;  %v19049_v1 = vld [vmem:[%s26927_s3 + $0x1ec] ss:$16 sps:$4 sm:$0xff]   ;;  %v19047_v3 = vld [vmem:[%s26927_s3 + $0x1e8] ss:$16 sps:$4 sm:$0xff]  }
  0x2e   :  { %15271 = vmatmul.mubr.msk.bf16.vlgmr.msra.gmra.mrb[12].mxu0 %vm339_vm0, %v21059_v26  ;;  %15272 = vmatmul.mubr.msk.bf16.vlgmr.msra.gmra.mrb[12].mxu1 %vm339_vm0, %v21059_v26  ;;  %v18984_v26 = vld [vmem:[%s26927_s3 + $0xa0] ss:$16 sps:$4 sm:$0xff]  }
  0x2f   :  { %1643 = vmatpush1.bf16.msra.mxu0 %v18954_v5  ;;  %1725 = vmatpush1.bf16.msra.mxu1 %v18957_v6  ;;  %v19055_v5 = vld [vmem:[%s26927_s3 + $0x20c] ss:$16 sps:$4 sm:$0xff]   ;;  %v99_v6 = vlaneseq }
  0x30   :  { %1644 = vmatprep.subr.bf16.mxu0 %v18962_v7  ;;  %1726 = vmatprep.subr.bf16.mxu1 %v18965_v9  ;;  %v95_v9 = vld [vmem:[%s26976_s23] sm:$0xff] }
  0x31   :  { %v21335_v7 = vshrl.u32 %v99_v6, 7  ;;  %vm21373_vm1 = vcmp.lt.s32.totalorder %v99_v6, 512 }
  0x33   :  { %1645 = vmatpush1.bf16.msra.mxu0 %v18960_v10  ;;  %1727 = vmatpush1.bf16.msra.mxu1 %v18963_v11  ;;  %v21341_v10 = vsub.s32 0, %v21335_v7  ;;  %v109_v11 = vsub.s32 2, %v21335_v7 }
  0x34   :  { %1646 = vmatprep.subr.bf16.mxu0 %v18968_v12  ;;  %1728 = vmatprep.subr.bf16.mxu1 %v18971_v13  ;;  %v105_v12 = vsub.s32 1, %v21335_v7  ;;  %v113_v13 = vsub.s32 3, %v21335_v7 }
  0x37   :  { %1647 = vmatpush1.bf16.msra.mxu0 %v18966_v14  ;;  %1729 = vmatpush1.bf16.msra.mxu1 %v18969_v15  ;;  %v20909_v14 = vmov 1966171168  }
  0x38   :  { %1648 = vmatprep.subr.bf16.mxu0 %v18974_v16  ;;  %1730 = vmatprep.subr.bf16.mxu1 %v18977_v17  ;;  %v694_v15 = vunpack.c.l.s4 %v20909_v14  ;;  %v102_v16 = vrot.slane %v95_v9, %v21341_v10  ;;  %v110_v17 = vrot.slane %v95_v9, %v109_v11 }
  0x3b   :  { %1649 = vmatpush1.bf16.msra.mxu0 %v18972_v18  ;;  %1731 = vmatpush1.bf16.msra.mxu1 %v18975_v19  ;;  %v106_v18 = vrot.slane %v95_v9, %v105_v12  ;;  %v114_v19 = vrot.slane %v95_v9, %v113_v13 }
  0x3c   :  { %1650 = vmatprep.subr.bf16.mxu0 %v18980_v20  ;;  %1732 = vmatprep.subr.bf16.mxu1 %v18983_v21  ;;  %v695_v21 = vunpack.c.0.s8 %v694_v15 }
  0x3f   :  { %1651 = vmatpush1.bf16.msra.mxu0 %v18978_v22  ;;  %1733 = vmatpush1.bf16.msra.mxu1 %v18981_v23 }
  0x40   :  { %1652 = vmatprep.subr.bf16.mxu0 %v18986_v24  ;;  %1734 = vmatprep.subr.bf16.mxu1 %v18989_v25  ;;  %v117_v25 = vsub.s32 4, %v21335_v7 }
  0x43   :  { %1653 = vmatpush1.bf16.msra.mxu0 %v18984_v26  ;;  %1735 = vmatpush1.bf16.msra.mxu1 %v18987_v27  ;;  %v125_v26 = vsub.s32 6, %v21335_v7  ;;  %v121_v27 = vsub.s32 5, %v21335_v7 }
  0x44   :  { %1654 = vmatprep.subr.bf16.mxu0 %v18992_v28  ;;  %1736 = vmatprep.subr.bf16.mxu1 %v18995_v29 }
  0x47   :  { %1655 = vmatpush1.bf16.msra.mxu0 %v18990_v30  ;;  %1737 = vmatpush1.bf16.msra.mxu1 %v18993_v31 }
  0x48   :  { %1656 = vmatprep.subr.bf16.mxu0 %v18998_v32  ;;  %1738 = vmatprep.subr.bf16.mxu1 %v19001_v33  ;;  %v129_v32 = vsub.s32 7, %v21335_v7 }
  0x4b   :  { %1657 = vmatpush1.bf16.msra.mxu0 %v18996_v34  ;;  %1739 = vmatpush1.bf16.msra.mxu1 %v18999_v35 }
  0x4c   :  { %1658 = vmatprep.subr.bf16.mxu0 %v19004_v36  ;;  %1740 = vmatprep.subr.bf16.mxu1 %v19007_v37 }
  0x4f   :  { %1659 = vmatpush1.bf16.msra.mxu0 %v19002_v38  ;;  %1741 = vmatpush1.bf16.msra.mxu1 %v19005_v39  ;;  %v21358_v39 = vsub.s32 %v695_v21, %v21335_v7 }
  0x50   :  { %1660 = vmatprep.subr.bf16.mxu0 %v19010_v40  ;;  %1742 = vmatprep.subr.bf16.mxu1 %v19013_v41 }
  0x53   :  { %1661 = vmatpush1.bf16.msra.mxu0 %v19008_v42  ;;  %1743 = vmatpush1.bf16.msra.mxu1 %v19011_v43  ;;  %v118_v42 = vrot.slane %v95_v9, %v117_v25 }
  0x54   :  { %1662 = vmatprep.subr.bf16.mxu0 %v19016_v44  ;;  %1744 = vmatprep.subr.bf16.mxu1 %v19019_v45  ;;  %v126_v44 = vrot.slane %v95_v9, %v125_v26  ;;  %v122_v45 = vrot.slane %v95_v9, %v121_v27 }
  0x57   :  { %1663 = vmatpush1.bf16.msra.mxu0 %v19014_v46  ;;  %1745 = vmatpush1.bf16.msra.mxu1 %v19017_v47  ;;  %v130_v47 = vrot.slane %v95_v9, %v129_v32 }
  0x58   :  { %1664 = vmatprep.subr.bf16.mxu0 %v19022_v48  ;;  %1746 = vmatprep.subr.bf16.mxu1 %v19025_v49 }
  0x5b   :  { %1665 = vmatpush1.bf16.msra.mxu0 %v19020_v50  ;;  %1747 = vmatpush1.bf16.msra.mxu1 %v19023_v51 }
  0x5c   :  { %1666 = vmatprep.subr.bf16.mxu0 %v19028_v52  ;;  %1748 = vmatprep.subr.bf16.mxu1 %v19031_v53 }
  0x5f   :  { %1667 = vmatpush1.bf16.msra.mxu0 %v19026_v54  ;;  %1749 = vmatpush1.bf16.msra.mxu1 %v19029_v55  ;;  %v96_v54 = vld [vmem:[%s26976_s23 + $0x8] sm:$0xff] }
  0x60   :  { %1668 = vmatprep.subr.bf16.mxu0 %v19034_v56  ;;  %1750 = vmatprep.subr.bf16.mxu1 %v19037_v57  ;;  %v134_v15 = vrot.slane %v96_v54, %v21341_v10  ;;  %v138_v6 = vrot.slane %v96_v54, %v105_v12 }
  0x63   :  { %1669 = vmatpush1.bf16.msra.mxu0 %v19032_v58  ;;  %1751 = vmatpush1.bf16.msra.mxu1 %v19035_v59 }
  0x64   :  { %1670 = vmatprep.subr.bf16.mxu0 %v19040_v60  ;;  %1752 = vmatprep.subr.bf16.mxu1 %v19043_v61 }
  0x67   :  { %1671 = vmatpush1.bf16.msra.mxu0 %v19038_v62  ;;  %1753 = vmatpush1.bf16.msra.mxu1 %v19041_v63 }
  0x68   :  { %1672 = vmatprep.subr.bf16.mxu0 %v19046_v0  ;;  %1754 = vmatprep.subr.bf16.mxu1 %v19049_v1  ;;  %v19058_v1 = vld [vmem:[%s26927_s3 + $0x224] ss:$16 sps:$4 sm:$0xff]  }
  0x6b   :  { %1673 = vmatpush1.bf16.msra.mxu0 %v19044_v2  ;;  %1755 = vmatpush1.bf16.msra.mxu1 %v19047_v3 }
  0x6c   :  { %1683 = vmatprep.subr.bf16.mxu0 %v19052_v4  ;;  %1765 = vmatprep.subr.bf16.mxu1 %v19055_v5 }
  0xe9   :  { %v377_v20 = vpop.f32.mrb[0].mxu0  ;;  %v418_v23 = vpop.f32.mrb[0].mxu1 }
  0xea   :  { %v378_v22 = vadd.f32 %v377_v20, %v102_v16  ;;  %v379_v24 = vpop.f32.mrb[1].mxu0  ;;  %v419_v28 = vadd.f32 %v418_v23, %v110_v17  ;;  %v420_v30 = vpop.f32.mrb[1].mxu1  ;;  %v142_v17 = vrot.slane %v96_v54, %v109_v11 }
  0xeb   :  { %v380_v29 = vadd.f32 %v379_v24, %v106_v18  ;;  %v381_v31 = vpop.f32.mrb[2].mxu0  ;;  %v421_v34 = vadd.f32 %v420_v30, %v114_v19  ;;  %v422_v35 = vpop.f32.mrb[2].mxu1  ;;  %v146_v19 = vrot.slane %v96_v54, %v113_v13 }
  0xec   :  { %v671_v33 = vmax.f32 %v378_v22, 0.0  ;;  %v382_v36 = vpop.f32.mrb[3].mxu0  ;;  %v673_v37 = vmax.f32 %v419_v28, 0.0  ;;  %v423_v40 = vpop.f32.mrb[3].mxu1 }
  0xed   :  { %v672_v38 = vmax.f32 %v380_v29, 0.0  ;;  %v674_v41 = vmax.f32 %v421_v34, 0.0 }
  0xef   :  { %v691_v43 = vcombine.low %v671_v33, %v672_v38  ;;  %v692_v46 = vcombine.low %v673_v37, %v674_v41 }
  0xf1   :  { %v699_v48 = vrot.slane %v691_v43, %v21358_v39  ;;  %v459_v49 = vpop.f32.mrb[4].mxu0  ;;  %v706_v50 = vrot.slane %v692_v46, %v21358_v39  ;;  %v500_v52 = vpop.f32.mrb[4].mxu1  ;;  %v158_v46 = vrot.slane %v96_v54, %v125_v26 }
  0xf2   :  { %v460_v51 = vadd.f32 %v459_v49, %v118_v42  ;;  %v461_v53 = vpop.f32.mrb[5].mxu0  ;;  %v501_v55 = vadd.f32 %v500_v52, %v126_v44  ;;  %v502_v57 = vpop.f32.mrb[5].mxu1  ;;  %v150_v44 = vrot.slane %v96_v54, %v117_v25  ;;  %v162_v49 = vrot.slane %v96_v54, %v129_v32 }
  0xf3   :  { %v462_v56 = vadd.f32 %v461_v53, %v122_v45  ;;  %v463_v58 = vpop.f32.mrb[6].mxu0  ;;  %v707_v59 = vcombine.low %v699_v48, %v706_v50  ;;  %v818_v60 = vcombine.high %v699_v48, %v706_v50  ;;  %v503_v62 = vadd.f32 %v502_v57, %v130_v47  ;;  %v504_v63 = vpop.f32.mrb[6].mxu1 }
  0xf4   :  { %v675_v61 = vmax.f32 %v460_v51, 0.0  ;;  %v464_v0 = vpop.f32.mrb[7].mxu0  ;;  %v677_v2 = vmax.f32 %v501_v55, 0.0  ;;  %v505_v4 = vpop.f32.mrb[7].mxu1  ;;  %v154_v47 = vrot.slane %v96_v54, %v121_v27 }
  0xf5   :  { %v676_v3 = vmax.f32 %v462_v56, 0.0  ;;  %v714_v5 = vrot.slane %v707_v59, %v21358_v39  ;;  %v825_v9 = vrot.slane %v818_v60, %v21358_v39  ;;  %v678_v14 = vmax.f32 %v503_v62, 0.0 }
  0xf7   :  { %v726_v16 = vcombine.low %v675_v61, %v676_v3  ;;  %720 = vst.msk [vmem:[#allocation2] ss:$8 sm:$0xf] %vm21373_vm1, %v714_v5  ;;  %828 = vst.msk [vmem:[#allocation2 + $0x4] ss:$8 sm:$0xf] %vm21373_vm1, %v825_v9  ;;  %v727_v18 = vcombine.low %v677_v2, %v678_v14 }
  0xf9   :  { %v734_v20 = vrot.slane %v726_v16, %v21358_v39  ;;  %v541_v21 = vpop.f32.mrb[8].mxu0  ;;  %v741_v22 = vrot.slane %v727_v18, %v21358_v39  ;;  %v582_v11 = vpop.f32.mrb[8].mxu1  ;;  %v19050_v18 = vld [vmem:[%s26927_s3 + $0x200] ss:$16 sps:$4 sm:$0xff]  }
  0xfa   :  { %v542_v23 = vadd.f32 %v541_v21, %v134_v15  ;;  %v543_v24 = vpop.f32.mrb[9].mxu0  ;;  %v583_v28 = vadd.f32 %v582_v11, %v142_v17  ;;  %v584_v29 = vpop.f32.mrb[9].mxu1  ;;  %v19053_v21 = vld [vmem:[%s26927_s3 + $0x208] ss:$16 sps:$4 sm:$0xff]   ;;  %v19056_v11 = vld [vmem:[%s26927_s3 + $0x220] ss:$16 sps:$4 sm:$0xff]  }
  0xfb   :  { %v544_v12 = vadd.f32 %v543_v24, %v138_v6  ;;  %v545_v30 = vpop.f32.mrb[10].mxu0  ;;  %v742_v31 = vcombine.low %v734_v20, %v741_v22  ;;  %v830_v33 = vcombine.high %v734_v20, %v741_v22  ;;  %v585_v35 = vadd.f32 %v584_v29, %v146_v19  ;;  %v586_v36 = vpop.f32.mrb[10].mxu1  ;;  %v19059_v24 = vld [vmem:[%s26927_s3 + $0x228] ss:$16 sps:$4 sm:$0xff]   ;;  %v19064_v29 = vld [vmem:[%s26927_s3 + $0x244] ss:$16 sps:$4 sm:$0xff]  }
  0xfc   :  { %v679_v34 = vmax.f32 %v542_v23, 0.0  ;;  %v546_v37 = vpop.f32.mrb[11].mxu0  ;;  %v681_v38 = vmax.f32 %v583_v28, 0.0  ;;  %v587_v40 = vpop.f32.mrb[11].mxu1  ;;  %v19061_v28 = vld [vmem:[%s26927_s3 + $0x22c] ss:$16 sps:$4 sm:$0xff]  }
  0xfd   :  { %v680_v13 = vmax.f32 %v544_v12, 0.0  ;;  %v749_v41 = vrot.slane %v742_v31, %v21358_v39  ;;  %v837_v42 = vrot.slane %v830_v33, %v21358_v39  ;;  %v682_v43 = vmax.f32 %v585_v35, 0.0  ;;  %v19067_v30 = vld [vmem:[%s26927_s3 + $0x24c] ss:$16 sps:$4 sm:$0xff]   ;;  %v19062_v31 = vld [vmem:[%s26927_s3 + $0x240] ss:$16 sps:$4 sm:$0xff]  }
  0xfe   :  { %v19065_v33 = vld [vmem:[%s26927_s3 + $0x248] ss:$16 sps:$4 sm:$0xff]   ;;  %v19073_v35 = vld [vmem:[%s26927_s3 + $0x26c] ss:$16 sps:$4 sm:$0xff]   ;;  %v19068_v36 = vld [vmem:[%s26927_s3 + $0x260] ss:$16 sps:$4 sm:$0xff]  }
  0xff   :  { %v758_v45 = vcombine.low %v679_v34, %v680_v13  ;;  %752 = vst.msk [vmem:[#allocation2 + $0x1] ss:$8 sm:$0xf] %vm21373_vm1, %v749_v41  ;;  %840 = vst.msk [vmem:[#allocation2 + $0x5] ss:$8 sm:$0xf] %vm21373_vm1, %v837_v42  ;;  %v759_v48 = vcombine.low %v681_v38, %v682_v43 }
 0x100   :  { %v19070_v34 = vld [vmem:[%s26927_s3 + $0x264] ss:$16 sps:$4 sm:$0xff]   ;;  %v19071_v37 = vld [vmem:[%s26927_s3 + $0x268] ss:$16 sps:$4 sm:$0xff]   ;;  %v19079_v13 = vld [vmem:[%s26927_s3 + $0x28c] ss:$16 sps:$4 sm:$0xff]  }
 0x101   :  { %v766_v50 = vrot.slane %v758_v45, %v21358_v39  ;;  %v623_v25 = vpop.f32.mrb[12].mxu0  ;;  %v773_v51 = vrot.slane %v759_v48, %v21358_v39  ;;  %v664_v26 = vpop.f32.mrb[12].mxu1  ;;  %v19076_v38 = vld [vmem:[%s26927_s3 + $0x284] ss:$16 sps:$4 sm:$0xff]   ;;  %v19074_v40 = vld [vmem:[%s26927_s3 + $0x280] ss:$16 sps:$4 sm:$0xff]  }
 0x102   :  { %v624_v52 = vadd.f32 %v623_v25, %v150_v44  ;;  %v625_v53 = vpop.f32.mrb[13].mxu0  ;;  %v665_v55 = vadd.f32 %v664_v26, %v158_v46  ;;  %v666_v56 = vpop.f32.mrb[13].mxu1  ;;  %v19077_v41 = vld [vmem:[%s26927_s3 + $0x288] ss:$16 sps:$4 sm:$0xff]   ;;  %v19082_v42 = vld [vmem:[%s26927_s3 + $0x2a4] ss:$16 sps:$4 sm:$0xff]  }
 0x103   :  { %v626_v27 = vadd.f32 %v625_v53, %v154_v47  ;;  %v627_v57 = vpop.f32.mrb[14].mxu0  ;;  %v774_v58 = vcombine.low %v766_v50, %v773_v51  ;;  %v842_v59 = vcombine.high %v766_v50, %v773_v51  ;;  %v667_v61 = vadd.f32 %v666_v56, %v162_v49  ;;  %v668_v62 = vpop.f32.mrb[14].mxu1  ;;  %v19085_v43 = vld [vmem:[%s26927_s3 + $0x2ac] ss:$16 sps:$4 sm:$0xff]   ;;  %v19080_v44 = vld [vmem:[%s26927_s3 + $0x2a0] ss:$16 sps:$4 sm:$0xff]  }
 0x104   :  { %v683_v60 = vmax.f32 %v624_v52, 0.0  ;;  %v628_v63 = vpop.f32.mrb[15].mxu0  ;;  %v685_v7 = vmax.f32 %v665_v55, 0.0  ;;  %v669_v54 = vpop.f32.mrb[15].mxu1  ;;  %v19083_v45 = vld [vmem:[%s26927_s3 + $0x2a8] ss:$16 sps:$4 sm:$0xff]  }
 0x105   :  { %v684_v32 = vmax.f32 %v626_v27, 0.0  ;;  %v781_v0 = vrot.slane %v774_v58, %v21358_v39  ;;  %v849_v2 = vrot.slane %v842_v59, %v21358_v39  ;;  %v686_v3 = vmax.f32 %v667_v61, 0.0  ;;  %v19088_v46 = vld [vmem:[%s26927_s3 + $0x2c4] ss:$16 sps:$4 sm:$0xff]   ;;  %v19091_v47 = vld [vmem:[%s26927_s3 + $0x2cc] ss:$16 sps:$4 sm:$0xff]  }
 0x106   :  { %v19086_v48 = vld [vmem:[%s26927_s3 + $0x2c0] ss:$16 sps:$4 sm:$0xff]   ;;  %v19089_v49 = vld [vmem:[%s26927_s3 + $0x2c8] ss:$16 sps:$4 sm:$0xff]   ;;  %v19094_v50 = vld [vmem:[%s26927_s3 + $0x2e4] ss:$16 sps:$4 sm:$0xff]  }
 0x107   :  { %v790_v4 = vcombine.low %v683_v60, %v684_v32  ;;  %784 = vst.msk [vmem:[#allocation2 + $0x2] ss:$8 sm:$0xf] %vm21373_vm1, %v781_v0  ;;  %852 = vst.msk [vmem:[#allocation2 + $0x6] ss:$8 sm:$0xf] %vm21373_vm1, %v849_v2  ;;  %v791_v5 = vcombine.low %v685_v7, %v686_v3 }
 0x108   :  { %v19097_v25 = vld [vmem:[%s26927_s3 + $0x2ec] ss:$16 sps:$4 sm:$0xff]   ;;  %v19092_v51 = vld [vmem:[%s26927_s3 + $0x2e0] ss:$16 sps:$4 sm:$0xff]   ;;  %v19095_v52 = vld [vmem:[%s26927_s3 + $0x2e8] ss:$16 sps:$4 sm:$0xff]  }
 0x109   :  { %v798_v9 = vrot.slane %v790_v4, %v21358_v39  ;;  %v805_v14 = vrot.slane %v791_v5, %v21358_v39  ;;  %v19100_v26 = vld [vmem:[%s26927_s3 + $0x304] ss:$16 sps:$4 sm:$0xff]   ;;  %v19103_v53 = vld [vmem:[%s26927_s3 + $0x30c] ss:$16 sps:$4 sm:$0xff]   ;;  %v19098_v55 = vld [vmem:[%s26927_s3 + $0x300] ss:$16 sps:$4 sm:$0xff]  }
 0x10a   :  { %v19101_v27 = vld [vmem:[%s26927_s3 + $0x308] ss:$16 sps:$4 sm:$0xff]   ;;  %v19106_v56 = vld [vmem:[%s26927_s3 + $0x324] ss:$16 sps:$4 sm:$0xff]   ;;  %v19109_v57 = vld [vmem:[%s26927_s3 + $0x32c] ss:$16 sps:$4 sm:$0xff]  }
 0x10b   :  { %v806_v15 = vcombine.low %v798_v9, %v805_v14  ;;  %v854_v16 = vcombine.high %v798_v9, %v805_v14  ;;  %v19104_v58 = vld [vmem:[%s26927_s3 + $0x320] ss:$16 sps:$4 sm:$0xff]   ;;  %v19107_v59 = vld [vmem:[%s26927_s3 + $0x328] ss:$16 sps:$4 sm:$0xff]   ;;  %v19112_v60 = vld [vmem:[%s26927_s3 + $0x344] ss:$16 sps:$4 sm:$0xff]  }
 0x10c   :  { %v19115_v61 = vld [vmem:[%s26927_s3 + $0x34c] ss:$16 sps:$4 sm:$0xff]   ;;  %v19110_v62 = vld [vmem:[%s26927_s3 + $0x340] ss:$16 sps:$4 sm:$0xff]   ;;  %v19113_v63 = vld [vmem:[%s26927_s3 + $0x348] ss:$16 sps:$4 sm:$0xff]  }
 0x10d   :  { %v813_v17 = vrot.slane %v806_v15, %v21358_v39  ;;  %v861_v6 = vrot.slane %v854_v16, %v21358_v39  ;;  %v19118_v7 = vld [vmem:[%s26927_s3 + $0x364] ss:$16 sps:$4 sm:$0xff]   ;;  %v19121_v32 = vld [vmem:[%s26927_s3 + $0x36c] ss:$16 sps:$4 sm:$0xff]   ;;  %v19116_v54 = vld [vmem:[%s26927_s3 + $0x360] ss:$16 sps:$4 sm:$0xff]  }
 0x10e   :  { %v19119_v0 = vld [vmem:[%s26927_s3 + $0x368] ss:$16 sps:$4 sm:$0xff]   ;;  %v19124_v2 = vld [vmem:[%s26927_s3 + $0x384] ss:$16 sps:$4 sm:$0xff]   ;;  %v19127_v3 = vld [vmem:[%s26927_s3 + $0x38c] ss:$16 sps:$4 sm:$0xff]  }
 0x10f   :  { %816 = vst.msk [vmem:[#allocation2 + $0x3] ss:$8 sm:$0xf] %vm21373_vm1, %v813_v17  ;;  %864 = vst.msk [vmem:[#allocation2 + $0x7] ss:$8 sm:$0xf] %vm21373_vm1, %v861_v6 }
 0x110   :  { %v19122_v4 = vld [vmem:[%s26927_s3 + $0x380] ss:$16 sps:$4 sm:$0xff]   ;;  %v19125_v5 = vld [vmem:[%s26927_s3 + $0x388] ss:$16 sps:$4 sm:$0xff]   ;;  %v19130_v9 = vld [vmem:[%s26927_s3 + $0x3a4] ss:$16 sps:$4 sm:$0xff]  }
 0x111   :  { %v19133_v14 = vld [vmem:[%s26927_s3 + $0x3ac] ss:$16 sps:$4 sm:$0xff]   ;;  %v19128_v15 = vld [vmem:[%s26927_s3 + $0x3a0] ss:$16 sps:$4 sm:$0xff]   ;;  %v19131_v16 = vld [vmem:[%s26927_s3 + $0x3a8] ss:$16 sps:$4 sm:$0xff]  }
 0x112   :  { %v19136_v17 = vld [vmem:[%s26927_s3 + $0x3c4] ss:$16 sps:$4 sm:$0xff]   ;;  %v19139_v6 = vld [vmem:[%s26927_s3 + $0x3cc] ss:$16 sps:$4 sm:$0xff]  }
 0x116   :  { %v866_v19 = vld [vmem:[#allocation2] sm:$0xff]  ;;  %v867_v20 = vld [vmem:[#allocation2 + $0x8] sm:$0xff]  ;;  %v869_v22 = vld [vmem:[#allocation2 + $0x18] sm:$0xff] }
 0x117   :  { %v21428_v23 = vpack.c.bf16 %v866_v19, %v866_v19  ;;  %v21430_v39 = vpack.c.bf16 %v867_v20, %v867_v20  ;;  %v21446_v12 = vpack.c.bf16 %v869_v22, %v869_v22  ;;  %v19137_v19 = vld [vmem:[%s26927_s3 + $0x3c8] ss:$16 sps:$4 sm:$0xff]   ;;  %v19142_v20 = vld [vmem:[%s26927_s3 + $0x3e4] ss:$16 sps:$4 sm:$0xff]   ;;  %v19140_v22 = vld [vmem:[%s26927_s3 + $0x3e0] ss:$16 sps:$4 sm:$0xff]  }
 0x119   :  { %1674 = vmatprep.mubr.bf16.mxu0 %v21430_v39  ;;  %1756 = vmatprep.mubr.bf16.mxu1 %v21430_v39 }
 0x11a   :  { %1675 = vmatmul.mubr.bf16.vlgmr.msra.gmra.mrb[16].mxu0 %v21428_v23  ;;  %1757 = vmatmul.mubr.bf16.vlgmr.msra.gmra.mrb[16].mxu1 %v21428_v23 }
 0x11b   :  { %1684 = vmatpush1.bf16.msra.mxu0 %v19050_v18  ;;  %1766 = vmatpush1.bf16.msra.mxu1 %v19053_v21  ;;  %v19134_v18 = vld [vmem:[%s26927_s3 + $0x3c0] ss:$16 sps:$4 sm:$0xff]   ;;  %v19145_v21 = vld [vmem:[%s26927_s3 + $0x3ec] ss:$16 sps:$4 sm:$0xff]  }
 0x11c   :  { %1715 = vmatprep.mubr.bf16.mxu0 %v21446_v12  ;;  %1797 = vmatprep.mubr.bf16.mxu1 %v21446_v12 }
 0x11d   :  { %1685 = vmatprep.subr.bf16.mxu0 %v19058_v1  ;;  %1767 = vmatprep.subr.bf16.mxu1 %v19061_v28  ;;  %v19143_v1 = vld [vmem:[%s26927_s3 + $0x3e8] ss:$16 sps:$4 sm:$0xff]   ;;  %v868_v28 = vld [vmem:[#allocation2 + $0x10] sm:$0xff] }
 0x11f   :  { %1686 = vmatpush1.bf16.msra.mxu0 %v19056_v11  ;;  %1768 = vmatpush1.bf16.msra.mxu1 %v19059_v24  ;;  %v19148_v11 = vld [vmem:[%s26927_s3 + $0x404] ss:$16 sps:$4 sm:$0xff]   ;;  %v19151_v24 = vld [vmem:[%s26927_s3 + $0x40c] ss:$16 sps:$4 sm:$0xff]  }
 0x120   :  { %1687 = vmatprep.subr.bf16.mxu0 %v19064_v29  ;;  %1769 = vmatprep.subr.bf16.mxu1 %v19067_v30  ;;  %v19146_v29 = vld [vmem:[%s26927_s3 + $0x400] ss:$16 sps:$4 sm:$0xff]   ;;  %v19149_v30 = vld [vmem:[%s26927_s3 + $0x408] ss:$16 sps:$4 sm:$0xff]  }
 0x123   :  { %1688 = vmatpush1.bf16.msra.mxu0 %v19062_v31  ;;  %1770 = vmatpush1.bf16.msra.mxu1 %v19065_v33  ;;  %v19154_v31 = vld [vmem:[%s26927_s3 + $0x424] ss:$16 sps:$4 sm:$0xff]   ;;  %v19157_v33 = vld [vmem:[%s26927_s3 + $0x42c] ss:$16 sps:$4 sm:$0xff]  }
 0x124   :  { %1689 = vmatprep.subr.bf16.mxu0 %v19070_v34  ;;  %1771 = vmatprep.subr.bf16.mxu1 %v19073_v35  ;;  %v21638_v34 = vpack.c.bf16 %v868_v28, %v868_v28  ;;  %v19152_v35 = vld [vmem:[%s26927_s3 + $0x420] ss:$16 sps:$4 sm:$0xff]   ;;  %v19233_v28 = vld [vmem:[%s26927_s3 + $0x5c8] ss:$16 sps:$4 sm:$0xff]  }
 0x127   :  { %1690 = vmatpush1.bf16.msra.mxu0 %v19068_v36  ;;  %1772 = vmatpush1.bf16.msra.mxu1 %v19071_v37  ;;  %v19155_v36 = vld [vmem:[%s26927_s3 + $0x428] ss:$16 sps:$4 sm:$0xff]   ;;  %v19160_v37 = vld [vmem:[%s26927_s3 + $0x444] ss:$16 sps:$4 sm:$0xff]  }
 0x128   :  { %1691 = vmatprep.subr.bf16.mxu0 %v19076_v38  ;;  %1773 = vmatprep.subr.bf16.mxu1 %v19079_v13  ;;  %v19163_v38 = vld [vmem:[%s26927_s3 + $0x44c] ss:$16 sps:$4 sm:$0xff]   ;;  %v19158_v13 = vld [vmem:[%s26927_s3 + $0x440] ss:$16 sps:$4 sm:$0xff]  }
 0x12b   :  { %1692 = vmatpush1.bf16.msra.mxu0 %v19074_v40  ;;  %1774 = vmatpush1.bf16.msra.mxu1 %v19077_v41  ;;  %v19161_v40 = vld [vmem:[%s26927_s3 + $0x448] ss:$16 sps:$4 sm:$0xff]   ;;  %v19166_v41 = vld [vmem:[%s26927_s3 + $0x464] ss:$16 sps:$4 sm:$0xff]  }
 0x12c   :  { %1693 = vmatprep.subr.bf16.mxu0 %v19082_v42  ;;  %1775 = vmatprep.subr.bf16.mxu1 %v19085_v43  ;;  %v19169_v42 = vld [vmem:[%s26927_s3 + $0x46c] ss:$16 sps:$4 sm:$0xff]   ;;  %v19164_v43 = vld [vmem:[%s26927_s3 + $0x460] ss:$16 sps:$4 sm:$0xff]  }
 0x12f   :  { %1694 = vmatpush1.bf16.msra.mxu0 %v19080_v44  ;;  %1776 = vmatpush1.bf16.msra.mxu1 %v19083_v45  ;;  %v19167_v44 = vld [vmem:[%s26927_s3 + $0x468] ss:$16 sps:$4 sm:$0xff]   ;;  %v19172_v45 = vld [vmem:[%s26927_s3 + $0x484] ss:$16 sps:$4 sm:$0xff]  }
 0x130   :  { %1695 = vmatprep.subr.bf16.mxu0 %v19088_v46  ;;  %1777 = vmatprep.subr.bf16.mxu1 %v19091_v47  ;;  %v19175_v46 = vld [vmem:[%s26927_s3 + $0x48c] ss:$16 sps:$4 sm:$0xff]   ;;  %v19170_v47 = vld [vmem:[%s26927_s3 + $0x480] ss:$16 sps:$4 sm:$0xff]  }
 0x133   :  { %1696 = vmatpush1.bf16.msra.mxu0 %v19086_v48  ;;  %1778 = vmatpush1.bf16.msra.mxu1 %v19089_v49  ;;  %v19173_v48 = vld [vmem:[%s26927_s3 + $0x488] ss:$16 sps:$4 sm:$0xff]   ;;  %v19178_v49 = vld [vmem:[%s26927_s3 + $0x4a4] ss:$16 sps:$4 sm:$0xff]  }
 0x134   :  { %1697 = vmatprep.subr.bf16.mxu0 %v19094_v50  ;;  %1779 = vmatprep.subr.bf16.mxu1 %v19097_v25  ;;  %v19181_v50 = vld [vmem:[%s26927_s3 + $0x4ac] ss:$16 sps:$4 sm:$0xff]   ;;  %v19176_v25 = vld [vmem:[%s26927_s3 + $0x4a0] ss:$16 sps:$4 sm:$0xff]  }
 0x137   :  { %1698 = vmatpush1.bf16.msra.mxu0 %v19092_v51  ;;  %1780 = vmatpush1.bf16.msra.mxu1 %v19095_v52  ;;  %v19179_v51 = vld [vmem:[%s26927_s3 + $0x4a8] ss:$16 sps:$4 sm:$0xff]   ;;  %v19184_v52 = vld [vmem:[%s26927_s3 + $0x4c4] ss:$16 sps:$4 sm:$0xff]  }
 0x138   :  { %1699 = vmatprep.subr.bf16.mxu0 %v19100_v26  ;;  %1781 = vmatprep.subr.bf16.mxu1 %v19103_v53  ;;  %v19187_v26 = vld [vmem:[%s26927_s3 + $0x4cc] ss:$16 sps:$4 sm:$0xff]   ;;  %v19182_v53 = vld [vmem:[%s26927_s3 + $0x4c0] ss:$16 sps:$4 sm:$0xff]  }
 0x13b   :  { %1700 = vmatpush1.bf16.msra.mxu0 %v19098_v55  ;;  %1782 = vmatpush1.bf16.msra.mxu1 %v19101_v27  ;;  %v19185_v55 = vld [vmem:[%s26927_s3 + $0x4c8] ss:$16 sps:$4 sm:$0xff]   ;;  %v19190_v27 = vld [vmem:[%s26927_s3 + $0x4e4] ss:$16 sps:$4 sm:$0xff]  }
 0x13c   :  { %1701 = vmatprep.subr.bf16.mxu0 %v19106_v56  ;;  %1783 = vmatprep.subr.bf16.mxu1 %v19109_v57  ;;  %v19193_v56 = vld [vmem:[%s26927_s3 + $0x4ec] ss:$16 sps:$4 sm:$0xff]   ;;  %v19188_v57 = vld [vmem:[%s26927_s3 + $0x4e0] ss:$16 sps:$4 sm:$0xff]  }
 0x13f   :  { %1702 = vmatpush1.bf16.msra.mxu0 %v19104_v58  ;;  %1784 = vmatpush1.bf16.msra.mxu1 %v19107_v59  ;;  %v19191_v58 = vld [vmem:[%s26927_s3 + $0x4e8] ss:$16 sps:$4 sm:$0xff]   ;;  %v19196_v59 = vld [vmem:[%s26927_s3 + $0x504] ss:$16 sps:$4 sm:$0xff]  }
 0x140   :  { %1703 = vmatprep.subr.bf16.mxu0 %v19112_v60  ;;  %1785 = vmatprep.subr.bf16.mxu1 %v19115_v61  ;;  %v19199_v60 = vld [vmem:[%s26927_s3 + $0x50c] ss:$16 sps:$4 sm:$0xff]   ;;  %v19194_v61 = vld [vmem:[%s26927_s3 + $0x500] ss:$16 sps:$4 sm:$0xff]  }
 0x143   :  { %1704 = vmatpush1.bf16.msra.mxu0 %v19110_v62  ;;  %1786 = vmatpush1.bf16.msra.mxu1 %v19113_v63  ;;  %v19197_v62 = vld [vmem:[%s26927_s3 + $0x508] ss:$16 sps:$4 sm:$0xff]   ;;  %v19202_v63 = vld [vmem:[%s26927_s3 + $0x524] ss:$16 sps:$4 sm:$0xff]  }
 0x144   :  { %1705 = vmatprep.subr.bf16.mxu0 %v19118_v7  ;;  %1787 = vmatprep.subr.bf16.mxu1 %v19121_v32  ;;  %v19205_v7 = vld [vmem:[%s26927_s3 + $0x52c] ss:$16 sps:$4 sm:$0xff]   ;;  %v19200_v32 = vld [vmem:[%s26927_s3 + $0x520] ss:$16 sps:$4 sm:$0xff]  }
 0x147   :  { %1706 = vmatpush1.bf16.msra.mxu0 %v19116_v54  ;;  %1788 = vmatpush1.bf16.msra.mxu1 %v19119_v0  ;;  %v19203_v54 = vld [vmem:[%s26927_s3 + $0x528] ss:$16 sps:$4 sm:$0xff]   ;;  %v19208_v0 = vld [vmem:[%s26927_s3 + $0x544] ss:$16 sps:$4 sm:$0xff]  }
 0x148   :  { %1707 = vmatprep.subr.bf16.mxu0 %v19124_v2  ;;  %1789 = vmatprep.subr.bf16.mxu1 %v19127_v3  ;;  %v19211_v2 = vld [vmem:[%s26927_s3 + $0x54c] ss:$16 sps:$4 sm:$0xff]   ;;  %v19206_v3 = vld [vmem:[%s26927_s3 + $0x540] ss:$16 sps:$4 sm:$0xff]  }
 0x14b   :  { %1708 = vmatpush1.bf16.msra.mxu0 %v19122_v4  ;;  %1790 = vmatpush1.bf16.msra.mxu1 %v19125_v5  ;;  %v19209_v4 = vld [vmem:[%s26927_s3 + $0x548] ss:$16 sps:$4 sm:$0xff]   ;;  %v19214_v5 = vld [vmem:[%s26927_s3 + $0x564] ss:$16 sps:$4 sm:$0xff]  }
 0x14c   :  { %1709 = vmatprep.subr.bf16.mxu0 %v19130_v9  ;;  %1791 = vmatprep.subr.bf16.mxu1 %v19133_v14  ;;  %v19217_v9 = vld [vmem:[%s26927_s3 + $0x56c] ss:$16 sps:$4 sm:$0xff]   ;;  %v19212_v14 = vld [vmem:[%s26927_s3 + $0x560] ss:$16 sps:$4 sm:$0xff]  }
 0x14f   :  { %1710 = vmatpush1.bf16.msra.mxu0 %v19128_v15  ;;  %1792 = vmatpush1.bf16.msra.mxu1 %v19131_v16  ;;  %v19215_v15 = vld [vmem:[%s26927_s3 + $0x568] ss:$16 sps:$4 sm:$0xff]   ;;  %v19220_v16 = vld [vmem:[%s26927_s3 + $0x584] ss:$16 sps:$4 sm:$0xff]  }
 0x150   :  { %1711 = vmatprep.subr.bf16.mxu0 %v19136_v17  ;;  %1793 = vmatprep.subr.bf16.mxu1 %v19139_v6  ;;  %v19223_v17 = vld [vmem:[%s26927_s3 + $0x58c] ss:$16 sps:$4 sm:$0xff]   ;;  %v19218_v6 = vld [vmem:[%s26927_s3 + $0x580] ss:$16 sps:$4 sm:$0xff]  }
 0x153   :  { %1712 = vmatpush1.bf16.msra.mxu0 %v19134_v18  ;;  %1794 = vmatpush1.bf16.msra.mxu1 %v19137_v19  ;;  %v19221_v18 = vld [vmem:[%s26927_s3 + $0x588] ss:$16 sps:$4 sm:$0xff]   ;;  %v19226_v19 = vld [vmem:[%s26927_s3 + $0x5a4] ss:$16 sps:$4 sm:$0xff]  }
 0x154   :  { %1713 = vmatprep.subr.bf16.mxu0 %v19142_v20  ;;  %1795 = vmatprep.subr.bf16.mxu1 %v19145_v21  ;;  %v19229_v20 = vld [vmem:[%s26927_s3 + $0x5ac] ss:$16 sps:$4 sm:$0xff]   ;;  %v19224_v21 = vld [vmem:[%s26927_s3 + $0x5a0] ss:$16 sps:$4 sm:$0xff]  }
 0x157   :  { %1714 = vmatpush1.bf16.msra.mxu0 %v19140_v22  ;;  %1796 = vmatpush1.bf16.msra.mxu1 %v19143_v1  ;;  %v19227_v22 = vld [vmem:[%s26927_s3 + $0x5a8] ss:$16 sps:$4 sm:$0xff]   ;;  %v19232_v1 = vld [vmem:[%s26927_s3 + $0x5c4] ss:$16 sps:$4 sm:$0xff]  }
 0x158   :  { %2577 = vmatprep.subr.bf16.mxu0 %v19148_v11  ;;  %2659 = vmatprep.subr.bf16.mxu1 %v19151_v24  ;;  %v19235_v11 = vld [vmem:[%s26927_s3 + $0x5cc] ss:$16 sps:$4 sm:$0xff]   ;;  %v19230_v24 = vld [vmem:[%s26927_s3 + $0x5c0] ss:$16 sps:$4 sm:$0xff]  }
 0x15a   :  { %1716 = vmatmul.mubr.bf16.vlgmr.msra.gmra.mrb[16].mxu0 %v21638_v34  ;;  %1798 = vmatmul.mubr.bf16.vlgmr.msra.gmra.mrb[16].mxu1 %v21638_v34 }
 0x15b   :  { %2578 = vmatpush1.bf16.msra.mxu0 %v19146_v29  ;;  %2609 = vmatprep.mubr.bf16.mxu0 %v21430_v39  ;;  %v19238_v29 = vld [vmem:[%s26927_s3 + $0x5e4] ss:$16 sps:$4 sm:$0xff]  }
 0x15c   :  { %2660 = vmatpush1.bf16.msra.mxu1 %v19149_v30  ;;  %2691 = vmatprep.mubr.bf16.mxu1 %v21430_v39  ;;  %v19241_v30 = vld [vmem:[%s26927_s3 + $0x5ec] ss:$16 sps:$4 sm:$0xff]  }
 0x15d   :  { %2579 = vmatprep.subr.bf16.mxu0 %v19154_v31  ;;  %2661 = vmatprep.subr.bf16.mxu1 %v19157_v33  ;;  %v19236_v31 = vld [vmem:[%s26927_s3 + $0x5e0] ss:$16 sps:$4 sm:$0xff]   ;;  %v19239_v33 = vld [vmem:[%s26927_s3 + $0x5e8] ss:$16 sps:$4 sm:$0xff]  }
 0x15f   :  { %2580 = vmatpush1.bf16.msra.mxu0 %v19152_v35  ;;  %v19244_v35 = vld [vmem:[%s26927_s3 + $0x604] ss:$16 sps:$4 sm:$0xff]  }
 0x160   :  { %2662 = vmatpush1.bf16.msra.mxu1 %v19155_v36  ;;  %2581 = vmatprep.subr.bf16.mxu0 %v19160_v37  ;;  %v19247_v36 = vld [vmem:[%s26927_s3 + $0x60c] ss:$16 sps:$4 sm:$0xff]   ;;  %v19242_v37 = vld [vmem:[%s26927_s3 + $0x600] ss:$16 sps:$4 sm:$0xff]  }
 0x161   :  { %2663 = vmatprep.subr.bf16.mxu1 %v19163_v38  ;;  %v19245_v38 = vld [vmem:[%s26927_s3 + $0x608] ss:$16 sps:$4 sm:$0xff]  }
 0x163   :  { %2582 = vmatpush1.bf16.msra.mxu0 %v19158_v13  ;;  %v19250_v13 = vld [vmem:[%s26927_s3 + $0x624] ss:$16 sps:$4 sm:$0xff]  }
 0x164   :  { %2664 = vmatpush1.bf16.msra.mxu1 %v19161_v40  ;;  %2583 = vmatprep.subr.bf16.mxu0 %v19166_v41  ;;  %v19253_v40 = vld [vmem:[%s26927_s3 + $0x62c] ss:$16 sps:$4 sm:$0xff]   ;;  %v19248_v41 = vld [vmem:[%s26927_s3 + $0x620] ss:$16 sps:$4 sm:$0xff]  }
 0x165   :  { %2665 = vmatprep.subr.bf16.mxu1 %v19169_v42  ;;  %v19251_v42 = vld [vmem:[%s26927_s3 + $0x628] ss:$16 sps:$4 sm:$0xff]  }
 0x167   :  { %2584 = vmatpush1.bf16.msra.mxu0 %v19164_v43  ;;  %v19256_v43 = vld [vmem:[%s26927_s3 + $0x644] ss:$16 sps:$4 sm:$0xff]  }
 0x168   :  { %2666 = vmatpush1.bf16.msra.mxu1 %v19167_v44  ;;  %2585 = vmatprep.subr.bf16.mxu0 %v19172_v45  ;;  %v19259_v44 = vld [vmem:[%s26927_s3 + $0x64c] ss:$16 sps:$4 sm:$0xff]   ;;  %v19254_v45 = vld [vmem:[%s26927_s3 + $0x640] ss:$16 sps:$4 sm:$0xff]  }
 0x169   :  { %2667 = vmatprep.subr.bf16.mxu1 %v19175_v46  ;;  %v19257_v46 = vld [vmem:[%s26927_s3 + $0x648] ss:$16 sps:$4 sm:$0xff]  }
 0x16b   :  { %2586 = vmatpush1.bf16.msra.mxu0 %v19170_v47  ;;  %v19262_v47 = vld [vmem:[%s26927_s3 + $0x664] ss:$16 sps:$4 sm:$0xff]  }
 0x16c   :  { %2668 = vmatpush1.bf16.msra.mxu1 %v19173_v48  ;;  %2587 = vmatprep.subr.bf16.mxu0 %v19178_v49  ;;  %v19265_v48 = vld [vmem:[%s26927_s3 + $0x66c] ss:$16 sps:$4 sm:$0xff]   ;;  %v19260_v49 = vld [vmem:[%s26927_s3 + $0x660] ss:$16 sps:$4 sm:$0xff]  }
 0x16d   :  { %2669 = vmatprep.subr.bf16.mxu1 %v19181_v50  ;;  %v19263_v50 = vld [vmem:[%s26927_s3 + $0x668] ss:$16 sps:$4 sm:$0xff]  }
 0x16f   :  { %2588 = vmatpush1.bf16.msra.mxu0 %v19176_v25  ;;  %v19268_v25 = vld [vmem:[%s26927_s3 + $0x684] ss:$16 sps:$4 sm:$0xff]  }
 0x170   :  { %2670 = vmatpush1.bf16.msra.mxu1 %v19179_v51  ;;  %2589 = vmatprep.subr.bf16.mxu0 %v19184_v52  ;;  %v19271_v51 = vld [vmem:[%s26927_s3 + $0x68c] ss:$16 sps:$4 sm:$0xff]   ;;  %v19266_v52 = vld [vmem:[%s26927_s3 + $0x680] ss:$16 sps:$4 sm:$0xff]  }
 0x171   :  { %2671 = vmatprep.subr.bf16.mxu1 %v19187_v26  ;;  %v19269_v26 = vld [vmem:[%s26927_s3 + $0x688] ss:$16 sps:$4 sm:$0xff]  }
 0x173   :  { %2590 = vmatpush1.bf16.msra.mxu0 %v19182_v53  ;;  %v19274_v53 = vld [vmem:[%s26927_s3 + $0x6a4] ss:$16 sps:$4 sm:$0xff]  }
 0x174   :  { %2672 = vmatpush1.bf16.msra.mxu1 %v19185_v55  ;;  %2591 = vmatprep.subr.bf16.mxu0 %v19190_v27  ;;  %v19277_v55 = vld [vmem:[%s26927_s3 + $0x6ac] ss:$16 sps:$4 sm:$0xff]   ;;  %v19272_v27 = vld [vmem:[%s26927_s3 + $0x6a0] ss:$16 sps:$4 sm:$0xff]  }
 0x175   :  { %2673 = vmatprep.subr.bf16.mxu1 %v19193_v56  ;;  %v19275_v56 = vld [vmem:[%s26927_s3 + $0x6a8] ss:$16 sps:$4 sm:$0xff]  }
 0x177   :  { %2592 = vmatpush1.bf16.msra.mxu0 %v19188_v57  ;;  %v19280_v57 = vld [vmem:[%s26927_s3 + $0x6c4] ss:$16 sps:$4 sm:$0xff]  }
 0x178   :  { %2674 = vmatpush1.bf16.msra.mxu1 %v19191_v58  ;;  %2593 = vmatprep.subr.bf16.mxu0 %v19196_v59  ;;  %v19283_v58 = vld [vmem:[%s26927_s3 + $0x6cc] ss:$16 sps:$4 sm:$0xff]   ;;  %v19278_v59 = vld [vmem:[%s26927_s3 + $0x6c0] ss:$16 sps:$4 sm:$0xff]  }
 0x179   :  { %2675 = vmatprep.subr.bf16.mxu1 %v19199_v60  ;;  %v19281_v60 = vld [vmem:[%s26927_s3 + $0x6c8] ss:$16 sps:$4 sm:$0xff]  }
 0x17b   :  { %2594 = vmatpush1.bf16.msra.mxu0 %v19194_v61  ;;  %v19286_v61 = vld [vmem:[%s26927_s3 + $0x6e4] ss:$16 sps:$4 sm:$0xff]  }
 0x17c   :  { %2676 = vmatpush1.bf16.msra.mxu1 %v19197_v62  ;;  %2595 = vmatprep.subr.bf16.mxu0 %v19202_v63  ;;  %v19289_v62 = vld [vmem:[%s26927_s3 + $0x6ec] ss:$16 sps:$4 sm:$0xff]   ;;  %v19284_v63 = vld [vmem:[%s26927_s3 + $0x6e0] ss:$16 sps:$4 sm:$0xff]  }
 0x17d   :  { %2677 = vmatprep.subr.bf16.mxu1 %v19205_v7  ;;  %v19287_v7 = vld [vmem:[%s26927_s3 + $0x6e8] ss:$16 sps:$4 sm:$0xff]  }
 0x17f   :  { %2596 = vmatpush1.bf16.msra.mxu0 %v19200_v32  ;;  %v19292_v32 = vld [vmem:[%s26927_s3 + $0x704] ss:$16 sps:$4 sm:$0xff]  }
 0x180   :  { %2678 = vmatpush1.bf16.msra.mxu1 %v19203_v54  ;;  %2597 = vmatprep.subr.bf16.mxu0 %v19208_v0  ;;  %v19295_v54 = vld [vmem:[%s26927_s3 + $0x70c] ss:$16 sps:$4 sm:$0xff]   ;;  %v19290_v0 = vld [vmem:[%s26927_s3 + $0x700] ss:$16 sps:$4 sm:$0xff]  }
 0x181   :  { %2679 = vmatprep.subr.bf16.mxu1 %v19211_v2  ;;  %v19293_v2 = vld [vmem:[%s26927_s3 + $0x708] ss:$16 sps:$4 sm:$0xff]  }
 0x183   :  { %2598 = vmatpush1.bf16.msra.mxu0 %v19206_v3  ;;  %v19298_v3 = vld [vmem:[%s26927_s3 + $0x724] ss:$16 sps:$4 sm:$0xff]  }
 0x184   :  { %2680 = vmatpush1.bf16.msra.mxu1 %v19209_v4  ;;  %2599 = vmatprep.subr.bf16.mxu0 %v19214_v5  ;;  %v19301_v4 = vld [vmem:[%s26927_s3 + $0x72c] ss:$16 sps:$4 sm:$0xff]   ;;  %v19296_v5 = vld [vmem:[%s26927_s3 + $0x720] ss:$16 sps:$4 sm:$0xff]  }
 0x185   :  { %2681 = vmatprep.subr.bf16.mxu1 %v19217_v9  ;;  %v19299_v9 = vld [vmem:[%s26927_s3 + $0x728] ss:$16 sps:$4 sm:$0xff]  }
 0x187   :  { %2600 = vmatpush1.bf16.msra.mxu0 %v19212_v14  ;;  %v19304_v14 = vld [vmem:[%s26927_s3 + $0x744] ss:$16 sps:$4 sm:$0xff]  }
 0x188   :  { %2682 = vmatpush1.bf16.msra.mxu1 %v19215_v15  ;;  %2601 = vmatprep.subr.bf16.mxu0 %v19220_v16  ;;  %v19307_v15 = vld [vmem:[%s26927_s3 + $0x74c] ss:$16 sps:$4 sm:$0xff]   ;;  %v19302_v16 = vld [vmem:[%s26927_s3 + $0x740] ss:$16 sps:$4 sm:$0xff]  }
 0x189   :  { %2683 = vmatprep.subr.bf16.mxu1 %v19223_v17  ;;  %v19305_v17 = vld [vmem:[%s26927_s3 + $0x748] ss:$16 sps:$4 sm:$0xff]  }
 0x18b   :  { %2602 = vmatpush1.bf16.msra.mxu0 %v19218_v6  ;;  %v19310_v6 = vld [vmem:[%s26927_s3 + $0x764] ss:$16 sps:$4 sm:$0xff]  }
 0x18c   :  { %2684 = vmatpush1.bf16.msra.mxu1 %v19221_v18  ;;  %2603 = vmatprep.subr.bf16.mxu0 %v19226_v19  ;;  %v19313_v18 = vld [vmem:[%s26927_s3 + $0x76c] ss:$16 sps:$4 sm:$0xff]   ;;  %v19308_v19 = vld [vmem:[%s26927_s3 + $0x760] ss:$16 sps:$4 sm:$0xff]  }
 0x18d   :  { %2685 = vmatprep.subr.bf16.mxu1 %v19229_v20  ;;  %v19311_v20 = vld [vmem:[%s26927_s3 + $0x768] ss:$16 sps:$4 sm:$0xff]  }
 0x18f   :  { %2604 = vmatpush1.bf16.msra.mxu0 %v19224_v21  ;;  %v19316_v21 = vld [vmem:[%s26927_s3 + $0x784] ss:$16 sps:$4 sm:$0xff]  }
 0x190   :  { %2686 = vmatpush1.bf16.msra.mxu1 %v19227_v22  ;;  %2605 = vmatprep.subr.bf16.mxu0 %v19232_v1  ;;  %v19319_v22 = vld [vmem:[%s26927_s3 + $0x78c] ss:$16 sps:$4 sm:$0xff]   ;;  %v19314_v1 = vld [vmem:[%s26927_s3 + $0x780] ss:$16 sps:$4 sm:$0xff]  }
 0x191   :  { %2687 = vmatprep.subr.bf16.mxu1 %v19235_v11  ;;  %v19317_v11 = vld [vmem:[%s26927_s3 + $0x788] ss:$16 sps:$4 sm:$0xff]  }
 0x193   :  { %2606 = vmatpush1.bf16.msra.mxu0 %v19230_v24  ;;  %v19322_v24 = vld [vmem:[%s26927_s3 + $0x7a4] ss:$16 sps:$4 sm:$0xff]  }
 0x194   :  { %2688 = vmatpush1.bf16.msra.mxu1 %v19233_v28  ;;  %2607 = vmatprep.subr.bf16.mxu0 %v19238_v29  ;;  %v19325_v28 = vld [vmem:[%s26927_s3 + $0x7ac] ss:$16 sps:$4 sm:$0xff]   ;;  %v19320_v29 = vld [vmem:[%s26927_s3 + $0x7a0] ss:$16 sps:$4 sm:$0xff]  }
 0x195   :  { %2689 = vmatprep.subr.bf16.mxu1 %v19241_v30  ;;  %v19323_v30 = vld [vmem:[%s26927_s3 + $0x7a8] ss:$16 sps:$4 sm:$0xff]  }
 0x197   :  { %2608 = vmatpush1.bf16.msra.mxu0 %v19236_v31  ;;  %v19328_v31 = vld [vmem:[%s26927_s3 + $0x7c4] ss:$16 sps:$4 sm:$0xff]  }
 0x198   :  { %2690 = vmatpush1.bf16.msra.mxu1 %v19239_v33  ;;  %2618 = vmatprep.subr.bf16.mxu0 %v19244_v35  ;;  %v19331_v33 = vld [vmem:[%s26927_s3 + $0x7cc] ss:$16 sps:$4 sm:$0xff]   ;;  %v19326_v35 = vld [vmem:[%s26927_s3 + $0x7c0] ss:$16 sps:$4 sm:$0xff]  }
 0x199   :  { %2700 = vmatprep.subr.bf16.mxu1 %v19247_v36  ;;  %v19329_v36 = vld [vmem:[%s26927_s3 + $0x7c8] ss:$16 sps:$4 sm:$0xff]  }
 0x19a   :  { %2610 = vmatmul.mubr.bf16.vlgmr.msra.gmra.mrb[20].mxu0 %v21428_v23 }
 0x19b   :  { %2692 = vmatmul.mubr.bf16.vlgmr.msra.gmra.mrb[20].mxu1 %v21428_v23  ;;  %2619 = vmatpush1.bf16.msra.mxu0 %v19242_v37  ;;  %v19334_v37 = vld [vmem:[%s26927_s3 + $0x7e4] ss:$16 sps:$4 sm:$0xff]  }
 0x19c   :  { %2650 = vmatprep.mubr.bf16.mxu0 %v21446_v12  ;;  %2701 = vmatpush1.bf16.msra.mxu1 %v19245_v38  ;;  %v19337_v38 = vld [vmem:[%s26927_s3 + $0x7ec] ss:$16 sps:$4 sm:$0xff]  }
 0x19d   :  { %2732 = vmatprep.mubr.bf16.mxu1 %v21446_v12  ;;  %2620 = vmatprep.subr.bf16.mxu0 %v19250_v13  ;;  %v19332_v13 = vld [vmem:[%s26927_s3 + $0x7e0] ss:$16 sps:$4 sm:$0xff]  }
 0x19e   :  { %2702 = vmatprep.subr.bf16.mxu1 %v19253_v40  ;;  %v19335_v40 = vld [vmem:[%s26927_s3 + $0x7e8] ss:$16 sps:$4 sm:$0xff]  }
 0x19f   :  { %2621 = vmatpush1.bf16.msra.mxu0 %v19248_v41 }
 0x1a0   :  { %2703 = vmatpush1.bf16.msra.mxu1 %v19251_v42  ;;  %2622 = vmatprep.subr.bf16.mxu0 %v19256_v43 }
 0x1a1   :  { %2704 = vmatprep.subr.bf16.mxu1 %v19259_v44 }
 0x1a3   :  { %2623 = vmatpush1.bf16.msra.mxu0 %v19254_v45 }
 0x1a4   :  { %2705 = vmatpush1.bf16.msra.mxu1 %v19257_v46  ;;  %2624 = vmatprep.subr.bf16.mxu0 %v19262_v47 }
 0x1a5   :  { %2706 = vmatprep.subr.bf16.mxu1 %v19265_v48 }
 0x1a7   :  { %2625 = vmatpush1.bf16.msra.mxu0 %v19260_v49  ;;  %v26947_v49 = vmov 0.0  }
 0x1a8   :  { %2707 = vmatpush1.bf16.msra.mxu1 %v19263_v50  ;;  %2626 = vmatprep.subr.bf16.mxu0 %v19268_v25 }
 0x1a9   :  { %2708 = vmatprep.subr.bf16.mxu1 %v19271_v51 }
 0x1ab   :  { %2627 = vmatpush1.bf16.msra.mxu0 %v19266_v52 }
 0x1ac   :  { %2709 = vmatpush1.bf16.msra.mxu1 %v19269_v26  ;;  %2628 = vmatprep.subr.bf16.mxu0 %v19274_v53 }
 0x1ad   :  { %2710 = vmatprep.subr.bf16.mxu1 %v19277_v55 }
 0x1af   :  { %2629 = vmatpush1.bf16.msra.mxu0 %v19272_v27 }
 0x1b0   :  { %2711 = vmatpush1.bf16.msra.mxu1 %v19275_v56  ;;  %2630 = vmatprep.subr.bf16.mxu0 %v19280_v57 }
 0x1b1   :  { %2712 = vmatprep.subr.bf16.mxu1 %v19283_v58 }
 0x1b3   :  { %2631 = vmatpush1.bf16.msra.mxu0 %v19278_v59 }
 0x1b4   :  { %2713 = vmatpush1.bf16.msra.mxu1 %v19281_v60  ;;  %2632 = vmatprep.subr.bf16.mxu0 %v19286_v61 }
 0x1b5   :  { %2714 = vmatprep.subr.bf16.mxu1 %v19289_v62 }
 0x1b7   :  { %2633 = vmatpush1.bf16.msra.mxu0 %v19284_v63 }
 0x1b8   :  { %2715 = vmatpush1.bf16.msra.mxu1 %v19287_v7  ;;  %2634 = vmatprep.subr.bf16.mxu0 %v19292_v32 }
 0x1b9   :  { %2716 = vmatprep.subr.bf16.mxu1 %v19295_v54 }
 0x1bb   :  { %2635 = vmatpush1.bf16.msra.mxu0 %v19290_v0 }
 0x1bc   :  { %2717 = vmatpush1.bf16.msra.mxu1 %v19293_v2  ;;  %2636 = vmatprep.subr.bf16.mxu0 %v19298_v3 }
 0x1bd   :  { %2718 = vmatprep.subr.bf16.mxu1 %v19301_v4 }
 0x1bf   :  { %2637 = vmatpush1.bf16.msra.mxu0 %v19296_v5 }
 0x1c0   :  { %2719 = vmatpush1.bf16.msra.mxu1 %v19299_v9  ;;  %2638 = vmatprep.subr.bf16.mxu0 %v19304_v14 }
 0x1c1   :  { %2720 = vmatprep.subr.bf16.mxu1 %v19307_v15 }
 0x1c3   :  { %2639 = vmatpush1.bf16.msra.mxu0 %v19302_v16 }
 0x1c4   :  { %2721 = vmatpush1.bf16.msra.mxu1 %v19305_v17  ;;  %2640 = vmatprep.subr.bf16.mxu0 %v19310_v6 }
 0x1c5   :  { %2722 = vmatprep.subr.bf16.mxu1 %v19313_v18 }
 0x1c7   :  { %2641 = vmatpush1.bf16.msra.mxu0 %v19308_v19 }
 0x1c8   :  { %2723 = vmatpush1.bf16.msra.mxu1 %v19311_v20  ;;  %2642 = vmatprep.subr.bf16.mxu0 %v19316_v21 }
 0x1c9   :  { %2724 = vmatprep.subr.bf16.mxu1 %v19319_v22 }
 0x1cb   :  { %2643 = vmatpush1.bf16.msra.mxu0 %v19314_v1 }
 0x1cc   :  { %2725 = vmatpush1.bf16.msra.mxu1 %v19317_v11  ;;  %2644 = vmatprep.subr.bf16.mxu0 %v19322_v24 }
 0x1cd   :  { %2726 = vmatprep.subr.bf16.mxu1 %v19325_v28 }
 0x1cf   :  { %2645 = vmatpush1.bf16.msra.mxu0 %v19320_v29 }
 0x1d0   :  { %2727 = vmatpush1.bf16.msra.mxu1 %v19323_v30  ;;  %2646 = vmatprep.subr.bf16.mxu0 %v19328_v31 }
 0x1d1   :  { %2728 = vmatprep.subr.bf16.mxu1 %v19331_v33 }
 0x1d3   :  { %2647 = vmatpush1.bf16.msra.mxu0 %v19326_v35 }
 0x1d4   :  { %2729 = vmatpush1.bf16.msra.mxu1 %v19329_v36  ;;  %2648 = vmatprep.subr.bf16.mxu0 %v19334_v37 }
 0x1d5   :  { %2730 = vmatprep.subr.bf16.mxu1 %v19337_v38 }
 0x1d7   :  { %2649 = vmatpush1.bf16.msra.mxu0 %v19332_v13 }
 0x1d8   :  { %2731 = vmatpush1.bf16.msra.mxu1 %v19335_v40 }
 0x1da   :  { %2651 = vmatmul.mubr.bf16.vlgmr.msra.gmra.mrb[20].mxu0 %v21638_v34 }
 0x1db   :  { %2733 = vmatmul.mubr.bf16.vlgmr.msra.gmra.mrb[20].mxu1 %v21638_v34  ;;  %2815 = vmatprep.mubr.f32.mxu0 %v26947_v49 }
 0x1dc   :  { %2892 = vmatprep.mubr.f32.mxu1 %v26947_v49 }
 0x22d   :  { %v1717_v41 = vpop.f32.mrb[16].mxu0  ;;  %v1799_v42 = vpop.f32.mrb[16].mxu1 }
 0x22e   :  { %v1719_v43 = vpop.f32.mrb[17].mxu0  ;;  %v1801_v44 = vpop.f32.mrb[17].mxu1 }
 0x22f   :  { %v1721_v45 = vpop.f32.mrb[18].mxu0  ;;  %v1803_v46 = vpop.f32.mrb[18].mxu1 }
 0x230   :  { %v1722_v47 = vpop.f32.mrb[19].mxu0  ;;  %v1804_v48 = vpop.f32.mrb[19].mxu1 }
 0x231   :  { %23 = vsyncpa [#allocation4], 0  ;;  %v15657_v52 = vld [vmem:[%s26928_s4 + $0x10] sm:$0xff]  ;;  %vm2744_vm2 = vcmask 64512   ;;  %v15658_v57 = vld [vmem:[%s26928_s4 + $0x18] sm:$0x3f] }
 0x232   :  { %v19340_v58 = vld [vmem:[%s26927_s3 + $0x804] ss:$16 sps:$4 sm:$0xff]   ;;  %v19343_v59 = vld [vmem:[%s26927_s3 + $0x80c] ss:$16 sps:$4 sm:$0xff]   ;;  %v19338_v60 = vld [vmem:[%s26927_s3 + $0x800] ss:$16 sps:$4 sm:$0xff]  }
 0x233   :  { %v1806_v61 = vld [vmem:[%s26928_s4] sm:$0xff]  ;;  %v19341_v62 = vld [vmem:[%s26927_s3 + $0x808] ss:$16 sps:$4 sm:$0xff]   ;;  %v19349_v7 = vld [vmem:[%s26927_s3 + $0x82c] ss:$16 sps:$4 sm:$0xff]   ;;  %vm6402_vm3 = vcmask 523264  }
 0x234   :  { %v19346_v63 = vld [vmem:[%s26927_s3 + $0x824] ss:$16 sps:$4 sm:$0xff]   ;;  %v19344_v32 = vld [vmem:[%s26927_s3 + $0x820] ss:$16 sps:$4 sm:$0xff]   ;;  %v1807_v54 = vld [vmem:[%s26928_s4 + $0x8] sm:$0x3f] }
 0x235   :  { %v19347_v0 = vld [vmem:[%s26927_s3 + $0x828] ss:$16 sps:$4 sm:$0xff]   ;;  %v19352_v2 = vld [vmem:[%s26927_s3 + $0x844] ss:$16 sps:$4 sm:$0xff]   ;;  %v19355_v3 = vld [vmem:[%s26927_s3 + $0x84c] ss:$16 sps:$4 sm:$0xff]  }
 0x236   :  { %v19350_v4 = vld [vmem:[%s26927_s3 + $0x840] ss:$16 sps:$4 sm:$0xff]   ;;  %v19353_v5 = vld [vmem:[%s26927_s3 + $0x848] ss:$16 sps:$4 sm:$0xff]   ;;  %v19358_v9 = vld [vmem:[%s26927_s3 + $0x864] ss:$16 sps:$4 sm:$0xff]  }
 0x237   :  { %v19361_v14 = vld [vmem:[%s26927_s3 + $0x86c] ss:$16 sps:$4 sm:$0xff]   ;;  %v19356_v15 = vld [vmem:[%s26927_s3 + $0x860] ss:$16 sps:$4 sm:$0xff]   ;;  %v19359_v16 = vld [vmem:[%s26927_s3 + $0x868] ss:$16 sps:$4 sm:$0xff]  }
 0x238   :  { %v19364_v17 = vld [vmem:[%s26927_s3 + $0x884] ss:$16 sps:$4 sm:$0xff]   ;;  %v19367_v6 = vld [vmem:[%s26927_s3 + $0x88c] ss:$16 sps:$4 sm:$0xff]   ;;  %v19362_v18 = vld [vmem:[%s26927_s3 + $0x880] ss:$16 sps:$4 sm:$0xff]  }
 0x239   :  { %v19365_v19 = vld [vmem:[%s26927_s3 + $0x888] ss:$16 sps:$4 sm:$0xff]   ;;  %v19370_v20 = vld [vmem:[%s26927_s3 + $0x8a4] ss:$16 sps:$4 sm:$0xff]   ;;  %v19373_v21 = vld [vmem:[%s26927_s3 + $0x8ac] ss:$16 sps:$4 sm:$0xff]  }
 0x23a   :  { %v19368_v22 = vld [vmem:[%s26927_s3 + $0x8a0] ss:$16 sps:$4 sm:$0xff]   ;;  %v19371_v1 = vld [vmem:[%s26927_s3 + $0x8a8] ss:$16 sps:$4 sm:$0xff]   ;;  %v19376_v11 = vld [vmem:[%s26927_s3 + $0x8c4] ss:$16 sps:$4 sm:$0xff]  }
 0x23b   :  { %v19379_v24 = vld [vmem:[%s26927_s3 + $0x8cc] ss:$16 sps:$4 sm:$0xff]   ;;  %v19374_v28 = vld [vmem:[%s26927_s3 + $0x8c0] ss:$16 sps:$4 sm:$0xff]   ;;  %v19377_v29 = vld [vmem:[%s26927_s3 + $0x8c8] ss:$16 sps:$4 sm:$0xff]  }
 0x23c   :  { %v19382_v30 = vld [vmem:[%s26927_s3 + $0x8e4] ss:$16 sps:$4 sm:$0xff]   ;;  %v19385_v31 = vld [vmem:[%s26927_s3 + $0x8ec] ss:$16 sps:$4 sm:$0xff]   ;;  %v19380_v33 = vld [vmem:[%s26927_s3 + $0x8e0] ss:$16 sps:$4 sm:$0xff]  }
 0x23d   :  { %v19383_v35 = vld [vmem:[%s26927_s3 + $0x8e8] ss:$16 sps:$4 sm:$0xff]   ;;  %v19388_v36 = vld [vmem:[%s26927_s3 + $0x904] ss:$16 sps:$4 sm:$0xff]   ;;  %v19391_v37 = vld [vmem:[%s26927_s3 + $0x90c] ss:$16 sps:$4 sm:$0xff]  }
 0x23e   :  { %v19386_v38 = vld [vmem:[%s26927_s3 + $0x900] ss:$16 sps:$4 sm:$0xff]   ;;  %v19389_v13 = vld [vmem:[%s26927_s3 + $0x908] ss:$16 sps:$4 sm:$0xff]   ;;  %v19394_v40 = vld [vmem:[%s26927_s3 + $0x924] ss:$16 sps:$4 sm:$0xff]  }
 0x23f   :  { %v19403_v45 = vld [vmem:[%s26927_s3 + $0x94c] ss:$16 sps:$4 sm:$0xff]   ;;  %v19398_v46 = vld [vmem:[%s26927_s3 + $0x940] ss:$16 sps:$4 sm:$0xff]   ;;  %v19401_v47 = vld [vmem:[%s26927_s3 + $0x948] ss:$16 sps:$4 sm:$0xff]  }
 0x240   :  { %v19406_v48 = vld [vmem:[%s26927_s3 + $0x964] ss:$16 sps:$4 sm:$0xff]   ;;  %vm6377_vm4 = vcmask 1045504   ;;  %vm6404_vm5 = vcmask 521216   ;;  %vm20912_vm6 = vmmov 1   ;;  %vm8890_vm8 = vcmask 113664  }
 0x241   :  { %vm24492_vm7 = vmpackc.low %vm6377_vm4, %vm20912_vm6  ;;  %vm12501_vm9 = vcmask 1043456   ;;  %vm12535_vm10 = vcmask 519168   ;;  %vm20913_vm11 = vmmov 0   ;;  %vm14016_vm13 = vcmask 228352  }
 0x242   :  { %vm26507_vm12 = vmpackc.low %vm12501_vm9, %vm20912_vm6 }
 0x2ad   :  { %v2652_v50 = vpop.f32.mrb[20].mxu0 }
 0x2ae   :  { %v2734_v25 = vpop.f32.mrb[20].mxu1  ;;  %v2654_v51 = vpop.f32.mrb[21].mxu0 }
 0x2af   :  { %v2736_v26 = vpop.f32.mrb[21].mxu1  ;;  %v2656_v53 = vpop.f32.mrb[22].mxu0  ;;  %2751 = vmatprep.subr.mxu0 %v2654_v51  ;;  %v19407_v51 = vld [vmem:[%s26927_s3 + $0x968] ss:$16 sps:$4 sm:$0xff]  }
 0x2b0   :  { %v2738_v55 = vpop.f32.mrb[22].mxu1  ;;  %2828 = vmatprep.subr.mxu1 %v2736_v26  ;;  %v2657_v27 = vpop.f32.mrb[23].mxu0  ;;  %2752 = vmatpush1.msra.mxu0 %v2652_v50  ;;  %v19409_v50 = vld [vmem:[%s26927_s3 + $0x96c] ss:$16 sps:$4 sm:$0xff]   ;;  %v19410_v53 = vld [vmem:[%s26927_s3 + $0x980] ss:$16 sps:$4 sm:$0xff]  }
 0x2b1   :  { %v2739_v56 = vpop.f32.mrb[23].mxu1  ;;  %2829 = vmatpush1.msra.mxu1 %v2734_v25  ;;  %15659 = vmatmul.mubr.msk.f32.vlgmr.msra.gmra.mrb[24].mxu0 %vm2744_vm2, %v15657_v52  ;;  %v19404_v25 = vld [vmem:[%s26927_s3 + $0x960] ss:$16 sps:$4 sm:$0xff]   ;;  %v19415_v26 = vld [vmem:[%s26927_s3 + $0x98c] ss:$16 sps:$4 sm:$0xff]  }
 0x2b2   :  { %15661 = vmatmul.mubr.msk.f32.vlgmr.msra.gmra.mrb[24].mxu1 %vm2744_vm2, %v15657_v52  ;;  %2911 = vmatprep.subr.mxu0 %v1719_v43  ;;  %v19395_v43 = vld [vmem:[%s26927_s3 + $0x928] ss:$16 sps:$4 sm:$0xff]   ;;  %v19412_v52 = vld [vmem:[%s26927_s3 + $0x984] ss:$16 sps:$4 sm:$0xff]   ;;  %v19421_v56 = vld [vmem:[%s26927_s3 + $0x9ac] ss:$16 sps:$4 sm:$0xff]  }
 0x2b3   :  { %2988 = vmatprep.subr.mxu1 %v1801_v44  ;;  %2912 = vmatpush1.msra.mxu0 %v1717_v41  ;;  %v19397_v41 = vld [vmem:[%s26927_s3 + $0x92c] ss:$16 sps:$4 sm:$0xff]   ;;  %v19400_v44 = vld [vmem:[%s26927_s3 + $0x944] ss:$16 sps:$4 sm:$0xff]   ;;  %v19413_v55 = vld [vmem:[%s26927_s3 + $0x988] ss:$16 sps:$4 sm:$0xff]  }
 0x2b4   :  { %2989 = vmatpush1.msra.mxu1 %v1799_v42  ;;  %2821 = vmatprep.mubr.f32.mxu0 %v26947_v49  ;;  %v19392_v42 = vld [vmem:[%s26927_s3 + $0x920] ss:$16 sps:$4 sm:$0xff]   ;;  %v19418_v27 = vld [vmem:[%s26927_s3 + $0x9a4] ss:$16 sps:$4 sm:$0xff]  }
 0x2b5   :  { %2898 = vmatprep.mubr.f32.mxu1 %v26947_v49  ;;  %15660 = vmatmul.mubr.msk.f32.gmra.mrb[26].mxu0 %vm2744_vm2, %v15658_v57 }
 0x2b6   :  { %15662 = vmatmul.mubr.msk.f32.gmra.mrb[26].mxu1 %vm2744_vm2, %v15658_v57  ;;  %2975 = vmatprep.mubr.f32.mxu0 %v26947_v49  ;;  %v19416_v57 = vld [vmem:[%s26927_s3 + $0x9a0] ss:$16 sps:$4 sm:$0xff]  }
 0x2b7   :  { %3052 = vmatprep.mubr.f32.mxu1 %v26947_v49  ;;  %3834 = vmatprep.subr.bf16.mxu0 %v19340_v58  ;;  %v19419_v58 = vld [vmem:[%s26927_s3 + $0x9a8] ss:$16 sps:$4 sm:$0xff]  }
 0x2b8   :  { %3916 = vmatprep.subr.bf16.mxu1 %v19343_v59  ;;  %v19424_v59 = vld [vmem:[%s26927_s3 + $0x9c4] ss:$16 sps:$4 sm:$0xff]  }
 0x2b9   :  { %15663 = vmatmul.mubr.msk.f32.vlgmr.msra.gmra.mrb[24].mxu0 %vm2744_vm2, %v1806_v61 }
 0x2ba   :  { %15665 = vmatmul.mubr.msk.f32.vlgmr.msra.gmra.mrb[24].mxu1 %vm2744_vm2, %v1806_v61  ;;  %3835 = vmatpush1.bf16.msra.mxu0 %v19338_v60  ;;  %v19427_v60 = vld [vmem:[%s26927_s3 + $0x9cc] ss:$16 sps:$4 sm:$0xff]   ;;  %v19422_v61 = vld [vmem:[%s26927_s3 + $0x9c0] ss:$16 sps:$4 sm:$0xff]  }
 0x2bb   :  { %3917 = vmatpush1.bf16.msra.mxu1 %v19341_v62  ;;  %2981 = vmatprep.mubr.f32.mxu0 %v26947_v49  ;;  %v19425_v62 = vld [vmem:[%s26927_s3 + $0x9c8] ss:$16 sps:$4 sm:$0xff]  }
 0x2bc   :  { %3058 = vmatprep.mubr.f32.mxu1 %v26947_v49  ;;  %3836 = vmatprep.subr.bf16.mxu0 %v19346_v63  ;;  %v19430_v63 = vld [vmem:[%s26927_s3 + $0x9e4] ss:$16 sps:$4 sm:$0xff]  }
 0x2bd   :  { %3918 = vmatprep.subr.bf16.mxu1 %v19349_v7  ;;  %15664 = vmatmul.mubr.msk.f32.gmra.mrb[26].mxu0 %vm2744_vm2, %v1807_v54  ;;  %v19433_v7 = vld [vmem:[%s26927_s3 + $0x9ec] ss:$16 sps:$4 sm:$0xff]  }
 0x2be   :  { %15666 = vmatmul.mubr.msk.f32.gmra.mrb[26].mxu1 %vm2744_vm2, %v1807_v54  ;;  %3837 = vmatpush1.bf16.msra.mxu0 %v19344_v32  ;;  %v19428_v32 = vld [vmem:[%s26927_s3 + $0x9e0] ss:$16 sps:$4 sm:$0xff]   ;;  %v19431_v54 = vld [vmem:[%s26927_s3 + $0x9e8] ss:$16 sps:$4 sm:$0xff]  }
 0x2bf   :  { %3919 = vmatpush1.bf16.msra.mxu1 %v19347_v0  ;;  %3866 = vmatprep.mubr.bf16.mxu0 %v21430_v39  ;;  %v19436_v0 = vld [vmem:[%s26927_s3 + $0xa04] ss:$16 sps:$4 sm:$0xff]  }
 0x2c0   :  { %3948 = vmatprep.mubr.bf16.mxu1 %v21430_v39  ;;  %3838 = vmatprep.subr.bf16.mxu0 %v19352_v2  ;;  %v19439_v2 = vld [vmem:[%s26927_s3 + $0xa0c] ss:$16 sps:$4 sm:$0xff]  }
 0x2c1   :  { %3920 = vmatprep.subr.bf16.mxu1 %v19355_v3  ;;  %v19434_v3 = vld [vmem:[%s26927_s3 + $0xa00] ss:$16 sps:$4 sm:$0xff]  }
 0x2c2   :  { %3839 = vmatpush1.bf16.msra.mxu0 %v19350_v4  ;;  %v19437_v4 = vld [vmem:[%s26927_s3 + $0xa08] ss:$16 sps:$4 sm:$0xff]  }
 0x2c3   :  { %3921 = vmatpush1.bf16.msra.mxu1 %v19353_v5  ;;  %3840 = vmatprep.subr.bf16.mxu0 %v19358_v9  ;;  %v19442_v5 = vld [vmem:[%s26927_s3 + $0xa24] ss:$16 sps:$4 sm:$0xff]   ;;  %v19445_v9 = vld [vmem:[%s26927_s3 + $0xa2c] ss:$16 sps:$4 sm:$0xff]  }
 0x2c4   :  { %3922 = vmatprep.subr.bf16.mxu1 %v19361_v14  ;;  %v19440_v14 = vld [vmem:[%s26927_s3 + $0xa20] ss:$16 sps:$4 sm:$0xff]  }
 0x2c6   :  { %3841 = vmatpush1.bf16.msra.mxu0 %v19356_v15  ;;  %v19443_v15 = vld [vmem:[%s26927_s3 + $0xa28] ss:$16 sps:$4 sm:$0xff]  }
 0x2c7   :  { %3923 = vmatpush1.bf16.msra.mxu1 %v19359_v16  ;;  %3842 = vmatprep.subr.bf16.mxu0 %v19364_v17  ;;  %v19448_v16 = vld [vmem:[%s26927_s3 + $0xa44] ss:$16 sps:$4 sm:$0xff]   ;;  %v19451_v17 = vld [vmem:[%s26927_s3 + $0xa4c] ss:$16 sps:$4 sm:$0xff]  }
 0x2c8   :  { %3924 = vmatprep.subr.bf16.mxu1 %v19367_v6  ;;  %v19446_v6 = vld [vmem:[%s26927_s3 + $0xa40] ss:$16 sps:$4 sm:$0xff]  }
 0x2ca   :  { %3843 = vmatpush1.bf16.msra.mxu0 %v19362_v18  ;;  %v19449_v18 = vld [vmem:[%s26927_s3 + $0xa48] ss:$16 sps:$4 sm:$0xff]  }
 0x2cb   :  { %3925 = vmatpush1.bf16.msra.mxu1 %v19365_v19  ;;  %3844 = vmatprep.subr.bf16.mxu0 %v19370_v20  ;;  %v19454_v19 = vld [vmem:[%s26927_s3 + $0xa64] ss:$16 sps:$4 sm:$0xff]   ;;  %v19457_v20 = vld [vmem:[%s26927_s3 + $0xa6c] ss:$16 sps:$4 sm:$0xff]  }
 0x2cc   :  { %3926 = vmatprep.subr.bf16.mxu1 %v19373_v21  ;;  %v19452_v21 = vld [vmem:[%s26927_s3 + $0xa60] ss:$16 sps:$4 sm:$0xff]  }
 0x2ce   :  { %3845 = vmatpush1.bf16.msra.mxu0 %v19368_v22  ;;  %v19455_v22 = vld [vmem:[%s26927_s3 + $0xa68] ss:$16 sps:$4 sm:$0xff]  }
 0x2cf   :  { %3927 = vmatpush1.bf16.msra.mxu1 %v19371_v1  ;;  %3846 = vmatprep.subr.bf16.mxu0 %v19376_v11  ;;  %v19460_v1 = vld [vmem:[%s26927_s3 + $0xa84] ss:$16 sps:$4 sm:$0xff]   ;;  %v19463_v11 = vld [vmem:[%s26927_s3 + $0xa8c] ss:$16 sps:$4 sm:$0xff]  }
 0x2d0   :  { %3928 = vmatprep.subr.bf16.mxu1 %v19379_v24  ;;  %v19458_v24 = vld [vmem:[%s26927_s3 + $0xa80] ss:$16 sps:$4 sm:$0xff]  }
 0x2d2   :  { %3847 = vmatpush1.bf16.msra.mxu0 %v19374_v28  ;;  %v19461_v28 = vld [vmem:[%s26927_s3 + $0xa88] ss:$16 sps:$4 sm:$0xff]  }
 0x2d3   :  { %3929 = vmatpush1.bf16.msra.mxu1 %v19377_v29  ;;  %3848 = vmatprep.subr.bf16.mxu0 %v19382_v30  ;;  %v19466_v29 = vld [vmem:[%s26927_s3 + $0xaa4] ss:$16 sps:$4 sm:$0xff]   ;;  %v19469_v30 = vld [vmem:[%s26927_s3 + $0xaac] ss:$16 sps:$4 sm:$0xff]  }
 0x2d4   :  { %3930 = vmatprep.subr.bf16.mxu1 %v19385_v31  ;;  %v19464_v31 = vld [vmem:[%s26927_s3 + $0xaa0] ss:$16 sps:$4 sm:$0xff]  }
 0x2d6   :  { %3849 = vmatpush1.bf16.msra.mxu0 %v19380_v33  ;;  %v19467_v33 = vld [vmem:[%s26927_s3 + $0xaa8] ss:$16 sps:$4 sm:$0xff]  }
 0x2d7   :  { %3931 = vmatpush1.bf16.msra.mxu1 %v19383_v35  ;;  %3850 = vmatprep.subr.bf16.mxu0 %v19388_v36  ;;  %v19472_v35 = vld [vmem:[%s26927_s3 + $0xac4] ss:$16 sps:$4 sm:$0xff]   ;;  %v19475_v36 = vld [vmem:[%s26927_s3 + $0xacc] ss:$16 sps:$4 sm:$0xff]  }
 0x2d8   :  { %3932 = vmatprep.subr.bf16.mxu1 %v19391_v37  ;;  %v19470_v37 = vld [vmem:[%s26927_s3 + $0xac0] ss:$16 sps:$4 sm:$0xff]  }
 0x2da   :  { %3851 = vmatpush1.bf16.msra.mxu0 %v19386_v38  ;;  %v19473_v38 = vld [vmem:[%s26927_s3 + $0xac8] ss:$16 sps:$4 sm:$0xff]  }
 0x2db   :  { %3933 = vmatpush1.bf16.msra.mxu1 %v19389_v13  ;;  %3852 = vmatprep.subr.bf16.mxu0 %v19394_v40  ;;  %v19478_v13 = vld [vmem:[%s26927_s3 + $0xae4] ss:$16 sps:$4 sm:$0xff]   ;;  %v19481_v40 = vld [vmem:[%s26927_s3 + $0xaec] ss:$16 sps:$4 sm:$0xff]  }
 0x2dc   :  { %3934 = vmatprep.subr.bf16.mxu1 %v19397_v41  ;;  %v19476_v41 = vld [vmem:[%s26927_s3 + $0xae0] ss:$16 sps:$4 sm:$0xff]  }
 0x2de   :  { %3853 = vmatpush1.bf16.msra.mxu0 %v19392_v42  ;;  %v19479_v42 = vld [vmem:[%s26927_s3 + $0xae8] ss:$16 sps:$4 sm:$0xff]  }
 0x2df   :  { %3935 = vmatpush1.bf16.msra.mxu1 %v19395_v43  ;;  %3854 = vmatprep.subr.bf16.mxu0 %v19400_v44  ;;  %v19484_v43 = vld [vmem:[%s26927_s3 + $0xb04] ss:$16 sps:$4 sm:$0xff]   ;;  %v19487_v44 = vld [vmem:[%s26927_s3 + $0xb0c] ss:$16 sps:$4 sm:$0xff]  }
 0x2e0   :  { %3936 = vmatprep.subr.bf16.mxu1 %v19403_v45  ;;  %v19482_v45 = vld [vmem:[%s26927_s3 + $0xb00] ss:$16 sps:$4 sm:$0xff]  }
 0x2e2   :  { %3855 = vmatpush1.bf16.msra.mxu0 %v19398_v46  ;;  %v19485_v46 = vld [vmem:[%s26927_s3 + $0xb08] ss:$16 sps:$4 sm:$0xff]  }
 0x2e3   :  { %3937 = vmatpush1.bf16.msra.mxu1 %v19401_v47  ;;  %3856 = vmatprep.subr.bf16.mxu0 %v19406_v48  ;;  %v19490_v47 = vld [vmem:[%s26927_s3 + $0xb24] ss:$16 sps:$4 sm:$0xff]   ;;  %v19493_v48 = vld [vmem:[%s26927_s3 + $0xb2c] ss:$16 sps:$4 sm:$0xff]  }
 0x2e4   :  { %3938 = vmatprep.subr.bf16.mxu1 %v19409_v50  ;;  %v19488_v50 = vld [vmem:[%s26927_s3 + $0xb20] ss:$16 sps:$4 sm:$0xff]  }
 0x2e6   :  { %3857 = vmatpush1.bf16.msra.mxu0 %v19404_v25  ;;  %v19491_v25 = vld [vmem:[%s26927_s3 + $0xb28] ss:$16 sps:$4 sm:$0xff]  }
 0x2e7   :  { %3939 = vmatpush1.bf16.msra.mxu1 %v19407_v51  ;;  %3858 = vmatprep.subr.bf16.mxu0 %v19412_v52  ;;  %v19496_v51 = vld [vmem:[%s26927_s3 + $0xb44] ss:$16 sps:$4 sm:$0xff]   ;;  %v19499_v52 = vld [vmem:[%s26927_s3 + $0xb4c] ss:$16 sps:$4 sm:$0xff]  }
 0x2e8   :  { %3940 = vmatprep.subr.bf16.mxu1 %v19415_v26  ;;  %v19494_v26 = vld [vmem:[%s26927_s3 + $0xb40] ss:$16 sps:$4 sm:$0xff]  }
 0x2ea   :  { %3859 = vmatpush1.bf16.msra.mxu0 %v19410_v53  ;;  %v19497_v53 = vld [vmem:[%s26927_s3 + $0xb48] ss:$16 sps:$4 sm:$0xff]  }
 0x2eb   :  { %3941 = vmatpush1.bf16.msra.mxu1 %v19413_v55  ;;  %3860 = vmatprep.subr.bf16.mxu0 %v19418_v27  ;;  %v19502_v55 = vld [vmem:[%s26927_s3 + $0xb64] ss:$16 sps:$4 sm:$0xff]   ;;  %v19505_v27 = vld [vmem:[%s26927_s3 + $0xb6c] ss:$16 sps:$4 sm:$0xff]  }
 0x2ec   :  { %3942 = vmatprep.subr.bf16.mxu1 %v19421_v56  ;;  %v19500_v56 = vld [vmem:[%s26927_s3 + $0xb60] ss:$16 sps:$4 sm:$0xff]  }
 0x2ee   :  { %3861 = vmatpush1.bf16.msra.mxu0 %v19416_v57  ;;  %v19503_v57 = vld [vmem:[%s26927_s3 + $0xb68] ss:$16 sps:$4 sm:$0xff]  }
 0x2ef   :  { %3943 = vmatpush1.bf16.msra.mxu1 %v19419_v58  ;;  %3862 = vmatprep.subr.bf16.mxu0 %v19424_v59  ;;  %v19508_v58 = vld [vmem:[%s26927_s3 + $0xb84] ss:$16 sps:$4 sm:$0xff]   ;;  %v19511_v59 = vld [vmem:[%s26927_s3 + $0xb8c] ss:$16 sps:$4 sm:$0xff]  }
 0x2f0   :  { %3944 = vmatprep.subr.bf16.mxu1 %v19427_v60  ;;  %v19506_v60 = vld [vmem:[%s26927_s3 + $0xb80] ss:$16 sps:$4 sm:$0xff]  }
 0x2f2   :  { %3863 = vmatpush1.bf16.msra.mxu0 %v19422_v61  ;;  %v19509_v61 = vld [vmem:[%s26927_s3 + $0xb88] ss:$16 sps:$4 sm:$0xff]  }
 0x2f3   :  { %3945 = vmatpush1.bf16.msra.mxu1 %v19425_v62  ;;  %3864 = vmatprep.subr.bf16.mxu0 %v19430_v63  ;;  %v19514_v62 = vld [vmem:[%s26927_s3 + $0xba4] ss:$16 sps:$4 sm:$0xff]   ;;  %v19517_v63 = vld [vmem:[%s26927_s3 + $0xbac] ss:$16 sps:$4 sm:$0xff]  }
 0x2f4   :  { %3946 = vmatprep.subr.bf16.mxu1 %v19433_v7  ;;  %v19512_v7 = vld [vmem:[%s26927_s3 + $0xba0] ss:$16 sps:$4 sm:$0xff]  }
 0x2f6   :  { %3865 = vmatpush1.bf16.msra.mxu0 %v19428_v32  ;;  %v19515_v32 = vld [vmem:[%s26927_s3 + $0xba8] ss:$16 sps:$4 sm:$0xff]  }
 0x2f7   :  { %3947 = vmatpush1.bf16.msra.mxu1 %v19431_v54  ;;  %3875 = vmatprep.subr.bf16.mxu0 %v19436_v0  ;;  %v19520_v54 = vld [vmem:[%s26927_s3 + $0xbc4] ss:$16 sps:$4 sm:$0xff]   ;;  %v19523_v0 = vld [vmem:[%s26927_s3 + $0xbcc] ss:$16 sps:$4 sm:$0xff]  }
 0x2f8   :  { %3957 = vmatprep.subr.bf16.mxu1 %v19439_v2  ;;  %v19518_v2 = vld [vmem:[%s26927_s3 + $0xbc0] ss:$16 sps:$4 sm:$0xff]  }
 0x2f9   :  { %3867 = vmatmul.mubr.bf16.vlgmr.msra.gmra.mrb[28].mxu0 %v21428_v23 }
 0x2fa   :  { %3949 = vmatmul.mubr.bf16.vlgmr.msra.gmra.mrb[28].mxu1 %v21428_v23  ;;  %3876 = vmatpush1.bf16.msra.mxu0 %v19434_v3  ;;  %v19521_v3 = vld [vmem:[%s26927_s3 + $0xbc8] ss:$16 sps:$4 sm:$0xff]  }
 0x2fb   :  { %3907 = vmatprep.mubr.bf16.mxu0 %v21446_v12  ;;  %3958 = vmatpush1.bf16.msra.mxu1 %v19437_v4  ;;  %v19526_v4 = vld [vmem:[%s26927_s3 + $0xbe4] ss:$16 sps:$4 sm:$0xff]  }
 0x2fc   :  { %3989 = vmatprep.mubr.bf16.mxu1 %v21446_v12  ;;  %3877 = vmatprep.subr.bf16.mxu0 %v19442_v5  ;;  %v19529_v5 = vld [vmem:[%s26927_s3 + $0xbec] ss:$16 sps:$4 sm:$0xff]  }
 0x2fd   :  { %3959 = vmatprep.subr.bf16.mxu1 %v19445_v9  ;;  %v19524_v9 = vld [vmem:[%s26927_s3 + $0xbe0] ss:$16 sps:$4 sm:$0xff]  }
 0x2fe   :  { %3878 = vmatpush1.bf16.msra.mxu0 %v19440_v14  ;;  %v19527_v14 = vld [vmem:[%s26927_s3 + $0xbe8] ss:$16 sps:$4 sm:$0xff]  }
 0x2ff   :  { %3960 = vmatpush1.bf16.msra.mxu1 %v19443_v15  ;;  %3879 = vmatprep.subr.bf16.mxu0 %v19448_v16 }
 0x300   :  { %3961 = vmatprep.subr.bf16.mxu1 %v19451_v17 }
 0x302   :  { %3880 = vmatpush1.bf16.msra.mxu0 %v19446_v6  ;;  %v15923_v6 = vld [vmem:[%s26928_s4 + $0x20] sm:$0xff] }
 0x303   :  { %3962 = vmatpush1.bf16.msra.mxu1 %v19449_v18  ;;  %3881 = vmatprep.subr.bf16.mxu0 %v19454_v19  ;;  %v19532_v18 = vld [vmem:[%s26927_s3 + $0xc04] ss:$16 sps:$4 sm:$0xff]  }
 0x304   :  { %3963 = vmatprep.subr.bf16.mxu1 %v19457_v20 }
 0x306   :  { %3882 = vmatpush1.bf16.msra.mxu0 %v19452_v21  ;;  %v19530_v21 = vld [vmem:[%s26927_s3 + $0xc00] ss:$16 sps:$4 sm:$0xff]  }
 0x307   :  { %3964 = vmatpush1.bf16.msra.mxu1 %v19455_v22  ;;  %3883 = vmatprep.subr.bf16.mxu0 %v19460_v1  ;;  %v19535_v22 = vld [vmem:[%s26927_s3 + $0xc0c] ss:$16 sps:$4 sm:$0xff]  }
 0x308   :  { %3965 = vmatprep.subr.bf16.mxu1 %v19463_v11 }
 0x30a   :  { %3884 = vmatpush1.bf16.msra.mxu0 %v19458_v24  ;;  %v19533_v24 = vld [vmem:[%s26927_s3 + $0xc08] ss:$16 sps:$4 sm:$0xff]  }
 0x30b   :  { %3966 = vmatpush1.bf16.msra.mxu1 %v19461_v28  ;;  %3885 = vmatprep.subr.bf16.mxu0 %v19466_v29  ;;  %v15924_v29 = vld [vmem:[%s26928_s4 + $0x28] sm:$0x3f] }
 0x30c   :  { %3967 = vmatprep.subr.bf16.mxu1 %v19469_v30  ;;  %v19538_v30 = vld [vmem:[%s26927_s3 + $0xc24] ss:$16 sps:$4 sm:$0xff]  }
 0x30e   :  { %3886 = vmatpush1.bf16.msra.mxu0 %v19464_v31  ;;  %v19536_v31 = vld [vmem:[%s26927_s3 + $0xc20] ss:$16 sps:$4 sm:$0xff]  }
 0x30f   :  { %3968 = vmatpush1.bf16.msra.mxu1 %v19467_v33  ;;  %3887 = vmatprep.subr.bf16.mxu0 %v19472_v35  ;;  %v19541_v33 = vld [vmem:[%s26927_s3 + $0xc2c] ss:$16 sps:$4 sm:$0xff]   ;;  %v19539_v35 = vld [vmem:[%s26927_s3 + $0xc28] ss:$16 sps:$4 sm:$0xff]  }
 0x310   :  { %3969 = vmatprep.subr.bf16.mxu1 %v19475_v36  ;;  %v19544_v36 = vld [vmem:[%s26927_s3 + $0xc44] ss:$16 sps:$4 sm:$0xff]  }
 0x312   :  { %3888 = vmatpush1.bf16.msra.mxu0 %v19470_v37  ;;  %v19547_v37 = vld [vmem:[%s26927_s3 + $0xc4c] ss:$16 sps:$4 sm:$0xff]  }
 0x313   :  { %3970 = vmatpush1.bf16.msra.mxu1 %v19473_v38  ;;  %3889 = vmatprep.subr.bf16.mxu0 %v19478_v13  ;;  %v19542_v38 = vld [vmem:[%s26927_s3 + $0xc40] ss:$16 sps:$4 sm:$0xff]   ;;  %v19545_v13 = vld [vmem:[%s26927_s3 + $0xc48] ss:$16 sps:$4 sm:$0xff]  }
 0x314   :  { %3971 = vmatprep.subr.bf16.mxu1 %v19481_v40  ;;  %v19550_v40 = vld [vmem:[%s26927_s3 + $0xc64] ss:$16 sps:$4 sm:$0xff]  }
 0x316   :  { %3890 = vmatpush1.bf16.msra.mxu0 %v19476_v41  ;;  %v19553_v41 = vld [vmem:[%s26927_s3 + $0xc6c] ss:$16 sps:$4 sm:$0xff]  }
 0x317   :  { %3972 = vmatpush1.bf16.msra.mxu1 %v19479_v42  ;;  %3891 = vmatprep.subr.bf16.mxu0 %v19484_v43  ;;  %v19548_v42 = vld [vmem:[%s26927_s3 + $0xc60] ss:$16 sps:$4 sm:$0xff]   ;;  %v19551_v43 = vld [vmem:[%s26927_s3 + $0xc68] ss:$16 sps:$4 sm:$0xff]  }
 0x318   :  { %3973 = vmatprep.subr.bf16.mxu1 %v19487_v44  ;;  %v19556_v44 = vld [vmem:[%s26927_s3 + $0xc84] ss:$16 sps:$4 sm:$0xff]  }
 0x31a   :  { %3892 = vmatpush1.bf16.msra.mxu0 %v19482_v45  ;;  %v19559_v45 = vld [vmem:[%s26927_s3 + $0xc8c] ss:$16 sps:$4 sm:$0xff]  }
 0x31b   :  { %3974 = vmatpush1.bf16.msra.mxu1 %v19485_v46  ;;  %3893 = vmatprep.subr.bf16.mxu0 %v19490_v47  ;;  %v19554_v46 = vld [vmem:[%s26927_s3 + $0xc80] ss:$16 sps:$4 sm:$0xff]   ;;  %v19557_v47 = vld [vmem:[%s26927_s3 + $0xc88] ss:$16 sps:$4 sm:$0xff]  }
 0x31c   :  { %3975 = vmatprep.subr.bf16.mxu1 %v19493_v48  ;;  %v19562_v48 = vld [vmem:[%s26927_s3 + $0xca4] ss:$16 sps:$4 sm:$0xff]  }
 0x31e   :  { %3894 = vmatpush1.bf16.msra.mxu0 %v19488_v50  ;;  %v19565_v50 = vld [vmem:[%s26927_s3 + $0xcac] ss:$16 sps:$4 sm:$0xff]  }
 0x31f   :  { %3976 = vmatpush1.bf16.msra.mxu1 %v19491_v25  ;;  %3895 = vmatprep.subr.bf16.mxu0 %v19496_v51  ;;  %v19560_v25 = vld [vmem:[%s26927_s3 + $0xca0] ss:$16 sps:$4 sm:$0xff]   ;;  %v19563_v51 = vld [vmem:[%s26927_s3 + $0xca8] ss:$16 sps:$4 sm:$0xff]  }
 0x320   :  { %3977 = vmatprep.subr.bf16.mxu1 %v19499_v52  ;;  %v19568_v52 = vld [vmem:[%s26927_s3 + $0xcc4] ss:$16 sps:$4 sm:$0xff]  }
 0x322   :  { %3896 = vmatpush1.bf16.msra.mxu0 %v19494_v26  ;;  %v19571_v26 = vld [vmem:[%s26927_s3 + $0xccc] ss:$16 sps:$4 sm:$0xff]  }
 0x323   :  { %3978 = vmatpush1.bf16.msra.mxu1 %v19497_v53  ;;  %3897 = vmatprep.subr.bf16.mxu0 %v19502_v55  ;;  %v19566_v53 = vld [vmem:[%s26927_s3 + $0xcc0] ss:$16 sps:$4 sm:$0xff]   ;;  %v19569_v55 = vld [vmem:[%s26927_s3 + $0xcc8] ss:$16 sps:$4 sm:$0xff]  }
 0x324   :  { %3979 = vmatprep.subr.bf16.mxu1 %v19505_v27  ;;  %v19574_v27 = vld [vmem:[%s26927_s3 + $0xce4] ss:$16 sps:$4 sm:$0xff]  }
 0x326   :  { %3898 = vmatpush1.bf16.msra.mxu0 %v19500_v56  ;;  %v19577_v56 = vld [vmem:[%s26927_s3 + $0xcec] ss:$16 sps:$4 sm:$0xff]  }
 0x327   :  { %3980 = vmatpush1.bf16.msra.mxu1 %v19503_v57  ;;  %3899 = vmatprep.subr.bf16.mxu0 %v19508_v58  ;;  %v19572_v57 = vld [vmem:[%s26927_s3 + $0xce0] ss:$16 sps:$4 sm:$0xff]   ;;  %v19575_v58 = vld [vmem:[%s26927_s3 + $0xce8] ss:$16 sps:$4 sm:$0xff]  }
 0x328   :  { %3981 = vmatprep.subr.bf16.mxu1 %v19511_v59  ;;  %v19580_v59 = vld [vmem:[%s26927_s3 + $0xd04] ss:$16 sps:$4 sm:$0xff]  }
 0x32a   :  { %3900 = vmatpush1.bf16.msra.mxu0 %v19506_v60  ;;  %v19583_v60 = vld [vmem:[%s26927_s3 + $0xd0c] ss:$16 sps:$4 sm:$0xff]  }
 0x32b   :  { %3982 = vmatpush1.bf16.msra.mxu1 %v19509_v61  ;;  %3901 = vmatprep.subr.bf16.mxu0 %v19514_v62  ;;  %v19578_v61 = vld [vmem:[%s26927_s3 + $0xd00] ss:$16 sps:$4 sm:$0xff]   ;;  %v19581_v62 = vld [vmem:[%s26927_s3 + $0xd08] ss:$16 sps:$4 sm:$0xff]  }
 0x32c   :  { %3983 = vmatprep.subr.bf16.mxu1 %v19517_v63  ;;  %v19586_v63 = vld [vmem:[%s26927_s3 + $0xd24] ss:$16 sps:$4 sm:$0xff]  }
 0x32e   :  { %3902 = vmatpush1.bf16.msra.mxu0 %v19512_v7  ;;  %v19589_v7 = vld [vmem:[%s26927_s3 + $0xd2c] ss:$16 sps:$4 sm:$0xff]  }
 0x32f   :  { %3984 = vmatpush1.bf16.msra.mxu1 %v19515_v32  ;;  %3903 = vmatprep.subr.bf16.mxu0 %v19520_v54  ;;  %v19584_v32 = vld [vmem:[%s26927_s3 + $0xd20] ss:$16 sps:$4 sm:$0xff]   ;;  %v19587_v54 = vld [vmem:[%s26927_s3 + $0xd28] ss:$16 sps:$4 sm:$0xff]  }
 0x330   :  { %3985 = vmatprep.subr.bf16.mxu1 %v19523_v0  ;;  %v19592_v0 = vld [vmem:[%s26927_s3 + $0xd44] ss:$16 sps:$4 sm:$0xff]  }
 0x332   :  { %3904 = vmatpush1.bf16.msra.mxu0 %v19518_v2  ;;  %v19595_v2 = vld [vmem:[%s26927_s3 + $0xd4c] ss:$16 sps:$4 sm:$0xff]  }
 0x333   :  { %3986 = vmatpush1.bf16.msra.mxu1 %v19521_v3  ;;  %3905 = vmatprep.subr.bf16.mxu0 %v19526_v4  ;;  %v19590_v3 = vld [vmem:[%s26927_s3 + $0xd40] ss:$16 sps:$4 sm:$0xff]   ;;  %v19593_v4 = vld [vmem:[%s26927_s3 + $0xd48] ss:$16 sps:$4 sm:$0xff]  }
 0x334   :  { %3987 = vmatprep.subr.bf16.mxu1 %v19529_v5  ;;  %v19598_v5 = vld [vmem:[%s26927_s3 + $0xd64] ss:$16 sps:$4 sm:$0xff]  }
 0x336   :  { %3906 = vmatpush1.bf16.msra.mxu0 %v19524_v9  ;;  %v19601_v9 = vld [vmem:[%s26927_s3 + $0xd6c] ss:$16 sps:$4 sm:$0xff]  }
 0x337   :  { %3988 = vmatpush1.bf16.msra.mxu1 %v19527_v14  ;;  %v19596_v14 = vld [vmem:[%s26927_s3 + $0xd60] ss:$16 sps:$4 sm:$0xff]  }
 0x339   :  { %3908 = vmatmul.mubr.bf16.vlgmr.msra.gmra.mrb[28].mxu0 %v21638_v34 }
 0x33a   :  { %3990 = vmatmul.mubr.bf16.vlgmr.msra.gmra.mrb[28].mxu1 %v21638_v34  ;;  %4071 = vmatprep.mubr.f32.mxu0 %v26947_v49 }
 0x33b   :  { %4148 = vmatprep.mubr.f32.mxu1 %v26947_v49 }
 0x40c   :  { %v3909_v15 = vpop.f32.mrb[28].mxu0 }
 0x40d   :  { %v3991_v16 = vpop.f32.mrb[28].mxu1  ;;  %v3911_v17 = vpop.f32.mrb[29].mxu0 }
 0x40e   :  { %v3993_v19 = vpop.f32.mrb[29].mxu1  ;;  %v3913_v20 = vpop.f32.mrb[30].mxu0  ;;  %4007 = vmatprep.subr.mxu0 %v3911_v17  ;;  %v19607_v17 = vld [vmem:[%s26927_s3 + $0xd8c] ss:$16 sps:$4 sm:$0xff]  }
 0x40f   :  { %v3995_v1 = vpop.f32.mrb[30].mxu1  ;;  %4084 = vmatprep.subr.mxu1 %v3993_v19  ;;  %v3914_v11 = vpop.f32.mrb[31].mxu0  ;;  %4008 = vmatpush1.msra.mxu0 %v3909_v15  ;;  %v19599_v15 = vld [vmem:[%s26927_s3 + $0xd68] ss:$16 sps:$4 sm:$0xff]   ;;  %v19610_v19 = vld [vmem:[%s26927_s3 + $0xda4] ss:$16 sps:$4 sm:$0xff]  }
 0x410   :  { %v3996_v28 = vpop.f32.mrb[31].mxu1  ;;  %4085 = vmatpush1.msra.mxu1 %v3991_v16  ;;  %15925 = vmatmul.mubr.msk.f32.vlgmr.msra.gmra.mrb[24].mxu0 %vm2744_vm2, %v15923_v6  ;;  %v19604_v16 = vld [vmem:[%s26927_s3 + $0xd84] ss:$16 sps:$4 sm:$0xff]   ;;  %v19613_v20 = vld [vmem:[%s26927_s3 + $0xdac] ss:$16 sps:$4 sm:$0xff]  }
 0x411   :  { %15927 = vmatmul.mubr.msk.f32.vlgmr.msra.gmra.mrb[24].mxu1 %vm2744_vm2, %v15923_v6  ;;  %4938 = vmatprep.subr.bf16.mxu0 %v19532_v18  ;;  %v19602_v6 = vld [vmem:[%s26927_s3 + $0xd80] ss:$16 sps:$4 sm:$0xff]   ;;  %v19605_v18 = vld [vmem:[%s26927_s3 + $0xd88] ss:$16 sps:$4 sm:$0xff]   ;;  %v19616_v1 = vld [vmem:[%s26927_s3 + $0xdc4] ss:$16 sps:$4 sm:$0xff]  }
 0x412   :  { %5020 = vmatprep.subr.bf16.mxu1 %v19535_v22  ;;  %4939 = vmatpush1.bf16.msra.mxu0 %v19530_v21  ;;  %v19608_v21 = vld [vmem:[%s26927_s3 + $0xda0] ss:$16 sps:$4 sm:$0xff]   ;;  %v19611_v22 = vld [vmem:[%s26927_s3 + $0xda8] ss:$16 sps:$4 sm:$0xff]   ;;  %v19619_v11 = vld [vmem:[%s26927_s3 + $0xdcc] ss:$16 sps:$4 sm:$0xff]  }
 0x413   :  { %5021 = vmatpush1.bf16.msra.mxu1 %v19533_v24  ;;  %4077 = vmatprep.mubr.f32.mxu0 %v26947_v49  ;;  %v19614_v24 = vld [vmem:[%s26927_s3 + $0xdc0] ss:$16 sps:$4 sm:$0xff]   ;;  %v19617_v28 = vld [vmem:[%s26927_s3 + $0xdc8] ss:$16 sps:$4 sm:$0xff]  }
 0x414   :  { %4154 = vmatprep.mubr.f32.mxu1 %v26947_v49  ;;  %15926 = vmatmul.mubr.msk.f32.gmra.mrb[26].mxu0 %vm2744_vm2, %v15924_v29 }
 0x415   :  { %15928 = vmatmul.mubr.msk.f32.gmra.mrb[26].mxu1 %vm2744_vm2, %v15924_v29  ;;  %4940 = vmatprep.subr.bf16.mxu0 %v19538_v30  ;;  %v19622_v29 = vld [vmem:[%s26927_s3 + $0xde4] ss:$16 sps:$4 sm:$0xff]   ;;  %v19625_v30 = vld [vmem:[%s26927_s3 + $0xdec] ss:$16 sps:$4 sm:$0xff]  }
 0x416   :  { %5022 = vmatprep.subr.bf16.mxu1 %v19541_v33  ;;  %4941 = vmatpush1.bf16.msra.mxu0 %v19536_v31  ;;  %v19620_v31 = vld [vmem:[%s26927_s3 + $0xde0] ss:$16 sps:$4 sm:$0xff]   ;;  %v19623_v33 = vld [vmem:[%s26927_s3 + $0xde8] ss:$16 sps:$4 sm:$0xff]  }
 0x417   :  { %4970 = vmatprep.mubr.bf16.mxu0 %v21430_v39  ;;  %5023 = vmatpush1.bf16.msra.mxu1 %v19539_v35  ;;  %v19628_v35 = vld [vmem:[%s26927_s3 + $0xe04] ss:$16 sps:$4 sm:$0xff]  }
 0x418   :  { %5052 = vmatprep.mubr.bf16.mxu1 %v21430_v39  ;;  %4942 = vmatprep.subr.bf16.mxu0 %v19544_v36  ;;  %v19631_v36 = vld [vmem:[%s26927_s3 + $0xe0c] ss:$16 sps:$4 sm:$0xff]  }
 0x419   :  { %5024 = vmatprep.subr.bf16.mxu1 %v19547_v37  ;;  %v19626_v37 = vld [vmem:[%s26927_s3 + $0xe00] ss:$16 sps:$4 sm:$0xff]  }
 0x41a   :  { %4943 = vmatpush1.bf16.msra.mxu0 %v19542_v38  ;;  %v19629_v38 = vld [vmem:[%s26927_s3 + $0xe08] ss:$16 sps:$4 sm:$0xff]  }
 0x41b   :  { %5025 = vmatpush1.bf16.msra.mxu1 %v19545_v13  ;;  %4944 = vmatprep.subr.bf16.mxu0 %v19550_v40  ;;  %v19634_v13 = vld [vmem:[%s26927_s3 + $0xe24] ss:$16 sps:$4 sm:$0xff]   ;;  %v19637_v40 = vld [vmem:[%s26927_s3 + $0xe2c] ss:$16 sps:$4 sm:$0xff]  }
 0x41c   :  { %5026 = vmatprep.subr.bf16.mxu1 %v19553_v41  ;;  %v19632_v41 = vld [vmem:[%s26927_s3 + $0xe20] ss:$16 sps:$4 sm:$0xff]  }
 0x41e   :  { %4945 = vmatpush1.bf16.msra.mxu0 %v19548_v42  ;;  %v19635_v42 = vld [vmem:[%s26927_s3 + $0xe28] ss:$16 sps:$4 sm:$0xff]  }
 0x41f   :  { %5027 = vmatpush1.bf16.msra.mxu1 %v19551_v43  ;;  %4946 = vmatprep.subr.bf16.mxu0 %v19556_v44  ;;  %v19640_v43 = vld [vmem:[%s26927_s3 + $0xe44] ss:$16 sps:$4 sm:$0xff]   ;;  %v19643_v44 = vld [vmem:[%s26927_s3 + $0xe4c] ss:$16 sps:$4 sm:$0xff]  }
 0x420   :  { %5028 = vmatprep.subr.bf16.mxu1 %v19559_v45  ;;  %v19638_v45 = vld [vmem:[%s26927_s3 + $0xe40] ss:$16 sps:$4 sm:$0xff]  }
 0x422   :  { %4947 = vmatpush1.bf16.msra.mxu0 %v19554_v46  ;;  %v19641_v46 = vld [vmem:[%s26927_s3 + $0xe48] ss:$16 sps:$4 sm:$0xff]  }
 0x423   :  { %5029 = vmatpush1.bf16.msra.mxu1 %v19557_v47  ;;  %4948 = vmatprep.subr.bf16.mxu0 %v19562_v48  ;;  %v19646_v47 = vld [vmem:[%s26927_s3 + $0xe64] ss:$16 sps:$4 sm:$0xff]   ;;  %v19649_v48 = vld [vmem:[%s26927_s3 + $0xe6c] ss:$16 sps:$4 sm:$0xff]  }
 0x424   :  { %5030 = vmatprep.subr.bf16.mxu1 %v19565_v50  ;;  %v19644_v50 = vld [vmem:[%s26927_s3 + $0xe60] ss:$16 sps:$4 sm:$0xff]  }
 0x426   :  { %4949 = vmatpush1.bf16.msra.mxu0 %v19560_v25  ;;  %v19647_v25 = vld [vmem:[%s26927_s3 + $0xe68] ss:$16 sps:$4 sm:$0xff]  }
 0x427   :  { %5031 = vmatpush1.bf16.msra.mxu1 %v19563_v51  ;;  %4950 = vmatprep.subr.bf16.mxu0 %v19568_v52  ;;  %v19652_v51 = vld [vmem:[%s26927_s3 + $0xe84] ss:$16 sps:$4 sm:$0xff]   ;;  %v19655_v52 = vld [vmem:[%s26927_s3 + $0xe8c] ss:$16 sps:$4 sm:$0xff]  }
 0x428   :  { %5032 = vmatprep.subr.bf16.mxu1 %v19571_v26  ;;  %v19650_v26 = vld [vmem:[%s26927_s3 + $0xe80] ss:$16 sps:$4 sm:$0xff]  }
 0x42a   :  { %4951 = vmatpush1.bf16.msra.mxu0 %v19566_v53  ;;  %v19653_v53 = vld [vmem:[%s26927_s3 + $0xe88] ss:$16 sps:$4 sm:$0xff]  }
 0x42b   :  { %5033 = vmatpush1.bf16.msra.mxu1 %v19569_v55  ;;  %4952 = vmatprep.subr.bf16.mxu0 %v19574_v27  ;;  %v19658_v55 = vld [vmem:[%s26927_s3 + $0xea4] ss:$16 sps:$4 sm:$0xff]   ;;  %v19661_v27 = vld [vmem:[%s26927_s3 + $0xeac] ss:$16 sps:$4 sm:$0xff]  }
 0x42c   :  { %5034 = vmatprep.subr.bf16.mxu1 %v19577_v56  ;;  %v19656_v56 = vld [vmem:[%s26927_s3 + $0xea0] ss:$16 sps:$4 sm:$0xff]  }
 0x42e   :  { %4953 = vmatpush1.bf16.msra.mxu0 %v19572_v57  ;;  %v19659_v57 = vld [vmem:[%s26927_s3 + $0xea8] ss:$16 sps:$4 sm:$0xff]  }
 0x42f   :  { %5035 = vmatpush1.bf16.msra.mxu1 %v19575_v58  ;;  %4954 = vmatprep.subr.bf16.mxu0 %v19580_v59  ;;  %v19664_v58 = vld [vmem:[%s26927_s3 + $0xec4] ss:$16 sps:$4 sm:$0xff]   ;;  %v19667_v59 = vld [vmem:[%s26927_s3 + $0xecc] ss:$16 sps:$4 sm:$0xff]  }
 0x430   :  { %5036 = vmatprep.subr.bf16.mxu1 %v19583_v60  ;;  %v19662_v60 = vld [vmem:[%s26927_s3 + $0xec0] ss:$16 sps:$4 sm:$0xff]  }
 0x432   :  { %4955 = vmatpush1.bf16.msra.mxu0 %v19578_v61  ;;  %v19665_v61 = vld [vmem:[%s26927_s3 + $0xec8] ss:$16 sps:$4 sm:$0xff]  }
 0x433   :  { %5037 = vmatpush1.bf16.msra.mxu1 %v19581_v62  ;;  %4956 = vmatprep.subr.bf16.mxu0 %v19586_v63  ;;  %v19670_v62 = vld [vmem:[%s26927_s3 + $0xee4] ss:$16 sps:$4 sm:$0xff]   ;;  %v19673_v63 = vld [vmem:[%s26927_s3 + $0xeec] ss:$16 sps:$4 sm:$0xff]  }
 0x434   :  { %5038 = vmatprep.subr.bf16.mxu1 %v19589_v7  ;;  %v19668_v7 = vld [vmem:[%s26927_s3 + $0xee0] ss:$16 sps:$4 sm:$0xff]  }
 0x436   :  { %4957 = vmatpush1.bf16.msra.mxu0 %v19584_v32  ;;  %v19671_v32 = vld [vmem:[%s26927_s3 + $0xee8] ss:$16 sps:$4 sm:$0xff]  }
 0x437   :  { %5039 = vmatpush1.bf16.msra.mxu1 %v19587_v54  ;;  %4958 = vmatprep.subr.bf16.mxu0 %v19592_v0  ;;  %v19676_v54 = vld [vmem:[%s26927_s3 + $0xf04] ss:$16 sps:$4 sm:$0xff]   ;;  %v19679_v0 = vld [vmem:[%s26927_s3 + $0xf0c] ss:$16 sps:$4 sm:$0xff]  }
 0x438   :  { %5040 = vmatprep.subr.bf16.mxu1 %v19595_v2  ;;  %v19674_v2 = vld [vmem:[%s26927_s3 + $0xf00] ss:$16 sps:$4 sm:$0xff]  }
 0x43a   :  { %4959 = vmatpush1.bf16.msra.mxu0 %v19590_v3  ;;  %v19677_v3 = vld [vmem:[%s26927_s3 + $0xf08] ss:$16 sps:$4 sm:$0xff]  }
 0x43b   :  { %5041 = vmatpush1.bf16.msra.mxu1 %v19593_v4  ;;  %4960 = vmatprep.subr.bf16.mxu0 %v19598_v5  ;;  %v19682_v4 = vld [vmem:[%s26927_s3 + $0xf24] ss:$16 sps:$4 sm:$0xff]   ;;  %v19685_v5 = vld [vmem:[%s26927_s3 + $0xf2c] ss:$16 sps:$4 sm:$0xff]  }
 0x43c   :  { %5042 = vmatprep.subr.bf16.mxu1 %v19601_v9  ;;  %v19680_v9 = vld [vmem:[%s26927_s3 + $0xf20] ss:$16 sps:$4 sm:$0xff]  }
 0x43e   :  { %4961 = vmatpush1.bf16.msra.mxu0 %v19596_v14  ;;  %v19683_v14 = vld [vmem:[%s26927_s3 + $0xf28] ss:$16 sps:$4 sm:$0xff]  }
 0x43f   :  { %5043 = vmatpush1.bf16.msra.mxu1 %v19599_v15  ;;  %4962 = vmatprep.subr.bf16.mxu0 %v19604_v16  ;;  %v19688_v15 = vld [vmem:[%s26927_s3 + $0xf44] ss:$16 sps:$4 sm:$0xff]   ;;  %v19691_v16 = vld [vmem:[%s26927_s3 + $0xf4c] ss:$16 sps:$4 sm:$0xff]  }
 0x440   :  { %5044 = vmatprep.subr.bf16.mxu1 %v19607_v17  ;;  %v19686_v17 = vld [vmem:[%s26927_s3 + $0xf40] ss:$16 sps:$4 sm:$0xff]  }
 0x442   :  { %4963 = vmatpush1.bf16.msra.mxu0 %v19602_v6  ;;  %v19689_v6 = vld [vmem:[%s26927_s3 + $0xf48] ss:$16 sps:$4 sm:$0xff]  }
 0x443   :  { %5045 = vmatpush1.bf16.msra.mxu1 %v19605_v18  ;;  %4964 = vmatprep.subr.bf16.mxu0 %v19610_v19  ;;  %v19694_v18 = vld [vmem:[%s26927_s3 + $0xf64] ss:$16 sps:$4 sm:$0xff]   ;;  %v19697_v19 = vld [vmem:[%s26927_s3 + $0xf6c] ss:$16 sps:$4 sm:$0xff]  }
 0x444   :  { %5046 = vmatprep.subr.bf16.mxu1 %v19613_v20  ;;  %v19692_v20 = vld [vmem:[%s26927_s3 + $0xf60] ss:$16 sps:$4 sm:$0xff]  }
 0x446   :  { %4965 = vmatpush1.bf16.msra.mxu0 %v19608_v21  ;;  %v19695_v21 = vld [vmem:[%s26927_s3 + $0xf68] ss:$16 sps:$4 sm:$0xff]  }
 0x447   :  { %5047 = vmatpush1.bf16.msra.mxu1 %v19611_v22  ;;  %4966 = vmatprep.subr.bf16.mxu0 %v19616_v1  ;;  %v19700_v22 = vld [vmem:[%s26927_s3 + $0xf84] ss:$16 sps:$4 sm:$0xff]   ;;  %v19703_v1 = vld [vmem:[%s26927_s3 + $0xf8c] ss:$16 sps:$4 sm:$0xff]  }
 0x448   :  { %5048 = vmatprep.subr.bf16.mxu1 %v19619_v11  ;;  %v19698_v11 = vld [vmem:[%s26927_s3 + $0xf80] ss:$16 sps:$4 sm:$0xff]  }
 0x44a   :  { %4967 = vmatpush1.bf16.msra.mxu0 %v19614_v24  ;;  %v19701_v24 = vld [vmem:[%s26927_s3 + $0xf88] ss:$16 sps:$4 sm:$0xff]  }
 0x44b   :  { %5049 = vmatpush1.bf16.msra.mxu1 %v19617_v28  ;;  %4968 = vmatprep.subr.bf16.mxu0 %v19622_v29  ;;  %v19706_v28 = vld [vmem:[%s26927_s3 + $0xfa4] ss:$16 sps:$4 sm:$0xff]   ;;  %v19709_v29 = vld [vmem:[%s26927_s3 + $0xfac] ss:$16 sps:$4 sm:$0xff]  }
 0x44c   :  { %5050 = vmatprep.subr.bf16.mxu1 %v19625_v30  ;;  %v19704_v30 = vld [vmem:[%s26927_s3 + $0xfa0] ss:$16 sps:$4 sm:$0xff]  }
 0x44e   :  { %4969 = vmatpush1.bf16.msra.mxu0 %v19620_v31  ;;  %v19707_v31 = vld [vmem:[%s26927_s3 + $0xfa8] ss:$16 sps:$4 sm:$0xff]  }
 0x44f   :  { %5051 = vmatpush1.bf16.msra.mxu1 %v19623_v33  ;;  %4979 = vmatprep.subr.bf16.mxu0 %v19628_v35  ;;  %v19712_v33 = vld [vmem:[%s26927_s3 + $0xfc4] ss:$16 sps:$4 sm:$0xff]   ;;  %v19715_v35 = vld [vmem:[%s26927_s3 + $0xfcc] ss:$16 sps:$4 sm:$0xff]  }
 0x450   :  { %5061 = vmatprep.subr.bf16.mxu1 %v19631_v36  ;;  %v19710_v36 = vld [vmem:[%s26927_s3 + $0xfc0] ss:$16 sps:$4 sm:$0xff]  }
 0x451   :  { %4971 = vmatmul.mubr.bf16.vlgmr.msra.gmra.mrb[32].mxu0 %v21428_v23 }
 0x452   :  { %5053 = vmatmul.mubr.bf16.vlgmr.msra.gmra.mrb[32].mxu1 %v21428_v23  ;;  %4980 = vmatpush1.bf16.msra.mxu0 %v19626_v37  ;;  %v19713_v37 = vld [vmem:[%s26927_s3 + $0xfc8] ss:$16 sps:$4 sm:$0xff]  }
 0x453   :  { %5011 = vmatprep.mubr.bf16.mxu0 %v21446_v12  ;;  %5062 = vmatpush1.bf16.msra.mxu1 %v19629_v38  ;;  %v19718_v38 = vld [vmem:[%s26927_s3 + $0xfe4] ss:$16 sps:$4 sm:$0xff]  }
 0x454   :  { %5093 = vmatprep.mubr.bf16.mxu1 %v21446_v12  ;;  %4981 = vmatprep.subr.bf16.mxu0 %v19634_v13  ;;  %v19721_v13 = vld [vmem:[%s26927_s3 + $0xfec] ss:$16 sps:$4 sm:$0xff]  }
 0x455   :  { %5063 = vmatprep.subr.bf16.mxu1 %v19637_v40  ;;  %v19716_v40 = vld [vmem:[%s26927_s3 + $0xfe0] ss:$16 sps:$4 sm:$0xff]  }
 0x456   :  { %4982 = vmatpush1.bf16.msra.mxu0 %v19632_v41  ;;  %v19719_v41 = vld [vmem:[%s26927_s3 + $0xfe8] ss:$16 sps:$4 sm:$0xff]  }
 0x457   :  { %5064 = vmatpush1.bf16.msra.mxu1 %v19635_v42  ;;  %4983 = vmatprep.subr.bf16.mxu0 %v19640_v43 }
 0x458   :  { %5065 = vmatprep.subr.bf16.mxu1 %v19643_v44 }
 0x45a   :  { %4984 = vmatpush1.bf16.msra.mxu0 %v19638_v45  ;;  %v16185_v45 = vld [vmem:[%s26928_s4 + $0x30] sm:$0xff] }
 0x45b   :  { %5066 = vmatpush1.bf16.msra.mxu1 %v19641_v46  ;;  %4985 = vmatprep.subr.bf16.mxu0 %v19646_v47  ;;  %v19724_v46 = vld [vmem:[%s26927_s3 + $0x1004] ss:$16 sps:$4 sm:$0xff]  }
 0x45c   :  { %5067 = vmatprep.subr.bf16.mxu1 %v19649_v48 }
 0x45e   :  { %4986 = vmatpush1.bf16.msra.mxu0 %v19644_v50  ;;  %v19722_v50 = vld [vmem:[%s26927_s3 + $0x1000] ss:$16 sps:$4 sm:$0xff]  }
 0x45f   :  { %5068 = vmatpush1.bf16.msra.mxu1 %v19647_v25  ;;  %4987 = vmatprep.subr.bf16.mxu0 %v19652_v51  ;;  %v19727_v25 = vld [vmem:[%s26927_s3 + $0x100c] ss:$16 sps:$4 sm:$0xff]  }
 0x460   :  { %5069 = vmatprep.subr.bf16.mxu1 %v19655_v52 }
 0x462   :  { %4988 = vmatpush1.bf16.msra.mxu0 %v19650_v26  ;;  %v19725_v26 = vld [vmem:[%s26927_s3 + $0x1008] ss:$16 sps:$4 sm:$0xff]  }
 0x463   :  { %5070 = vmatpush1.bf16.msra.mxu1 %v19653_v53  ;;  %4989 = vmatprep.subr.bf16.mxu0 %v19658_v55  ;;  %v16186_v55 = vld [vmem:[%s26928_s4 + $0x38] sm:$0x3f] }
 0x464   :  { %5071 = vmatprep.subr.bf16.mxu1 %v19661_v27  ;;  %v19730_v27 = vld [vmem:[%s26927_s3 + $0x1024] ss:$16 sps:$4 sm:$0xff]  }
 0x466   :  { %4990 = vmatpush1.bf16.msra.mxu0 %v19656_v56  ;;  %v19728_v56 = vld [vmem:[%s26927_s3 + $0x1020] ss:$16 sps:$4 sm:$0xff]  }
 0x467   :  { %5072 = vmatpush1.bf16.msra.mxu1 %v19659_v57  ;;  %4991 = vmatprep.subr.bf16.mxu0 %v19664_v58  ;;  %v19733_v57 = vld [vmem:[%s26927_s3 + $0x102c] ss:$16 sps:$4 sm:$0xff]   ;;  %v19731_v58 = vld [vmem:[%s26927_s3 + $0x1028] ss:$16 sps:$4 sm:$0xff]  }
 0x468   :  { %5073 = vmatprep.subr.bf16.mxu1 %v19667_v59  ;;  %v19736_v59 = vld [vmem:[%s26927_s3 + $0x1044] ss:$16 sps:$4 sm:$0xff]  }
 0x46a   :  { %4992 = vmatpush1.bf16.msra.mxu0 %v19662_v60  ;;  %v19739_v60 = vld [vmem:[%s26927_s3 + $0x104c] ss:$16 sps:$4 sm:$0xff]  }
 0x46b   :  { %5074 = vmatpush1.bf16.msra.mxu1 %v19665_v61  ;;  %4993 = vmatprep.subr.bf16.mxu0 %v19670_v62  ;;  %v19734_v61 = vld [vmem:[%s26927_s3 + $0x1040] ss:$16 sps:$4 sm:$0xff]   ;;  %v19737_v62 = vld [vmem:[%s26927_s3 + $0x1048] ss:$16 sps:$4 sm:$0xff]  }
 0x46c   :  { %5075 = vmatprep.subr.bf16.mxu1 %v19673_v63  ;;  %v19742_v63 = vld [vmem:[%s26927_s3 + $0x1064] ss:$16 sps:$4 sm:$0xff]  }
 0x46e   :  { %4994 = vmatpush1.bf16.msra.mxu0 %v19668_v7  ;;  %v19745_v7 = vld [vmem:[%s26927_s3 + $0x106c] ss:$16 sps:$4 sm:$0xff]  }
 0x46f   :  { %5076 = vmatpush1.bf16.msra.mxu1 %v19671_v32  ;;  %4995 = vmatprep.subr.bf16.mxu0 %v19676_v54  ;;  %v19740_v32 = vld [vmem:[%s26927_s3 + $0x1060] ss:$16 sps:$4 sm:$0xff]   ;;  %v19743_v54 = vld [vmem:[%s26927_s3 + $0x1068] ss:$16 sps:$4 sm:$0xff]  }
 0x470   :  { %5077 = vmatprep.subr.bf16.mxu1 %v19679_v0  ;;  %v19751_v0 = vld [vmem:[%s26927_s3 + $0x108c] ss:$16 sps:$4 sm:$0xff]  }
 0x472   :  { %4996 = vmatpush1.bf16.msra.mxu0 %v19674_v2  ;;  %v19746_v2 = vld [vmem:[%s26927_s3 + $0x1080] ss:$16 sps:$4 sm:$0xff]  }
 0x473   :  { %5078 = vmatpush1.bf16.msra.mxu1 %v19677_v3  ;;  %4997 = vmatprep.subr.bf16.mxu0 %v19682_v4  ;;  %v19749_v3 = vld [vmem:[%s26927_s3 + $0x1088] ss:$16 sps:$4 sm:$0xff]   ;;  %v19754_v4 = vld [vmem:[%s26927_s3 + $0x10a4] ss:$16 sps:$4 sm:$0xff]  }
 0x474   :  { %5079 = vmatprep.subr.bf16.mxu1 %v19685_v5  ;;  %v19757_v5 = vld [vmem:[%s26927_s3 + $0x10ac] ss:$16 sps:$4 sm:$0xff]  }
 0x476   :  { %4998 = vmatpush1.bf16.msra.mxu0 %v19680_v9  ;;  %v19752_v9 = vld [vmem:[%s26927_s3 + $0x10a0] ss:$16 sps:$4 sm:$0xff]  }
 0x477   :  { %5080 = vmatpush1.bf16.msra.mxu1 %v19683_v14  ;;  %4999 = vmatprep.subr.bf16.mxu0 %v19688_v15  ;;  %v19755_v14 = vld [vmem:[%s26927_s3 + $0x10a8] ss:$16 sps:$4 sm:$0xff]   ;;  %v19760_v15 = vld [vmem:[%s26927_s3 + $0x10c4] ss:$16 sps:$4 sm:$0xff]  }
 0x478   :  { %5081 = vmatprep.subr.bf16.mxu1 %v19691_v16  ;;  %v19763_v16 = vld [vmem:[%s26927_s3 + $0x10cc] ss:$16 sps:$4 sm:$0xff]  }
 0x47a   :  { %5000 = vmatpush1.bf16.msra.mxu0 %v19686_v17  ;;  %v19758_v17 = vld [vmem:[%s26927_s3 + $0x10c0] ss:$16 sps:$4 sm:$0xff]  }
 0x47b   :  { %5082 = vmatpush1.bf16.msra.mxu1 %v19689_v6  ;;  %5001 = vmatprep.subr.bf16.mxu0 %v19694_v18  ;;  %v19761_v6 = vld [vmem:[%s26927_s3 + $0x10c8] ss:$16 sps:$4 sm:$0xff]   ;;  %v19766_v18 = vld [vmem:[%s26927_s3 + $0x10e4] ss:$16 sps:$4 sm:$0xff]  }
 0x47c   :  { %5083 = vmatprep.subr.bf16.mxu1 %v19697_v19  ;;  %v19769_v19 = vld [vmem:[%s26927_s3 + $0x10ec] ss:$16 sps:$4 sm:$0xff]  }
 0x47e   :  { %5002 = vmatpush1.bf16.msra.mxu0 %v19692_v20  ;;  %v19764_v20 = vld [vmem:[%s26927_s3 + $0x10e0] ss:$16 sps:$4 sm:$0xff]  }
 0x47f   :  { %5084 = vmatpush1.bf16.msra.mxu1 %v19695_v21  ;;  %5003 = vmatprep.subr.bf16.mxu0 %v19700_v22  ;;  %v19767_v21 = vld [vmem:[%s26927_s3 + $0x10e8] ss:$16 sps:$4 sm:$0xff]   ;;  %v19772_v22 = vld [vmem:[%s26927_s3 + $0x1104] ss:$16 sps:$4 sm:$0xff]  }
 0x480   :  { %5085 = vmatprep.subr.bf16.mxu1 %v19703_v1  ;;  %v19775_v1 = vld [vmem:[%s26927_s3 + $0x110c] ss:$16 sps:$4 sm:$0xff]  }
 0x482   :  { %5004 = vmatpush1.bf16.msra.mxu0 %v19698_v11  ;;  %v19770_v11 = vld [vmem:[%s26927_s3 + $0x1100] ss:$16 sps:$4 sm:$0xff]  }
 0x483   :  { %5086 = vmatpush1.bf16.msra.mxu1 %v19701_v24  ;;  %5005 = vmatprep.subr.bf16.mxu0 %v19706_v28  ;;  %v19773_v24 = vld [vmem:[%s26927_s3 + $0x1108] ss:$16 sps:$4 sm:$0xff]   ;;  %v19778_v28 = vld [vmem:[%s26927_s3 + $0x1124] ss:$16 sps:$4 sm:$0xff]  }
 0x484   :  { %5087 = vmatprep.subr.bf16.mxu1 %v19709_v29  ;;  %v19781_v29 = vld [vmem:[%s26927_s3 + $0x112c] ss:$16 sps:$4 sm:$0xff]  }
 0x486   :  { %5006 = vmatpush1.bf16.msra.mxu0 %v19704_v30  ;;  %v19776_v30 = vld [vmem:[%s26927_s3 + $0x1120] ss:$16 sps:$4 sm:$0xff]  }
 0x487   :  { %5088 = vmatpush1.bf16.msra.mxu1 %v19707_v31  ;;  %5007 = vmatprep.subr.bf16.mxu0 %v19712_v33  ;;  %v19779_v31 = vld [vmem:[%s26927_s3 + $0x1128] ss:$16 sps:$4 sm:$0xff]   ;;  %v19784_v33 = vld [vmem:[%s26927_s3 + $0x1144] ss:$16 sps:$4 sm:$0xff]  }
 0x488   :  { %5089 = vmatprep.subr.bf16.mxu1 %v19715_v35  ;;  %v19787_v35 = vld [vmem:[%s26927_s3 + $0x114c] ss:$16 sps:$4 sm:$0xff]  }
 0x48a   :  { %5008 = vmatpush1.bf16.msra.mxu0 %v19710_v36  ;;  %v19782_v36 = vld [vmem:[%s26927_s3 + $0x1140] ss:$16 sps:$4 sm:$0xff]  }
 0x48b   :  { %5090 = vmatpush1.bf16.msra.mxu1 %v19713_v37  ;;  %5009 = vmatprep.subr.bf16.mxu0 %v19718_v38  ;;  %v19785_v37 = vld [vmem:[%s26927_s3 + $0x1148] ss:$16 sps:$4 sm:$0xff]   ;;  %v19790_v38 = vld [vmem:[%s26927_s3 + $0x1164] ss:$16 sps:$4 sm:$0xff]  }
 0x48c   :  { %5091 = vmatprep.subr.bf16.mxu1 %v19721_v13  ;;  %v19793_v13 = vld [vmem:[%s26927_s3 + $0x116c] ss:$16 sps:$4 sm:$0xff]  }
 0x48e   :  { %5010 = vmatpush1.bf16.msra.mxu0 %v19716_v40  ;;  %v19788_v40 = vld [vmem:[%s26927_s3 + $0x1160] ss:$16 sps:$4 sm:$0xff]  }
 0x48f   :  { %5092 = vmatpush1.bf16.msra.mxu1 %v19719_v41  ;;  %v19791_v41 = vld [vmem:[%s26927_s3 + $0x1168] ss:$16 sps:$4 sm:$0xff]  }
 0x491   :  { %5012 = vmatmul.mubr.bf16.vlgmr.msra.gmra.mrb[32].mxu0 %v21638_v34 }
 0x492   :  { %5094 = vmatmul.mubr.bf16.vlgmr.msra.gmra.mrb[32].mxu1 %v21638_v34  ;;  %5175 = vmatprep.mubr.f32.mxu0 %v26947_v49 }
 0x493   :  { %5252 = vmatprep.mubr.f32.mxu1 %v26947_v49 }
 0x564   :  { %v5013_v42 = vpop.f32.mrb[32].mxu0 }
 0x565   :  { %v5095_v43 = vpop.f32.mrb[32].mxu1  ;;  %v5015_v44 = vpop.f32.mrb[33].mxu0 }
 0x566   :  { %v5097_v47 = vpop.f32.mrb[33].mxu1  ;;  %v5017_v48 = vpop.f32.mrb[34].mxu0  ;;  %5111 = vmatprep.subr.mxu0 %v5015_v44  ;;  %v19794_v44 = vld [vmem:[%s26927_s3 + $0x1180] ss:$16 sps:$4 sm:$0xff]  }
 0x567   :  { %v5099_v51 = vpop.f32.mrb[34].mxu1  ;;  %5188 = vmatprep.subr.mxu1 %v5097_v47  ;;  %v5018_v52 = vpop.f32.mrb[35].mxu0  ;;  %5112 = vmatpush1.msra.mxu0 %v5013_v42  ;;  %v19796_v42 = vld [vmem:[%s26927_s3 + $0x1184] ss:$16 sps:$4 sm:$0xff]   ;;  %v19805_v47 = vld [vmem:[%s26927_s3 + $0x11ac] ss:$16 sps:$4 sm:$0xff]  }
 0x568   :  { %v5100_v53 = vpop.f32.mrb[35].mxu1  ;;  %5189 = vmatpush1.msra.mxu1 %v5095_v43  ;;  %16187 = vmatmul.mubr.msk.f32.vlgmr.msra.gmra.mrb[24].mxu0 %vm2744_vm2, %v16185_v45  ;;  %v19799_v43 = vld [vmem:[%s26927_s3 + $0x118c] ss:$16 sps:$4 sm:$0xff]   ;;  %v19800_v48 = vld [vmem:[%s26927_s3 + $0x11a0] ss:$16 sps:$4 sm:$0xff]  }
 0x569   :  { %16189 = vmatmul.mubr.msk.f32.vlgmr.msra.gmra.mrb[24].mxu1 %vm2744_vm2, %v16185_v45  ;;  %6042 = vmatprep.subr.bf16.mxu0 %v19724_v46  ;;  %v19797_v45 = vld [vmem:[%s26927_s3 + $0x1188] ss:$16 sps:$4 sm:$0xff]   ;;  %v19802_v46 = vld [vmem:[%s26927_s3 + $0x11a4] ss:$16 sps:$4 sm:$0xff]   ;;  %v19811_v51 = vld [vmem:[%s26927_s3 + $0x11cc] ss:$16 sps:$4 sm:$0xff]  }
 0x56a   :  { %6124 = vmatprep.subr.bf16.mxu1 %v19727_v25  ;;  %6043 = vmatpush1.bf16.msra.mxu0 %v19722_v50  ;;  %v19803_v50 = vld [vmem:[%s26927_s3 + $0x11a8] ss:$16 sps:$4 sm:$0xff]   ;;  %v19808_v25 = vld [vmem:[%s26927_s3 + $0x11c4] ss:$16 sps:$4 sm:$0xff]   ;;  %v19806_v52 = vld [vmem:[%s26927_s3 + $0x11c0] ss:$16 sps:$4 sm:$0xff]  }
 0x56b   :  { %6125 = vmatpush1.bf16.msra.mxu1 %v19725_v26  ;;  %5181 = vmatprep.mubr.f32.mxu0 %v26947_v49  ;;  %v19809_v26 = vld [vmem:[%s26927_s3 + $0x11c8] ss:$16 sps:$4 sm:$0xff]   ;;  %v19814_v53 = vld [vmem:[%s26927_s3 + $0x11e4] ss:$16 sps:$4 sm:$0xff]  }
 0x56c   :  { %5258 = vmatprep.mubr.f32.mxu1 %v26947_v49  ;;  %16188 = vmatmul.mubr.msk.f32.gmra.mrb[26].mxu0 %vm2744_vm2, %v16186_v55 }
 0x56d   :  { %16190 = vmatmul.mubr.msk.f32.gmra.mrb[26].mxu1 %vm2744_vm2, %v16186_v55  ;;  %6044 = vmatprep.subr.bf16.mxu0 %v19730_v27  ;;  %v19817_v55 = vld [vmem:[%s26927_s3 + $0x11ec] ss:$16 sps:$4 sm:$0xff]   ;;  %v19812_v27 = vld [vmem:[%s26927_s3 + $0x11e0] ss:$16 sps:$4 sm:$0xff]  }
 0x56e   :  { %6126 = vmatprep.subr.bf16.mxu1 %v19733_v57  ;;  %6045 = vmatpush1.bf16.msra.mxu0 %v19728_v56  ;;  %v19815_v56 = vld [vmem:[%s26927_s3 + $0x11e8] ss:$16 sps:$4 sm:$0xff]   ;;  %v19820_v57 = vld [vmem:[%s26927_s3 + $0x1204] ss:$16 sps:$4 sm:$0xff]  }
 0x56f   :  { %6074 = vmatprep.mubr.bf16.mxu0 %v21430_v39  ;;  %6127 = vmatpush1.bf16.msra.mxu1 %v19731_v58  ;;  %v19823_v58 = vld [vmem:[%s26927_s3 + $0x120c] ss:$16 sps:$4 sm:$0xff]  }
 0x570   :  { %6156 = vmatprep.mubr.bf16.mxu1 %v21430_v39  ;;  %6046 = vmatprep.subr.bf16.mxu0 %v19736_v59  ;;  %v19748_v39 = vld [vmem:[%s26927_s3 + $0x1084] ss:$16 sps:$4 sm:$0xff]   ;;  %v19818_v59 = vld [vmem:[%s26927_s3 + $0x1200] ss:$16 sps:$4 sm:$0xff]  }
 0x571   :  { %6128 = vmatprep.subr.bf16.mxu1 %v19739_v60  ;;  %v19821_v60 = vld [vmem:[%s26927_s3 + $0x1208] ss:$16 sps:$4 sm:$0xff]  }
 0x572   :  { %6047 = vmatpush1.bf16.msra.mxu0 %v19734_v61  ;;  %v19826_v61 = vld [vmem:[%s26927_s3 + $0x1224] ss:$16 sps:$4 sm:$0xff]  }
 0x573   :  { %6129 = vmatpush1.bf16.msra.mxu1 %v19737_v62  ;;  %6048 = vmatprep.subr.bf16.mxu0 %v19742_v63  ;;  %v19829_v62 = vld [vmem:[%s26927_s3 + $0x122c] ss:$16 sps:$4 sm:$0xff]   ;;  %v19824_v63 = vld [vmem:[%s26927_s3 + $0x1220] ss:$16 sps:$4 sm:$0xff]  }
 0x574   :  { %6130 = vmatprep.subr.bf16.mxu1 %v19745_v7  ;;  %v19827_v7 = vld [vmem:[%s26927_s3 + $0x1228] ss:$16 sps:$4 sm:$0xff]  }
 0x576   :  { %6049 = vmatpush1.bf16.msra.mxu0 %v19740_v32  ;;  %v19832_v32 = vld [vmem:[%s26927_s3 + $0x1244] ss:$16 sps:$4 sm:$0xff]  }
 0x577   :  { %6131 = vmatpush1.bf16.msra.mxu1 %v19743_v54  ;;  %6050 = vmatprep.subr.bf16.mxu0 %v19748_v39  ;;  %v19830_v54 = vld [vmem:[%s26927_s3 + $0x1240] ss:$16 sps:$4 sm:$0xff]   ;;  %v19833_v39 = vld [vmem:[%s26927_s3 + $0x1248] ss:$16 sps:$4 sm:$0xff]  }
 0x578   :  { %6132 = vmatprep.subr.bf16.mxu1 %v19751_v0  ;;  %v19841_v0 = vld [vmem:[%s26927_s3 + $0x126c] ss:$16 sps:$4 sm:$0xff]  }
 0x57a   :  { %6051 = vmatpush1.bf16.msra.mxu0 %v19746_v2  ;;  %v19836_v2 = vld [vmem:[%s26927_s3 + $0x1260] ss:$16 sps:$4 sm:$0xff]  }
 0x57b   :  { %6133 = vmatpush1.bf16.msra.mxu1 %v19749_v3  ;;  %6052 = vmatprep.subr.bf16.mxu0 %v19754_v4  ;;  %v19839_v3 = vld [vmem:[%s26927_s3 + $0x1268] ss:$16 sps:$4 sm:$0xff]   ;;  %v19844_v4 = vld [vmem:[%s26927_s3 + $0x1284] ss:$16 sps:$4 sm:$0xff]  }
 0x57c   :  { %6134 = vmatprep.subr.bf16.mxu1 %v19757_v5  ;;  %v19847_v5 = vld [vmem:[%s26927_s3 + $0x128c] ss:$16 sps:$4 sm:$0xff]  }
 0x57e   :  { %6053 = vmatpush1.bf16.msra.mxu0 %v19752_v9  ;;  %v19842_v9 = vld [vmem:[%s26927_s3 + $0x1280] ss:$16 sps:$4 sm:$0xff]  }
 0x57f   :  { %6135 = vmatpush1.bf16.msra.mxu1 %v19755_v14  ;;  %6054 = vmatprep.subr.bf16.mxu0 %v19760_v15  ;;  %v19845_v14 = vld [vmem:[%s26927_s3 + $0x1288] ss:$16 sps:$4 sm:$0xff]   ;;  %v19850_v15 = vld [vmem:[%s26927_s3 + $0x12a4] ss:$16 sps:$4 sm:$0xff]  }
 0x580   :  { %6136 = vmatprep.subr.bf16.mxu1 %v19763_v16  ;;  %v19853_v16 = vld [vmem:[%s26927_s3 + $0x12ac] ss:$16 sps:$4 sm:$0xff]  }
 0x582   :  { %6055 = vmatpush1.bf16.msra.mxu0 %v19758_v17  ;;  %v19848_v17 = vld [vmem:[%s26927_s3 + $0x12a0] ss:$16 sps:$4 sm:$0xff]  }
 0x583   :  { %6137 = vmatpush1.bf16.msra.mxu1 %v19761_v6  ;;  %6056 = vmatprep.subr.bf16.mxu0 %v19766_v18  ;;  %v19851_v6 = vld [vmem:[%s26927_s3 + $0x12a8] ss:$16 sps:$4 sm:$0xff]   ;;  %v19856_v18 = vld [vmem:[%s26927_s3 + $0x12c4] ss:$16 sps:$4 sm:$0xff]  }
 0x584   :  { %6138 = vmatprep.subr.bf16.mxu1 %v19769_v19  ;;  %v19859_v19 = vld [vmem:[%s26927_s3 + $0x12cc] ss:$16 sps:$4 sm:$0xff]  }
 0x586   :  { %6057 = vmatpush1.bf16.msra.mxu0 %v19764_v20  ;;  %v19854_v20 = vld [vmem:[%s26927_s3 + $0x12c0] ss:$16 sps:$4 sm:$0xff]  }
 0x587   :  { %6139 = vmatpush1.bf16.msra.mxu1 %v19767_v21  ;;  %6058 = vmatprep.subr.bf16.mxu0 %v19772_v22  ;;  %v19857_v21 = vld [vmem:[%s26927_s3 + $0x12c8] ss:$16 sps:$4 sm:$0xff]   ;;  %v19862_v22 = vld [vmem:[%s26927_s3 + $0x12e4] ss:$16 sps:$4 sm:$0xff]  }
 0x588   :  { %6140 = vmatprep.subr.bf16.mxu1 %v19775_v1  ;;  %v19865_v1 = vld [vmem:[%s26927_s3 + $0x12ec] ss:$16 sps:$4 sm:$0xff]  }
 0x58a   :  { %6059 = vmatpush1.bf16.msra.mxu0 %v19770_v11  ;;  %v19860_v11 = vld [vmem:[%s26927_s3 + $0x12e0] ss:$16 sps:$4 sm:$0xff]  }
 0x58b   :  { %6141 = vmatpush1.bf16.msra.mxu1 %v19773_v24  ;;  %6060 = vmatprep.subr.bf16.mxu0 %v19778_v28  ;;  %v19863_v24 = vld [vmem:[%s26927_s3 + $0x12e8] ss:$16 sps:$4 sm:$0xff]   ;;  %v19868_v28 = vld [vmem:[%s26927_s3 + $0x1304] ss:$16 sps:$4 sm:$0xff]  }
 0x58c   :  { %6142 = vmatprep.subr.bf16.mxu1 %v19781_v29  ;;  %v19871_v29 = vld [vmem:[%s26927_s3 + $0x130c] ss:$16 sps:$4 sm:$0xff]  }
 0x58e   :  { %6061 = vmatpush1.bf16.msra.mxu0 %v19776_v30  ;;  %v19866_v30 = vld [vmem:[%s26927_s3 + $0x1300] ss:$16 sps:$4 sm:$0xff]  }
 0x58f   :  { %6143 = vmatpush1.bf16.msra.mxu1 %v19779_v31  ;;  %6062 = vmatprep.subr.bf16.mxu0 %v19784_v33  ;;  %v19869_v31 = vld [vmem:[%s26927_s3 + $0x1308] ss:$16 sps:$4 sm:$0xff]   ;;  %v19874_v33 = vld [vmem:[%s26927_s3 + $0x1324] ss:$16 sps:$4 sm:$0xff]  }
 0x590   :  { %6144 = vmatprep.subr.bf16.mxu1 %v19787_v35  ;;  %v19877_v35 = vld [vmem:[%s26927_s3 + $0x132c] ss:$16 sps:$4 sm:$0xff]  }
 0x592   :  { %6063 = vmatpush1.bf16.msra.mxu0 %v19782_v36  ;;  %v19872_v36 = vld [vmem:[%s26927_s3 + $0x1320] ss:$16 sps:$4 sm:$0xff]  }
 0x593   :  { %6145 = vmatpush1.bf16.msra.mxu1 %v19785_v37  ;;  %6064 = vmatprep.subr.bf16.mxu0 %v19790_v38  ;;  %v19875_v37 = vld [vmem:[%s26927_s3 + $0x1328] ss:$16 sps:$4 sm:$0xff]   ;;  %v19880_v38 = vld [vmem:[%s26927_s3 + $0x1344] ss:$16 sps:$4 sm:$0xff]  }
 0x594   :  { %6146 = vmatprep.subr.bf16.mxu1 %v19793_v13  ;;  %v19883_v13 = vld [vmem:[%s26927_s3 + $0x134c] ss:$16 sps:$4 sm:$0xff]  }
 0x596   :  { %6065 = vmatpush1.bf16.msra.mxu0 %v19788_v40  ;;  %v19878_v40 = vld [vmem:[%s26927_s3 + $0x1340] ss:$16 sps:$4 sm:$0xff]  }
 0x597   :  { %6147 = vmatpush1.bf16.msra.mxu1 %v19791_v41  ;;  %6066 = vmatprep.subr.bf16.mxu0 %v19796_v42  ;;  %v19881_v41 = vld [vmem:[%s26927_s3 + $0x1348] ss:$16 sps:$4 sm:$0xff]   ;;  %v19886_v42 = vld [vmem:[%s26927_s3 + $0x1364] ss:$16 sps:$4 sm:$0xff]  }
 0x598   :  { %6148 = vmatprep.subr.bf16.mxu1 %v19799_v43  ;;  %v19889_v43 = vld [vmem:[%s26927_s3 + $0x136c] ss:$16 sps:$4 sm:$0xff]  }
 0x59a   :  { %6067 = vmatpush1.bf16.msra.mxu0 %v19794_v44  ;;  %v19884_v44 = vld [vmem:[%s26927_s3 + $0x1360] ss:$16 sps:$4 sm:$0xff]  }
 0x59b   :  { %6149 = vmatpush1.bf16.msra.mxu1 %v19797_v45  ;;  %6068 = vmatprep.subr.bf16.mxu0 %v19802_v46  ;;  %v19887_v45 = vld [vmem:[%s26927_s3 + $0x1368] ss:$16 sps:$4 sm:$0xff]   ;;  %v19892_v46 = vld [vmem:[%s26927_s3 + $0x1384] ss:$16 sps:$4 sm:$0xff]  }
 0x59c   :  { %6150 = vmatprep.subr.bf16.mxu1 %v19805_v47  ;;  %v19895_v47 = vld [vmem:[%s26927_s3 + $0x138c] ss:$16 sps:$4 sm:$0xff]  }
 0x59e   :  { %6069 = vmatpush1.bf16.msra.mxu0 %v19800_v48  ;;  %v19890_v48 = vld [vmem:[%s26927_s3 + $0x1380] ss:$16 sps:$4 sm:$0xff]  }
 0x59f   :  { %6151 = vmatpush1.bf16.msra.mxu1 %v19803_v50  ;;  %6070 = vmatprep.subr.bf16.mxu0 %v19808_v25  ;;  %v19893_v50 = vld [vmem:[%s26927_s3 + $0x1388] ss:$16 sps:$4 sm:$0xff]   ;;  %v19898_v25 = vld [vmem:[%s26927_s3 + $0x13a4] ss:$16 sps:$4 sm:$0xff]  }
 0x5a0   :  { %6152 = vmatprep.subr.bf16.mxu1 %v19811_v51  ;;  %v19901_v51 = vld [vmem:[%s26927_s3 + $0x13ac] ss:$16 sps:$4 sm:$0xff]  }
 0x5a2   :  { %6071 = vmatpush1.bf16.msra.mxu0 %v19806_v52  ;;  %v19896_v52 = vld [vmem:[%s26927_s3 + $0x13a0] ss:$16 sps:$4 sm:$0xff]  }
 0x5a3   :  { %6153 = vmatpush1.bf16.msra.mxu1 %v19809_v26  ;;  %6072 = vmatprep.subr.bf16.mxu0 %v19814_v53  ;;  %v19899_v26 = vld [vmem:[%s26927_s3 + $0x13a8] ss:$16 sps:$4 sm:$0xff]   ;;  %v19904_v53 = vld [vmem:[%s26927_s3 + $0x13c4] ss:$16 sps:$4 sm:$0xff]  }
 0x5a4   :  { %6154 = vmatprep.subr.bf16.mxu1 %v19817_v55  ;;  %v19907_v55 = vld [vmem:[%s26927_s3 + $0x13cc] ss:$16 sps:$4 sm:$0xff]  }
 0x5a6   :  { %6073 = vmatpush1.bf16.msra.mxu0 %v19812_v27  ;;  %v19902_v27 = vld [vmem:[%s26927_s3 + $0x13c0] ss:$16 sps:$4 sm:$0xff]  }
 0x5a7   :  { %6155 = vmatpush1.bf16.msra.mxu1 %v19815_v56  ;;  %6083 = vmatprep.subr.bf16.mxu0 %v19820_v57  ;;  %v19905_v56 = vld [vmem:[%s26927_s3 + $0x13c8] ss:$16 sps:$4 sm:$0xff]   ;;  %v19910_v57 = vld [vmem:[%s26927_s3 + $0x13e4] ss:$16 sps:$4 sm:$0xff]  }
 0x5a8   :  { %6165 = vmatprep.subr.bf16.mxu1 %v19823_v58  ;;  %v19913_v58 = vld [vmem:[%s26927_s3 + $0x13ec] ss:$16 sps:$4 sm:$0xff]  }
 0x5a9   :  { %6075 = vmatmul.mubr.bf16.vlgmr.msra.gmra.mrb[36].mxu0 %v21428_v23 }
 0x5aa   :  { %6157 = vmatmul.mubr.bf16.vlgmr.msra.gmra.mrb[36].mxu1 %v21428_v23  ;;  %6084 = vmatpush1.bf16.msra.mxu0 %v19818_v59  ;;  %v19835_v23 = vld [vmem:[%s26927_s3 + $0x124c] ss:$16 sps:$4 sm:$0xff]   ;;  %v19908_v59 = vld [vmem:[%s26927_s3 + $0x13e0] ss:$16 sps:$4 sm:$0xff]  }
 0x5ab   :  { %6115 = vmatprep.mubr.bf16.mxu0 %v21446_v12  ;;  %6166 = vmatpush1.bf16.msra.mxu1 %v19821_v60  ;;  %v19911_v60 = vld [vmem:[%s26927_s3 + $0x13e8] ss:$16 sps:$4 sm:$0xff]  }
 0x5ac   :  { %6197 = vmatprep.mubr.bf16.mxu1 %v21446_v12  ;;  %6085 = vmatprep.subr.bf16.mxu0 %v19826_v61  ;;  %v19838_v12 = vld [vmem:[%s26927_s3 + $0x1264] ss:$16 sps:$4 sm:$0xff]  }
 0x5ad   :  { %6167 = vmatprep.subr.bf16.mxu1 %v19829_v62  ;;  %v6486_v61 = vld [vmem:[%s26932_s8 + $0x100] sm:$0xff] }
 0x5ae   :  { %6086 = vmatpush1.bf16.msra.mxu0 %v19824_v63  ;;  %v6487_v63 = vld [vmem:[%s26932_s8 + $0x108] sm:$0xff] }
 0x5af   :  { %6168 = vmatpush1.bf16.msra.mxu1 %v19827_v7  ;;  %6087 = vmatprep.subr.bf16.mxu0 %v19832_v32  ;;  %v6470_v7 = vld [vmem:[%s26932_s8 + $0x80] sm:$0xff] }
 0x5b0   :  { %6169 = vmatprep.subr.bf16.mxu1 %v19835_v23 }
 0x5b2   :  { %6088 = vmatpush1.bf16.msra.mxu0 %v19830_v54  ;;  %v16447_v54 = vld [vmem:[%s26928_s4 + $0x40] sm:$0xff] }
 0x5b3   :  { %6170 = vmatpush1.bf16.msra.mxu1 %v19833_v39  ;;  %6089 = vmatprep.subr.bf16.mxu0 %v19838_v12 }
 0x5b4   :  { %6171 = vmatprep.subr.bf16.mxu1 %v19841_v0  ;;  %v6454_v0 = vld [vmem:[%s26932_s8] sm:$0xff] }
 0x5b6   :  { %6090 = vmatpush1.bf16.msra.mxu0 %v19836_v2  ;;  %v6455_v2 = vld [vmem:[%s26932_s8 + $0x8] sm:$0xff] }
 0x5b7   :  { %6172 = vmatpush1.bf16.msra.mxu1 %v19839_v3  ;;  %6091 = vmatprep.subr.bf16.mxu0 %v19844_v4 }
 0x5b8   :  { %6173 = vmatprep.subr.bf16.mxu1 %v19847_v5  ;;  %v23271_v5 = vpack.c.bf16 %v6487_v63, %v6486_v61  ;;  %v6463_v63 = vld [vmem:[%s26932_s8 + $0x48] sm:$0xff] }
 0x5ba   :  { %6092 = vmatpush1.bf16.msra.mxu0 %v19842_v9 }
 0x5bb   :  { %6174 = vmatpush1.bf16.msra.mxu1 %v19845_v14  ;;  %6093 = vmatprep.subr.bf16.mxu0 %v19850_v15  ;;  %v6472_v14 = vld [vmem:[%s26932_s8 + $0x90] sm:$0xff]  ;;  %v6473_v15 = vld [vmem:[%s26932_s8 + $0x98] sm:$0xff] }
 0x5bc   :  { %6175 = vmatprep.subr.bf16.mxu1 %v19853_v16 }
 0x5be   :  { %6094 = vmatpush1.bf16.msra.mxu0 %v19848_v17  ;;  %v6488_v17 = vld [vmem:[%s26932_s8 + $0x110] sm:$0xff] }
 0x5bf   :  { %6176 = vmatpush1.bf16.msra.mxu1 %v19851_v6  ;;  %6095 = vmatprep.subr.bf16.mxu0 %v19856_v18  ;;  %v6489_v6 = vld [vmem:[%s26932_s8 + $0x118] sm:$0xff]  ;;  %v16448_v18 = vld [vmem:[%s26928_s4 + $0x48] sm:$0x3f] }
 0x5c0   :  { %6177 = vmatprep.subr.bf16.mxu1 %v19859_v19  ;;  %v23293_v19 = vpack.c.bf16 %v6455_v2, %v6454_v0  ;;  %v6464_v0 = vld [vmem:[%s26932_s8 + $0x50] sm:$0xff]  ;;  %v6465_v2 = vld [vmem:[%s26932_s8 + $0x58] sm:$0xff] }
 0x5c2   :  { %6096 = vmatpush1.bf16.msra.mxu0 %v19854_v20  ;;  %v26949_v20 = vmov 0.0|0.0  }
 0x5c3   :  { %6178 = vmatpush1.bf16.msra.mxu1 %v19857_v21  ;;  %6097 = vmatprep.subr.bf16.mxu0 %v19862_v22  ;;  %v23297_v21 = vpack.c.bf16 %v6473_v15, %v6472_v14  ;;  %v6456_v22 = vld [vmem:[%s26932_s8 + $0x10] sm:$0xff]  ;;  %v6505_v14 = vld [vmem:[%s26932_s8 + $0x198] sm:$0xff] }
 0x5c4   :  { %6179 = vmatprep.subr.bf16.mxu1 %v19865_v1  ;;  %v6457_v1 = vld [vmem:[%s26932_s8 + $0x18] sm:$0xff] }
 0x5c6   :  { %6098 = vmatpush1.bf16.msra.mxu0 %v19860_v11  ;;  %v23306_v11 = vpack.c.bf16 %v6489_v6, %v6488_v17  ;;  %v6483_v17 = vld [vmem:[%s26932_s8 + $0xe8] sm:$0xff] }
 0x5c7   :  { %6180 = vmatpush1.bf16.msra.mxu1 %v19863_v24  ;;  %6099 = vmatprep.subr.bf16.mxu0 %v19868_v28  ;;  %v6474_v24 = vld [vmem:[%s26932_s8 + $0xa0] sm:$0xff]  ;;  %v6475_v28 = vld [vmem:[%s26932_s8 + $0xa8] sm:$0xff] }
 0x5c8   :  { %6181 = vmatprep.subr.bf16.mxu1 %v19871_v29  ;;  %v6490_v29 = vld [vmem:[%s26932_s8 + $0x120] sm:$0xff] }
 0x5ca   :  { %6100 = vmatpush1.bf16.msra.mxu0 %v19866_v30  ;;  %v6491_v30 = vld [vmem:[%s26932_s8 + $0x128] sm:$0xff] }
 0x5cb   :  { %6182 = vmatpush1.bf16.msra.mxu1 %v19869_v31  ;;  %6101 = vmatprep.subr.bf16.mxu0 %v19874_v33  ;;  %v23325_v31 = vpack.c.bf16 %v6457_v1, %v6456_v22  ;;  %v23328_v33 = vpack.c.bf16 %v6475_v28, %v6474_v24  ;;  %v6467_v22 = vld [vmem:[%s26932_s8 + $0x68] sm:$0xff]  ;;  %v6506_v1 = vld [vmem:[%s26932_s8 + $0x1a0] sm:$0xff] }
 0x5cc   :  { %6183 = vmatprep.subr.bf16.mxu1 %v19877_v35  ;;  %v6458_v35 = vld [vmem:[%s26932_s8 + $0x20] sm:$0xff]  ;;  %v6507_v28 = vld [vmem:[%s26932_s8 + $0x1a8] sm:$0xff] }
 0x5ce   :  { %6102 = vmatpush1.bf16.msra.mxu0 %v19872_v36  ;;  %v6459_v36 = vld [vmem:[%s26932_s8 + $0x28] sm:$0xff] }
 0x5cf   :  { %6184 = vmatpush1.bf16.msra.mxu1 %v19875_v37  ;;  %6103 = vmatprep.subr.bf16.mxu0 %v19880_v38  ;;  %v23337_v37 = vpack.c.bf16 %v6491_v30, %v6490_v29  ;;  %v6492_v38 = vld [vmem:[%s26932_s8 + $0x130] sm:$0xff]  ;;  %v23494_v29 = vpack.c.bf16 %v6507_v28, %v6506_v1 }
 0x5d0   :  { %6185 = vmatprep.subr.bf16.mxu1 %v19883_v13  ;;  %v6493_v13 = vld [vmem:[%s26932_s8 + $0x138] sm:$0xff]  ;;  %v6484_v30 = vld [vmem:[%s26932_s8 + $0xf0] sm:$0xff] }
 0x5d2   :  { %6104 = vmatpush1.bf16.msra.mxu0 %v19878_v40  ;;  %v23347_v40 = vpack.c.bf16 %v6459_v36, %v6458_v35  ;;  %v6485_v35 = vld [vmem:[%s26932_s8 + $0xf8] sm:$0xff] }
 0x5d3   :  { %6186 = vmatpush1.bf16.msra.mxu1 %v19881_v41  ;;  %6105 = vmatprep.subr.bf16.mxu0 %v19886_v42  ;;  %v23351_v41 = vpack.c.bf16 %v6493_v13, %v6492_v38  ;;  %v6494_v42 = vld [vmem:[%s26932_s8 + $0x140] sm:$0xff]  ;;  %v23504_v36 = vpack.c.bf16 %v6485_v35, %v6484_v30  ;;  %v6468_v38 = vld [vmem:[%s26932_s8 + $0x70] sm:$0xff]  ;;  %v6469_v13 = vld [vmem:[%s26932_s8 + $0x78] sm:$0xff] }
 0x5d4   :  { %6187 = vmatprep.subr.bf16.mxu1 %v19889_v43  ;;  %v6495_v43 = vld [vmem:[%s26932_s8 + $0x148] sm:$0xff] }
 0x5d6   :  { %6106 = vmatpush1.bf16.msra.mxu0 %v19884_v44  ;;  %v23362_v44 = vpack.c.bf16 %v6495_v43, %v6494_v42  ;;  %v6508_v42 = vld [vmem:[%s26932_s8 + $0x1b0] sm:$0xff]  ;;  %v23516_v43 = vpack.c.bf16 %v6469_v13, %v6468_v38 }
 0x5d7   :  { %6188 = vmatpush1.bf16.msra.mxu1 %v19887_v45  ;;  %6107 = vmatprep.subr.bf16.mxu0 %v19892_v46  ;;  %v6496_v45 = vld [vmem:[%s26932_s8 + $0x150] sm:$0xff]  ;;  %v6497_v46 = vld [vmem:[%s26932_s8 + $0x158] sm:$0xff] }
 0x5d8   :  { %6189 = vmatprep.subr.bf16.mxu1 %v19895_v47  ;;  %v23372_v47 = vpack.c.bf16 %v6497_v46, %v6496_v45  ;;  %v6509_v45 = vld [vmem:[%s26932_s8 + $0x1b8] sm:$0xff] }
 0x5d9   :  { %v23522_v46 = vpack.c.bf16 %v6509_v45, %v6508_v42 }
 0x5da   :  { %6108 = vmatpush1.bf16.msra.mxu0 %v19890_v48  ;;  %v6498_v48 = vld [vmem:[%s26932_s8 + $0x160] sm:$0xff] }
 0x5db   :  { %6190 = vmatpush1.bf16.msra.mxu1 %v19893_v50  ;;  %6109 = vmatprep.subr.bf16.mxu0 %v19898_v25  ;;  %v6499_v50 = vld [vmem:[%s26932_s8 + $0x168] sm:$0xff] }
 0x5dc   :  { %6191 = vmatprep.subr.bf16.mxu1 %v19901_v51  ;;  %v23382_v25 = vpack.c.bf16 %v6499_v50, %v6498_v48  ;;  %v6476_v51 = vld [vmem:[%s26932_s8 + $0xb0] sm:$0xff] }
 0x5de   :  { %6110 = vmatpush1.bf16.msra.mxu0 %v19896_v52  ;;  %v6477_v52 = vld [vmem:[%s26932_s8 + $0xb8] sm:$0xff] }
 0x5df   :  { %6192 = vmatpush1.bf16.msra.mxu1 %v19899_v26  ;;  %6111 = vmatprep.subr.bf16.mxu0 %v19904_v53  ;;  %v23393_v26 = vpack.c.bf16 %v6477_v52, %v6476_v51  ;;  %v6460_v53 = vld [vmem:[%s26932_s8 + $0x30] sm:$0xff] }
 0x5e0   :  { %6193 = vmatprep.subr.bf16.mxu1 %v19907_v55  ;;  %v6461_v55 = vld [vmem:[%s26932_s8 + $0x38] sm:$0xff] }
 0x5e2   :  { %6112 = vmatpush1.bf16.msra.mxu0 %v19902_v27  ;;  %v6500_v27 = vld [vmem:[%s26932_s8 + $0x170] sm:$0xff] }
 0x5e3   :  { %6194 = vmatpush1.bf16.msra.mxu1 %v19905_v56  ;;  %6113 = vmatprep.subr.bf16.mxu0 %v19910_v57  ;;  %v23404_v56 = vpack.c.bf16 %v6461_v55, %v6460_v53  ;;  %v6501_v57 = vld [vmem:[%s26932_s8 + $0x178] sm:$0xff] }
 0x5e4   :  { %6195 = vmatprep.subr.bf16.mxu1 %v19913_v58  ;;  %v23410_v58 = vpack.c.bf16 %v6501_v57, %v6500_v27 }
 0x5e6   :  { %6114 = vmatpush1.bf16.msra.mxu0 %v19908_v59  ;;  %v6478_v59 = vld [vmem:[%s26932_s8 + $0xc0] sm:$0xff] }
 0x5e7   :  { %6196 = vmatpush1.bf16.msra.mxu1 %v19911_v60  ;;  %v6479_v60 = vld [vmem:[%s26932_s8 + $0xc8] sm:$0xff] }
 0x5e8   :  { %v23421_v61 = vpack.c.bf16 %v6479_v60, %v6478_v59 }
 0x5e9   :  { %6116 = vmatmul.mubr.bf16.vlgmr.msra.gmra.mrb[36].mxu0 %v21638_v34 }
 0x5ea   :  { %6198 = vmatmul.mubr.bf16.vlgmr.msra.gmra.mrb[36].mxu1 %v21638_v34  ;;  %6279 = vmatprep.mubr.f32.mxu0 %v26947_v49  ;;  %v6471_v34 = vld [vmem:[%s26932_s8 + $0x88] sm:$0xff] }
 0x5eb   :  { %6356 = vmatprep.mubr.f32.mxu1 %v26947_v49  ;;  %v23273_v9 = vpack.c.bf16 %v6471_v34, %v6470_v7  ;;  %v6502_v7 = vld [vmem:[%s26932_s8 + $0x180] sm:$0xff] }
 0x6bc   :  { %v6117_v62 = vpop.f32.mrb[36].mxu0 }
 0x6bd   :  { %v6199_v32 = vpop.f32.mrb[36].mxu1  ;;  %v6119_v23 = vpop.f32.mrb[37].mxu0 }
 0x6be   :  { %v6201_v39 = vpop.f32.mrb[37].mxu1  ;;  %v6121_v12 = vpop.f32.mrb[38].mxu0  ;;  %6215 = vmatprep.subr.mxu0 %v6119_v23 }
 0x6bf   :  { %v6203_v3 = vpop.f32.mrb[38].mxu1  ;;  %6292 = vmatprep.subr.mxu1 %v6201_v39  ;;  %v6122_v4 = vpop.f32.mrb[39].mxu0  ;;  %6216 = vmatpush1.msra.mxu0 %v6117_v62  ;;  %v6462_v62 = vld [vmem:[%s26932_s8 + $0x40] sm:$0xff]  ;;  %v6481_v39 = vld [vmem:[%s26932_s8 + $0xd8] sm:$0xff] }
 0x6c0   :  { %v6204_v16 = vpop.f32.mrb[39].mxu1  ;;  %6293 = vmatpush1.msra.mxu1 %v6199_v32  ;;  %16449 = vmatmul.mubr.msk.f32.vlgmr.msra.gmra.mrb[24].mxu0 %vm2744_vm2, %v16447_v54  ;;  %v23432_v34 = vpack.c.bf16 %v6463_v63, %v6462_v62  ;;  %v6503_v32 = vld [vmem:[%s26932_s8 + $0x188] sm:$0xff]  ;;  %v6504_v3 = vld [vmem:[%s26932_s8 + $0x190] sm:$0xff]  ;;  %v23460_v4 = vpack.c.bf16 %v6465_v2, %v6464_v0 }
 0x6c1   :  { %16451 = vmatmul.mubr.msk.f32.vlgmr.msra.gmra.mrb[24].mxu1 %vm2744_vm2, %v16447_v54  ;;  %6285 = vmatprep.mubr.f32.mxu0 %v26947_v49  ;;  %v23438_v23 = vpack.c.bf16 %v6503_v32, %v6502_v7  ;;  %v6480_v54 = vld [vmem:[%s26932_s8 + $0xd0] sm:$0xff]  ;;  %v23466_v15 = vpack.c.bf16 %v6505_v14, %v6504_v3  ;;  %v6482_v16 = vld [vmem:[%s26932_s8 + $0xe0] sm:$0xff] }
 0x6c2   :  { %6362 = vmatprep.mubr.f32.mxu1 %v26947_v49  ;;  %18345 = vmatprep.subr.bf16.mxu1 %v26949_v20  ;;  %v23448_v12 = vpack.c.bf16 %v6481_v39, %v6480_v54  ;;  %v23476_v6 = vpack.c.bf16 %v6483_v17, %v6482_v16 }
 0x6c3   :  { %18347 = vmatpush1.bf16.msra.mxu1 %v23271_v5  ;;  %18314 = vmatprep.subr.bf16.mxu0 %v23273_v9 }
 0x6c4   :  { %16450 = vmatmul.mubr.msk.f32.gmra.mrb[26].mxu0 %vm2744_vm2, %v16448_v18  ;;  %18348 = vmatprep.subr.bf16.mxu1 %v26949_v20 }
 0x6c5   :  { %16452 = vmatmul.mubr.msk.f32.gmra.mrb[26].mxu1 %vm2744_vm2, %v16448_v18  ;;  %18316 = vmatpush3.bf16.msra.mxu0 %v23293_v19  ;;  %v6466_v18 = vld [vmem:[%s26932_s8 + $0x60] sm:$0xff] }
 0x6c6   :  { %18318 = vmatprep.subr.bf16.mxu0 %v23297_v21  ;;  %v23488_v24 = vpack.c.bf16 %v6467_v22, %v6466_v18 }
 0x6c7   :  { %18350 = vmatpush1.bf16.msra.mxu1 %v23306_v11 }
 0x6c8   :  { %18351 = vmatprep.subr.bf16.mxu1 %v26949_v20 }
 0x6c9   :  { %18320 = vmatpush3.bf16.msra.mxu0 %v23325_v31 }
 0x6ca   :  { %18322 = vmatprep.subr.bf16.mxu0 %v23328_v33 }
 0x6cb   :  { %18353 = vmatpush1.bf16.msra.mxu1 %v23337_v37 }
 0x6cc   :  { %18354 = vmatprep.subr.bf16.mxu1 %v26949_v20 }
 0x6cd   :  { %18324 = vmatpush3.bf16.msra.mxu0 %v23347_v40 }
 0x6ce   :  { %18326 = vmatprep.subr.bf16.mxu0 %v23393_v26 }
 0x6cf   :  { %18356 = vmatpush1.bf16.msra.mxu1 %v23351_v41 }
 0x6d0   :  { %18357 = vmatprep.subr.bf16.mxu1 %v26949_v20 }
 0x6d1   :  { %18328 = vmatpush3.bf16.msra.mxu0 %v23404_v56 }
 0x6d2   :  { %18330 = vmatprep.subr.bf16.mxu0 %v23421_v61 }
 0x6d3   :  { %18359 = vmatpush1.bf16.msra.mxu1 %v23362_v44 }
 0x6d4   :  { %18360 = vmatprep.subr.bf16.mxu1 %v26949_v20 }
 0x6d5   :  { %18332 = vmatpush3.bf16.msra.mxu0 %v23432_v34 }
 0x6d6   :  { %18334 = vmatprep.subr.bf16.mxu0 %v23448_v12 }
 0x6d7   :  { %18362 = vmatpush1.bf16.msra.mxu1 %v23372_v47 }
 0x6d8   :  { %18363 = vmatprep.subr.bf16.mxu1 %v26949_v20 }
 0x6d9   :  { %18336 = vmatpush3.bf16.msra.mxu0 %v23460_v4 }
 0x6da   :  { %18338 = vmatprep.subr.bf16.mxu0 %v23476_v6 }
 0x6db   :  { %18365 = vmatpush1.bf16.msra.mxu1 %v23382_v25 }
 0x6dc   :  { %18366 = vmatprep.subr.bf16.mxu1 %v26949_v20 }
 0x6dd   :  { %18340 = vmatpush3.bf16.msra.mxu0 %v23488_v24 }
 0x6de   :  { %18342 = vmatprep.subr.bf16.mxu0 %v23504_v36 }
 0x6df   :  { %18368 = vmatpush1.bf16.msra.mxu1 %v23410_v58 }
 0x6e0   :  { %18369 = vmatprep.subr.bf16.mxu1 %v26949_v20 }
 0x6e1   :  { %18344 = vmatpush3.bf16.msra.mxu0 %v23516_v43 }
 0x6e2   :  { %18382 = vmatprep.subr.bf16.mxu0 %v23273_v9 }
 0x6e3   :  { %18371 = vmatpush1.bf16.msra.mxu1 %v23438_v23 }
 0x6e4   :  { %18372 = vmatprep.subr.bf16.mxu1 %v26949_v20 }
 0x6e7   :  { %18374 = vmatpush1.bf16.msra.mxu1 %v23466_v15 }
 0x6e8   :  { %18375 = vmatprep.subr.bf16.mxu1 %v26949_v20 }
 0x6eb   :  { %18377 = vmatpush1.bf16.msra.mxu1 %v23494_v29 }
 0x6ec   :  { %18378 = vmatprep.subr.bf16.mxu1 %v26949_v20 }
 0x6ef   :  { %18380 = vmatpush1.bf16.msra.mxu1 %v23522_v46 }
 0x6f0   :  { %18413 = vmatprep.subr.bf16.mxu1 %v26949_v20 }
 0x793   :  { %v23528_v48 = vpop.f32.mrb[24].mxu0 }
 0x794   :  { %v23530_v50 = vpop.f32.mrb[24].mxu1  ;;  %v23532_v51 = vpop.f32.mrb[25].mxu0  ;;  %v6413_v53 = vmul.f32 %v23528_v48, %v23528_v48 }
 0x795   :  { %26979 = vst [vmem:[#allocation6_spill] sm:$0xff] %v23530_v50  ;;  %v23534_v52 = vpop.f32.mrb[25].mxu1  ;;  %v6415_v55 = vmul.f32 %v23530_v50, %v23530_v50  ;;  %v6414_v9 = vmul.f32 %v23532_v51, %v23532_v51 }
 0x796   :  { %26980 = vst [vmem:[#allocation7_spill] sm:$0xff] %v23534_v52  ;;  %v6403_v57 = vsel %vm6402_vm3, %v23534_v52, 0.0  ;;  %v6416_v59 = vmul.f32 %v23534_v52, %v23534_v52 }
 0x797   :  { %v23542_v27 = vpop.f32.mrb[26].mxu0 }
 0x798   :  { %v6378_v60 = vsel %vm6377_vm4, %v23542_v27, 0.0  ;;  %v6417_v62 = vmul.f32 %v23542_v27, %v23542_v27  ;;  %v23552_v63 = vpop.f32.mrb[26].mxu1  ;;  %v23554_v7 = vpop.f32.mrb[27].mxu0  ;;  %v6445_v8 = vsel %vm6402_vm3, %v6416_v59, 0.0 }
 0x799   :  { %26981 = vst [vmem:[#allocation8_spill] sm:$0xff] %v23552_v63  ;;  %26982 = vst [vmem:[#allocation9_spill] sm:$0xff] %v23554_v7  ;;  %v6379_v32 = vadd.f32 %v6378_v60, %v23528_v48  ;;  %v6394_v54 = vsel %vm6377_vm4, %v23552_v63, 0.0  ;;  %v6419_v39 = vmul.f32 %v23552_v63, %v23552_v63  ;;  %v6386_v0 = vsel %vm6377_vm4, %v23554_v7, 0.0  ;;  %v23563_v2 = vpop.f32.mrb[27].mxu1 }
 0x79a   :  { %26983 = vst [vmem:[#allocation10_spill] sm:$0xff] %v23563_v2  ;;  %v6421_v3 = vsel %vm6377_vm4, %v6417_v62, 0.0  ;;  %v6395_v14 = vadd.f32 %v6394_v54, %v23530_v50  ;;  %v6387_v16 = vadd.f32 %v6386_v0, %v23532_v51  ;;  %v6418_v17 = vmul.f32 %v23554_v7, %v23554_v7 }
 0x79b   :  { %v6380_v18 = vrot.slane %v6379_v32, 4  ;;  %v23570_v22 = vadd.f32 %v6421_v3, %v6413_v53  ;;  %v6437_v1 = vsel %vm6377_vm4, %v6419_v39, 0.0  ;;  %v6405_v28 = vsel %vm6404_vm5, %v23563_v2, 0.0 }
 0x79c   :  { %v6396_v30 = vrot.slane %v6395_v14, 4  ;;  %v23575_v35 = vadd.f32 %v6437_v1, %v6415_v55  ;;  %v6388_v38 = vrot.slane %v6387_v16, 4  ;;  %v6429_v13 = vsel %vm6377_vm4, %v6418_v17, 0.0 }
 0x79d   :  { %v6381_v42 = vadd.f32 %v6380_v18, %v6379_v32  ;;  %v6430_v45 = vadd.f32 %v6429_v13, %v6414_v9  ;;  %v6406_v60 = vadd.f32 %v6405_v28, %v6403_v57  ;;  %v6420_v53 = vmul.f32 %v23563_v2, %v23563_v2 }
 0x79e   :  { %v6397_v62 = vadd.f32 %v6396_v30, %v6395_v14  ;;  %v6389_v54 = vadd.f32 %v6388_v38, %v6387_v16 }
 0x79f   :  { %v6382_v0 = vrot.slane %v6381_v42, 2  ;;  %v6431_v3 = vrot.slane %v6430_v45, 4  ;;  %v6407_v39 = vrot.slane %v6406_v60, 4  ;;  %v6446_v55 = vsel %vm6404_vm5, %v6420_v53, 0.0 }
 0x7a0   :  { %v6398_v49 = vrot.slane %v6397_v62, 2  ;;  %v6390_v1 = vrot.slane %v6389_v54, 2  ;;  %v6447_v17 = vadd.f32 %v6446_v55, %v6445_v8  ;;  %v6822_v55 = vld [vmem:[%s26931_s7 + $0x78] sm:$0xff] }
 0x7a1   :  { %v6383_v20 = vadd.f32 %v6382_v0, %v6381_v42  ;;  %v6408_v52 = vadd.f32 %v6407_v39, %v6406_v60  ;;  %v6432_v57 = vadd.f32 %v6431_v3, %v6430_v45  ;;  %v6827_v3 = vld [vmem:[%s26931_s7 + $0xa0] sm:$0xff]  ;;  %v6818_v39 = vld [vmem:[%s26931_s7 + $0x58] sm:$0xff] }
 0x7a2   :  { %v6399_v32 = vadd.f32 %v6398_v49, %v6397_v62  ;;  %v6391_v9 = vadd.f32 %v6390_v1, %v6389_v54  ;;  %v6448_v18 = vrot.slane %v6447_v17, 4  ;;  %v6823_v54 = vld [vmem:[%s26931_s7 + $0x80] sm:$0xff] }
 0x7a3   :  { %v6384_v14 = vrot.slane %v6383_v20, 1  ;;  %v6409_v16 = vrot.slane %v6408_v52, 2  ;;  %v6433_v30 = vrot.slane %v6432_v57, 2  ;;  %v23698_v1 = vpack.c.bf16 %v6827_v3, %v6823_v54  ;;  %v19925_v54 = vld [vmem:[%s26933_s9 + $0x2c] ss:$16 sps:$4 sm:$0xff]  }
 0x7a4   :  { %v6392_v28 = vrot.slane %v6391_v9, 1  ;;  %v6449_v13 = vadd.f32 %v6448_v18, %v6447_v17  ;;  %v6400_v2 = vrot.slane %v6399_v32, 1  ;;  %v18469_v17 = vpack.c.bf16 %v6822_v55, %v6818_v39  ;;  %v6831_v18 = vld [vmem:[%s26931_s7 + $0xc0] sm:$0xff]  ;;  %v19931_v3 = vld [vmem:[%s26933_s9 + $0x4c] ss:$16 sps:$4 sm:$0xff]  }
 0x7a5   :  { %v6410_v38 = vadd.f32 %v6409_v16, %v6408_v52  ;;  %v6434_v59 = vadd.f32 %v6433_v30, %v6432_v57  ;;  %v6385_v50 = vadd.f32 %v6384_v14, %v6383_v20  ;;  %v26984_v52 = vmov 0.0|0.0   ;;  %v6832_v57 = vld [vmem:[%s26931_s7 + $0xc8] sm:$0xff] }
 0x7a6   :  { %v6393_v63 = vadd.f32 %v6392_v28, %v6391_v9  ;;  %v6450_v7 = vrot.slane %v6449_v13, 2  ;;  %v6401_v49 = vadd.f32 %v6400_v2, %v6399_v32  ;;  %v6817_v32 = vld [vmem:[%s26931_s7 + $0x50] sm:$0xff]  ;;  %v6836_v16 = vld [vmem:[%s26931_s7 + $0xe8] sm:$0xff]  ;;  %v6835_v28 = vld [vmem:[%s26931_s7 + $0xe0] sm:$0xff] }
 0x7a7   :  { %v6411_v53 = vrot.slane %v6410_v38, 1  ;;  %v6435_v42 = vrot.slane %v6434_v59, 1  ;;  %v6821_v9 = vld [vmem:[%s26931_s7 + $0x70] sm:$0xff]  ;;  %v23720_v30 = vpack.c.bf16 %v6836_v16, %v6832_v57  ;;  %v19929_v39 = vld [vmem:[%s26933_s9 + $0x48] ss:$16 sps:$4 sm:$0xff]  }
 0x7a8   :  { %6577 = vmatprep.mubr.f32.mxu0 %v6393_v63  ;;  %v6451_v8 = vadd.f32 %v6450_v7, %v6449_v13  ;;  %v6813_v63 = vld [vmem:[%s26931_s7 + $0x30] sm:$0xff]  ;;  %v18471_v14 = vpack.c.bf16 %v6821_v9, %v6817_v32  ;;  %v6830_v13 = vld [vmem:[%s26931_s7 + $0xb8] sm:$0xff] }
 0x7a9   :  { %v6412_v60 = vadd.f32 %v6411_v53, %v6410_v38  ;;  %6578 = vmatmul.mubr.f32.vlgmr.msra.gmra.mrb[40].mxu0 %v6385_v50  ;;  %v6436_v45 = vadd.f32 %v6435_v42, %v6434_v59  ;;  %v6809_v50 = vld [vmem:[%s26931_s7 + $0x10] sm:$0xff]  ;;  %v6826_v38 = vld [vmem:[%s26931_s7 + $0x98] sm:$0xff]  ;;  %v23732_v53 = vpack.c.bf16 %v6835_v28, %v6831_v18 }
 0x7aa   :  { %18384 = vmatpush3.bf16.msra.mxu0 %v23293_v19  ;;  %v6452_v62 = vrot.slane %v6451_v8, 1  ;;  %v6423_v19 = vrot.slane %v23570_v22, 4  ;;  %v23675_v2 = vpack.c.bf16 %v6813_v63, %v6809_v50  ;;  %v6825_v59 = vld [vmem:[%s26931_s7 + $0x90] sm:$0xff]  ;;  %v18473_v42 = vpack.c.bf16 %v6830_v13, %v6826_v38  ;;  %v6804_v63 = vld [vmem:[%s26930_s6] sm:$0x1] }
 0x7ab   :  { %16453 = vmatprep.mubr.msk.f32.mxu1 %vm6402_vm3, %v6412_v60  ;;  %18386 = vmatprep.subr.bf16.mxu0 %v23297_v21  ;;  %v6829_v60 = vld [vmem:[%s26931_s7 + $0xb0] sm:$0xff]  ;;  %v19937_v55 = vld [vmem:[%s26933_s9 + $0x6c] ss:$16 sps:$4 sm:$0xff]  }
 0x7ac   :  { %6648 = vmatmul.mubr.f32.vlgmr.msra.gmra.mrb[40].mxu1 %v6401_v49  ;;  %6721 = vmatprep.mubr.f32.mxu0 %v6436_v45  ;;  %v6453_v20 = vadd.f32 %v6452_v62, %v6451_v8  ;;  %v18475_v8 = vpack.c.bf16 %v6829_v60, %v6825_v59  ;;  %v6834_v49 = vld [vmem:[%s26931_s7 + $0xd8] sm:$0xff]  ;;  %v19928_v57 = vld [vmem:[%s26933_s9 + $0x44] ss:$16 sps:$4 sm:$0xff]   ;;  %v19932_v18 = vld [vmem:[%s26933_s9 + $0x60] ss:$16 sps:$4 sm:$0xff]  }
 0x7ad   :  { %18415 = vmatpush1.bf16.msra.mxu1 %v23271_v5  ;;  %v6424_v5 = vadd.f32 %v6423_v19, %v23570_v22  ;;  %v6824_v22 = vld [vmem:[%s26931_s7 + $0x88] sm:$0xff]  ;;  %v6838_v45 = vld [vmem:[%s26931_s7 + $0xf8] sm:$0xff]  ;;  %v6837_v19 = vld [vmem:[%s26931_s7 + $0xf0] sm:$0xff] }
 0x7ae   :  { %18416 = vmatprep.subr.bf16.mxu1 %v26984_v52  ;;  %18388 = vmatpush3.bf16.msra.mxu0 %v23325_v31  ;;  %v18477_v62 = vpack.c.bf16 %v6838_v45, %v6834_v49  ;;  %v19943_v32 = vld [vmem:[%s26933_s9 + $0x8c] ss:$16 sps:$4 sm:$0xff]   ;;  %v19934_v16 = vld [vmem:[%s26933_s9 + $0x64] ss:$16 sps:$4 sm:$0xff]   ;;  %v19944_v13 = vld [vmem:[%s26933_s9 + $0xa0] ss:$16 sps:$4 sm:$0xff]  }
 0x7af   :  { %16454 = vmatprep.mubr.msk.f32.mxu1 %vm6402_vm3, %v6453_v20  ;;  %18390 = vmatprep.subr.bf16.mxu0 %v23328_v33  ;;  %v6425_v21 = vrot.slane %v6424_v5, 2  ;;  %v6439_v33 = vrot.slane %v23575_v35, 4  ;;  %v6833_v20 = vld [vmem:[%s26931_s7 + $0xd0] sm:$0xff]  ;;  %v19949_v9 = vld [vmem:[%s26933_s9 + $0xac] ss:$16 sps:$4 sm:$0xff]  }
 0x7b0   :  { %v19940_v28 = vld [vmem:[%s26933_s9 + $0x84] ss:$16 sps:$4 sm:$0xff]   ;;  %v19953_v60 = vld [vmem:[%s26933_s9 + $0xc8] ss:$16 sps:$4 sm:$0xff]   ;;  %v19961_v49 = vld [vmem:[%s26933_s9 + $0xec] ss:$16 sps:$4 sm:$0xff]  }
 0x7b1   :  { %18418 = vmatpush1.bf16.msra.mxu1 %v23306_v11  ;;  %v6426_v11 = vadd.f32 %v6425_v21, %v6424_v5  ;;  %v18479_v5 = vpack.c.bf16 %v6837_v19, %v6833_v20  ;;  %v19919_v21 = vld [vmem:[%s26933_s9 + $0xc] ss:$16 sps:$4 sm:$0xff]   ;;  %v19946_v38 = vld [vmem:[%s26933_s9 + $0xa4] ss:$16 sps:$4 sm:$0xff]   ;;  %v19956_v45 = vld [vmem:[%s26933_s9 + $0xe0] ss:$16 sps:$4 sm:$0xff]  }
 0x7b2   :  { %18419 = vmatprep.subr.bf16.mxu1 %v26984_v52  ;;  %18392 = vmatpush3.bf16.msra.mxu0 %v23347_v40  ;;  %v6440_v40 = vadd.f32 %v6439_v33, %v23575_v35  ;;  %v6828_v35 = vld [vmem:[%s26931_s7 + $0xa8] sm:$0xff]  ;;  %v19952_v59 = vld [vmem:[%s26933_s9 + $0xc4] ss:$16 sps:$4 sm:$0xff]   ;;  %v19962_v19 = vld [vmem:[%s26933_s9 + $0x100] ss:$16 sps:$4 sm:$0xff]  }
 0x7b3   :  { %18394 = vmatprep.subr.bf16.mxu0 %v23393_v26  ;;  %v6427_v31 = vrot.slane %v6426_v11, 1  ;;  %v23687_v0 = vpack.c.bf16 %v6828_v35, %v6824_v22  ;;  %v19917_v22 = vld [vmem:[%s26933_s9 + $0x8] ss:$16 sps:$4 sm:$0xff]   ;;  %v19964_v20 = vld [vmem:[%s26933_s9 + $0x104] ss:$16 sps:$4 sm:$0xff]  }
 0x7b5   :  { %18421 = vmatpush1.bf16.msra.mxu1 %v23337_v37  ;;  %v6428_v37 = vadd.f32 %v6427_v31, %v6426_v11 }
 0x7b6   :  { %18422 = vmatprep.subr.bf16.mxu1 %v26984_v52  ;;  %18396 = vmatpush3.bf16.msra.mxu0 %v23404_v56  ;;  %v6808_v56 = vld [vmem:[%s26931_s7 + $0x8] sm:$0xff] }
 0x7b7   :  { %18398 = vmatprep.subr.bf16.mxu0 %v23421_v61 }
 0x7b9   :  { %18424 = vmatpush1.bf16.msra.mxu1 %v23351_v41  ;;  %v26985_v41 = vmov 0.0  }
 0x7ba   :  { %18425 = vmatprep.subr.bf16.mxu1 %v26984_v52  ;;  %18400 = vmatpush3.bf16.msra.mxu0 %v23432_v34  ;;  %v6807_v34 = vld [vmem:[%s26931_s7] sm:$0xff] }
 0x7bb   :  { %18402 = vmatprep.subr.bf16.mxu0 %v23448_v12 }
 0x7bd   :  { %18427 = vmatpush1.bf16.msra.mxu1 %v23362_v44  ;;  %v6441_v44 = vrot.slane %v6440_v40, 2 }
 0x7be   :  { %18428 = vmatprep.subr.bf16.mxu1 %v26984_v52  ;;  %18404 = vmatpush3.bf16.msra.mxu0 %v23460_v4  ;;  %v6816_v4 = vld [vmem:[%s26931_s7 + $0x48] sm:$0xff] }
 0x7bf   :  { %18406 = vmatprep.subr.bf16.mxu0 %v23476_v6 }
 0x7c1   :  { %18430 = vmatpush1.bf16.msra.mxu1 %v23372_v47  ;;  %v6442_v47 = vadd.f32 %v6441_v44, %v6440_v40 }
 0x7c2   :  { %18431 = vmatprep.subr.bf16.mxu1 %v26984_v52  ;;  %18408 = vmatpush3.bf16.msra.mxu0 %v23488_v24  ;;  %v6815_v24 = vld [vmem:[%s26931_s7 + $0x40] sm:$0xff] }
 0x7c3   :  { %18410 = vmatprep.subr.bf16.mxu0 %v23504_v36  ;;  %v6810_v36 = vld [vmem:[%s26931_s7 + $0x18] sm:$0xff] }
 0x7c5   :  { %18433 = vmatpush1.bf16.msra.mxu1 %v23382_v25  ;;  %v6443_v25 = vrot.slane %v6442_v47, 1 }
 0x7c6   :  { %18434 = vmatprep.subr.bf16.mxu1 %v26984_v52  ;;  %18412 = vmatpush3.bf16.msra.mxu0 %v23516_v43 }
 0x7c7   :  { %v6444_v26 = vadd.f32 %v6443_v25, %v6442_v47 }
 0x7c9   :  { %18436 = vmatpush1.bf16.msra.mxu1 %v23410_v58  ;;  %6722 = vmatmul.mubr.f32.vlgmr.msra.gmra.mrb[42].mxu0 %v6428_v37  ;;  %v6812_v58 = vld [vmem:[%s26931_s7 + $0x28] sm:$0xff] }
 0x7ca   :  { %18437 = vmatprep.subr.bf16.mxu1 %v26984_v52  ;;  %6906 = vmatprep.mubr.f32.mxu0 %v26985_v41  ;;  %v23634_v61 = vpack.c.bf16 %v6812_v58, %v6808_v56 }
 0x7cc   :  { %18450 = vmatprep.subr.bf16.mxu0 %v23634_v61 }
 0x7cd   :  { %18439 = vmatpush1.bf16.msra.mxu1 %v23438_v23  ;;  %v6811_v23 = vld [vmem:[%s26931_s7 + $0x20] sm:$0xff] }
 0x7ce   :  { %18440 = vmatprep.subr.bf16.mxu1 %v26984_v52  ;;  %v23642_v12 = vpack.c.bf16 %v6811_v23, %v6807_v34 }
 0x7d0   :  { %18452 = vmatpush1.bf16.msra.mxu0 %v23642_v12 }
 0x7d1   :  { %18442 = vmatpush1.bf16.msra.mxu1 %v23466_v15  ;;  %v6820_v15 = vld [vmem:[%s26931_s7 + $0x68] sm:$0xff] }
 0x7d2   :  { %18443 = vmatprep.subr.bf16.mxu1 %v26984_v52  ;;  %v23652_v6 = vpack.c.bf16 %v6820_v15, %v6816_v4 }
 0x7d4   :  { %18454 = vmatprep.subr.bf16.mxu0 %v23652_v6 }
 0x7d5   :  { %18445 = vmatpush1.bf16.msra.mxu1 %v23494_v29  ;;  %v6819_v29 = vld [vmem:[%s26931_s7 + $0x60] sm:$0xff] }
 0x7d6   :  { %18446 = vmatprep.subr.bf16.mxu1 %v26984_v52  ;;  %v23663_v43 = vpack.c.bf16 %v6819_v29, %v6815_v24 }
 0x7d8   :  { %18456 = vmatpush1.bf16.msra.mxu0 %v23663_v43 }
 0x7d9   :  { %18448 = vmatpush1.bf16.msra.mxu1 %v23522_v46  ;;  %v6814_v46 = vld [vmem:[%s26931_s7 + $0x38] sm:$0xff]  ;;  %18458 = vmatprep.subr.bf16.mxu0 %v23687_v0 }
 0x7da   :  { %v18465_v7 = vpack.c.bf16 %v6814_v46, %v6810_v36  ;;  %v6800_v36 = vld [vmem:[%s26929_s5] sm:$0x1] }
 0x7dc   :  { %6792 = vmatmul.mubr.f32.vlgmr.msra.gmra.mrb[42].mxu1 %v6444_v26  ;;  %18498 = vmatprep.subr.bf16.mxu1 %v18465_v7 }
 0x7dd   :  { %7122 = vmatprep.mubr.f32.mxu1 %v26985_v41  ;;  %18500 = vmatpush1.bf16.msra.mxu1 %v23675_v2 }
 0x7de   :  { %18502 = vmatprep.subr.bf16.mxu1 %v18469_v17  ;;  %18460 = vmatpush1.bf16.msra.mxu0 %v23698_v1 }
 0x7df   :  { %18462 = vmatprep.subr.bf16.mxu0 %v23720_v30 }
 0x7e1   :  { %18504 = vmatpush1.bf16.msra.mxu1 %v18471_v14 }
 0x7e2   :  { %18506 = vmatprep.subr.bf16.mxu1 %v18473_v42  ;;  %18464 = vmatpush1.bf16.msra.mxu0 %v23732_v53 }
 0x7e3   :  { %18466 = vmatprep.subr.bf16.mxu0 %v18465_v7 }
 0x7e5   :  { %18508 = vmatpush1.bf16.msra.mxu1 %v18475_v8 }
 0x7e6   :  { %18510 = vmatprep.subr.bf16.mxu1 %v18477_v62 }
 0x7e9   :  { %18512 = vmatpush1.bf16.msra.mxu1 %v18479_v5 }
 0x7ea   :  { %7950 = vmatprep.subr.bf16.mxu1 %v19919_v21  ;;  %v19967_v21 = vld [vmem:[%s26933_s9 + $0x10c] ss:$16 sps:$4 sm:$0xff]  }
 0x87c   :  { %v17933_v11 = vpop.f32.mrb[40].mxu0 }
 0x87d   :  { %v17934_v31 = vpop.f32.mrb[41].mxu0 }
 0x87e   :  { %v17935_v33 = vadd.f32 %v17934_v31, %v17933_v11  ;;  %v19970_v11 = vld [vmem:[%s26933_s9 + $0x124] ss:$16 sps:$4 sm:$0xff]   ;;  %v19973_v31 = vld [vmem:[%s26933_s9 + $0x12c] ss:$16 sps:$4 sm:$0xff]  }
 0x87f   :  { %v6649_v37 = vpop.f32.mrb[40].mxu1 }
 0x880   :  { %v6650_v40 = vadd.f32 %v17935_v33, %v6649_v37  ;;  %v6651_v44 = vpop.f32.mrb[41].mxu1  ;;  %v19968_v33 = vld [vmem:[%s26933_s9 + $0x120] ss:$16 sps:$4 sm:$0xff]   ;;  %v19971_v37 = vld [vmem:[%s26933_s9 + $0x128] ss:$16 sps:$4 sm:$0xff]  }
 0x881   :  { %v19979_v44 = vld [vmem:[%s26933_s9 + $0x14c] ss:$16 sps:$4 sm:$0xff]  }
 0x882   :  { %v6653_v56 = vmul.f32 0.010204081, %v6650_v40  ;;  %v19976_v40 = vld [vmem:[%s26933_s9 + $0x144] ss:$16 sps:$4 sm:$0xff]  }
 0x884   :  { %v6798_v15 = vmul.f32 %v6653_v56, %v6653_v56 }
 0x89c   :  { %v17968_v47 = vpop.f32.mrb[42].mxu0 }
 0x89d   :  { %v17969_v25 = vpop.f32.mrb[43].mxu0 }
 0x89e   :  { %v17970_v26 = vadd.f32 %v17969_v25, %v17968_v47  ;;  %v19974_v47 = vld [vmem:[%s26933_s9 + $0x140] ss:$16 sps:$4 sm:$0xff]   ;;  %v19977_v25 = vld [vmem:[%s26933_s9 + $0x148] ss:$16 sps:$4 sm:$0xff]  }
 0x8af   :  { %v6793_v58 = vpop.f32.mrb[42].mxu1 }
 0x8b0   :  { %v6794_v34 = vadd.f32 %v17970_v26, %v6793_v58  ;;  %v6795_v23 = vpop.f32.mrb[43].mxu1  ;;  %v19982_v26 = vld [vmem:[%s26933_s9 + $0x164] ss:$16 sps:$4 sm:$0xff]   ;;  %v19980_v58 = vld [vmem:[%s26933_s9 + $0x160] ss:$16 sps:$4 sm:$0xff]  }
 0x8b1   :  { %v19988_v23 = vld [vmem:[%s26933_s9 + $0x184] ss:$16 sps:$4 sm:$0xff]  }
 0x8b2   :  { %v6797_v4 = vmul.f32 0.010204081, %v6794_v34  ;;  %v19983_v34 = vld [vmem:[%s26933_s9 + $0x168] ss:$16 sps:$4 sm:$0xff]  }
 0x8b4   :  { %v6799_v24 = vsub.f32 %v6797_v4, %v6798_v15  ;;  %v19991_v4 = vld [vmem:[%s26933_s9 + $0x18c] ss:$16 sps:$4 sm:$0xff]   ;;  %v19986_v15 = vld [vmem:[%s26933_s9 + $0x180] ss:$16 sps:$4 sm:$0xff]  }
 0x8b6   :  { %v6801_v29 = vadd.f32 1e-05, %v6799_v24  ;;  %v19989_v24 = vld [vmem:[%s26933_s9 + $0x188] ss:$16 sps:$4 sm:$0xff]  }
 0x8b8   :  { %20866 = vrsqrt.f32 %v6801_v29  ;;  %v19994_v29 = vld [vmem:[%s26933_s9 + $0x1a4] ss:$16 sps:$4 sm:$0xff]  }
 0x8c2   :  { %v20867_v46 = vpop.eup %20866 }
 0x8c3   :  { %v6803_v50 = vmul.f32 %v20867_v46, %v6800_v36  ;;  %v19992_v36 = vld [vmem:[%s26933_s9 + $0x1a0] ss:$16 sps:$4 sm:$0xff]   ;;  %v19995_v46 = vld [vmem:[%s26933_s9 + $0x1a8] ss:$16 sps:$4 sm:$0xff]  }
 0x8c5   :  { %16455 = vmatmul.mubr.msk.f32.vlgmr.msra.gmra.mrb[44].mxu0 %vm6402_vm3, %v6803_v50  ;;  %v6805_v7 = vmul.f32 %v6803_v50, %v6653_v56  ;;  %v19985_v56 = vld [vmem:[%s26933_s9 + $0x16c] ss:$16 sps:$4 sm:$0xff]  }
 0x8c6   :  { %18468 = vmatpush1.bf16.msra.mxu0 %v23675_v2  ;;  %6977 = vmatprep.mubr.f32.mxu0 %v26985_v41  ;;  %v19923_v2 = vld [vmem:[%s26933_s9 + $0x28] ss:$16 sps:$4 sm:$0xff]  }
 0x8c7   :  { %18470 = vmatprep.subr.bf16.mxu0 %v18469_v17  ;;  %v6806_v35 = vsub.f32 %v6804_v63, %v6805_v7  ;;  %v19935_v17 = vld [vmem:[%s26933_s9 + $0x68] ss:$16 sps:$4 sm:$0xff]   ;;  %v20000_v63 = vld [vmem:[%s26933_s9 + $0x1c4] ss:$16 sps:$4 sm:$0xff]   ;;  %v20003_v7 = vld [vmem:[%s26933_s9 + $0x1cc] ss:$16 sps:$4 sm:$0xff]  }
 0x8c9   :  { %16458 = vmatmul.mubr.msk.f32.vlgmr.msra.gmra.mrb[44].mxu1 %vm6402_vm3, %v6806_v35 }
 0x8ca   :  { %18472 = vmatpush1.bf16.msra.mxu0 %v18471_v14  ;;  %7951 = vmatpush1.bf16.msra.mxu1 %v19917_v22  ;;  %v19926_v14 = vld [vmem:[%s26933_s9 + $0x40] ss:$16 sps:$4 sm:$0xff]  }
 0x8cb   :  { %18474 = vmatprep.subr.bf16.mxu0 %v18473_v42  ;;  %7952 = vmatprep.subr.bf16.mxu1 %v19925_v54  ;;  %v19950_v42 = vld [vmem:[%s26933_s9 + $0xc0] ss:$16 sps:$4 sm:$0xff]   ;;  %v20006_v54 = vld [vmem:[%s26933_s9 + $0x1e4] ss:$16 sps:$4 sm:$0xff]  }
 0x8cc   :  { %v19998_v22 = vld [vmem:[%s26933_s9 + $0x1c0] ss:$16 sps:$4 sm:$0xff]  }
 0x8ce   :  { %18476 = vmatpush1.bf16.msra.mxu0 %v18475_v8  ;;  %7953 = vmatpush1.bf16.msra.mxu1 %v19923_v2  ;;  %v19958_v8 = vld [vmem:[%s26933_s9 + $0xe4] ss:$16 sps:$4 sm:$0xff]   ;;  %v20009_v2 = vld [vmem:[%s26933_s9 + $0x1ec] ss:$16 sps:$4 sm:$0xff]  }
 0x8cf   :  { %18478 = vmatprep.subr.bf16.mxu0 %v18477_v62  ;;  %7954 = vmatprep.subr.bf16.mxu1 %v19931_v3  ;;  %v19959_v62 = vld [vmem:[%s26933_s9 + $0xe8] ss:$16 sps:$4 sm:$0xff]   ;;  %v20004_v3 = vld [vmem:[%s26933_s9 + $0x1e0] ss:$16 sps:$4 sm:$0xff]  }
 0x8d2   :  { %18480 = vmatpush1.bf16.msra.mxu0 %v18479_v5  ;;  %7955 = vmatpush1.bf16.msra.mxu1 %v19929_v39  ;;  %v19965_v5 = vld [vmem:[%s26933_s9 + $0x108] ss:$16 sps:$4 sm:$0xff]  }
 0x8d3   :  { %18482 = vmatprep.subr.bf16.mxu0 %v23634_v61  ;;  %7956 = vmatprep.subr.bf16.mxu1 %v19937_v55  ;;  %v19941_v61 = vld [vmem:[%s26933_s9 + $0x88] ss:$16 sps:$4 sm:$0xff]   ;;  %v20012_v55 = vld [vmem:[%s26933_s9 + $0x204] ss:$16 sps:$4 sm:$0xff]  }
 0x8d4   :  { %v20007_v39 = vld [vmem:[%s26933_s9 + $0x1e8] ss:$16 sps:$4 sm:$0xff]  }
 0x8d5   :  { %16456 = vmatmul.mubr.msk.f32.vlgmr.msra.gmra.mrb[46].mxu0 %vm6402_vm3, %v6803_v50  ;;  %v19997_v50 = vld [vmem:[%s26933_s9 + $0x1ac] ss:$16 sps:$4 sm:$0xff]  }
 0x8d6   :  { %18484 = vmatpush1.bf16.msra.mxu0 %v23642_v12  ;;  %7051 = vmatprep.mubr.f32.mxu0 %v26985_v41  ;;  %v19947_v12 = vld [vmem:[%s26933_s9 + $0xa8] ss:$16 sps:$4 sm:$0xff]  }
 0x8d7   :  { %18486 = vmatprep.subr.bf16.mxu0 %v23652_v6  ;;  %7957 = vmatpush1.bf16.msra.mxu1 %v19935_v17  ;;  %v19916_v6 = vld [vmem:[%s26933_s9 + $0x4] ss:$16 sps:$4 sm:$0xff]   ;;  %v20015_v17 = vld [vmem:[%s26933_s9 + $0x20c] ss:$16 sps:$4 sm:$0xff]  }
 0x8d8   :  { %7958 = vmatprep.subr.bf16.mxu1 %v19943_v32 }
 0x8da   :  { %18488 = vmatpush1.bf16.msra.mxu0 %v23663_v43  ;;  %v19914_v43 = vld [vmem:[%s26933_s9] ss:$16 sps:$4 sm:$0xff]  }
 0x8db   :  { %18490 = vmatprep.subr.bf16.mxu0 %v23687_v0  ;;  %7959 = vmatpush1.bf16.msra.mxu1 %v19941_v61  ;;  %v19922_v0 = vld [vmem:[%s26933_s9 + $0x24] ss:$16 sps:$4 sm:$0xff]  }
 0x8dc   :  { %7960 = vmatprep.subr.bf16.mxu1 %v19949_v9 }
 0x8de   :  { %18492 = vmatpush1.bf16.msra.mxu0 %v23698_v1  ;;  %v19920_v1 = vld [vmem:[%s26933_s9 + $0x20] ss:$16 sps:$4 sm:$0xff]  }
 0x8df   :  { %18494 = vmatprep.subr.bf16.mxu0 %v23720_v30  ;;  %7961 = vmatpush1.bf16.msra.mxu1 %v19947_v12  ;;  %v19938_v30 = vld [vmem:[%s26933_s9 + $0x80] ss:$16 sps:$4 sm:$0xff]  }
 0x8e2   :  { %18496 = vmatpush1.bf16.msra.mxu0 %v23732_v53  ;;  %v19955_v53 = vld [vmem:[%s26933_s9 + $0xcc] ss:$16 sps:$4 sm:$0xff]  }
 0x8e3   :  { %7864 = vmatprep.subr.bf16.mxu0 %v19916_v6  ;;  %7962 = vmatprep.subr.bf16.mxu1 %v19955_v53 }
 0x8e4   :  { %7963 = vmatpush1.bf16.msra.mxu1 %v19953_v60  ;;  %v26989_v60 = vld [vmem:[#allocation7_spill] sm:$0xff] }
 0x8e5   :  { %16457 = vmatmul.mubr.msk.f32.vlgmr.msra.gmra.mrb[48].mxu0 %vm6402_vm3, %v6806_v35  ;;  %7964 = vmatprep.subr.bf16.mxu1 %v19961_v49  ;;  %v20001_v35 = vld [vmem:[%s26933_s9 + $0x1c8] ss:$16 sps:$4 sm:$0xff]  }
 0x8e6   :  { %7865 = vmatpush1.bf16.msra.mxu0 %v19914_v43 }
 0x8e7   :  { %7866 = vmatprep.subr.bf16.mxu0 %v19922_v0 }
 0x8e8   :  { %7965 = vmatpush1.bf16.msra.mxu1 %v19959_v62 }
 0x8e9   :  { %7966 = vmatprep.subr.bf16.mxu1 %v19967_v21 }
 0x8ea   :  { %7867 = vmatpush1.bf16.msra.mxu0 %v19920_v1  ;;  %v26986_v1 = vld [vmem:[#allocation9_spill] sm:$0xff] }
 0x8eb   :  { %7868 = vmatprep.subr.bf16.mxu0 %v19928_v57 }
 0x8ec   :  { %7967 = vmatpush1.bf16.msra.mxu1 %v19965_v5 }
 0x8ed   :  { %7968 = vmatprep.subr.bf16.mxu1 %v19973_v31 }
 0x8ee   :  { %7869 = vmatpush1.bf16.msra.mxu0 %v19926_v14 }
 0x8ef   :  { %7870 = vmatprep.subr.bf16.mxu0 %v19934_v16 }
 0x8f0   :  { %7969 = vmatpush1.bf16.msra.mxu1 %v19971_v37 }
 0x8f1   :  { %7970 = vmatprep.subr.bf16.mxu1 %v19979_v44 }
 0x8f2   :  { %7871 = vmatpush1.bf16.msra.mxu0 %v19932_v18 }
 0x8f3   :  { %7872 = vmatprep.subr.bf16.mxu0 %v19940_v28 }
 0x8f4   :  { %7971 = vmatpush1.bf16.msra.mxu1 %v19977_v25 }
 0x8f5   :  { %7972 = vmatprep.subr.bf16.mxu1 %v19985_v56 }
 0x8f6   :  { %7873 = vmatpush1.bf16.msra.mxu0 %v19938_v30 }
 0x8f7   :  { %7874 = vmatprep.subr.bf16.mxu0 %v19946_v38 }
 0x8f8   :  { %7973 = vmatpush1.bf16.msra.mxu1 %v19983_v34 }
 0x8f9   :  { %7974 = vmatprep.subr.bf16.mxu1 %v19991_v4 }
 0x8fa   :  { %7875 = vmatpush1.bf16.msra.mxu0 %v19944_v13 }
 0x8fb   :  { %7876 = vmatprep.subr.bf16.mxu0 %v19952_v59  ;;  %v26987_v59 = vld [vmem:[#allocation6_spill] sm:$0xff] }
 0x8fc   :  { %7975 = vmatpush1.bf16.msra.mxu1 %v19989_v24 }
 0x8fd   :  { %7976 = vmatprep.subr.bf16.mxu1 %v19997_v50  ;;  %v20013_v50 = vld [vmem:[%s26933_s9 + $0x208] ss:$16 sps:$4 sm:$0xff]  }
 0x8fe   :  { %7877 = vmatpush1.bf16.msra.mxu0 %v19950_v42  ;;  %v26988_v42 = vld [vmem:[#allocation8_spill] sm:$0xff] }
 0x8ff   :  { %7878 = vmatprep.subr.bf16.mxu0 %v19958_v8  ;;  %v26990_v8 = vld [vmem:[#allocation10_spill] sm:$0xff] }
 0x900   :  { %7977 = vmatpush1.bf16.msra.mxu1 %v19995_v46  ;;  %v20010_v46 = vld [vmem:[%s26933_s9 + $0x200] ss:$16 sps:$4 sm:$0xff]  }
 0x901   :  { %7978 = vmatprep.subr.bf16.mxu1 %v20003_v7  ;;  %v20021_v7 = vld [vmem:[%s26933_s9 + $0x22c] ss:$16 sps:$4 sm:$0xff]  }
 0x902   :  { %7879 = vmatpush1.bf16.msra.mxu0 %v19956_v45 }
 0x903   :  { %7880 = vmatprep.subr.bf16.mxu0 %v19964_v20 }
 0x904   :  { %7979 = vmatpush1.bf16.msra.mxu1 %v20001_v35  ;;  %v20019_v35 = vld [vmem:[%s26933_s9 + $0x228] ss:$16 sps:$4 sm:$0xff]  }
 0x905   :  { %7980 = vmatprep.subr.bf16.mxu1 %v20009_v2  ;;  %v20027_v2 = vld [vmem:[%s26933_s9 + $0x24c] ss:$16 sps:$4 sm:$0xff]  }
 0x906   :  { %7881 = vmatpush1.bf16.msra.mxu0 %v19962_v19 }
 0x907   :  { %7882 = vmatprep.subr.bf16.mxu0 %v19970_v11 }
 0x908   :  { %7981 = vmatpush1.bf16.msra.mxu1 %v20007_v39  ;;  %v20025_v39 = vld [vmem:[%s26933_s9 + $0x248] ss:$16 sps:$4 sm:$0xff]  }
 0x909   :  { %7993 = vmatprep.subr.bf16.mxu1 %v20015_v17  ;;  %v20033_v17 = vld [vmem:[%s26933_s9 + $0x26c] ss:$16 sps:$4 sm:$0xff]  }
 0x90a   :  { %7883 = vmatpush1.bf16.msra.mxu0 %v19968_v33 }
 0x90b   :  { %7884 = vmatprep.subr.bf16.mxu0 %v19976_v40 }
 0x90e   :  { %7885 = vmatpush1.bf16.msra.mxu0 %v19974_v47 }
 0x90f   :  { %7886 = vmatprep.subr.bf16.mxu0 %v19982_v26 }
 0x912   :  { %7887 = vmatpush1.bf16.msra.mxu0 %v19980_v58 }
 0x913   :  { %7888 = vmatprep.subr.bf16.mxu0 %v19988_v23 }
 0x916   :  { %7889 = vmatpush1.bf16.msra.mxu0 %v19986_v15 }
 0x917   :  { %7890 = vmatprep.subr.bf16.mxu0 %v19994_v29 }
 0x91a   :  { %7891 = vmatpush1.bf16.msra.mxu0 %v19992_v36 }
 0x91b   :  { %7892 = vmatprep.subr.bf16.mxu0 %v20000_v63  ;;  %v20018_v63 = vld [vmem:[%s26933_s9 + $0x224] ss:$16 sps:$4 sm:$0xff]  }
 0x91e   :  { %7893 = vmatpush1.bf16.msra.mxu0 %v19998_v22  ;;  %v20016_v22 = vld [vmem:[%s26933_s9 + $0x220] ss:$16 sps:$4 sm:$0xff]  }
 0x91f   :  { %7894 = vmatprep.subr.bf16.mxu0 %v20006_v54  ;;  %v20024_v54 = vld [vmem:[%s26933_s9 + $0x244] ss:$16 sps:$4 sm:$0xff]  }
 0x922   :  { %7895 = vmatpush1.bf16.msra.mxu0 %v20004_v3  ;;  %v20022_v3 = vld [vmem:[%s26933_s9 + $0x240] ss:$16 sps:$4 sm:$0xff]  }
 0x923   :  { %7907 = vmatprep.subr.bf16.mxu0 %v20012_v55  ;;  %v20030_v55 = vld [vmem:[%s26933_s9 + $0x264] ss:$16 sps:$4 sm:$0xff]  }
 0x998   :  { %v6908_v32 = vpop.f32.mrb[44].mxu0 }
 0x999   :  { %v7132_v61 = vrot.slane %v6908_v32, %v21341_v10  ;;  %v6910_v9 = vpop.f32.mrb[45].mxu0  ;;  %v20028_v32 = vld [vmem:[%s26933_s9 + $0x260] ss:$16 sps:$4 sm:$0xff]  }
 0x99a   :  { %v7136_v12 = vrot.slane %v6910_v9, %v21341_v10  ;;  %v20036_v9 = vld [vmem:[%s26933_s9 + $0x284] ss:$16 sps:$4 sm:$0xff]  }
 0x99b   :  { %v7145_v6 = vmul.f32 %v7132_v61, %v23528_v48  ;;  %v7149_v43 = vmul.f32 %v7132_v61, %v23542_v27  ;;  %v20031_v61 = vld [vmem:[%s26933_s9 + $0x268] ss:$16 sps:$4 sm:$0xff]  }
 0x99c   :  { %v7146_v0 = vmul.f32 %v7136_v12, %v23532_v51  ;;  %v7150_v57 = vmul.f32 %v7136_v12, %v26986_v1  ;;  %v7124_v14 = vpop.f32.mrb[44].mxu1  ;;  %v20039_v12 = vld [vmem:[%s26933_s9 + $0x28c] ss:$16 sps:$4 sm:$0xff]  }
 0x99d   :  { %v7126_v16 = vpop.f32.mrb[45].mxu1  ;;  %v7164_v13 = vrot.slane %v7124_v14, %v21341_v10  ;;  %v20045_v1 = vld [vmem:[%s26933_s9 + $0x2ac] ss:$16 sps:$4 sm:$0xff]   ;;  %v20043_v14 = vld [vmem:[%s26933_s9 + $0x2a8] ss:$16 sps:$4 sm:$0xff]  }
 0x99e   :  { %v7168_v27 = vrot.slane %v7126_v16, %v21341_v10  ;;  %v20048_v16 = vld [vmem:[%s26933_s9 + $0x2c4] ss:$16 sps:$4 sm:$0xff]  }
 0x9a8   :  { %v6979_v18 = vpop.f32.mrb[46].mxu0 }
 0x9a9   :  { %v7140_v28 = vrot.slane %v6979_v18, %v21341_v10  ;;  %v6981_v30 = vpop.f32.mrb[47].mxu0  ;;  %v20051_v18 = vld [vmem:[%s26933_s9 + $0x2cc] ss:$16 sps:$4 sm:$0xff]  }
 0x9aa   :  { %v7144_v38 = vrot.slane %v6981_v30, %v21341_v10  ;;  %v20049_v30 = vld [vmem:[%s26933_s9 + $0x2c8] ss:$16 sps:$4 sm:$0xff]  }
 0x9ab   :  { %v7147_v53 = vmul.f32 %v7140_v28, %v26987_v59  ;;  %v7151_v48 = vmul.f32 %v7140_v28, %v26988_v42  ;;  %v20046_v28 = vld [vmem:[%s26933_s9 + $0x2c0] ss:$16 sps:$4 sm:$0xff]   ;;  %v20060_v42 = vld [vmem:[%s26933_s9 + $0x304] ss:$16 sps:$4 sm:$0xff]  }
 0x9ac   :  { %v7148_v51 = vmul.f32 %v7144_v38, %v26989_v60  ;;  %v7152_v49 = vmul.f32 %v7144_v38, %v26990_v8  ;;  %v20054_v38 = vld [vmem:[%s26933_s9 + $0x2e4] ss:$16 sps:$4 sm:$0xff]   ;;  %v20052_v59 = vld [vmem:[%s26933_s9 + $0x2e0] ss:$16 sps:$4 sm:$0xff]   ;;  %v20061_v60 = vld [vmem:[%s26933_s9 + $0x308] ss:$16 sps:$4 sm:$0xff]  }
 0x9ad   :  { %v7171_v45 = vadd.f32 %v7164_v13, %v7147_v53  ;;  %v7175_v62 = vadd.f32 %v7164_v13, %v7151_v48  ;;  %v20057_v13 = vld [vmem:[%s26933_s9 + $0x2ec] ss:$16 sps:$4 sm:$0xff]   ;;  %v20055_v53 = vld [vmem:[%s26933_s9 + $0x2e8] ss:$16 sps:$4 sm:$0xff]  }
 0x9ae   :  { %v7172_v20 = vadd.f32 %v7168_v27, %v7148_v51  ;;  %v7176_v19 = vadd.f32 %v7168_v27, %v7152_v49  ;;  %v20063_v48 = vld [vmem:[%s26933_s9 + $0x30c] ss:$16 sps:$4 sm:$0xff]   ;;  %v20058_v27 = vld [vmem:[%s26933_s9 + $0x300] ss:$16 sps:$4 sm:$0xff]   ;;  %v20066_v51 = vld [vmem:[%s26933_s9 + $0x324] ss:$16 sps:$4 sm:$0xff]  }
 0x9af   :  { %v7179_v5 = vmax.f32 %v7171_v45, 0.0  ;;  %v7183_v21 = vmax.f32 %v7175_v62, 0.0  ;;  %v20069_v8 = vld [vmem:[%s26933_s9 + $0x32c] ss:$16 sps:$4 sm:$0xff]   ;;  %v20064_v49 = vld [vmem:[%s26933_s9 + $0x320] ss:$16 sps:$4 sm:$0xff]  }
 0x9b0   :  { %v7180_v11 = vmax.f32 %v7172_v20, 0.0  ;;  %v7184_v31 = vmax.f32 %v7176_v19, 0.0  ;;  %v20067_v45 = vld [vmem:[%s26933_s9 + $0x328] ss:$16 sps:$4 sm:$0xff]   ;;  %v20072_v62 = vld [vmem:[%s26933_s9 + $0x344] ss:$16 sps:$4 sm:$0xff]  }
 0x9b1   :  { %v23984_v33 = vpack.c.bf16 %v7183_v21, %v7179_v5  ;;  %v20075_v20 = vld [vmem:[%s26933_s9 + $0x34c] ss:$16 sps:$4 sm:$0xff]   ;;  %v20070_v19 = vld [vmem:[%s26933_s9 + $0x340] ss:$16 sps:$4 sm:$0xff]   ;;  %v20073_v5 = vld [vmem:[%s26933_s9 + $0x348] ss:$16 sps:$4 sm:$0xff]  }
 0x9b2   :  { %v23986_v37 = vpack.c.bf16 %v7184_v31, %v7180_v11  ;;  %v20078_v21 = vld [vmem:[%s26933_s9 + $0x364] ss:$16 sps:$4 sm:$0xff]   ;;  %v20081_v11 = vld [vmem:[%s26933_s9 + $0x36c] ss:$16 sps:$4 sm:$0xff]   ;;  %v20076_v31 = vld [vmem:[%s26933_s9 + $0x360] ss:$16 sps:$4 sm:$0xff]  }
 0x9b8   :  { %v7053_v40 = vpop.f32.mrb[48].mxu0 }
 0x9b9   :  { %v7156_v44 = vrot.slane %v7053_v40, %v21341_v10  ;;  %v7055_v47 = vpop.f32.mrb[49].mxu0  ;;  %v20079_v40 = vld [vmem:[%s26933_s9 + $0x368] ss:$16 sps:$4 sm:$0xff]  }
 0x9ba   :  { %v7160_v25 = vrot.slane %v7055_v47, %v21341_v10  ;;  %v20087_v47 = vld [vmem:[%s26933_s9 + $0x38c] ss:$16 sps:$4 sm:$0xff]  }
 0x9bb   :  { %v7169_v26 = vadd.f32 %v7156_v44, %v7145_v6  ;;  %v7173_v56 = vadd.f32 %v7156_v44, %v7149_v43  ;;  %v20034_v6 = vld [vmem:[%s26933_s9 + $0x280] ss:$16 sps:$4 sm:$0xff]   ;;  %v20037_v43 = vld [vmem:[%s26933_s9 + $0x288] ss:$16 sps:$4 sm:$0xff]   ;;  %v20084_v44 = vld [vmem:[%s26933_s9 + $0x384] ss:$16 sps:$4 sm:$0xff]  }
 0x9bc   :  { %v7170_v58 = vadd.f32 %v7160_v25, %v7146_v0  ;;  %v7174_v34 = vadd.f32 %v7160_v25, %v7150_v57  ;;  %v20042_v0 = vld [vmem:[%s26933_s9 + $0x2a4] ss:$16 sps:$4 sm:$0xff]   ;;  %v20040_v57 = vld [vmem:[%s26933_s9 + $0x2a0] ss:$16 sps:$4 sm:$0xff]  }
 0x9bd   :  { %v7177_v23 = vmax.f32 %v7169_v26, 0.0  ;;  %v7181_v4 = vmax.f32 %v7173_v56, 0.0  ;;  %v20082_v25 = vld [vmem:[%s26933_s9 + $0x380] ss:$16 sps:$4 sm:$0xff]   ;;  %v20085_v26 = vld [vmem:[%s26933_s9 + $0x388] ss:$16 sps:$4 sm:$0xff]  }
 0x9be   :  { %v7178_v15 = vmax.f32 %v7170_v58, 0.0  ;;  %v7182_v24 = vmax.f32 %v7174_v34, 0.0  ;;  %v20090_v56 = vld [vmem:[%s26933_s9 + $0x3a4] ss:$16 sps:$4 sm:$0xff]   ;;  %v20093_v58 = vld [vmem:[%s26933_s9 + $0x3ac] ss:$16 sps:$4 sm:$0xff]  }
 0x9bf   :  { %v23990_v29 = vpack.c.bf16 %v7181_v4, %v7177_v23  ;;  %v20088_v34 = vld [vmem:[%s26933_s9 + $0x3a0] ss:$16 sps:$4 sm:$0xff]   ;;  %v20091_v23 = vld [vmem:[%s26933_s9 + $0x3a8] ss:$16 sps:$4 sm:$0xff]   ;;  %v20096_v4 = vld [vmem:[%s26933_s9 + $0x3c4] ss:$16 sps:$4 sm:$0xff]  }
 0x9c0   :  { %v23992_v36 = vpack.c.bf16 %v7182_v24, %v7178_v15  ;;  %v20099_v15 = vld [vmem:[%s26933_s9 + $0x3cc] ss:$16 sps:$4 sm:$0xff]   ;;  %v20094_v24 = vld [vmem:[%s26933_s9 + $0x3c0] ss:$16 sps:$4 sm:$0xff]  }
 0x9c2   :  { %7896 = vmatprep.mubr.bf16.mxu0 %v23992_v36  ;;  %7982 = vmatprep.mubr.bf16.mxu1 %v23992_v36 }
 0x9c3   :  { %7897 = vmatmul.mubr.bf16.vlgmr.msra.gmra.mrb[52].mxu0 %v23990_v29  ;;  %7983 = vmatmul.mubr.bf16.vlgmr.msra.gmra.mrb[48].mxu1 %v23990_v29 }
 0x9c4   :  { %7908 = vmatpush1.bf16.msra.mxu0 %v20010_v46  ;;  %7994 = vmatpush1.bf16.msra.mxu1 %v20013_v50  ;;  %v20097_v46 = vld [vmem:[%s26933_s9 + $0x3c8] ss:$16 sps:$4 sm:$0xff]   ;;  %v20102_v50 = vld [vmem:[%s26933_s9 + $0x3e4] ss:$16 sps:$4 sm:$0xff]  }
 0x9c5   :  { %16571 = vmatprep.mubr.msk.bf16.mxu0 %vm6402_vm3, %v23986_v37  ;;  %16572 = vmatprep.mubr.msk.bf16.mxu1 %vm6402_vm3, %v23986_v37 }
 0x9c6   :  { %7909 = vmatprep.subr.bf16.mxu0 %v20018_v63  ;;  %7995 = vmatprep.subr.bf16.mxu1 %v20021_v7  ;;  %v20105_v63 = vld [vmem:[%s26933_s9 + $0x3ec] ss:$16 sps:$4 sm:$0xff]   ;;  %v20100_v7 = vld [vmem:[%s26933_s9 + $0x3e0] ss:$16 sps:$4 sm:$0xff]  }
 0x9c8   :  { %7910 = vmatpush1.bf16.msra.mxu0 %v20016_v22  ;;  %7996 = vmatpush1.bf16.msra.mxu1 %v20019_v35  ;;  %v20103_v22 = vld [vmem:[%s26933_s9 + $0x3e8] ss:$16 sps:$4 sm:$0xff]   ;;  %v20108_v35 = vld [vmem:[%s26933_s9 + $0x404] ss:$16 sps:$4 sm:$0xff]  }
 0x9c9   :  { %7911 = vmatprep.subr.bf16.mxu0 %v20024_v54  ;;  %7997 = vmatprep.subr.bf16.mxu1 %v20027_v2  ;;  %v20111_v54 = vld [vmem:[%s26933_s9 + $0x40c] ss:$16 sps:$4 sm:$0xff]   ;;  %v20106_v2 = vld [vmem:[%s26933_s9 + $0x400] ss:$16 sps:$4 sm:$0xff]  }
 0x9cc   :  { %7912 = vmatpush1.bf16.msra.mxu0 %v20022_v3  ;;  %7998 = vmatpush1.bf16.msra.mxu1 %v20025_v39  ;;  %v20109_v3 = vld [vmem:[%s26933_s9 + $0x408] ss:$16 sps:$4 sm:$0xff]   ;;  %v20114_v39 = vld [vmem:[%s26933_s9 + $0x424] ss:$16 sps:$4 sm:$0xff]  }
 0x9cd   :  { %7913 = vmatprep.subr.bf16.mxu0 %v20030_v55  ;;  %7999 = vmatprep.subr.bf16.mxu1 %v20033_v17  ;;  %v20117_v55 = vld [vmem:[%s26933_s9 + $0x42c] ss:$16 sps:$4 sm:$0xff]   ;;  %v20112_v17 = vld [vmem:[%s26933_s9 + $0x420] ss:$16 sps:$4 sm:$0xff]  }
 0x9d0   :  { %7914 = vmatpush1.bf16.msra.mxu0 %v20028_v32  ;;  %8000 = vmatpush1.bf16.msra.mxu1 %v20031_v61  ;;  %v20115_v32 = vld [vmem:[%s26933_s9 + $0x428] ss:$16 sps:$4 sm:$0xff]   ;;  %v20120_v61 = vld [vmem:[%s26933_s9 + $0x444] ss:$16 sps:$4 sm:$0xff]  }
 0x9d1   :  { %7915 = vmatprep.subr.bf16.mxu0 %v20036_v9  ;;  %8001 = vmatprep.subr.bf16.mxu1 %v20039_v12  ;;  %v20123_v9 = vld [vmem:[%s26933_s9 + $0x44c] ss:$16 sps:$4 sm:$0xff]   ;;  %v20118_v12 = vld [vmem:[%s26933_s9 + $0x440] ss:$16 sps:$4 sm:$0xff]  }
 0x9d4   :  { %7916 = vmatpush1.bf16.msra.mxu0 %v20034_v6  ;;  %8002 = vmatpush1.bf16.msra.mxu1 %v20037_v43  ;;  %v20121_v6 = vld [vmem:[%s26933_s9 + $0x448] ss:$16 sps:$4 sm:$0xff]   ;;  %v20126_v43 = vld [vmem:[%s26933_s9 + $0x464] ss:$16 sps:$4 sm:$0xff]  }
 0x9d5   :  { %7917 = vmatprep.subr.bf16.mxu0 %v20042_v0  ;;  %8003 = vmatprep.subr.bf16.mxu1 %v20045_v1  ;;  %v20129_v0 = vld [vmem:[%s26933_s9 + $0x46c] ss:$16 sps:$4 sm:$0xff]   ;;  %v20124_v1 = vld [vmem:[%s26933_s9 + $0x460] ss:$16 sps:$4 sm:$0xff]  }
 0x9d8   :  { %7918 = vmatpush1.bf16.msra.mxu0 %v20040_v57  ;;  %8004 = vmatpush1.bf16.msra.mxu1 %v20043_v14  ;;  %v20127_v57 = vld [vmem:[%s26933_s9 + $0x468] ss:$16 sps:$4 sm:$0xff]   ;;  %v20132_v14 = vld [vmem:[%s26933_s9 + $0x484] ss:$16 sps:$4 sm:$0xff]  }
 0x9d9   :  { %7919 = vmatprep.subr.bf16.mxu0 %v20048_v16  ;;  %8005 = vmatprep.subr.bf16.mxu1 %v20051_v18  ;;  %v20135_v16 = vld [vmem:[%s26933_s9 + $0x48c] ss:$16 sps:$4 sm:$0xff]   ;;  %v20130_v18 = vld [vmem:[%s26933_s9 + $0x480] ss:$16 sps:$4 sm:$0xff]  }
 0x9dc   :  { %7920 = vmatpush1.bf16.msra.mxu0 %v20046_v28  ;;  %8006 = vmatpush1.bf16.msra.mxu1 %v20049_v30  ;;  %v20133_v28 = vld [vmem:[%s26933_s9 + $0x488] ss:$16 sps:$4 sm:$0xff]   ;;  %v20138_v30 = vld [vmem:[%s26933_s9 + $0x4a4] ss:$16 sps:$4 sm:$0xff]  }
 0x9dd   :  { %7921 = vmatprep.subr.bf16.mxu0 %v20054_v38  ;;  %8007 = vmatprep.subr.bf16.mxu1 %v20057_v13  ;;  %v20141_v38 = vld [vmem:[%s26933_s9 + $0x4ac] ss:$16 sps:$4 sm:$0xff]   ;;  %v20136_v13 = vld [vmem:[%s26933_s9 + $0x4a0] ss:$16 sps:$4 sm:$0xff]  }
 0x9e0   :  { %7922 = vmatpush1.bf16.msra.mxu0 %v20052_v59  ;;  %8008 = vmatpush1.bf16.msra.mxu1 %v20055_v53  ;;  %v20139_v59 = vld [vmem:[%s26933_s9 + $0x4a8] ss:$16 sps:$4 sm:$0xff]   ;;  %v20144_v53 = vld [vmem:[%s26933_s9 + $0x4c4] ss:$16 sps:$4 sm:$0xff]  }
 0x9e1   :  { %7923 = vmatprep.subr.bf16.mxu0 %v20060_v42  ;;  %8009 = vmatprep.subr.bf16.mxu1 %v20063_v48  ;;  %v20147_v42 = vld [vmem:[%s26933_s9 + $0x4cc] ss:$16 sps:$4 sm:$0xff]   ;;  %v20142_v48 = vld [vmem:[%s26933_s9 + $0x4c0] ss:$16 sps:$4 sm:$0xff]  }
 0x9e4   :  { %7924 = vmatpush1.bf16.msra.mxu0 %v20058_v27  ;;  %8010 = vmatpush1.bf16.msra.mxu1 %v20061_v60  ;;  %v20145_v27 = vld [vmem:[%s26933_s9 + $0x4c8] ss:$16 sps:$4 sm:$0xff]   ;;  %v20150_v60 = vld [vmem:[%s26933_s9 + $0x4e4] ss:$16 sps:$4 sm:$0xff]  }
 0x9e5   :  { %7925 = vmatprep.subr.bf16.mxu0 %v20066_v51  ;;  %8011 = vmatprep.subr.bf16.mxu1 %v20069_v8  ;;  %v20153_v51 = vld [vmem:[%s26933_s9 + $0x4ec] ss:$16 sps:$4 sm:$0xff]   ;;  %v20148_v8 = vld [vmem:[%s26933_s9 + $0x4e0] ss:$16 sps:$4 sm:$0xff]  }
 0x9e8   :  { %7926 = vmatpush1.bf16.msra.mxu0 %v20064_v49  ;;  %8012 = vmatpush1.bf16.msra.mxu1 %v20067_v45  ;;  %v20151_v49 = vld [vmem:[%s26933_s9 + $0x4e8] ss:$16 sps:$4 sm:$0xff]   ;;  %v20156_v45 = vld [vmem:[%s26933_s9 + $0x504] ss:$16 sps:$4 sm:$0xff]  }
 0x9e9   :  { %7927 = vmatprep.subr.bf16.mxu0 %v20072_v62  ;;  %8013 = vmatprep.subr.bf16.mxu1 %v20075_v20  ;;  %v20159_v62 = vld [vmem:[%s26933_s9 + $0x50c] ss:$16 sps:$4 sm:$0xff]   ;;  %v20154_v20 = vld [vmem:[%s26933_s9 + $0x500] ss:$16 sps:$4 sm:$0xff]  }
 0x9ec   :  { %7928 = vmatpush1.bf16.msra.mxu0 %v20070_v19  ;;  %8014 = vmatpush1.bf16.msra.mxu1 %v20073_v5  ;;  %v20157_v19 = vld [vmem:[%s26933_s9 + $0x508] ss:$16 sps:$4 sm:$0xff]   ;;  %v20162_v5 = vld [vmem:[%s26933_s9 + $0x524] ss:$16 sps:$4 sm:$0xff]  }
 0x9ed   :  { %7929 = vmatprep.subr.bf16.mxu0 %v20078_v21  ;;  %8015 = vmatprep.subr.bf16.mxu1 %v20081_v11  ;;  %v20165_v21 = vld [vmem:[%s26933_s9 + $0x52c] ss:$16 sps:$4 sm:$0xff]   ;;  %v20160_v11 = vld [vmem:[%s26933_s9 + $0x520] ss:$16 sps:$4 sm:$0xff]  }
 0x9f0   :  { %7930 = vmatpush1.bf16.msra.mxu0 %v20076_v31  ;;  %8016 = vmatpush1.bf16.msra.mxu1 %v20079_v40  ;;  %v20163_v31 = vld [vmem:[%s26933_s9 + $0x528] ss:$16 sps:$4 sm:$0xff]   ;;  %v20168_v40 = vld [vmem:[%s26933_s9 + $0x544] ss:$16 sps:$4 sm:$0xff]  }
 0x9f1   :  { %8713 = vmatprep.subr.bf16.mxu0 %v20084_v44  ;;  %8799 = vmatprep.subr.bf16.mxu1 %v20087_v47  ;;  %v20171_v44 = vld [vmem:[%s26933_s9 + $0x54c] ss:$16 sps:$4 sm:$0xff]   ;;  %v20166_v47 = vld [vmem:[%s26933_s9 + $0x540] ss:$16 sps:$4 sm:$0xff]  }
 0x9f3   :  { %7940 = vmatmul.mubr.bf16.vlgmr.msra.gmra.mrb[52].mxu0 %v23984_v33  ;;  %8026 = vmatmul.mubr.bf16.vlgmr.msra.gmra.mrb[48].mxu1 %v23984_v33 }
 0x9f4   :  { %8714 = vmatpush1.bf16.msra.mxu0 %v20082_v25  ;;  %8745 = vmatprep.mubr.bf16.mxu0 %v23992_v36  ;;  %v20169_v25 = vld [vmem:[%s26933_s9 + $0x548] ss:$16 sps:$4 sm:$0xff]  }
 0x9f5   :  { %8800 = vmatpush1.bf16.msra.mxu1 %v20085_v26  ;;  %8831 = vmatprep.mubr.bf16.mxu1 %v23992_v36  ;;  %v20174_v26 = vld [vmem:[%s26933_s9 + $0x564] ss:$16 sps:$4 sm:$0xff]  }
 0x9f6   :  { %8715 = vmatprep.subr.bf16.mxu0 %v20090_v56  ;;  %8801 = vmatprep.subr.bf16.mxu1 %v20093_v58  ;;  %v20177_v56 = vld [vmem:[%s26933_s9 + $0x56c] ss:$16 sps:$4 sm:$0xff]   ;;  %v20172_v58 = vld [vmem:[%s26933_s9 + $0x560] ss:$16 sps:$4 sm:$0xff]  }
 0x9f8   :  { %8716 = vmatpush1.bf16.msra.mxu0 %v20088_v34  ;;  %v20175_v34 = vld [vmem:[%s26933_s9 + $0x568] ss:$16 sps:$4 sm:$0xff]  }
 0x9f9   :  { %8802 = vmatpush1.bf16.msra.mxu1 %v20091_v23  ;;  %8717 = vmatprep.subr.bf16.mxu0 %v20096_v4  ;;  %v20180_v23 = vld [vmem:[%s26933_s9 + $0x584] ss:$16 sps:$4 sm:$0xff]   ;;  %v20183_v4 = vld [vmem:[%s26933_s9 + $0x58c] ss:$16 sps:$4 sm:$0xff]  }
 0x9fa   :  { %8803 = vmatprep.subr.bf16.mxu1 %v20099_v15  ;;  %v20178_v15 = vld [vmem:[%s26933_s9 + $0x580] ss:$16 sps:$4 sm:$0xff]  }
 0x9fc   :  { %8718 = vmatpush1.bf16.msra.mxu0 %v20094_v24  ;;  %v20181_v24 = vld [vmem:[%s26933_s9 + $0x588] ss:$16 sps:$4 sm:$0xff]  }
 0x9fd   :  { %8804 = vmatpush1.bf16.msra.mxu1 %v20097_v46  ;;  %8719 = vmatprep.subr.bf16.mxu0 %v20102_v50  ;;  %v20186_v46 = vld [vmem:[%s26933_s9 + $0x5a4] ss:$16 sps:$4 sm:$0xff]   ;;  %v20189_v50 = vld [vmem:[%s26933_s9 + $0x5ac] ss:$16 sps:$4 sm:$0xff]  }
 0x9fe   :  { %8805 = vmatprep.subr.bf16.mxu1 %v20105_v63  ;;  %v20184_v63 = vld [vmem:[%s26933_s9 + $0x5a0] ss:$16 sps:$4 sm:$0xff]  }
 0xa00   :  { %8720 = vmatpush1.bf16.msra.mxu0 %v20100_v7  ;;  %v20187_v7 = vld [vmem:[%s26933_s9 + $0x5a8] ss:$16 sps:$4 sm:$0xff]  }
 0xa01   :  { %8806 = vmatpush1.bf16.msra.mxu1 %v20103_v22  ;;  %8721 = vmatprep.subr.bf16.mxu0 %v20108_v35  ;;  %v20192_v22 = vld [vmem:[%s26933_s9 + $0x5c4] ss:$16 sps:$4 sm:$0xff]   ;;  %v20195_v35 = vld [vmem:[%s26933_s9 + $0x5cc] ss:$16 sps:$4 sm:$0xff]  }
 0xa02   :  { %8807 = vmatprep.subr.bf16.mxu1 %v20111_v54  ;;  %v20190_v54 = vld [vmem:[%s26933_s9 + $0x5c0] ss:$16 sps:$4 sm:$0xff]  }
 0xa04   :  { %8722 = vmatpush1.bf16.msra.mxu0 %v20106_v2  ;;  %v20193_v2 = vld [vmem:[%s26933_s9 + $0x5c8] ss:$16 sps:$4 sm:$0xff]  }
 0xa05   :  { %8808 = vmatpush1.bf16.msra.mxu1 %v20109_v3  ;;  %8723 = vmatprep.subr.bf16.mxu0 %v20114_v39  ;;  %v20198_v3 = vld [vmem:[%s26933_s9 + $0x5e4] ss:$16 sps:$4 sm:$0xff]   ;;  %v20201_v39 = vld [vmem:[%s26933_s9 + $0x5ec] ss:$16 sps:$4 sm:$0xff]  }
 0xa06   :  { %8809 = vmatprep.subr.bf16.mxu1 %v20117_v55  ;;  %v20196_v55 = vld [vmem:[%s26933_s9 + $0x5e0] ss:$16 sps:$4 sm:$0xff]  }
 0xa08   :  { %8724 = vmatpush1.bf16.msra.mxu0 %v20112_v17  ;;  %v20199_v17 = vld [vmem:[%s26933_s9 + $0x5e8] ss:$16 sps:$4 sm:$0xff]  }
 0xa09   :  { %8810 = vmatpush1.bf16.msra.mxu1 %v20115_v32  ;;  %8725 = vmatprep.subr.bf16.mxu0 %v20120_v61  ;;  %v20204_v32 = vld [vmem:[%s26933_s9 + $0x604] ss:$16 sps:$4 sm:$0xff]   ;;  %v20207_v61 = vld [vmem:[%s26933_s9 + $0x60c] ss:$16 sps:$4 sm:$0xff]  }
 0xa0a   :  { %8811 = vmatprep.subr.bf16.mxu1 %v20123_v9  ;;  %v20202_v9 = vld [vmem:[%s26933_s9 + $0x600] ss:$16 sps:$4 sm:$0xff]  }
 0xa0c   :  { %8726 = vmatpush1.bf16.msra.mxu0 %v20118_v12  ;;  %v20205_v12 = vld [vmem:[%s26933_s9 + $0x608] ss:$16 sps:$4 sm:$0xff]  }
 0xa0d   :  { %8812 = vmatpush1.bf16.msra.mxu1 %v20121_v6  ;;  %8727 = vmatprep.subr.bf16.mxu0 %v20126_v43  ;;  %v20210_v6 = vld [vmem:[%s26933_s9 + $0x624] ss:$16 sps:$4 sm:$0xff]   ;;  %v20213_v43 = vld [vmem:[%s26933_s9 + $0x62c] ss:$16 sps:$4 sm:$0xff]  }
 0xa0e   :  { %8813 = vmatprep.subr.bf16.mxu1 %v20129_v0  ;;  %v20208_v0 = vld [vmem:[%s26933_s9 + $0x620] ss:$16 sps:$4 sm:$0xff]  }
 0xa10   :  { %8728 = vmatpush1.bf16.msra.mxu0 %v20124_v1  ;;  %v20211_v1 = vld [vmem:[%s26933_s9 + $0x628] ss:$16 sps:$4 sm:$0xff]  }
 0xa11   :  { %8814 = vmatpush1.bf16.msra.mxu1 %v20127_v57  ;;  %8729 = vmatprep.subr.bf16.mxu0 %v20132_v14  ;;  %v20216_v57 = vld [vmem:[%s26933_s9 + $0x644] ss:$16 sps:$4 sm:$0xff]   ;;  %v20219_v14 = vld [vmem:[%s26933_s9 + $0x64c] ss:$16 sps:$4 sm:$0xff]  }
 0xa12   :  { %8815 = vmatprep.subr.bf16.mxu1 %v20135_v16  ;;  %v20214_v16 = vld [vmem:[%s26933_s9 + $0x640] ss:$16 sps:$4 sm:$0xff]  }
 0xa14   :  { %8730 = vmatpush1.bf16.msra.mxu0 %v20130_v18  ;;  %v20217_v18 = vld [vmem:[%s26933_s9 + $0x648] ss:$16 sps:$4 sm:$0xff]  }
 0xa15   :  { %8816 = vmatpush1.bf16.msra.mxu1 %v20133_v28  ;;  %8731 = vmatprep.subr.bf16.mxu0 %v20138_v30  ;;  %v20222_v28 = vld [vmem:[%s26933_s9 + $0x664] ss:$16 sps:$4 sm:$0xff]   ;;  %v20225_v30 = vld [vmem:[%s26933_s9 + $0x66c] ss:$16 sps:$4 sm:$0xff]  }
 0xa16   :  { %8817 = vmatprep.subr.bf16.mxu1 %v20141_v38  ;;  %v20220_v38 = vld [vmem:[%s26933_s9 + $0x660] ss:$16 sps:$4 sm:$0xff]  }
 0xa18   :  { %8732 = vmatpush1.bf16.msra.mxu0 %v20136_v13  ;;  %v20223_v13 = vld [vmem:[%s26933_s9 + $0x668] ss:$16 sps:$4 sm:$0xff]  }
 0xa19   :  { %8818 = vmatpush1.bf16.msra.mxu1 %v20139_v59  ;;  %8733 = vmatprep.subr.bf16.mxu0 %v20144_v53  ;;  %v20228_v59 = vld [vmem:[%s26933_s9 + $0x684] ss:$16 sps:$4 sm:$0xff]   ;;  %v20231_v53 = vld [vmem:[%s26933_s9 + $0x68c] ss:$16 sps:$4 sm:$0xff]  }
 0xa1a   :  { %8819 = vmatprep.subr.bf16.mxu1 %v20147_v42  ;;  %v20226_v42 = vld [vmem:[%s26933_s9 + $0x680] ss:$16 sps:$4 sm:$0xff]  }
 0xa1c   :  { %8734 = vmatpush1.bf16.msra.mxu0 %v20142_v48  ;;  %v20229_v48 = vld [vmem:[%s26933_s9 + $0x688] ss:$16 sps:$4 sm:$0xff]  }
 0xa1d   :  { %8820 = vmatpush1.bf16.msra.mxu1 %v20145_v27  ;;  %8735 = vmatprep.subr.bf16.mxu0 %v20150_v60  ;;  %v20234_v27 = vld [vmem:[%s26933_s9 + $0x6a4] ss:$16 sps:$4 sm:$0xff]   ;;  %v20237_v60 = vld [vmem:[%s26933_s9 + $0x6ac] ss:$16 sps:$4 sm:$0xff]  }
 0xa1e   :  { %8821 = vmatprep.subr.bf16.mxu1 %v20153_v51  ;;  %v20232_v51 = vld [vmem:[%s26933_s9 + $0x6a0] ss:$16 sps:$4 sm:$0xff]  }
 0xa20   :  { %8736 = vmatpush1.bf16.msra.mxu0 %v20148_v8  ;;  %v20235_v8 = vld [vmem:[%s26933_s9 + $0x6a8] ss:$16 sps:$4 sm:$0xff]  }
 0xa21   :  { %8822 = vmatpush1.bf16.msra.mxu1 %v20151_v49  ;;  %8737 = vmatprep.subr.bf16.mxu0 %v20156_v45  ;;  %v20240_v49 = vld [vmem:[%s26933_s9 + $0x6c4] ss:$16 sps:$4 sm:$0xff]   ;;  %v20243_v45 = vld [vmem:[%s26933_s9 + $0x6cc] ss:$16 sps:$4 sm:$0xff]  }
 0xa22   :  { %8823 = vmatprep.subr.bf16.mxu1 %v20159_v62  ;;  %v20238_v62 = vld [vmem:[%s26933_s9 + $0x6c0] ss:$16 sps:$4 sm:$0xff]  }
 0xa24   :  { %8738 = vmatpush1.bf16.msra.mxu0 %v20154_v20  ;;  %v20241_v20 = vld [vmem:[%s26933_s9 + $0x6c8] ss:$16 sps:$4 sm:$0xff]  }
 0xa25   :  { %8824 = vmatpush1.bf16.msra.mxu1 %v20157_v19  ;;  %8739 = vmatprep.subr.bf16.mxu0 %v20162_v5  ;;  %v20246_v19 = vld [vmem:[%s26933_s9 + $0x6e4] ss:$16 sps:$4 sm:$0xff]   ;;  %v20249_v5 = vld [vmem:[%s26933_s9 + $0x6ec] ss:$16 sps:$4 sm:$0xff]  }
 0xa26   :  { %8825 = vmatprep.subr.bf16.mxu1 %v20165_v21  ;;  %v20244_v21 = vld [vmem:[%s26933_s9 + $0x6e0] ss:$16 sps:$4 sm:$0xff]  }
 0xa28   :  { %8740 = vmatpush1.bf16.msra.mxu0 %v20160_v11  ;;  %v20247_v11 = vld [vmem:[%s26933_s9 + $0x6e8] ss:$16 sps:$4 sm:$0xff]  }
 0xa29   :  { %8826 = vmatpush1.bf16.msra.mxu1 %v20163_v31  ;;  %8741 = vmatprep.subr.bf16.mxu0 %v20168_v40 }
 0xa2a   :  { %8827 = vmatprep.subr.bf16.mxu1 %v20171_v44 }
 0xa2c   :  { %8742 = vmatpush1.bf16.msra.mxu0 %v20166_v47 }
 0xa2d   :  { %8828 = vmatpush1.bf16.msra.mxu1 %v20169_v25  ;;  %8743 = vmatprep.subr.bf16.mxu0 %v20174_v26 }
 0xa2e   :  { %8829 = vmatprep.subr.bf16.mxu1 %v20177_v56 }
 0xa30   :  { %8744 = vmatpush1.bf16.msra.mxu0 %v20172_v58 }
 0xa31   :  { %8830 = vmatpush1.bf16.msra.mxu1 %v20175_v34  ;;  %8756 = vmatprep.subr.bf16.mxu0 %v20180_v23 }
 0xa32   :  { %8842 = vmatprep.subr.bf16.mxu1 %v20183_v4 }
 0xa33   :  { %8746 = vmatmul.mubr.bf16.vlgmr.msra.gmra.mrb[56].mxu0 %v23990_v29 }
 0xa34   :  { %8832 = vmatmul.mubr.bf16.vlgmr.msra.gmra.mrb[52].mxu1 %v23990_v29  ;;  %8757 = vmatpush1.bf16.msra.mxu0 %v20178_v15 }
 0xa35   :  { %16797 = vmatprep.mubr.msk.bf16.mxu0 %vm6402_vm3, %v23986_v37  ;;  %8843 = vmatpush1.bf16.msra.mxu1 %v20181_v24 }
 0xa36   :  { %16798 = vmatprep.mubr.msk.bf16.mxu1 %vm6402_vm3, %v23986_v37  ;;  %8758 = vmatprep.subr.bf16.mxu0 %v20186_v46 }
 0xa37   :  { %8844 = vmatprep.subr.bf16.mxu1 %v20189_v50 }
 0xa38   :  { %8759 = vmatpush1.bf16.msra.mxu0 %v20184_v63 }
 0xa39   :  { %8845 = vmatpush1.bf16.msra.mxu1 %v20187_v7  ;;  %8760 = vmatprep.subr.bf16.mxu0 %v20192_v22  ;;  %v17538_v22 = vld [vmem:[%s26934_s10 + $0x88] sm:$0xff] }
 0xa3a   :  { %8846 = vmatprep.subr.bf16.mxu1 %v20195_v35 }
 0xa3c   :  { %8761 = vmatpush1.bf16.msra.mxu0 %v20190_v54 }
 0xa3d   :  { %8847 = vmatpush1.bf16.msra.mxu1 %v20193_v2  ;;  %8762 = vmatprep.subr.bf16.mxu0 %v20198_v3 }
 0xa3e   :  { %8848 = vmatprep.subr.bf16.mxu1 %v20201_v39 }
 0xa40   :  { %8763 = vmatpush1.bf16.msra.mxu0 %v20196_v55 }
 0xa41   :  { %8849 = vmatpush1.bf16.msra.mxu1 %v20199_v17  ;;  %8764 = vmatprep.subr.bf16.mxu0 %v20204_v32  ;;  %v16799_v32 = vld [vmem:[%s26934_s10 + $0x20] sm:$0xff] }
 0xa42   :  { %8850 = vmatprep.subr.bf16.mxu1 %v20207_v61  ;;  %v20252_v61 = vld [vmem:[%s26933_s9 + $0x704] ss:$16 sps:$4 sm:$0xff]  }
 0xa44   :  { %8765 = vmatpush1.bf16.msra.mxu0 %v20202_v9  ;;  %v20255_v9 = vld [vmem:[%s26933_s9 + $0x70c] ss:$16 sps:$4 sm:$0xff]  }
 0xa45   :  { %8851 = vmatpush1.bf16.msra.mxu1 %v20205_v12  ;;  %8766 = vmatprep.subr.bf16.mxu0 %v20210_v6  ;;  %v16800_v12 = vld [vmem:[%s26934_s10 + $0x28] sm:$0xff]  ;;  %v16801_v6 = vld [vmem:[%s26934_s10 + $0x30] sm:$0xff] }
 0xa46   :  { %8852 = vmatprep.subr.bf16.mxu1 %v20213_v43  ;;  %v16802_v43 = vld [vmem:[%s26934_s10 + $0x38] sm:$0xf] }
 0xa48   :  { %8767 = vmatpush1.bf16.msra.mxu0 %v20208_v0  ;;  %v20250_v0 = vld [vmem:[%s26933_s9 + $0x700] ss:$16 sps:$4 sm:$0xff]  }
 0xa49   :  { %8853 = vmatpush1.bf16.msra.mxu1 %v20211_v1  ;;  %8768 = vmatprep.subr.bf16.mxu0 %v20216_v57  ;;  %v8036_v1 = vld [vmem:[%s26934_s10] sm:$0xff]  ;;  %v20253_v57 = vld [vmem:[%s26933_s9 + $0x708] ss:$16 sps:$4 sm:$0xff]  }
 0xa4a   :  { %8854 = vmatprep.subr.bf16.mxu1 %v20219_v14  ;;  %v20258_v14 = vld [vmem:[%s26933_s9 + $0x724] ss:$16 sps:$4 sm:$0xff]  }
 0xa4c   :  { %8769 = vmatpush1.bf16.msra.mxu0 %v20214_v16  ;;  %v20261_v16 = vld [vmem:[%s26933_s9 + $0x72c] ss:$16 sps:$4 sm:$0xff]  }
 0xa4d   :  { %8855 = vmatpush1.bf16.msra.mxu1 %v20217_v18  ;;  %8770 = vmatprep.subr.bf16.mxu0 %v20222_v28  ;;  %v20256_v18 = vld [vmem:[%s26933_s9 + $0x720] ss:$16 sps:$4 sm:$0xff]   ;;  %v8037_v28 = vld [vmem:[%s26934_s10 + $0x8] sm:$0xff] }
 0xa4e   :  { %8856 = vmatprep.subr.bf16.mxu1 %v20225_v30  ;;  %v20259_v30 = vld [vmem:[%s26933_s9 + $0x728] ss:$16 sps:$4 sm:$0xff]  }
 0xa50   :  { %8771 = vmatpush1.bf16.msra.mxu0 %v20220_v38  ;;  %v20264_v38 = vld [vmem:[%s26933_s9 + $0x744] ss:$16 sps:$4 sm:$0xff]  }
 0xa51   :  { %8857 = vmatpush1.bf16.msra.mxu1 %v20223_v13  ;;  %8772 = vmatprep.subr.bf16.mxu0 %v20228_v59  ;;  %v20267_v13 = vld [vmem:[%s26933_s9 + $0x74c] ss:$16 sps:$4 sm:$0xff]   ;;  %v20262_v59 = vld [vmem:[%s26933_s9 + $0x740] ss:$16 sps:$4 sm:$0xff]  }
 0xa52   :  { %8858 = vmatprep.subr.bf16.mxu1 %v20231_v53  ;;  %v8038_v53 = vld [vmem:[%s26934_s10 + $0x10] sm:$0xff] }
 0xa54   :  { %8773 = vmatpush1.bf16.msra.mxu0 %v20226_v42  ;;  %v20265_v42 = vld [vmem:[%s26933_s9 + $0x748] ss:$16 sps:$4 sm:$0xff]  }
 0xa55   :  { %8859 = vmatpush1.bf16.msra.mxu1 %v20229_v48  ;;  %8774 = vmatprep.subr.bf16.mxu0 %v20234_v27  ;;  %v20270_v48 = vld [vmem:[%s26933_s9 + $0x764] ss:$16 sps:$4 sm:$0xff]   ;;  %v20273_v27 = vld [vmem:[%s26933_s9 + $0x76c] ss:$16 sps:$4 sm:$0xff]  }
 0xa56   :  { %8860 = vmatprep.subr.bf16.mxu1 %v20237_v60  ;;  %v20268_v60 = vld [vmem:[%s26933_s9 + $0x760] ss:$16 sps:$4 sm:$0xff]  }
 0xa58   :  { %8775 = vmatpush1.bf16.msra.mxu0 %v20232_v51  ;;  %v8039_v51 = vld [vmem:[%s26934_s10 + $0x18] sm:$0xf] }
 0xa59   :  { %8861 = vmatpush1.bf16.msra.mxu1 %v20235_v8  ;;  %8776 = vmatprep.subr.bf16.mxu0 %v20240_v49  ;;  %v20271_v8 = vld [vmem:[%s26933_s9 + $0x768] ss:$16 sps:$4 sm:$0xff]   ;;  %v20276_v49 = vld [vmem:[%s26933_s9 + $0x784] ss:$16 sps:$4 sm:$0xff]  }
 0xa5a   :  { %8862 = vmatprep.subr.bf16.mxu1 %v20243_v45  ;;  %v20279_v45 = vld [vmem:[%s26933_s9 + $0x78c] ss:$16 sps:$4 sm:$0xff]  }
 0xa5c   :  { %8777 = vmatpush1.bf16.msra.mxu0 %v20238_v62  ;;  %v20274_v62 = vld [vmem:[%s26933_s9 + $0x780] ss:$16 sps:$4 sm:$0xff]  }
 0xa5d   :  { %8863 = vmatpush1.bf16.msra.mxu1 %v20241_v20  ;;  %8778 = vmatprep.subr.bf16.mxu0 %v20246_v19  ;;  %v20277_v20 = vld [vmem:[%s26933_s9 + $0x788] ss:$16 sps:$4 sm:$0xff]   ;;  %v20282_v19 = vld [vmem:[%s26933_s9 + $0x7a4] ss:$16 sps:$4 sm:$0xff]  }
 0xa5e   :  { %8864 = vmatprep.subr.bf16.mxu1 %v20249_v5  ;;  %v20285_v5 = vld [vmem:[%s26933_s9 + $0x7ac] ss:$16 sps:$4 sm:$0xff]  }
 0xa60   :  { %8779 = vmatpush1.bf16.msra.mxu0 %v20244_v21  ;;  %v20280_v21 = vld [vmem:[%s26933_s9 + $0x7a0] ss:$16 sps:$4 sm:$0xff]  }
 0xa61   :  { %8865 = vmatpush1.bf16.msra.mxu1 %v20247_v11  ;;  %v20283_v11 = vld [vmem:[%s26933_s9 + $0x7a8] ss:$16 sps:$4 sm:$0xff]  }
 0xa63   :  { %8789 = vmatmul.mubr.bf16.vlgmr.msra.gmra.mrb[56].mxu0 %v23984_v33 }
 0xa64   :  { %8875 = vmatmul.mubr.bf16.vlgmr.msra.gmra.mrb[52].mxu1 %v23984_v33  ;;  %8979 = vmatprep.mubr.f32.mxu0 %v26985_v41 }
 0xa65   :  { %9068 = vmatprep.mubr.f32.mxu1 %v26985_v41 }
 0xac6   :  { %v7941_v31 = vpop.f32.mrb[52].mxu0  ;;  %v8027_v40 = vpop.f32.mrb[48].mxu1 }
 0xac7   :  { %v7943_v44 = vpop.f32.mrb[53].mxu0  ;;  %v8029_v47 = vpop.f32.mrb[49].mxu1 }
 0xac8   :  { %v7945_v25 = vpop.f32.mrb[54].mxu0  ;;  %v8031_v26 = vpop.f32.mrb[50].mxu1 }
 0xac9   :  { %v18528_v56 = vpack.c.bf16 %v7945_v25, %v7941_v31  ;;  %v18534_v58 = vpack.c.bf16 %v8031_v26, %v8027_v40  ;;  %v7947_v34 = vpop.f32.mrb[55].mxu0  ;;  %v8033_v23 = vpop.f32.mrb[51].mxu1  ;;  %v20288_v31 = vld [vmem:[%s26933_s9 + $0x7c4] ss:$16 sps:$4 sm:$0xff]   ;;  %v20291_v40 = vld [vmem:[%s26933_s9 + $0x7cc] ss:$16 sps:$4 sm:$0xff]  }
 0xaca   :  { %v18525_v4 = vpack.c.bf16 %v7947_v34, %v7943_v44  ;;  %v18531_v15 = vpack.c.bf16 %v8033_v23, %v8029_v47  ;;  %v20286_v44 = vld [vmem:[%s26933_s9 + $0x7c0] ss:$16 sps:$4 sm:$0xff]   ;;  %v20289_v47 = vld [vmem:[%s26933_s9 + $0x7c8] ss:$16 sps:$4 sm:$0xff]   ;;  %v20294_v25 = vld [vmem:[%s26933_s9 + $0x7e4] ss:$16 sps:$4 sm:$0xff]  }
 0xacb   :  { %v20297_v26 = vld [vmem:[%s26933_s9 + $0x7ec] ss:$16 sps:$4 sm:$0xff]   ;;  %v20300_v34 = vld [vmem:[%s26933_s9 + $0x804] ss:$16 sps:$4 sm:$0xff]  }
 0xacc   :  { %v20303_v23 = vld [vmem:[%s26933_s9 + $0x80c] ss:$16 sps:$4 sm:$0xff]  }
 0xb36   :  { %v8790_v24 = vpop.f32.mrb[56].mxu0 }
 0xb37   :  { %v8876_v46 = vpop.f32.mrb[52].mxu1  ;;  %v8792_v50 = vpop.f32.mrb[57].mxu0 }
 0xb38   :  { %v8878_v63 = vpop.f32.mrb[53].mxu1  ;;  %v8794_v7 = vpop.f32.mrb[58].mxu0 }
 0xb39   :  { %v18516_v35 = vpack.c.bf16 %v8794_v7, %v8790_v24  ;;  %v8880_v54 = vpop.f32.mrb[54].mxu1  ;;  %v8796_v2 = vpop.f32.mrb[59].mxu0  ;;  %v20306_v24 = vld [vmem:[%s26933_s9 + $0x824] ss:$16 sps:$4 sm:$0xff]  }
 0xb3a   :  { %v18522_v3 = vpack.c.bf16 %v8880_v54, %v8876_v46  ;;  %v18513_v39 = vpack.c.bf16 %v8796_v2, %v8792_v50  ;;  %v8882_v55 = vpop.f32.mrb[55].mxu1  ;;  %v20309_v46 = vld [vmem:[%s26933_s9 + $0x82c] ss:$16 sps:$4 sm:$0xff]   ;;  %v20304_v50 = vld [vmem:[%s26933_s9 + $0x820] ss:$16 sps:$4 sm:$0xff]  }
 0xb3b   :  { %v18519_v17 = vpack.c.bf16 %v8882_v55, %v8878_v63  ;;  %v20307_v63 = vld [vmem:[%s26933_s9 + $0x828] ss:$16 sps:$4 sm:$0xff]   ;;  %v20312_v7 = vld [vmem:[%s26933_s9 + $0x844] ss:$16 sps:$4 sm:$0xff]   ;;  %v20310_v54 = vld [vmem:[%s26933_s9 + $0x840] ss:$16 sps:$4 sm:$0xff]  }
 0xb3c   :  { %18515 = vmatprep.subr.msk.bf16.mxu0 %vm24492_vm7, %v18513_v39  ;;  %v20313_v2 = vld [vmem:[%s26933_s9 + $0x848] ss:$16 sps:$4 sm:$0xff]   ;;  %v20321_v39 = vld [vmem:[%s26933_s9 + $0x86c] ss:$16 sps:$4 sm:$0xff]   ;;  %v20316_v55 = vld [vmem:[%s26933_s9 + $0x860] ss:$16 sps:$4 sm:$0xff]  }
 0xb3d   :  { %18521 = vmatprep.subr.msk.bf16.mxu1 %vm24492_vm7, %v18519_v17  ;;  %18518 = vmatpush1.bf16.msk.msra.mxu0 %vm24492_vm7, %v18516_v35  ;;  %v20315_v35 = vld [vmem:[%s26933_s9 + $0x84c] ss:$16 sps:$4 sm:$0xff]   ;;  %v20319_v17 = vld [vmem:[%s26933_s9 + $0x868] ss:$16 sps:$4 sm:$0xff]  }
 0xb3e   :  { %18524 = vmatpush1.bf16.msk.msra.mxu1 %vm24492_vm7, %v18522_v3  ;;  %18527 = vmatprep.subr.msk.bf16.mxu0 %vm24492_vm7, %v18525_v4  ;;  %v20298_v4 = vld [vmem:[%s26933_s9 + $0x800] ss:$16 sps:$4 sm:$0xff]   ;;  %v20318_v3 = vld [vmem:[%s26933_s9 + $0x864] ss:$16 sps:$4 sm:$0xff]  }
 0xb3f   :  { %18533 = vmatprep.subr.msk.bf16.mxu1 %vm24492_vm7, %v18531_v15  ;;  %v20301_v15 = vld [vmem:[%s26933_s9 + $0x808] ss:$16 sps:$4 sm:$0xff]  }
 0xb40   :  { %16805 = vmatmul.mubr.msk.f32.vlgmr.msra.gmra.mrb[50].mxu0 %vm8890_vm8, %v16799_v32 }
 0xb41   :  { %16811 = vmatmul.mubr.msk.f32.vlgmr.msra.gmra.mrb[46].mxu1 %vm8890_vm8, %v16799_v32  ;;  %18530 = vmatpush1.bf16.msk.msra.mxu0 %vm24492_vm7, %v18528_v56  ;;  %v20292_v56 = vld [vmem:[%s26933_s9 + $0x7e0] ss:$16 sps:$4 sm:$0xff]   ;;  %v20324_v32 = vld [vmem:[%s26933_s9 + $0x884] ss:$16 sps:$4 sm:$0xff]  }
 0xb42   :  { %18536 = vmatpush1.bf16.msk.msra.mxu1 %vm24492_vm7, %v18534_v58  ;;  %8985 = vmatprep.mubr.f32.mxu0 %v26985_v41  ;;  %v20295_v58 = vld [vmem:[%s26933_s9 + $0x7e8] ss:$16 sps:$4 sm:$0xff]  }
 0xb43   :  { %9074 = vmatprep.mubr.f32.mxu1 %v26985_v41  ;;  %9968 = vmatprep.subr.bf16.mxu0 %v20252_v61  ;;  %v20327_v61 = vld [vmem:[%s26933_s9 + $0x88c] ss:$16 sps:$4 sm:$0xff]  }
 0xb44   :  { %16806 = vmatmul.mubr.msk.f32.gmra.mrb[60].mxu0 %vm8890_vm8, %v16800_v12  ;;  %10054 = vmatprep.subr.bf16.mxu1 %v20255_v9  ;;  %v20322_v9 = vld [vmem:[%s26933_s9 + $0x880] ss:$16 sps:$4 sm:$0xff]  }
 0xb45   :  { %16812 = vmatmul.mubr.msk.f32.gmra.mrb[56].mxu1 %vm8890_vm8, %v16800_v12  ;;  %8991 = vmatprep.mubr.f32.mxu0 %v26985_v41  ;;  %v20325_v12 = vld [vmem:[%s26933_s9 + $0x888] ss:$16 sps:$4 sm:$0xff]  }
 0xb46   :  { %9080 = vmatprep.mubr.f32.mxu1 %v26985_v41 }
 0xb48   :  { %16807 = vmatmul.mubr.msk.f32.gmra.mrb[62].mxu0 %vm8890_vm8, %v16801_v6 }
 0xb49   :  { %16813 = vmatmul.mubr.msk.f32.gmra.mrb[58].mxu1 %vm8890_vm8, %v16801_v6  ;;  %8997 = vmatprep.mubr.f32.mxu0 %v26985_v41  ;;  %v20330_v6 = vld [vmem:[%s26933_s9 + $0x8a4] ss:$16 sps:$4 sm:$0xff]  }
 0xb4a   :  { %9086 = vmatprep.mubr.f32.mxu1 %v26985_v41 }
 0xb4c   :  { %16808 = vmatmul.mubr.msk.f32.gmra.mrb[64].mxu0 %vm8890_vm8, %v16802_v43 }
 0xb4d   :  { %16814 = vmatmul.mubr.msk.f32.gmra.mrb[60].mxu1 %vm8890_vm8, %v16802_v43  ;;  %9181 = vmatprep.mubr.f32.mxu0 %v26985_v41  ;;  %v20333_v43 = vld [vmem:[%s26933_s9 + $0x8ac] ss:$16 sps:$4 sm:$0xff]  }
 0xb4e   :  { %9270 = vmatprep.mubr.f32.mxu1 %v26985_v41 }
 0xb50   :  { %16817 = vmatmul.mubr.msk.f32.vlgmr.msra.gmra.mrb[50].mxu0 %vm8890_vm8, %v8036_v1 }
 0xb51   :  { %16823 = vmatmul.mubr.msk.f32.vlgmr.msra.gmra.mrb[46].mxu1 %vm8890_vm8, %v8036_v1  ;;  %9969 = vmatpush1.bf16.msra.mxu0 %v20250_v0  ;;  %v20328_v0 = vld [vmem:[%s26933_s9 + $0x8a0] ss:$16 sps:$4 sm:$0xff]   ;;  %v20331_v1 = vld [vmem:[%s26933_s9 + $0x8a8] ss:$16 sps:$4 sm:$0xff]  }
 0xb52   :  { %10055 = vmatpush1.bf16.msra.mxu1 %v20253_v57  ;;  %9187 = vmatprep.mubr.f32.mxu0 %v26985_v41  ;;  %v20336_v57 = vld [vmem:[%s26933_s9 + $0x8c4] ss:$16 sps:$4 sm:$0xff]  }
 0xb53   :  { %9276 = vmatprep.mubr.f32.mxu1 %v26985_v41  ;;  %9970 = vmatprep.subr.bf16.mxu0 %v20258_v14  ;;  %v20339_v14 = vld [vmem:[%s26933_s9 + $0x8cc] ss:$16 sps:$4 sm:$0xff]  }
 0xb54   :  { %10056 = vmatprep.subr.bf16.mxu1 %v20261_v16  ;;  %16818 = vmatmul.mubr.msk.f32.gmra.mrb[60].mxu0 %vm8890_vm8, %v8037_v28  ;;  %v20334_v16 = vld [vmem:[%s26933_s9 + $0x8c0] ss:$16 sps:$4 sm:$0xff]  }
 0xb55   :  { %16824 = vmatmul.mubr.msk.f32.gmra.mrb[56].mxu1 %vm8890_vm8, %v8037_v28  ;;  %9971 = vmatpush1.bf16.msra.mxu0 %v20256_v18  ;;  %v20337_v18 = vld [vmem:[%s26933_s9 + $0x8c8] ss:$16 sps:$4 sm:$0xff]   ;;  %v20342_v28 = vld [vmem:[%s26933_s9 + $0x8e4] ss:$16 sps:$4 sm:$0xff]  }
 0xb56   :  { %10057 = vmatpush1.bf16.msra.mxu1 %v20259_v30  ;;  %9193 = vmatprep.mubr.f32.mxu0 %v26985_v41  ;;  %v20345_v30 = vld [vmem:[%s26933_s9 + $0x8ec] ss:$16 sps:$4 sm:$0xff]  }
 0xb57   :  { %9282 = vmatprep.mubr.f32.mxu1 %v26985_v41  ;;  %9972 = vmatprep.subr.bf16.mxu0 %v20264_v38  ;;  %v20340_v38 = vld [vmem:[%s26933_s9 + $0x8e0] ss:$16 sps:$4 sm:$0xff]  }
 0xb58   :  { %10058 = vmatprep.subr.bf16.mxu1 %v20267_v13  ;;  %16819 = vmatmul.mubr.msk.f32.gmra.mrb[62].mxu0 %vm8890_vm8, %v8038_v53  ;;  %v20343_v13 = vld [vmem:[%s26933_s9 + $0x8e8] ss:$16 sps:$4 sm:$0xff]  }
 0xb59   :  { %16825 = vmatmul.mubr.msk.f32.gmra.mrb[58].mxu1 %vm8890_vm8, %v8038_v53  ;;  %9973 = vmatpush1.bf16.msra.mxu0 %v20262_v59  ;;  %v20348_v59 = vld [vmem:[%s26933_s9 + $0x904] ss:$16 sps:$4 sm:$0xff]   ;;  %v20351_v53 = vld [vmem:[%s26933_s9 + $0x90c] ss:$16 sps:$4 sm:$0xff]  }
 0xb5a   :  { %10059 = vmatpush1.bf16.msra.mxu1 %v20265_v42  ;;  %9199 = vmatprep.mubr.f32.mxu0 %v26985_v41  ;;  %v20346_v42 = vld [vmem:[%s26933_s9 + $0x900] ss:$16 sps:$4 sm:$0xff]  }
 0xb5b   :  { %9288 = vmatprep.mubr.f32.mxu1 %v26985_v41  ;;  %9974 = vmatprep.subr.bf16.mxu0 %v20270_v48  ;;  %v20349_v48 = vld [vmem:[%s26933_s9 + $0x908] ss:$16 sps:$4 sm:$0xff]  }
 0xb5c   :  { %10060 = vmatprep.subr.bf16.mxu1 %v20273_v27  ;;  %16820 = vmatmul.mubr.msk.f32.gmra.mrb[64].mxu0 %vm8890_vm8, %v8039_v51  ;;  %v20354_v27 = vld [vmem:[%s26933_s9 + $0x924] ss:$16 sps:$4 sm:$0xff]  }
 0xb5d   :  { %16826 = vmatmul.mubr.msk.f32.gmra.mrb[60].mxu1 %vm8890_vm8, %v8039_v51  ;;  %9975 = vmatpush1.bf16.msra.mxu0 %v20268_v60  ;;  %v20357_v60 = vld [vmem:[%s26933_s9 + $0x92c] ss:$16 sps:$4 sm:$0xff]   ;;  %v20352_v51 = vld [vmem:[%s26933_s9 + $0x920] ss:$16 sps:$4 sm:$0xff]  }
 0xb5e   :  { %10061 = vmatpush1.bf16.msra.mxu1 %v20271_v8  ;;  %10000 = vmatprep.mubr.bf16.mxu0 %v23992_v36  ;;  %v20355_v8 = vld [vmem:[%s26933_s9 + $0x928] ss:$16 sps:$4 sm:$0xff]  }
 0xb5f   :  { %10086 = vmatprep.mubr.bf16.mxu1 %v23992_v36  ;;  %9976 = vmatprep.subr.bf16.mxu0 %v20276_v49  ;;  %v20360_v49 = vld [vmem:[%s26933_s9 + $0x944] ss:$16 sps:$4 sm:$0xff]  }
 0xb60   :  { %10062 = vmatprep.subr.bf16.mxu1 %v20279_v45  ;;  %v20363_v45 = vld [vmem:[%s26933_s9 + $0x94c] ss:$16 sps:$4 sm:$0xff]  }
 0xb61   :  { %9977 = vmatpush1.bf16.msra.mxu0 %v20274_v62  ;;  %v20358_v62 = vld [vmem:[%s26933_s9 + $0x940] ss:$16 sps:$4 sm:$0xff]  }
 0xb62   :  { %10063 = vmatpush1.bf16.msra.mxu1 %v20277_v20  ;;  %9978 = vmatprep.subr.bf16.mxu0 %v20282_v19  ;;  %v20361_v20 = vld [vmem:[%s26933_s9 + $0x948] ss:$16 sps:$4 sm:$0xff]   ;;  %v20366_v19 = vld [vmem:[%s26933_s9 + $0x964] ss:$16 sps:$4 sm:$0xff]  }
 0xb63   :  { %10064 = vmatprep.subr.bf16.mxu1 %v20285_v5  ;;  %v20369_v5 = vld [vmem:[%s26933_s9 + $0x96c] ss:$16 sps:$4 sm:$0xff]  }
 0xb65   :  { %9979 = vmatpush1.bf16.msra.mxu0 %v20280_v21  ;;  %v20364_v21 = vld [vmem:[%s26933_s9 + $0x960] ss:$16 sps:$4 sm:$0xff]  }
 0xb66   :  { %10065 = vmatpush1.bf16.msra.mxu1 %v20283_v11  ;;  %9980 = vmatprep.subr.bf16.mxu0 %v20288_v31  ;;  %v20367_v11 = vld [vmem:[%s26933_s9 + $0x968] ss:$16 sps:$4 sm:$0xff]   ;;  %v20372_v31 = vld [vmem:[%s26933_s9 + $0x984] ss:$16 sps:$4 sm:$0xff]  }
 0xb67   :  { %10066 = vmatprep.subr.bf16.mxu1 %v20291_v40  ;;  %v20375_v40 = vld [vmem:[%s26933_s9 + $0x98c] ss:$16 sps:$4 sm:$0xff]  }
 0xb69   :  { %9981 = vmatpush1.bf16.msra.mxu0 %v20286_v44  ;;  %v20370_v44 = vld [vmem:[%s26933_s9 + $0x980] ss:$16 sps:$4 sm:$0xff]  }
 0xb6a   :  { %10067 = vmatpush1.bf16.msra.mxu1 %v20289_v47  ;;  %9982 = vmatprep.subr.bf16.mxu0 %v20294_v25  ;;  %v20373_v47 = vld [vmem:[%s26933_s9 + $0x988] ss:$16 sps:$4 sm:$0xff]   ;;  %v20378_v25 = vld [vmem:[%s26933_s9 + $0x9a4] ss:$16 sps:$4 sm:$0xff]  }
 0xb6b   :  { %10068 = vmatprep.subr.bf16.mxu1 %v20297_v26  ;;  %v20381_v26 = vld [vmem:[%s26933_s9 + $0x9ac] ss:$16 sps:$4 sm:$0xff]  }
 0xb6d   :  { %9983 = vmatpush1.bf16.msra.mxu0 %v20292_v56  ;;  %v20376_v56 = vld [vmem:[%s26933_s9 + $0x9a0] ss:$16 sps:$4 sm:$0xff]  }
 0xb6e   :  { %10069 = vmatpush1.bf16.msra.mxu1 %v20295_v58  ;;  %9984 = vmatprep.subr.bf16.mxu0 %v20300_v34  ;;  %v20379_v58 = vld [vmem:[%s26933_s9 + $0x9a8] ss:$16 sps:$4 sm:$0xff]   ;;  %v20384_v34 = vld [vmem:[%s26933_s9 + $0x9c4] ss:$16 sps:$4 sm:$0xff]  }
 0xb6f   :  { %10070 = vmatprep.subr.bf16.mxu1 %v20303_v23  ;;  %v20387_v23 = vld [vmem:[%s26933_s9 + $0x9cc] ss:$16 sps:$4 sm:$0xff]  }
 0xb71   :  { %9985 = vmatpush1.bf16.msra.mxu0 %v20298_v4  ;;  %v20382_v4 = vld [vmem:[%s26933_s9 + $0x9c0] ss:$16 sps:$4 sm:$0xff]  }
 0xb72   :  { %10071 = vmatpush1.bf16.msra.mxu1 %v20301_v15  ;;  %9986 = vmatprep.subr.bf16.mxu0 %v20306_v24  ;;  %v20385_v15 = vld [vmem:[%s26933_s9 + $0x9c8] ss:$16 sps:$4 sm:$0xff]   ;;  %v20390_v24 = vld [vmem:[%s26933_s9 + $0x9e4] ss:$16 sps:$4 sm:$0xff]  }
 0xb73   :  { %10072 = vmatprep.subr.bf16.mxu1 %v20309_v46  ;;  %v20393_v46 = vld [vmem:[%s26933_s9 + $0x9ec] ss:$16 sps:$4 sm:$0xff]  }
 0xb75   :  { %9987 = vmatpush1.bf16.msra.mxu0 %v20304_v50  ;;  %v20388_v50 = vld [vmem:[%s26933_s9 + $0x9e0] ss:$16 sps:$4 sm:$0xff]  }
 0xb76   :  { %10073 = vmatpush1.bf16.msra.mxu1 %v20307_v63  ;;  %9988 = vmatprep.subr.bf16.mxu0 %v20312_v7  ;;  %v20391_v63 = vld [vmem:[%s26933_s9 + $0x9e8] ss:$16 sps:$4 sm:$0xff]   ;;  %v20396_v7 = vld [vmem:[%s26933_s9 + $0xa04] ss:$16 sps:$4 sm:$0xff]  }
 0xb77   :  { %10074 = vmatprep.subr.bf16.mxu1 %v20315_v35  ;;  %v20399_v35 = vld [vmem:[%s26933_s9 + $0xa0c] ss:$16 sps:$4 sm:$0xff]  }
 0xb79   :  { %9989 = vmatpush1.bf16.msra.mxu0 %v20310_v54  ;;  %v20394_v54 = vld [vmem:[%s26933_s9 + $0xa00] ss:$16 sps:$4 sm:$0xff]  }
 0xb7a   :  { %10075 = vmatpush1.bf16.msra.mxu1 %v20313_v2  ;;  %9990 = vmatprep.subr.bf16.mxu0 %v20318_v3  ;;  %v20397_v2 = vld [vmem:[%s26933_s9 + $0xa08] ss:$16 sps:$4 sm:$0xff]   ;;  %v20402_v3 = vld [vmem:[%s26933_s9 + $0xa24] ss:$16 sps:$4 sm:$0xff]  }
 0xb7b   :  { %10076 = vmatprep.subr.bf16.mxu1 %v20321_v39  ;;  %v20405_v39 = vld [vmem:[%s26933_s9 + $0xa2c] ss:$16 sps:$4 sm:$0xff]  }
 0xb7d   :  { %9991 = vmatpush1.bf16.msra.mxu0 %v20316_v55  ;;  %v20400_v55 = vld [vmem:[%s26933_s9 + $0xa20] ss:$16 sps:$4 sm:$0xff]  }
 0xb7e   :  { %10077 = vmatpush1.bf16.msra.mxu1 %v20319_v17  ;;  %9992 = vmatprep.subr.bf16.mxu0 %v20324_v32  ;;  %v20403_v17 = vld [vmem:[%s26933_s9 + $0xa28] ss:$16 sps:$4 sm:$0xff]   ;;  %v20408_v32 = vld [vmem:[%s26933_s9 + $0xa44] ss:$16 sps:$4 sm:$0xff]  }
 0xb7f   :  { %10078 = vmatprep.subr.bf16.mxu1 %v20327_v61  ;;  %v20411_v61 = vld [vmem:[%s26933_s9 + $0xa4c] ss:$16 sps:$4 sm:$0xff]  }
 0xb81   :  { %9993 = vmatpush1.bf16.msra.mxu0 %v20322_v9  ;;  %v20406_v9 = vld [vmem:[%s26933_s9 + $0xa40] ss:$16 sps:$4 sm:$0xff]  }
 0xb82   :  { %10079 = vmatpush1.bf16.msra.mxu1 %v20325_v12  ;;  %9994 = vmatprep.subr.bf16.mxu0 %v20330_v6  ;;  %v20409_v12 = vld [vmem:[%s26933_s9 + $0xa48] ss:$16 sps:$4 sm:$0xff]   ;;  %v20414_v6 = vld [vmem:[%s26933_s9 + $0xa64] ss:$16 sps:$4 sm:$0xff]  }
 0xb83   :  { %10080 = vmatprep.subr.bf16.mxu1 %v20333_v43  ;;  %v20417_v43 = vld [vmem:[%s26933_s9 + $0xa6c] ss:$16 sps:$4 sm:$0xff]  }
 0xb85   :  { %9995 = vmatpush1.bf16.msra.mxu0 %v20328_v0  ;;  %v20412_v0 = vld [vmem:[%s26933_s9 + $0xa60] ss:$16 sps:$4 sm:$0xff]  }
 0xb86   :  { %10081 = vmatpush1.bf16.msra.mxu1 %v20331_v1  ;;  %9996 = vmatprep.subr.bf16.mxu0 %v20336_v57  ;;  %v20415_v1 = vld [vmem:[%s26933_s9 + $0xa68] ss:$16 sps:$4 sm:$0xff]  }
 0xb87   :  { %10082 = vmatprep.subr.bf16.mxu1 %v20339_v14 }
 0xb89   :  { %9997 = vmatpush1.bf16.msra.mxu0 %v20334_v16 }
 0xb8a   :  { %10083 = vmatpush1.bf16.msra.mxu1 %v20337_v18  ;;  %9998 = vmatprep.subr.bf16.mxu0 %v20342_v28 }
 0xb8b   :  { %10084 = vmatprep.subr.bf16.mxu1 %v20345_v30 }
 0xb8d   :  { %9999 = vmatpush1.bf16.msra.mxu0 %v20340_v38 }
 0xb8e   :  { %10085 = vmatpush1.bf16.msra.mxu1 %v20343_v13  ;;  %10011 = vmatprep.subr.bf16.mxu0 %v20348_v59 }
 0xb8f   :  { %10097 = vmatprep.subr.bf16.mxu1 %v20351_v53 }
 0xb90   :  { %10001 = vmatmul.mubr.bf16.vlgmr.msra.gmra.mrb[68].mxu0 %v23990_v29 }
 0xb91   :  { %10087 = vmatmul.mubr.bf16.vlgmr.msra.gmra.mrb[64].mxu1 %v23990_v29  ;;  %10012 = vmatpush1.bf16.msra.mxu0 %v20346_v42 }
 0xb92   :  { %17051 = vmatprep.mubr.msk.bf16.mxu0 %vm6402_vm3, %v23986_v37  ;;  %10098 = vmatpush1.bf16.msra.mxu1 %v20349_v48  ;;  %v20420_v48 = vld [vmem:[%s26933_s9 + $0xa84] ss:$16 sps:$4 sm:$0xff]  }
 0xb93   :  { %17052 = vmatprep.mubr.msk.bf16.mxu1 %vm6402_vm3, %v23986_v37  ;;  %10013 = vmatprep.subr.bf16.mxu0 %v20354_v27 }
 0xb94   :  { %10099 = vmatprep.subr.bf16.mxu1 %v20357_v60  ;;  %v20423_v60 = vld [vmem:[%s26933_s9 + $0xa8c] ss:$16 sps:$4 sm:$0xff]  }
 0xb95   :  { %10014 = vmatpush1.bf16.msra.mxu0 %v20352_v51  ;;  %v17053_v51 = vld [vmem:[%s26934_s10 + $0x40] sm:$0xff] }
 0xb96   :  { %10100 = vmatpush1.bf16.msra.mxu1 %v20355_v8  ;;  %10015 = vmatprep.subr.bf16.mxu0 %v20360_v49  ;;  %v20418_v8 = vld [vmem:[%s26933_s9 + $0xa80] ss:$16 sps:$4 sm:$0xff]   ;;  %v20421_v49 = vld [vmem:[%s26933_s9 + $0xa88] ss:$16 sps:$4 sm:$0xff]  }
 0xb97   :  { %10101 = vmatprep.subr.bf16.mxu1 %v20363_v45  ;;  %v20426_v45 = vld [vmem:[%s26933_s9 + $0xaa4] ss:$16 sps:$4 sm:$0xff]  }
 0xb99   :  { %10016 = vmatpush1.bf16.msra.mxu0 %v20358_v62  ;;  %v20429_v62 = vld [vmem:[%s26933_s9 + $0xaac] ss:$16 sps:$4 sm:$0xff]  }
 0xb9a   :  { %10102 = vmatpush1.bf16.msra.mxu1 %v20361_v20  ;;  %10017 = vmatprep.subr.bf16.mxu0 %v20366_v19  ;;  %v17054_v20 = vld [vmem:[%s26934_s10 + $0x48] sm:$0xff]  ;;  %v20424_v19 = vld [vmem:[%s26933_s9 + $0xaa0] ss:$16 sps:$4 sm:$0xff]  }
 0xb9b   :  { %10103 = vmatprep.subr.bf16.mxu1 %v20369_v5  ;;  %v20427_v5 = vld [vmem:[%s26933_s9 + $0xaa8] ss:$16 sps:$4 sm:$0xff]  }
 0xb9d   :  { %10018 = vmatpush1.bf16.msra.mxu0 %v20364_v21  ;;  %v20432_v21 = vld [vmem:[%s26933_s9 + $0xac4] ss:$16 sps:$4 sm:$0xff]  }
 0xb9e   :  { %10104 = vmatpush1.bf16.msra.mxu1 %v20367_v11  ;;  %10019 = vmatprep.subr.bf16.mxu0 %v20372_v31  ;;  %v20435_v11 = vld [vmem:[%s26933_s9 + $0xacc] ss:$16 sps:$4 sm:$0xff]   ;;  %v17055_v31 = vld [vmem:[%s26934_s10 + $0x50] sm:$0xff] }
 0xb9f   :  { %10105 = vmatprep.subr.bf16.mxu1 %v20375_v40  ;;  %v20430_v40 = vld [vmem:[%s26933_s9 + $0xac0] ss:$16 sps:$4 sm:$0xff]  }
 0xba1   :  { %10020 = vmatpush1.bf16.msra.mxu0 %v20370_v44  ;;  %v20433_v44 = vld [vmem:[%s26933_s9 + $0xac8] ss:$16 sps:$4 sm:$0xff]  }
 0xba2   :  { %10106 = vmatpush1.bf16.msra.mxu1 %v20373_v47  ;;  %10021 = vmatprep.subr.bf16.mxu0 %v20378_v25  ;;  %v20438_v47 = vld [vmem:[%s26933_s9 + $0xae4] ss:$16 sps:$4 sm:$0xff]   ;;  %v20441_v25 = vld [vmem:[%s26933_s9 + $0xaec] ss:$16 sps:$4 sm:$0xff]  }
 0xba3   :  { %10107 = vmatprep.subr.bf16.mxu1 %v20381_v26  ;;  %v17056_v26 = vld [vmem:[%s26934_s10 + $0x58] sm:$0xf] }
 0xba5   :  { %10022 = vmatpush1.bf16.msra.mxu0 %v20376_v56  ;;  %v20436_v56 = vld [vmem:[%s26933_s9 + $0xae0] ss:$16 sps:$4 sm:$0xff]  }
 0xba6   :  { %10108 = vmatpush1.bf16.msra.mxu1 %v20379_v58  ;;  %10023 = vmatprep.subr.bf16.mxu0 %v20384_v34  ;;  %v20439_v58 = vld [vmem:[%s26933_s9 + $0xae8] ss:$16 sps:$4 sm:$0xff]   ;;  %v20444_v34 = vld [vmem:[%s26933_s9 + $0xb04] ss:$16 sps:$4 sm:$0xff]  }
 0xba7   :  { %10109 = vmatprep.subr.bf16.mxu1 %v20387_v23  ;;  %v20447_v23 = vld [vmem:[%s26933_s9 + $0xb0c] ss:$16 sps:$4 sm:$0xff]  }
 0xba9   :  { %10024 = vmatpush1.bf16.msra.mxu0 %v20382_v4  ;;  %v20442_v4 = vld [vmem:[%s26933_s9 + $0xb00] ss:$16 sps:$4 sm:$0xff]  }
 0xbaa   :  { %10110 = vmatpush1.bf16.msra.mxu1 %v20385_v15  ;;  %10025 = vmatprep.subr.bf16.mxu0 %v20390_v24  ;;  %v20445_v15 = vld [vmem:[%s26933_s9 + $0xb08] ss:$16 sps:$4 sm:$0xff]   ;;  %v20450_v24 = vld [vmem:[%s26933_s9 + $0xb24] ss:$16 sps:$4 sm:$0xff]  }
 0xbab   :  { %10111 = vmatprep.subr.bf16.mxu1 %v20393_v46  ;;  %v20453_v46 = vld [vmem:[%s26933_s9 + $0xb2c] ss:$16 sps:$4 sm:$0xff]  }
 0xbad   :  { %10026 = vmatpush1.bf16.msra.mxu0 %v20388_v50  ;;  %v20448_v50 = vld [vmem:[%s26933_s9 + $0xb20] ss:$16 sps:$4 sm:$0xff]  }
 0xbae   :  { %10112 = vmatpush1.bf16.msra.mxu1 %v20391_v63  ;;  %10027 = vmatprep.subr.bf16.mxu0 %v20396_v7  ;;  %v20451_v63 = vld [vmem:[%s26933_s9 + $0xb28] ss:$16 sps:$4 sm:$0xff]   ;;  %v20456_v7 = vld [vmem:[%s26933_s9 + $0xb44] ss:$16 sps:$4 sm:$0xff]  }
 0xbaf   :  { %10113 = vmatprep.subr.bf16.mxu1 %v20399_v35  ;;  %v20459_v35 = vld [vmem:[%s26933_s9 + $0xb4c] ss:$16 sps:$4 sm:$0xff]  }
 0xbb1   :  { %10028 = vmatpush1.bf16.msra.mxu0 %v20394_v54  ;;  %v20454_v54 = vld [vmem:[%s26933_s9 + $0xb40] ss:$16 sps:$4 sm:$0xff]  }
 0xbb2   :  { %10114 = vmatpush1.bf16.msra.mxu1 %v20397_v2  ;;  %10029 = vmatprep.subr.bf16.mxu0 %v20402_v3  ;;  %v20457_v2 = vld [vmem:[%s26933_s9 + $0xb48] ss:$16 sps:$4 sm:$0xff]   ;;  %v20462_v3 = vld [vmem:[%s26933_s9 + $0xb64] ss:$16 sps:$4 sm:$0xff]  }
 0xbb3   :  { %10115 = vmatprep.subr.bf16.mxu1 %v20405_v39  ;;  %v20465_v39 = vld [vmem:[%s26933_s9 + $0xb6c] ss:$16 sps:$4 sm:$0xff]  }
 0xbb5   :  { %10030 = vmatpush1.bf16.msra.mxu0 %v20400_v55  ;;  %v20460_v55 = vld [vmem:[%s26933_s9 + $0xb60] ss:$16 sps:$4 sm:$0xff]  }
 0xbb6   :  { %10116 = vmatpush1.bf16.msra.mxu1 %v20403_v17  ;;  %10031 = vmatprep.subr.bf16.mxu0 %v20408_v32  ;;  %v20463_v17 = vld [vmem:[%s26933_s9 + $0xb68] ss:$16 sps:$4 sm:$0xff]   ;;  %v20468_v32 = vld [vmem:[%s26933_s9 + $0xb84] ss:$16 sps:$4 sm:$0xff]  }
 0xbb7   :  { %10117 = vmatprep.subr.bf16.mxu1 %v20411_v61  ;;  %v20471_v61 = vld [vmem:[%s26933_s9 + $0xb8c] ss:$16 sps:$4 sm:$0xff]  }
 0xbb9   :  { %10032 = vmatpush1.bf16.msra.mxu0 %v20406_v9  ;;  %v20466_v9 = vld [vmem:[%s26933_s9 + $0xb80] ss:$16 sps:$4 sm:$0xff]  }
 0xbba   :  { %10118 = vmatpush1.bf16.msra.mxu1 %v20409_v12  ;;  %10033 = vmatprep.subr.bf16.mxu0 %v20414_v6  ;;  %v20469_v12 = vld [vmem:[%s26933_s9 + $0xb88] ss:$16 sps:$4 sm:$0xff]   ;;  %v20474_v6 = vld [vmem:[%s26933_s9 + $0xba4] ss:$16 sps:$4 sm:$0xff]  }
 0xbbb   :  { %10119 = vmatprep.subr.bf16.mxu1 %v20417_v43  ;;  %v20477_v43 = vld [vmem:[%s26933_s9 + $0xbac] ss:$16 sps:$4 sm:$0xff]  }
 0xbbd   :  { %10034 = vmatpush1.bf16.msra.mxu0 %v20412_v0  ;;  %v20472_v0 = vld [vmem:[%s26933_s9 + $0xba0] ss:$16 sps:$4 sm:$0xff]  }
 0xbbe   :  { %10120 = vmatpush1.bf16.msra.mxu1 %v20415_v1  ;;  %v20475_v1 = vld [vmem:[%s26933_s9 + $0xba8] ss:$16 sps:$4 sm:$0xff]  }
 0xbc0   :  { %10044 = vmatmul.mubr.bf16.vlgmr.msra.gmra.mrb[68].mxu0 %v23984_v33 }
 0xbc1   :  { %10130 = vmatmul.mubr.bf16.vlgmr.msra.gmra.mrb[64].mxu1 %v23984_v33  ;;  %10233 = vmatprep.mubr.f32.mxu0 %v26985_v41 }
 0xbc2   :  { %10322 = vmatprep.mubr.f32.mxu1 %v26985_v41 }
 0xc93   :  { %v10045_v57 = vpop.f32.mrb[68].mxu0 }
 0xc94   :  { %v10131_v14 = vpop.f32.mrb[64].mxu1  ;;  %v10047_v16 = vpop.f32.mrb[69].mxu0 }
 0xc95   :  { %v10133_v18 = vpop.f32.mrb[65].mxu1  ;;  %v10049_v28 = vpop.f32.mrb[70].mxu0 }
 0xc96   :  { %v18540_v30 = vpack.c.bf16 %v10049_v28, %v10045_v57  ;;  %v10135_v38 = vpop.f32.mrb[66].mxu1  ;;  %v10051_v13 = vpop.f32.mrb[71].mxu0  ;;  %v20480_v57 = vld [vmem:[%s26933_s9 + $0xbc4] ss:$16 sps:$4 sm:$0xff]  }
 0xc97   :  { %v18546_v59 = vpack.c.bf16 %v10135_v38, %v10131_v14  ;;  %v18537_v53 = vpack.c.bf16 %v10051_v13, %v10047_v16  ;;  %v10137_v42 = vpop.f32.mrb[67].mxu1  ;;  %v20483_v14 = vld [vmem:[%s26933_s9 + $0xbcc] ss:$16 sps:$4 sm:$0xff]   ;;  %v20478_v16 = vld [vmem:[%s26933_s9 + $0xbc0] ss:$16 sps:$4 sm:$0xff]  }
 0xc98   :  { %v18543_v27 = vpack.c.bf16 %v10137_v42, %v10133_v18  ;;  %v20481_v18 = vld [vmem:[%s26933_s9 + $0xbc8] ss:$16 sps:$4 sm:$0xff]   ;;  %v20486_v28 = vld [vmem:[%s26933_s9 + $0xbe4] ss:$16 sps:$4 sm:$0xff]   ;;  %v20484_v38 = vld [vmem:[%s26933_s9 + $0xbe0] ss:$16 sps:$4 sm:$0xff]  }
 0xc99   :  { %18539 = vmatprep.subr.msk.bf16.mxu0 %vm24492_vm7, %v18537_v53  ;;  %v20487_v13 = vld [vmem:[%s26933_s9 + $0xbe8] ss:$16 sps:$4 sm:$0xff]   ;;  %v20495_v53 = vld [vmem:[%s26933_s9 + $0xc0c] ss:$16 sps:$4 sm:$0xff]   ;;  %v20490_v42 = vld [vmem:[%s26933_s9 + $0xc00] ss:$16 sps:$4 sm:$0xff]  }
 0xc9a   :  { %18545 = vmatprep.subr.msk.bf16.mxu1 %vm24492_vm7, %v18543_v27  ;;  %18542 = vmatpush1.bf16.msk.msra.mxu0 %vm24492_vm7, %v18540_v30  ;;  %v20489_v30 = vld [vmem:[%s26933_s9 + $0xbec] ss:$16 sps:$4 sm:$0xff]   ;;  %v20498_v27 = vld [vmem:[%s26933_s9 + $0xc24] ss:$16 sps:$4 sm:$0xff]  }
 0xc9b   :  { %18548 = vmatpush1.bf16.msk.msra.mxu1 %vm24492_vm7, %v18546_v59  ;;  %11036 = vmatprep.subr.bf16.mxu0 %v20420_v48  ;;  %v20492_v59 = vld [vmem:[%s26933_s9 + $0xc04] ss:$16 sps:$4 sm:$0xff]   ;;  %v20493_v48 = vld [vmem:[%s26933_s9 + $0xc08] ss:$16 sps:$4 sm:$0xff]  }
 0xc9c   :  { %11122 = vmatprep.subr.bf16.mxu1 %v20423_v60  ;;  %v20501_v60 = vld [vmem:[%s26933_s9 + $0xc2c] ss:$16 sps:$4 sm:$0xff]  }
 0xc9d   :  { %17059 = vmatmul.mubr.msk.f32.vlgmr.msra.gmra.mrb[50].mxu0 %vm8890_vm8, %v17053_v51 }
 0xc9e   :  { %17065 = vmatmul.mubr.msk.f32.vlgmr.msra.gmra.mrb[46].mxu1 %vm8890_vm8, %v17053_v51  ;;  %11037 = vmatpush1.bf16.msra.mxu0 %v20418_v8  ;;  %v20496_v51 = vld [vmem:[%s26933_s9 + $0xc20] ss:$16 sps:$4 sm:$0xff]   ;;  %v20499_v8 = vld [vmem:[%s26933_s9 + $0xc28] ss:$16 sps:$4 sm:$0xff]  }
 0xc9f   :  { %11123 = vmatpush1.bf16.msra.mxu1 %v20421_v49  ;;  %10239 = vmatprep.mubr.f32.mxu0 %v26985_v41  ;;  %v20504_v49 = vld [vmem:[%s26933_s9 + $0xc44] ss:$16 sps:$4 sm:$0xff]  }
 0xca0   :  { %10328 = vmatprep.mubr.f32.mxu1 %v26985_v41  ;;  %11038 = vmatprep.subr.bf16.mxu0 %v20426_v45  ;;  %v20507_v45 = vld [vmem:[%s26933_s9 + $0xc4c] ss:$16 sps:$4 sm:$0xff]  }
 0xca1   :  { %17060 = vmatmul.mubr.msk.f32.gmra.mrb[60].mxu0 %vm8890_vm8, %v17054_v20  ;;  %11124 = vmatprep.subr.bf16.mxu1 %v20429_v62  ;;  %v20502_v62 = vld [vmem:[%s26933_s9 + $0xc40] ss:$16 sps:$4 sm:$0xff]  }
 0xca2   :  { %17066 = vmatmul.mubr.msk.f32.gmra.mrb[56].mxu1 %vm8890_vm8, %v17054_v20  ;;  %11039 = vmatpush1.bf16.msra.mxu0 %v20424_v19  ;;  %v20505_v20 = vld [vmem:[%s26933_s9 + $0xc48] ss:$16 sps:$4 sm:$0xff]   ;;  %v20510_v19 = vld [vmem:[%s26933_s9 + $0xc64] ss:$16 sps:$4 sm:$0xff]  }
 0xca3   :  { %11125 = vmatpush1.bf16.msra.mxu1 %v20427_v5  ;;  %10245 = vmatprep.mubr.f32.mxu0 %v26985_v41  ;;  %v20513_v5 = vld [vmem:[%s26933_s9 + $0xc6c] ss:$16 sps:$4 sm:$0xff]  }
 0xca4   :  { %10334 = vmatprep.mubr.f32.mxu1 %v26985_v41  ;;  %11040 = vmatprep.subr.bf16.mxu0 %v20432_v21  ;;  %v20508_v21 = vld [vmem:[%s26933_s9 + $0xc60] ss:$16 sps:$4 sm:$0xff]  }
 0xca5   :  { %17061 = vmatmul.mubr.msk.f32.gmra.mrb[62].mxu0 %vm8890_vm8, %v17055_v31  ;;  %11126 = vmatprep.subr.bf16.mxu1 %v20435_v11  ;;  %v20511_v11 = vld [vmem:[%s26933_s9 + $0xc68] ss:$16 sps:$4 sm:$0xff]  }
 0xca6   :  { %17067 = vmatmul.mubr.msk.f32.gmra.mrb[58].mxu1 %vm8890_vm8, %v17055_v31  ;;  %11041 = vmatpush1.bf16.msra.mxu0 %v20430_v40  ;;  %v20516_v31 = vld [vmem:[%s26933_s9 + $0xc84] ss:$16 sps:$4 sm:$0xff]   ;;  %v20519_v40 = vld [vmem:[%s26933_s9 + $0xc8c] ss:$16 sps:$4 sm:$0xff]  }
 0xca7   :  { %11127 = vmatpush1.bf16.msra.mxu1 %v20433_v44  ;;  %10251 = vmatprep.mubr.f32.mxu0 %v26985_v41  ;;  %v20514_v44 = vld [vmem:[%s26933_s9 + $0xc80] ss:$16 sps:$4 sm:$0xff]  }
 0xca8   :  { %10340 = vmatprep.mubr.f32.mxu1 %v26985_v41  ;;  %11042 = vmatprep.subr.bf16.mxu0 %v20438_v47  ;;  %v20517_v47 = vld [vmem:[%s26933_s9 + $0xc88] ss:$16 sps:$4 sm:$0xff]  }
 0xca9   :  { %17062 = vmatmul.mubr.msk.f32.gmra.mrb[64].mxu0 %vm8890_vm8, %v17056_v26  ;;  %11128 = vmatprep.subr.bf16.mxu1 %v20441_v25  ;;  %v20522_v25 = vld [vmem:[%s26933_s9 + $0xca4] ss:$16 sps:$4 sm:$0xff]  }
 0xcaa   :  { %17068 = vmatmul.mubr.msk.f32.gmra.mrb[60].mxu1 %vm8890_vm8, %v17056_v26  ;;  %11043 = vmatpush1.bf16.msra.mxu0 %v20436_v56  ;;  %v20525_v26 = vld [vmem:[%s26933_s9 + $0xcac] ss:$16 sps:$4 sm:$0xff]   ;;  %v20520_v56 = vld [vmem:[%s26933_s9 + $0xca0] ss:$16 sps:$4 sm:$0xff]  }
 0xcab   :  { %11068 = vmatprep.mubr.bf16.mxu0 %v23992_v36  ;;  %11129 = vmatpush1.bf16.msra.mxu1 %v20439_v58  ;;  %v20523_v58 = vld [vmem:[%s26933_s9 + $0xca8] ss:$16 sps:$4 sm:$0xff]  }
 0xcac   :  { %11154 = vmatprep.mubr.bf16.mxu1 %v23992_v36  ;;  %11044 = vmatprep.subr.bf16.mxu0 %v20444_v34  ;;  %v20528_v34 = vld [vmem:[%s26933_s9 + $0xcc4] ss:$16 sps:$4 sm:$0xff]  }
 0xcad   :  { %11130 = vmatprep.subr.bf16.mxu1 %v20447_v23  ;;  %v20531_v23 = vld [vmem:[%s26933_s9 + $0xccc] ss:$16 sps:$4 sm:$0xff]  }
 0xcae   :  { %11045 = vmatpush1.bf16.msra.mxu0 %v20442_v4  ;;  %v20526_v4 = vld [vmem:[%s26933_s9 + $0xcc0] ss:$16 sps:$4 sm:$0xff]  }
 0xcaf   :  { %11131 = vmatpush1.bf16.msra.mxu1 %v20445_v15  ;;  %11046 = vmatprep.subr.bf16.mxu0 %v20450_v24  ;;  %v20529_v15 = vld [vmem:[%s26933_s9 + $0xcc8] ss:$16 sps:$4 sm:$0xff]   ;;  %v20534_v24 = vld [vmem:[%s26933_s9 + $0xce4] ss:$16 sps:$4 sm:$0xff]  }
 0xcb0   :  { %11132 = vmatprep.subr.bf16.mxu1 %v20453_v46  ;;  %v20537_v46 = vld [vmem:[%s26933_s9 + $0xcec] ss:$16 sps:$4 sm:$0xff]  }
 0xcb2   :  { %11047 = vmatpush1.bf16.msra.mxu0 %v20448_v50  ;;  %v20532_v50 = vld [vmem:[%s26933_s9 + $0xce0] ss:$16 sps:$4 sm:$0xff]  }
 0xcb3   :  { %11133 = vmatpush1.bf16.msra.mxu1 %v20451_v63  ;;  %11048 = vmatprep.subr.bf16.mxu0 %v20456_v7  ;;  %v20535_v63 = vld [vmem:[%s26933_s9 + $0xce8] ss:$16 sps:$4 sm:$0xff]   ;;  %v20540_v7 = vld [vmem:[%s26933_s9 + $0xd04] ss:$16 sps:$4 sm:$0xff]  }
 0xcb4   :  { %11134 = vmatprep.subr.bf16.mxu1 %v20459_v35  ;;  %v20543_v35 = vld [vmem:[%s26933_s9 + $0xd0c] ss:$16 sps:$4 sm:$0xff]  }
 0xcb6   :  { %11049 = vmatpush1.bf16.msra.mxu0 %v20454_v54  ;;  %v20538_v54 = vld [vmem:[%s26933_s9 + $0xd00] ss:$16 sps:$4 sm:$0xff]  }
 0xcb7   :  { %11135 = vmatpush1.bf16.msra.mxu1 %v20457_v2  ;;  %11050 = vmatprep.subr.bf16.mxu0 %v20462_v3  ;;  %v20541_v2 = vld [vmem:[%s26933_s9 + $0xd08] ss:$16 sps:$4 sm:$0xff]   ;;  %v20546_v3 = vld [vmem:[%s26933_s9 + $0xd24] ss:$16 sps:$4 sm:$0xff]  }
 0xcb8   :  { %11136 = vmatprep.subr.bf16.mxu1 %v20465_v39  ;;  %v20549_v39 = vld [vmem:[%s26933_s9 + $0xd2c] ss:$16 sps:$4 sm:$0xff]  }
 0xcba   :  { %11051 = vmatpush1.bf16.msra.mxu0 %v20460_v55  ;;  %v20544_v55 = vld [vmem:[%s26933_s9 + $0xd20] ss:$16 sps:$4 sm:$0xff]  }
 0xcbb   :  { %11137 = vmatpush1.bf16.msra.mxu1 %v20463_v17  ;;  %11052 = vmatprep.subr.bf16.mxu0 %v20468_v32  ;;  %v20547_v17 = vld [vmem:[%s26933_s9 + $0xd28] ss:$16 sps:$4 sm:$0xff]   ;;  %v20552_v32 = vld [vmem:[%s26933_s9 + $0xd44] ss:$16 sps:$4 sm:$0xff]  }
 0xcbc   :  { %11138 = vmatprep.subr.bf16.mxu1 %v20471_v61  ;;  %v20555_v61 = vld [vmem:[%s26933_s9 + $0xd4c] ss:$16 sps:$4 sm:$0xff]  }
 0xcbe   :  { %11053 = vmatpush1.bf16.msra.mxu0 %v20466_v9  ;;  %v20550_v9 = vld [vmem:[%s26933_s9 + $0xd40] ss:$16 sps:$4 sm:$0xff]  }
 0xcbf   :  { %11139 = vmatpush1.bf16.msra.mxu1 %v20469_v12  ;;  %11054 = vmatprep.subr.bf16.mxu0 %v20474_v6  ;;  %v20553_v12 = vld [vmem:[%s26933_s9 + $0xd48] ss:$16 sps:$4 sm:$0xff]   ;;  %v20558_v6 = vld [vmem:[%s26933_s9 + $0xd64] ss:$16 sps:$4 sm:$0xff]  }
 0xcc0   :  { %11140 = vmatprep.subr.bf16.mxu1 %v20477_v43  ;;  %v20561_v43 = vld [vmem:[%s26933_s9 + $0xd6c] ss:$16 sps:$4 sm:$0xff]  }
 0xcc2   :  { %11055 = vmatpush1.bf16.msra.mxu0 %v20472_v0  ;;  %v20556_v0 = vld [vmem:[%s26933_s9 + $0xd60] ss:$16 sps:$4 sm:$0xff]  }
 0xcc3   :  { %11141 = vmatpush1.bf16.msra.mxu1 %v20475_v1  ;;  %11056 = vmatprep.subr.bf16.mxu0 %v20480_v57  ;;  %v20559_v1 = vld [vmem:[%s26933_s9 + $0xd68] ss:$16 sps:$4 sm:$0xff]   ;;  %v20564_v57 = vld [vmem:[%s26933_s9 + $0xd84] ss:$16 sps:$4 sm:$0xff]  }
 0xcc4   :  { %11142 = vmatprep.subr.bf16.mxu1 %v20483_v14  ;;  %v20567_v14 = vld [vmem:[%s26933_s9 + $0xd8c] ss:$16 sps:$4 sm:$0xff]  }
 0xcc6   :  { %11057 = vmatpush1.bf16.msra.mxu0 %v20478_v16  ;;  %v20562_v16 = vld [vmem:[%s26933_s9 + $0xd80] ss:$16 sps:$4 sm:$0xff]  }
 0xcc7   :  { %11143 = vmatpush1.bf16.msra.mxu1 %v20481_v18  ;;  %11058 = vmatprep.subr.bf16.mxu0 %v20486_v28  ;;  %v20565_v18 = vld [vmem:[%s26933_s9 + $0xd88] ss:$16 sps:$4 sm:$0xff]   ;;  %v20570_v28 = vld [vmem:[%s26933_s9 + $0xda4] ss:$16 sps:$4 sm:$0xff]  }
 0xcc8   :  { %11144 = vmatprep.subr.bf16.mxu1 %v20489_v30  ;;  %v20573_v30 = vld [vmem:[%s26933_s9 + $0xdac] ss:$16 sps:$4 sm:$0xff]  }
 0xcca   :  { %11059 = vmatpush1.bf16.msra.mxu0 %v20484_v38  ;;  %v20568_v38 = vld [vmem:[%s26933_s9 + $0xda0] ss:$16 sps:$4 sm:$0xff]  }
 0xccb   :  { %11145 = vmatpush1.bf16.msra.mxu1 %v20487_v13  ;;  %11060 = vmatprep.subr.bf16.mxu0 %v20492_v59  ;;  %v20571_v13 = vld [vmem:[%s26933_s9 + $0xda8] ss:$16 sps:$4 sm:$0xff]   ;;  %v20576_v59 = vld [vmem:[%s26933_s9 + $0xdc4] ss:$16 sps:$4 sm:$0xff]  }
 0xccc   :  { %11146 = vmatprep.subr.bf16.mxu1 %v20495_v53  ;;  %v20579_v53 = vld [vmem:[%s26933_s9 + $0xdcc] ss:$16 sps:$4 sm:$0xff]  }
 0xcce   :  { %11061 = vmatpush1.bf16.msra.mxu0 %v20490_v42  ;;  %v20574_v42 = vld [vmem:[%s26933_s9 + $0xdc0] ss:$16 sps:$4 sm:$0xff]  }
 0xccf   :  { %11147 = vmatpush1.bf16.msra.mxu1 %v20493_v48  ;;  %11062 = vmatprep.subr.bf16.mxu0 %v20498_v27  ;;  %v20577_v48 = vld [vmem:[%s26933_s9 + $0xdc8] ss:$16 sps:$4 sm:$0xff]   ;;  %v20582_v27 = vld [vmem:[%s26933_s9 + $0xde4] ss:$16 sps:$4 sm:$0xff]  }
 0xcd0   :  { %11148 = vmatprep.subr.bf16.mxu1 %v20501_v60  ;;  %v20585_v60 = vld [vmem:[%s26933_s9 + $0xdec] ss:$16 sps:$4 sm:$0xff]  }
 0xcd2   :  { %11063 = vmatpush1.bf16.msra.mxu0 %v20496_v51  ;;  %v20580_v51 = vld [vmem:[%s26933_s9 + $0xde0] ss:$16 sps:$4 sm:$0xff]  }
 0xcd3   :  { %11149 = vmatpush1.bf16.msra.mxu1 %v20499_v8  ;;  %11064 = vmatprep.subr.bf16.mxu0 %v20504_v49  ;;  %v20583_v8 = vld [vmem:[%s26933_s9 + $0xde8] ss:$16 sps:$4 sm:$0xff]  }
 0xcd4   :  { %11150 = vmatprep.subr.bf16.mxu1 %v20507_v45 }
 0xcd6   :  { %11065 = vmatpush1.bf16.msra.mxu0 %v20502_v62 }
 0xcd7   :  { %11151 = vmatpush1.bf16.msra.mxu1 %v20505_v20  ;;  %11066 = vmatprep.subr.bf16.mxu0 %v20510_v19 }
 0xcd8   :  { %11152 = vmatprep.subr.bf16.mxu1 %v20513_v5 }
 0xcda   :  { %11067 = vmatpush1.bf16.msra.mxu0 %v20508_v21 }
 0xcdb   :  { %11153 = vmatpush1.bf16.msra.mxu1 %v20511_v11  ;;  %11079 = vmatprep.subr.bf16.mxu0 %v20516_v31 }
 0xcdc   :  { %11165 = vmatprep.subr.bf16.mxu1 %v20519_v40 }
 0xcdd   :  { %11069 = vmatmul.mubr.bf16.vlgmr.msra.gmra.mrb[72].mxu0 %v23990_v29 }
 0xcde   :  { %11155 = vmatmul.mubr.bf16.vlgmr.msra.gmra.mrb[68].mxu1 %v23990_v29  ;;  %11080 = vmatpush1.bf16.msra.mxu0 %v20514_v44 }
 0xcdf   :  { %17293 = vmatprep.mubr.msk.bf16.mxu0 %vm6402_vm3, %v23986_v37  ;;  %11166 = vmatpush1.bf16.msra.mxu1 %v20517_v47  ;;  %v20588_v47 = vld [vmem:[%s26933_s9 + $0xe04] ss:$16 sps:$4 sm:$0xff]  }
 0xce0   :  { %17294 = vmatprep.mubr.msk.bf16.mxu1 %vm6402_vm3, %v23986_v37  ;;  %11081 = vmatprep.subr.bf16.mxu0 %v20522_v25 }
 0xce1   :  { %11167 = vmatprep.subr.bf16.mxu1 %v20525_v26  ;;  %v20591_v26 = vld [vmem:[%s26933_s9 + $0xe0c] ss:$16 sps:$4 sm:$0xff]  }
 0xce2   :  { %11082 = vmatpush1.bf16.msra.mxu0 %v20520_v56  ;;  %v17295_v56 = vld [vmem:[%s26934_s10 + $0x60] sm:$0xff] }
 0xce3   :  { %11168 = vmatpush1.bf16.msra.mxu1 %v20523_v58  ;;  %11083 = vmatprep.subr.bf16.mxu0 %v20528_v34  ;;  %v20586_v58 = vld [vmem:[%s26933_s9 + $0xe00] ss:$16 sps:$4 sm:$0xff]   ;;  %v20589_v34 = vld [vmem:[%s26933_s9 + $0xe08] ss:$16 sps:$4 sm:$0xff]  }
 0xce4   :  { %11169 = vmatprep.subr.bf16.mxu1 %v20531_v23  ;;  %v20594_v23 = vld [vmem:[%s26933_s9 + $0xe24] ss:$16 sps:$4 sm:$0xff]  }
 0xce6   :  { %11084 = vmatpush1.bf16.msra.mxu0 %v20526_v4  ;;  %v20597_v4 = vld [vmem:[%s26933_s9 + $0xe2c] ss:$16 sps:$4 sm:$0xff]  }
 0xce7   :  { %11170 = vmatpush1.bf16.msra.mxu1 %v20529_v15  ;;  %11085 = vmatprep.subr.bf16.mxu0 %v20534_v24  ;;  %v17296_v15 = vld [vmem:[%s26934_s10 + $0x68] sm:$0xff]  ;;  %v20592_v24 = vld [vmem:[%s26933_s9 + $0xe20] ss:$16 sps:$4 sm:$0xff]  }
 0xce8   :  { %11171 = vmatprep.subr.bf16.mxu1 %v20537_v46  ;;  %v20595_v46 = vld [vmem:[%s26933_s9 + $0xe28] ss:$16 sps:$4 sm:$0xff]  }
 0xcea   :  { %11086 = vmatpush1.bf16.msra.mxu0 %v20532_v50  ;;  %v20600_v50 = vld [vmem:[%s26933_s9 + $0xe44] ss:$16 sps:$4 sm:$0xff]  }
 0xceb   :  { %11172 = vmatpush1.bf16.msra.mxu1 %v20535_v63  ;;  %11087 = vmatprep.subr.bf16.mxu0 %v20540_v7  ;;  %v20603_v63 = vld [vmem:[%s26933_s9 + $0xe4c] ss:$16 sps:$4 sm:$0xff]   ;;  %v17297_v7 = vld [vmem:[%s26934_s10 + $0x70] sm:$0xff] }
 0xcec   :  { %11173 = vmatprep.subr.bf16.mxu1 %v20543_v35  ;;  %v20598_v35 = vld [vmem:[%s26933_s9 + $0xe40] ss:$16 sps:$4 sm:$0xff]  }
 0xcee   :  { %11088 = vmatpush1.bf16.msra.mxu0 %v20538_v54  ;;  %v20601_v54 = vld [vmem:[%s26933_s9 + $0xe48] ss:$16 sps:$4 sm:$0xff]  }
 0xcef   :  { %11174 = vmatpush1.bf16.msra.mxu1 %v20541_v2  ;;  %11089 = vmatprep.subr.bf16.mxu0 %v20546_v3  ;;  %v20606_v2 = vld [vmem:[%s26933_s9 + $0xe64] ss:$16 sps:$4 sm:$0xff]   ;;  %v20609_v3 = vld [vmem:[%s26933_s9 + $0xe6c] ss:$16 sps:$4 sm:$0xff]  }
 0xcf0   :  { %11175 = vmatprep.subr.bf16.mxu1 %v20549_v39  ;;  %v17298_v39 = vld [vmem:[%s26934_s10 + $0x78] sm:$0xf] }
 0xcf2   :  { %11090 = vmatpush1.bf16.msra.mxu0 %v20544_v55  ;;  %v20604_v55 = vld [vmem:[%s26933_s9 + $0xe60] ss:$16 sps:$4 sm:$0xff]  }
 0xcf3   :  { %11176 = vmatpush1.bf16.msra.mxu1 %v20547_v17  ;;  %11091 = vmatprep.subr.bf16.mxu0 %v20552_v32  ;;  %v20607_v17 = vld [vmem:[%s26933_s9 + $0xe68] ss:$16 sps:$4 sm:$0xff]   ;;  %v20612_v32 = vld [vmem:[%s26933_s9 + $0xe84] ss:$16 sps:$4 sm:$0xff]  }
 0xcf4   :  { %11177 = vmatprep.subr.bf16.mxu1 %v20555_v61  ;;  %v20615_v61 = vld [vmem:[%s26933_s9 + $0xe8c] ss:$16 sps:$4 sm:$0xff]  }
 0xcf6   :  { %11092 = vmatpush1.bf16.msra.mxu0 %v20550_v9  ;;  %v20610_v9 = vld [vmem:[%s26933_s9 + $0xe80] ss:$16 sps:$4 sm:$0xff]  }
 0xcf7   :  { %11178 = vmatpush1.bf16.msra.mxu1 %v20553_v12  ;;  %11093 = vmatprep.subr.bf16.mxu0 %v20558_v6  ;;  %v20613_v12 = vld [vmem:[%s26933_s9 + $0xe88] ss:$16 sps:$4 sm:$0xff]   ;;  %v20618_v6 = vld [vmem:[%s26933_s9 + $0xea4] ss:$16 sps:$4 sm:$0xff]  }
 0xcf8   :  { %11179 = vmatprep.subr.bf16.mxu1 %v20561_v43  ;;  %v20621_v43 = vld [vmem:[%s26933_s9 + $0xeac] ss:$16 sps:$4 sm:$0xff]  }
 0xcfa   :  { %11094 = vmatpush1.bf16.msra.mxu0 %v20556_v0  ;;  %v20616_v0 = vld [vmem:[%s26933_s9 + $0xea0] ss:$16 sps:$4 sm:$0xff]  }
 0xcfb   :  { %11180 = vmatpush1.bf16.msra.mxu1 %v20559_v1  ;;  %11095 = vmatprep.subr.bf16.mxu0 %v20564_v57  ;;  %v20619_v1 = vld [vmem:[%s26933_s9 + $0xea8] ss:$16 sps:$4 sm:$0xff]   ;;  %v20627_v57 = vld [vmem:[%s26933_s9 + $0xecc] ss:$16 sps:$4 sm:$0xff]  }
 0xcfc   :  { %11181 = vmatprep.subr.bf16.mxu1 %v20567_v14  ;;  %v20622_v14 = vld [vmem:[%s26933_s9 + $0xec0] ss:$16 sps:$4 sm:$0xff]  }
 0xcfe   :  { %11096 = vmatpush1.bf16.msra.mxu0 %v20562_v16  ;;  %v20625_v16 = vld [vmem:[%s26933_s9 + $0xec8] ss:$16 sps:$4 sm:$0xff]  }
 0xcff   :  { %11182 = vmatpush1.bf16.msra.mxu1 %v20565_v18  ;;  %11097 = vmatprep.subr.bf16.mxu0 %v20570_v28  ;;  %v20630_v18 = vld [vmem:[%s26933_s9 + $0xee4] ss:$16 sps:$4 sm:$0xff]   ;;  %v20633_v28 = vld [vmem:[%s26933_s9 + $0xeec] ss:$16 sps:$4 sm:$0xff]  }
 0xd00   :  { %11183 = vmatprep.subr.bf16.mxu1 %v20573_v30  ;;  %v20628_v30 = vld [vmem:[%s26933_s9 + $0xee0] ss:$16 sps:$4 sm:$0xff]  }
 0xd02   :  { %11098 = vmatpush1.bf16.msra.mxu0 %v20568_v38  ;;  %v20631_v38 = vld [vmem:[%s26933_s9 + $0xee8] ss:$16 sps:$4 sm:$0xff]  }
 0xd03   :  { %11184 = vmatpush1.bf16.msra.mxu1 %v20571_v13  ;;  %11099 = vmatprep.subr.bf16.mxu0 %v20576_v59  ;;  %v20636_v13 = vld [vmem:[%s26933_s9 + $0xf04] ss:$16 sps:$4 sm:$0xff]   ;;  %v20639_v59 = vld [vmem:[%s26933_s9 + $0xf0c] ss:$16 sps:$4 sm:$0xff]  }
 0xd04   :  { %11185 = vmatprep.subr.bf16.mxu1 %v20579_v53  ;;  %v20634_v53 = vld [vmem:[%s26933_s9 + $0xf00] ss:$16 sps:$4 sm:$0xff]  }
 0xd06   :  { %11100 = vmatpush1.bf16.msra.mxu0 %v20574_v42  ;;  %v20637_v42 = vld [vmem:[%s26933_s9 + $0xf08] ss:$16 sps:$4 sm:$0xff]  }
 0xd07   :  { %11186 = vmatpush1.bf16.msra.mxu1 %v20577_v48  ;;  %11101 = vmatprep.subr.bf16.mxu0 %v20582_v27  ;;  %v20642_v48 = vld [vmem:[%s26933_s9 + $0xf24] ss:$16 sps:$4 sm:$0xff]   ;;  %v20645_v27 = vld [vmem:[%s26933_s9 + $0xf2c] ss:$16 sps:$4 sm:$0xff]  }
 0xd08   :  { %11187 = vmatprep.subr.bf16.mxu1 %v20585_v60  ;;  %v20640_v60 = vld [vmem:[%s26933_s9 + $0xf20] ss:$16 sps:$4 sm:$0xff]  }
 0xd0a   :  { %11102 = vmatpush1.bf16.msra.mxu0 %v20580_v51  ;;  %v20643_v51 = vld [vmem:[%s26933_s9 + $0xf28] ss:$16 sps:$4 sm:$0xff]  }
 0xd0b   :  { %11188 = vmatpush1.bf16.msra.mxu1 %v20583_v8  ;;  %v20648_v8 = vld [vmem:[%s26933_s9 + $0xf44] ss:$16 sps:$4 sm:$0xff]  }
 0xd0d   :  { %11112 = vmatmul.mubr.bf16.vlgmr.msra.gmra.mrb[72].mxu0 %v23984_v33 }
 0xd0e   :  { %11198 = vmatmul.mubr.bf16.vlgmr.msra.gmra.mrb[68].mxu1 %v23984_v33  ;;  %11301 = vmatprep.mubr.f32.mxu0 %v26985_v41 }
 0xd0f   :  { %11390 = vmatprep.mubr.f32.mxu1 %v26985_v41 }
 0xde0   :  { %v11113_v49 = vpop.f32.mrb[72].mxu0 }
 0xde1   :  { %v11199_v45 = vpop.f32.mrb[68].mxu1  ;;  %v11115_v62 = vpop.f32.mrb[73].mxu0 }
 0xde2   :  { %v11201_v20 = vpop.f32.mrb[69].mxu1  ;;  %v11117_v19 = vpop.f32.mrb[74].mxu0 }
 0xde3   :  { %v18552_v5 = vpack.c.bf16 %v11117_v19, %v11113_v49  ;;  %v11203_v21 = vpop.f32.mrb[70].mxu1  ;;  %v11119_v11 = vpop.f32.mrb[75].mxu0  ;;  %v20651_v49 = vld [vmem:[%s26933_s9 + $0xf4c] ss:$16 sps:$4 sm:$0xff]  }
 0xde4   :  { %v18558_v31 = vpack.c.bf16 %v11203_v21, %v11199_v45  ;;  %v18549_v40 = vpack.c.bf16 %v11119_v11, %v11115_v62  ;;  %v11205_v44 = vpop.f32.mrb[71].mxu1  ;;  %v20646_v45 = vld [vmem:[%s26933_s9 + $0xf40] ss:$16 sps:$4 sm:$0xff]   ;;  %v20649_v62 = vld [vmem:[%s26933_s9 + $0xf48] ss:$16 sps:$4 sm:$0xff]  }
 0xde5   :  { %v18555_v25 = vpack.c.bf16 %v11205_v44, %v11201_v20  ;;  %v20654_v20 = vld [vmem:[%s26933_s9 + $0xf64] ss:$16 sps:$4 sm:$0xff]   ;;  %v20657_v19 = vld [vmem:[%s26933_s9 + $0xf6c] ss:$16 sps:$4 sm:$0xff]   ;;  %v20655_v21 = vld [vmem:[%s26933_s9 + $0xf68] ss:$16 sps:$4 sm:$0xff]  }
 0xde6   :  { %18551 = vmatprep.subr.msk.bf16.mxu0 %vm24492_vm7, %v18549_v40  ;;  %v20660_v11 = vld [vmem:[%s26933_s9 + $0xf84] ss:$16 sps:$4 sm:$0xff]   ;;  %v20658_v40 = vld [vmem:[%s26933_s9 + $0xf80] ss:$16 sps:$4 sm:$0xff]   ;;  %v20661_v44 = vld [vmem:[%s26933_s9 + $0xf88] ss:$16 sps:$4 sm:$0xff]  }
 0xde7   :  { %18557 = vmatprep.subr.msk.bf16.mxu1 %vm24492_vm7, %v18555_v25  ;;  %18554 = vmatpush1.bf16.msk.msra.mxu0 %vm24492_vm7, %v18552_v5  ;;  %v20652_v5 = vld [vmem:[%s26933_s9 + $0xf60] ss:$16 sps:$4 sm:$0xff]   ;;  %v20669_v25 = vld [vmem:[%s26933_s9 + $0xfac] ss:$16 sps:$4 sm:$0xff]  }
 0xde8   :  { %18560 = vmatpush1.bf16.msk.msra.mxu1 %vm24492_vm7, %v18558_v31  ;;  %12104 = vmatprep.subr.bf16.mxu0 %v20588_v47  ;;  %v20663_v31 = vld [vmem:[%s26933_s9 + $0xf8c] ss:$16 sps:$4 sm:$0xff]   ;;  %v20666_v47 = vld [vmem:[%s26933_s9 + $0xfa4] ss:$16 sps:$4 sm:$0xff]  }
 0xde9   :  { %12190 = vmatprep.subr.bf16.mxu1 %v20591_v26  ;;  %v20664_v26 = vld [vmem:[%s26933_s9 + $0xfa0] ss:$16 sps:$4 sm:$0xff]  }
 0xdea   :  { %17301 = vmatmul.mubr.msk.f32.vlgmr.msra.gmra.mrb[50].mxu0 %vm8890_vm8, %v17295_v56 }
 0xdeb   :  { %17307 = vmatmul.mubr.msk.f32.vlgmr.msra.gmra.mrb[46].mxu1 %vm8890_vm8, %v17295_v56  ;;  %12105 = vmatpush1.bf16.msra.mxu0 %v20586_v58  ;;  %v20667_v56 = vld [vmem:[%s26933_s9 + $0xfa8] ss:$16 sps:$4 sm:$0xff]   ;;  %v20672_v58 = vld [vmem:[%s26933_s9 + $0xfc4] ss:$16 sps:$4 sm:$0xff]  }
 0xdec   :  { %12191 = vmatpush1.bf16.msra.mxu1 %v20589_v34  ;;  %11307 = vmatprep.mubr.f32.mxu0 %v26985_v41  ;;  %v20675_v34 = vld [vmem:[%s26933_s9 + $0xfcc] ss:$16 sps:$4 sm:$0xff]  }
 0xded   :  { %11396 = vmatprep.mubr.f32.mxu1 %v26985_v41  ;;  %12106 = vmatprep.subr.bf16.mxu0 %v20594_v23  ;;  %v20670_v23 = vld [vmem:[%s26933_s9 + $0xfc0] ss:$16 sps:$4 sm:$0xff]  }
 0xdee   :  { %17302 = vmatmul.mubr.msk.f32.gmra.mrb[60].mxu0 %vm8890_vm8, %v17296_v15  ;;  %12192 = vmatprep.subr.bf16.mxu1 %v20597_v4  ;;  %v20673_v4 = vld [vmem:[%s26933_s9 + $0xfc8] ss:$16 sps:$4 sm:$0xff]  }
 0xdef   :  { %17308 = vmatmul.mubr.msk.f32.gmra.mrb[56].mxu1 %vm8890_vm8, %v17296_v15  ;;  %12107 = vmatpush1.bf16.msra.mxu0 %v20592_v24  ;;  %v20678_v15 = vld [vmem:[%s26933_s9 + $0xfe4] ss:$16 sps:$4 sm:$0xff]   ;;  %v20681_v24 = vld [vmem:[%s26933_s9 + $0xfec] ss:$16 sps:$4 sm:$0xff]  }
 0xdf0   :  { %12193 = vmatpush1.bf16.msra.mxu1 %v20595_v46  ;;  %11313 = vmatprep.mubr.f32.mxu0 %v26985_v41  ;;  %v20676_v46 = vld [vmem:[%s26933_s9 + $0xfe0] ss:$16 sps:$4 sm:$0xff]  }
 0xdf1   :  { %11402 = vmatprep.mubr.f32.mxu1 %v26985_v41  ;;  %12108 = vmatprep.subr.bf16.mxu0 %v20600_v50  ;;  %v20679_v50 = vld [vmem:[%s26933_s9 + $0xfe8] ss:$16 sps:$4 sm:$0xff]  }
 0xdf2   :  { %17303 = vmatmul.mubr.msk.f32.gmra.mrb[62].mxu0 %vm8890_vm8, %v17297_v7  ;;  %12194 = vmatprep.subr.bf16.mxu1 %v20603_v63  ;;  %v20684_v63 = vld [vmem:[%s26933_s9 + $0x1004] ss:$16 sps:$4 sm:$0xff]  }
 0xdf3   :  { %17309 = vmatmul.mubr.msk.f32.gmra.mrb[58].mxu1 %vm8890_vm8, %v17297_v7  ;;  %12109 = vmatpush1.bf16.msra.mxu0 %v20598_v35  ;;  %v20687_v7 = vld [vmem:[%s26933_s9 + $0x100c] ss:$16 sps:$4 sm:$0xff]   ;;  %v20682_v35 = vld [vmem:[%s26933_s9 + $0x1000] ss:$16 sps:$4 sm:$0xff]  }
 0xdf4   :  { %12195 = vmatpush1.bf16.msra.mxu1 %v20601_v54  ;;  %11319 = vmatprep.mubr.f32.mxu0 %v26985_v41  ;;  %v20685_v54 = vld [vmem:[%s26933_s9 + $0x1008] ss:$16 sps:$4 sm:$0xff]  }
 0xdf5   :  { %11408 = vmatprep.mubr.f32.mxu1 %v26985_v41  ;;  %12110 = vmatprep.subr.bf16.mxu0 %v20606_v2  ;;  %v20690_v2 = vld [vmem:[%s26933_s9 + $0x1024] ss:$16 sps:$4 sm:$0xff]  }
 0xdf6   :  { %17304 = vmatmul.mubr.msk.f32.gmra.mrb[64].mxu0 %vm8890_vm8, %v17298_v39  ;;  %12196 = vmatprep.subr.bf16.mxu1 %v20609_v3  ;;  %v20693_v3 = vld [vmem:[%s26933_s9 + $0x102c] ss:$16 sps:$4 sm:$0xff]  }
 0xdf7   :  { %17310 = vmatmul.mubr.msk.f32.gmra.mrb[60].mxu1 %vm8890_vm8, %v17298_v39  ;;  %12111 = vmatpush1.bf16.msra.mxu0 %v20604_v55  ;;  %v20688_v39 = vld [vmem:[%s26933_s9 + $0x1020] ss:$16 sps:$4 sm:$0xff]   ;;  %v20691_v55 = vld [vmem:[%s26933_s9 + $0x1028] ss:$16 sps:$4 sm:$0xff]  }
 0xdf8   :  { %12136 = vmatprep.mubr.bf16.mxu0 %v23992_v36  ;;  %12197 = vmatpush1.bf16.msra.mxu1 %v20607_v17  ;;  %v20696_v17 = vld [vmem:[%s26933_s9 + $0x1044] ss:$16 sps:$4 sm:$0xff]  }
 0xdf9   :  { %12222 = vmatprep.mubr.bf16.mxu1 %v23992_v36  ;;  %12112 = vmatprep.subr.bf16.mxu0 %v20612_v32  ;;  %v20624_v36 = vld [vmem:[%s26933_s9 + $0xec4] ss:$16 sps:$4 sm:$0xff]   ;;  %v20694_v32 = vld [vmem:[%s26933_s9 + $0x1040] ss:$16 sps:$4 sm:$0xff]  }
 0xdfa   :  { %12198 = vmatprep.subr.bf16.mxu1 %v20615_v61  ;;  %v20697_v61 = vld [vmem:[%s26933_s9 + $0x1048] ss:$16 sps:$4 sm:$0xff]  }
 0xdfb   :  { %12113 = vmatpush1.bf16.msra.mxu0 %v20610_v9  ;;  %v20705_v9 = vld [vmem:[%s26933_s9 + $0x106c] ss:$16 sps:$4 sm:$0xff]  }
 0xdfc   :  { %12199 = vmatpush1.bf16.msra.mxu1 %v20613_v12  ;;  %12114 = vmatprep.subr.bf16.mxu0 %v20618_v6  ;;  %v20700_v12 = vld [vmem:[%s26933_s9 + $0x1060] ss:$16 sps:$4 sm:$0xff]   ;;  %v20703_v6 = vld [vmem:[%s26933_s9 + $0x1068] ss:$16 sps:$4 sm:$0xff]  }
 0xdfd   :  { %12200 = vmatprep.subr.bf16.mxu1 %v20621_v43  ;;  %v20708_v43 = vld [vmem:[%s26933_s9 + $0x1084] ss:$16 sps:$4 sm:$0xff]  }
 0xdff   :  { %12115 = vmatpush1.bf16.msra.mxu0 %v20616_v0  ;;  %v20711_v0 = vld [vmem:[%s26933_s9 + $0x108c] ss:$16 sps:$4 sm:$0xff]  }
 0xe00   :  { %12201 = vmatpush1.bf16.msra.mxu1 %v20619_v1  ;;  %12116 = vmatprep.subr.bf16.mxu0 %v20624_v36  ;;  %v20706_v1 = vld [vmem:[%s26933_s9 + $0x1080] ss:$16 sps:$4 sm:$0xff]   ;;  %v20709_v36 = vld [vmem:[%s26933_s9 + $0x1088] ss:$16 sps:$4 sm:$0xff]  }
 0xe01   :  { %12202 = vmatprep.subr.bf16.mxu1 %v20627_v57  ;;  %v20714_v57 = vld [vmem:[%s26933_s9 + $0x10a4] ss:$16 sps:$4 sm:$0xff]  }
 0xe03   :  { %12117 = vmatpush1.bf16.msra.mxu0 %v20622_v14  ;;  %v20717_v14 = vld [vmem:[%s26933_s9 + $0x10ac] ss:$16 sps:$4 sm:$0xff]  }
 0xe04   :  { %12203 = vmatpush1.bf16.msra.mxu1 %v20625_v16  ;;  %12118 = vmatprep.subr.bf16.mxu0 %v20630_v18  ;;  %v20712_v16 = vld [vmem:[%s26933_s9 + $0x10a0] ss:$16 sps:$4 sm:$0xff]   ;;  %v20715_v18 = vld [vmem:[%s26933_s9 + $0x10a8] ss:$16 sps:$4 sm:$0xff]  }
 0xe05   :  { %12204 = vmatprep.subr.bf16.mxu1 %v20633_v28  ;;  %v20720_v28 = vld [vmem:[%s26933_s9 + $0x10c4] ss:$16 sps:$4 sm:$0xff]  }
 0xe07   :  { %12119 = vmatpush1.bf16.msra.mxu0 %v20628_v30  ;;  %v20723_v30 = vld [vmem:[%s26933_s9 + $0x10cc] ss:$16 sps:$4 sm:$0xff]  }
 0xe08   :  { %12205 = vmatpush1.bf16.msra.mxu1 %v20631_v38  ;;  %12120 = vmatprep.subr.bf16.mxu0 %v20636_v13  ;;  %v20718_v38 = vld [vmem:[%s26933_s9 + $0x10c0] ss:$16 sps:$4 sm:$0xff]   ;;  %v20721_v13 = vld [vmem:[%s26933_s9 + $0x10c8] ss:$16 sps:$4 sm:$0xff]  }
 0xe09   :  { %12206 = vmatprep.subr.bf16.mxu1 %v20639_v59  ;;  %v20726_v59 = vld [vmem:[%s26933_s9 + $0x10e4] ss:$16 sps:$4 sm:$0xff]  }
 0xe0b   :  { %12121 = vmatpush1.bf16.msra.mxu0 %v20634_v53  ;;  %v20729_v53 = vld [vmem:[%s26933_s9 + $0x10ec] ss:$16 sps:$4 sm:$0xff]  }
 0xe0c   :  { %12207 = vmatpush1.bf16.msra.mxu1 %v20637_v42  ;;  %12122 = vmatprep.subr.bf16.mxu0 %v20642_v48  ;;  %v20724_v42 = vld [vmem:[%s26933_s9 + $0x10e0] ss:$16 sps:$4 sm:$0xff]   ;;  %v20727_v48 = vld [vmem:[%s26933_s9 + $0x10e8] ss:$16 sps:$4 sm:$0xff]  }
 0xe0d   :  { %12208 = vmatprep.subr.bf16.mxu1 %v20645_v27  ;;  %v20732_v27 = vld [vmem:[%s26933_s9 + $0x1104] ss:$16 sps:$4 sm:$0xff]  }
 0xe0f   :  { %12123 = vmatpush1.bf16.msra.mxu0 %v20640_v60  ;;  %v20735_v60 = vld [vmem:[%s26933_s9 + $0x110c] ss:$16 sps:$4 sm:$0xff]  }
 0xe10   :  { %12209 = vmatpush1.bf16.msra.mxu1 %v20643_v51  ;;  %12124 = vmatprep.subr.bf16.mxu0 %v20648_v8  ;;  %v20730_v51 = vld [vmem:[%s26933_s9 + $0x1100] ss:$16 sps:$4 sm:$0xff]   ;;  %v20733_v8 = vld [vmem:[%s26933_s9 + $0x1108] ss:$16 sps:$4 sm:$0xff]  }
 0xe11   :  { %12210 = vmatprep.subr.bf16.mxu1 %v20651_v49  ;;  %v20738_v49 = vld [vmem:[%s26933_s9 + $0x1124] ss:$16 sps:$4 sm:$0xff]  }
 0xe13   :  { %12125 = vmatpush1.bf16.msra.mxu0 %v20646_v45  ;;  %v20741_v45 = vld [vmem:[%s26933_s9 + $0x112c] ss:$16 sps:$4 sm:$0xff]  }
 0xe14   :  { %12211 = vmatpush1.bf16.msra.mxu1 %v20649_v62  ;;  %12126 = vmatprep.subr.bf16.mxu0 %v20654_v20  ;;  %v20736_v62 = vld [vmem:[%s26933_s9 + $0x1120] ss:$16 sps:$4 sm:$0xff]   ;;  %v20739_v20 = vld [vmem:[%s26933_s9 + $0x1128] ss:$16 sps:$4 sm:$0xff]  }
 0xe15   :  { %12212 = vmatprep.subr.bf16.mxu1 %v20657_v19  ;;  %v20744_v19 = vld [vmem:[%s26933_s9 + $0x1144] ss:$16 sps:$4 sm:$0xff]  }
 0xe17   :  { %12127 = vmatpush1.bf16.msra.mxu0 %v20652_v5  ;;  %v20747_v5 = vld [vmem:[%s26933_s9 + $0x114c] ss:$16 sps:$4 sm:$0xff]  }
 0xe18   :  { %12213 = vmatpush1.bf16.msra.mxu1 %v20655_v21  ;;  %12128 = vmatprep.subr.bf16.mxu0 %v20660_v11  ;;  %v20742_v21 = vld [vmem:[%s26933_s9 + $0x1140] ss:$16 sps:$4 sm:$0xff]   ;;  %v20745_v11 = vld [vmem:[%s26933_s9 + $0x1148] ss:$16 sps:$4 sm:$0xff]  }
 0xe19   :  { %12214 = vmatprep.subr.bf16.mxu1 %v20663_v31  ;;  %v20750_v31 = vld [vmem:[%s26933_s9 + $0x1164] ss:$16 sps:$4 sm:$0xff]  }
 0xe1b   :  { %12129 = vmatpush1.bf16.msra.mxu0 %v20658_v40  ;;  %v20753_v40 = vld [vmem:[%s26933_s9 + $0x116c] ss:$16 sps:$4 sm:$0xff]  }
 0xe1c   :  { %12215 = vmatpush1.bf16.msra.mxu1 %v20661_v44  ;;  %12130 = vmatprep.subr.bf16.mxu0 %v20666_v47  ;;  %v20748_v44 = vld [vmem:[%s26933_s9 + $0x1160] ss:$16 sps:$4 sm:$0xff]   ;;  %v20751_v47 = vld [vmem:[%s26933_s9 + $0x1168] ss:$16 sps:$4 sm:$0xff]  }
 0xe1d   :  { %12216 = vmatprep.subr.bf16.mxu1 %v20669_v25 }
 0xe1f   :  { %12131 = vmatpush1.bf16.msra.mxu0 %v20664_v26 }
 0xe20   :  { %12217 = vmatpush1.bf16.msra.mxu1 %v20667_v56  ;;  %12132 = vmatprep.subr.bf16.mxu0 %v20672_v58  ;;  %v12619_v58 = vld [vmem:[%s26938_s14 + $0x80] sm:$0xff] }
 0xe21   :  { %12218 = vmatprep.subr.bf16.mxu1 %v20675_v34  ;;  %v12620_v34 = vld [vmem:[%s26938_s14 + $0x88] sm:$0xff] }
 0xe23   :  { %12133 = vmatpush1.bf16.msra.mxu0 %v20670_v23 }
 0xe24   :  { %12219 = vmatpush1.bf16.msra.mxu1 %v20673_v4  ;;  %12134 = vmatprep.subr.bf16.mxu0 %v20678_v15 }
 0xe25   :  { %12220 = vmatprep.subr.bf16.mxu1 %v20681_v24 }
 0xe27   :  { %12135 = vmatpush1.bf16.msra.mxu0 %v20676_v46 }
 0xe28   :  { %12221 = vmatpush1.bf16.msra.mxu1 %v20679_v50  ;;  %12147 = vmatprep.subr.bf16.mxu0 %v20684_v63 }
 0xe29   :  { %12233 = vmatprep.subr.bf16.mxu1 %v20687_v7  ;;  %v25684_v7 = vpack.c.bf16 %v12620_v34, %v12619_v58  ;;  %v12627_v58 = vld [vmem:[%s26938_s14 + $0xc0] sm:$0xff]  ;;  %v12628_v34 = vld [vmem:[%s26938_s14 + $0xc8] sm:$0xff] }
 0xe2a   :  { %12137 = vmatmul.mubr.bf16.vlgmr.msra.gmra.mrb[76].mxu0 %v23990_v29 }
 0xe2b   :  { %12223 = vmatmul.mubr.bf16.vlgmr.msra.gmra.mrb[72].mxu1 %v23990_v29  ;;  %12148 = vmatpush1.bf16.msra.mxu0 %v20682_v35  ;;  %v20699_v29 = vld [vmem:[%s26933_s9 + $0x104c] ss:$16 sps:$4 sm:$0xff]  }
 0xe2c   :  { %17535 = vmatprep.mubr.msk.bf16.mxu0 %vm6402_vm3, %v23986_v37  ;;  %12234 = vmatpush1.bf16.msra.mxu1 %v20685_v54  ;;  %v12635_v54 = vld [vmem:[%s26938_s14 + $0x100] sm:$0xff] }
 0xe2d   :  { %17536 = vmatprep.mubr.msk.bf16.mxu1 %vm6402_vm3, %v23986_v37  ;;  %12149 = vmatprep.subr.bf16.mxu0 %v20690_v2  ;;  %v20702_v37 = vld [vmem:[%s26933_s9 + $0x1064] ss:$16 sps:$4 sm:$0xff]   ;;  %v12636_v2 = vld [vmem:[%s26938_s14 + $0x108] sm:$0xff] }
 0xe2e   :  { %12235 = vmatprep.subr.bf16.mxu1 %v20693_v3  ;;  %v12603_v3 = vld [vmem:[%s26938_s14] sm:$0xff] }
 0xe2f   :  { %12150 = vmatpush1.bf16.msra.mxu0 %v20688_v39  ;;  %v12604_v39 = vld [vmem:[%s26938_s14 + $0x8] sm:$0xff] }
 0xe30   :  { %12236 = vmatpush1.bf16.msra.mxu1 %v20691_v55  ;;  %12151 = vmatprep.subr.bf16.mxu0 %v20696_v17  ;;  %v17537_v55 = vld [vmem:[%s26934_s10 + $0x80] sm:$0xff]  ;;  %v25709_v17 = vpack.c.bf16 %v12636_v2, %v12635_v54  ;;  %v12613_v2 = vld [vmem:[%s26938_s14 + $0x50] sm:$0xff] }
 0xe31   :  { %12237 = vmatprep.subr.bf16.mxu1 %v20699_v29  ;;  %v12637_v29 = vld [vmem:[%s26938_s14 + $0x110] sm:$0xff] }
 0xe33   :  { %12152 = vmatpush1.bf16.msra.mxu0 %v20694_v32  ;;  %v12638_v32 = vld [vmem:[%s26938_s14 + $0x118] sm:$0xff] }
 0xe34   :  { %12238 = vmatpush1.bf16.msra.mxu1 %v20697_v61  ;;  %12153 = vmatprep.subr.bf16.mxu0 %v20702_v37  ;;  %v25719_v61 = vpack.c.bf16 %v12604_v39, %v12603_v3  ;;  %v25729_v37 = vpack.c.bf16 %v12638_v32, %v12637_v29  ;;  %v12614_v3 = vld [vmem:[%s26938_s14 + $0x58] sm:$0xff]  ;;  %v12653_v39 = vld [vmem:[%s26938_s14 + $0x190] sm:$0xff] }
 0xe35   :  { %12239 = vmatprep.subr.bf16.mxu1 %v20705_v9  ;;  %v12639_v9 = vld [vmem:[%s26938_s14 + $0x120] sm:$0xff]  ;;  %v12654_v29 = vld [vmem:[%s26938_s14 + $0x198] sm:$0xff] }
 0xe36   :  { %v25916_v32 = vpack.c.bf16 %v12654_v29, %v12653_v39 }
 0xe37   :  { %12154 = vmatpush1.bf16.msra.mxu0 %v20700_v12  ;;  %v12640_v12 = vld [vmem:[%s26938_s14 + $0x128] sm:$0xff] }
 0xe38   :  { %12240 = vmatpush1.bf16.msra.mxu1 %v20703_v6  ;;  %12155 = vmatprep.subr.bf16.mxu0 %v20708_v43  ;;  %v17539_v6 = vld [vmem:[%s26934_s10 + $0x90] sm:$0xff]  ;;  %v25747_v43 = vpack.c.bf16 %v12640_v12, %v12639_v9  ;;  %v12632_v9 = vld [vmem:[%s26938_s14 + $0xe8] sm:$0xff] }
 0xe39   :  { %12241 = vmatprep.subr.bf16.mxu1 %v20711_v0  ;;  %v12641_v0 = vld [vmem:[%s26938_s14 + $0x130] sm:$0xff] }
 0xe3b   :  { %12156 = vmatpush1.bf16.msra.mxu0 %v20706_v1  ;;  %v12642_v1 = vld [vmem:[%s26938_s14 + $0x138] sm:$0xff] }
 0xe3c   :  { %12242 = vmatpush1.bf16.msra.mxu1 %v20709_v36  ;;  %12157 = vmatprep.subr.bf16.mxu0 %v20714_v57  ;;  %v17540_v36 = vld [vmem:[%s26934_s10 + $0x98] sm:$0xf]  ;;  %v25764_v57 = vpack.c.bf16 %v12642_v1, %v12641_v0  ;;  %v12616_v0 = vld [vmem:[%s26938_s14 + $0x68] sm:$0xff]  ;;  %v12655_v1 = vld [vmem:[%s26938_s14 + $0x1a0] sm:$0xff] }
 0xe3d   :  { %12243 = vmatprep.subr.bf16.mxu1 %v20717_v14  ;;  %v12643_v14 = vld [vmem:[%s26938_s14 + $0x140] sm:$0xff] }
 0xe3f   :  { %12158 = vmatpush1.bf16.msra.mxu0 %v20712_v16  ;;  %v12644_v16 = vld [vmem:[%s26938_s14 + $0x148] sm:$0xff] }
 0xe40   :  { %12244 = vmatpush1.bf16.msra.mxu1 %v20715_v18  ;;  %12159 = vmatprep.subr.bf16.mxu0 %v20720_v28  ;;  %v25776_v18 = vpack.c.bf16 %v12644_v16, %v12643_v14  ;;  %v12621_v28 = vld [vmem:[%s26938_s14 + $0x90] sm:$0xff]  ;;  %v12656_v14 = vld [vmem:[%s26938_s14 + $0x1a8] sm:$0xff] }
 0xe41   :  { %12245 = vmatprep.subr.bf16.mxu1 %v20723_v30  ;;  %v12622_v30 = vld [vmem:[%s26938_s14 + $0x98] sm:$0xff]  ;;  %v25944_v16 = vpack.c.bf16 %v12656_v14, %v12655_v1 }
 0xe43   :  { %12160 = vmatpush1.bf16.msra.mxu0 %v20718_v38  ;;  %v25787_v38 = vpack.c.bf16 %v12622_v30, %v12621_v28  ;;  %v12633_v28 = vld [vmem:[%s26938_s14 + $0xf0] sm:$0xff]  ;;  %v12634_v30 = vld [vmem:[%s26938_s14 + $0xf8] sm:$0xff] }
 0xe44   :  { %12246 = vmatpush1.bf16.msra.mxu1 %v20721_v13  ;;  %12161 = vmatprep.subr.bf16.mxu0 %v20726_v59  ;;  %v12605_v13 = vld [vmem:[%s26938_s14 + $0x10] sm:$0xff]  ;;  %v12606_v59 = vld [vmem:[%s26938_s14 + $0x18] sm:$0xff] }
 0xe45   :  { %12247 = vmatprep.subr.bf16.mxu1 %v20729_v53  ;;  %v12645_v53 = vld [vmem:[%s26938_s14 + $0x150] sm:$0xff] }
 0xe47   :  { %12162 = vmatpush1.bf16.msra.mxu0 %v20724_v42  ;;  %v25798_v42 = vpack.c.bf16 %v12606_v59, %v12605_v13  ;;  %v25954_v13 = vpack.c.bf16 %v12634_v30, %v12633_v28  ;;  %v12617_v59 = vld [vmem:[%s26938_s14 + $0x70] sm:$0xff] }
 0xe48   :  { %12248 = vmatpush1.bf16.msra.mxu1 %v20727_v48  ;;  %12163 = vmatprep.subr.bf16.mxu0 %v20732_v27  ;;  %v12646_v48 = vld [vmem:[%s26938_s14 + $0x158] sm:$0xff] }
 0xe49   :  { %12249 = vmatprep.subr.bf16.mxu1 %v20735_v60  ;;  %v25804_v27 = vpack.c.bf16 %v12646_v48, %v12645_v53  ;;  %v12623_v60 = vld [vmem:[%s26938_s14 + $0xa0] sm:$0xff]  ;;  %v12618_v53 = vld [vmem:[%s26938_s14 + $0x78] sm:$0xff]  ;;  %v12657_v48 = vld [vmem:[%s26938_s14 + $0x1b0] sm:$0xff] }
 0xe4b   :  { %12164 = vmatpush1.bf16.msra.mxu0 %v20730_v51  ;;  %v12624_v51 = vld [vmem:[%s26938_s14 + $0xa8] sm:$0xff] }
 0xe4c   :  { %12250 = vmatpush1.bf16.msra.mxu1 %v20733_v8  ;;  %12165 = vmatprep.subr.bf16.mxu0 %v20738_v49  ;;  %v25814_v8 = vpack.c.bf16 %v12624_v51, %v12623_v60  ;;  %v12607_v49 = vld [vmem:[%s26938_s14 + $0x20] sm:$0xff]  ;;  %v25966_v60 = vpack.c.bf16 %v12618_v53, %v12617_v59  ;;  %v12658_v51 = vld [vmem:[%s26938_s14 + $0x1b8] sm:$0xff] }
 0xe4d   :  { %12251 = vmatprep.subr.bf16.mxu1 %v20741_v45  ;;  %v12608_v45 = vld [vmem:[%s26938_s14 + $0x28] sm:$0xff] }
 0xe4f   :  { %12166 = vmatpush1.bf16.msra.mxu0 %v20736_v62  ;;  %v12647_v62 = vld [vmem:[%s26938_s14 + $0x160] sm:$0xff] }
 0xe50   :  { %12252 = vmatpush1.bf16.msra.mxu1 %v20739_v20  ;;  %12167 = vmatprep.subr.bf16.mxu0 %v20744_v19  ;;  %v25826_v20 = vpack.c.bf16 %v12608_v45, %v12607_v49  ;;  %v12648_v19 = vld [vmem:[%s26938_s14 + $0x168] sm:$0xff]  ;;  %v25972_v49 = vpack.c.bf16 %v12658_v51, %v12657_v48 }
 0xe51   :  { %12253 = vmatprep.subr.bf16.mxu1 %v20747_v5  ;;  %v25832_v5 = vpack.c.bf16 %v12648_v19, %v12647_v62 }
 0xe53   :  { %12168 = vmatpush1.bf16.msra.mxu0 %v20742_v21  ;;  %v12625_v21 = vld [vmem:[%s26938_s14 + $0xb0] sm:$0xff] }
 0xe54   :  { %12254 = vmatpush1.bf16.msra.mxu1 %v20745_v11  ;;  %12169 = vmatprep.subr.bf16.mxu0 %v20750_v31  ;;  %v12626_v11 = vld [vmem:[%s26938_s14 + $0xb8] sm:$0xff] }
 0xe55   :  { %12255 = vmatprep.subr.bf16.mxu1 %v20753_v40  ;;  %v25842_v31 = vpack.c.bf16 %v12626_v11, %v12625_v21  ;;  %v12609_v40 = vld [vmem:[%s26938_s14 + $0x30] sm:$0xff] }
 0xe57   :  { %12170 = vmatpush1.bf16.msra.mxu0 %v20748_v44  ;;  %v12610_v44 = vld [vmem:[%s26938_s14 + $0x38] sm:$0xff] }
 0xe58   :  { %12256 = vmatpush1.bf16.msra.mxu1 %v20751_v47  ;;  %v12649_v47 = vld [vmem:[%s26938_s14 + $0x170] sm:$0xff] }
 0xe5a   :  { %12180 = vmatmul.mubr.bf16.vlgmr.msra.gmra.mrb[76].mxu0 %v23984_v33 }
 0xe5b   :  { %12266 = vmatmul.mubr.bf16.vlgmr.msra.gmra.mrb[72].mxu1 %v23984_v33  ;;  %12369 = vmatprep.mubr.f32.mxu0 %v26985_v41 }
 0xe5c   :  { %12458 = vmatprep.mubr.f32.mxu1 %v26985_v41 }
 0xf2d   :  { %v12181_v25 = vpop.f32.mrb[76].mxu0 }
 0xf2e   :  { %v12267_v26 = vpop.f32.mrb[72].mxu1  ;;  %v12183_v56 = vpop.f32.mrb[77].mxu0 }
 0xf2f   :  { %v12269_v23 = vpop.f32.mrb[73].mxu1  ;;  %v12185_v4 = vpop.f32.mrb[78].mxu0 }
 0xf30   :  { %v18564_v15 = vpack.c.bf16 %v12185_v4, %v12181_v25  ;;  %v12271_v24 = vpop.f32.mrb[74].mxu1  ;;  %v12187_v33 = vpop.f32.mrb[79].mxu0  ;;  %v25854_v25 = vpack.c.bf16 %v12610_v44, %v12609_v40  ;;  %v12611_v4 = vld [vmem:[%s26938_s14 + $0x40] sm:$0xff] }
 0xf31   :  { %v18570_v46 = vpack.c.bf16 %v12271_v24, %v12267_v26  ;;  %v18561_v50 = vpack.c.bf16 %v12187_v33, %v12183_v56  ;;  %v12273_v63 = vpop.f32.mrb[75].mxu1  ;;  %v12650_v26 = vld [vmem:[%s26938_s14 + $0x178] sm:$0xff]  ;;  %v12651_v24 = vld [vmem:[%s26938_s14 + $0x180] sm:$0xff] }
 0xf32   :  { %v18567_v35 = vpack.c.bf16 %v12273_v63, %v12269_v23  ;;  %v25860_v56 = vpack.c.bf16 %v12650_v26, %v12649_v47  ;;  %v25871_v23 = vpack.c.bf16 %v12628_v34, %v12627_v58  ;;  %v12629_v63 = vld [vmem:[%s26938_s14 + $0xd0] sm:$0xff] }
 0xf33   :  { %18563 = vmatprep.subr.msk.bf16.mxu0 %vm24492_vm7, %v18561_v50 }
 0xf34   :  { %18569 = vmatprep.subr.msk.bf16.mxu1 %vm24492_vm7, %v18567_v35  ;;  %18566 = vmatpush1.bf16.msk.msra.mxu0 %vm24492_vm7, %v18564_v15  ;;  %v12612_v15 = vld [vmem:[%s26938_s14 + $0x48] sm:$0xff]  ;;  %v12630_v35 = vld [vmem:[%s26938_s14 + $0xd8] sm:$0xff] }
 0xf35   :  { %18572 = vmatpush1.bf16.msk.msra.mxu1 %vm24492_vm7, %v18570_v46  ;;  %18574 = vmatprep.subr.bf16.mxu0 %v25684_v7  ;;  %v25882_v33 = vpack.c.bf16 %v12612_v15, %v12611_v4  ;;  %v12652_v46 = vld [vmem:[%s26938_s14 + $0x188] sm:$0xff]  ;;  %v25898_v54 = vpack.c.bf16 %v12630_v35, %v12629_v63 }
 0xf36   :  { %18605 = vmatprep.subr.bf16.mxu1 %v26984_v52  ;;  %v25888_v50 = vpack.c.bf16 %v12652_v46, %v12651_v24 }
 0xf37   :  { %17543 = vmatmul.mubr.msk.f32.vlgmr.msra.gmra.mrb[50].mxu0 %vm8890_vm8, %v17537_v55 }
 0xf38   :  { %17549 = vmatmul.mubr.msk.f32.vlgmr.msra.gmra.mrb[46].mxu1 %vm8890_vm8, %v17537_v55  ;;  %12375 = vmatprep.mubr.f32.mxu0 %v26985_v41  ;;  %v25910_v55 = vpack.c.bf16 %v12614_v3, %v12613_v2 }
 0xf39   :  { %12464 = vmatprep.mubr.f32.mxu1 %v26985_v41  ;;  %18607 = vmatpush1.bf16.msra.mxu1 %v25709_v17 }
 0xf3a   :  { %18608 = vmatprep.subr.bf16.mxu1 %v26984_v52  ;;  %18576 = vmatpush3.bf16.msra.mxu0 %v25719_v61 }
 0xf3b   :  { %17544 = vmatmul.mubr.msk.f32.gmra.mrb[60].mxu0 %vm8890_vm8, %v17538_v22  ;;  %18578 = vmatprep.subr.bf16.mxu0 %v25787_v38 }
 0xf3c   :  { %17550 = vmatmul.mubr.msk.f32.gmra.mrb[56].mxu1 %vm8890_vm8, %v17538_v22  ;;  %12381 = vmatprep.mubr.f32.mxu0 %v26985_v41  ;;  %v12631_v22 = vld [vmem:[%s26938_s14 + $0xe0] sm:$0xff] }
 0xf3d   :  { %12470 = vmatprep.mubr.f32.mxu1 %v26985_v41  ;;  %18610 = vmatpush1.bf16.msra.mxu1 %v25729_v37  ;;  %v25926_v12 = vpack.c.bf16 %v12632_v9, %v12631_v22 }
 0xf3e   :  { %18611 = vmatprep.subr.bf16.mxu1 %v26984_v52  ;;  %18580 = vmatpush3.bf16.msra.mxu0 %v25798_v42 }
 0xf3f   :  { %17545 = vmatmul.mubr.msk.f32.gmra.mrb[62].mxu0 %vm8890_vm8, %v17539_v6  ;;  %18582 = vmatprep.subr.bf16.mxu0 %v25814_v8 }
 0xf40   :  { %17551 = vmatmul.mubr.msk.f32.gmra.mrb[58].mxu1 %vm8890_vm8, %v17539_v6  ;;  %12387 = vmatprep.mubr.f32.mxu0 %v26985_v41  ;;  %v12615_v6 = vld [vmem:[%s26938_s14 + $0x60] sm:$0xff] }
 0xf41   :  { %12476 = vmatprep.mubr.f32.mxu1 %v26985_v41  ;;  %18613 = vmatpush1.bf16.msra.mxu1 %v25747_v43 }
 0xf42   :  { %18614 = vmatprep.subr.bf16.mxu1 %v26984_v52  ;;  %18584 = vmatpush3.bf16.msra.mxu0 %v25826_v20 }
 0xf43   :  { %17546 = vmatmul.mubr.msk.f32.gmra.mrb[64].mxu0 %vm8890_vm8, %v17540_v36  ;;  %18586 = vmatprep.subr.bf16.mxu0 %v25842_v31 }
 0xf44   :  { %17552 = vmatmul.mubr.msk.f32.gmra.mrb[60].mxu1 %vm8890_vm8, %v17540_v36  ;;  %v25938_v36 = vpack.c.bf16 %v12616_v0, %v12615_v6 }
 0xf45   :  { %18616 = vmatpush1.bf16.msra.mxu1 %v25764_v57 }
 0xf46   :  { %18617 = vmatprep.subr.bf16.mxu1 %v26984_v52  ;;  %18588 = vmatpush3.bf16.msra.mxu0 %v25854_v25 }
 0xf47   :  { %18590 = vmatprep.subr.bf16.mxu0 %v25871_v23 }
 0xf49   :  { %18619 = vmatpush1.bf16.msra.mxu1 %v25776_v18 }
 0xf4a   :  { %18620 = vmatprep.subr.bf16.mxu1 %v26984_v52  ;;  %18592 = vmatpush3.bf16.msra.mxu0 %v25882_v33 }
 0xf4b   :  { %18594 = vmatprep.subr.bf16.mxu0 %v25898_v54 }
 0xf4d   :  { %18622 = vmatpush1.bf16.msra.mxu1 %v25804_v27 }
 0xf4e   :  { %18623 = vmatprep.subr.bf16.mxu1 %v26984_v52  ;;  %18596 = vmatpush3.bf16.msra.mxu0 %v25910_v55 }
 0xf4f   :  { %18598 = vmatprep.subr.bf16.mxu0 %v25926_v12 }
 0xf51   :  { %18625 = vmatpush1.bf16.msra.mxu1 %v25832_v5 }
 0xf52   :  { %18626 = vmatprep.subr.bf16.mxu1 %v26984_v52  ;;  %18600 = vmatpush3.bf16.msra.mxu0 %v25938_v36 }
 0xf53   :  { %18602 = vmatprep.subr.bf16.mxu0 %v25954_v13 }
 0xf55   :  { %18628 = vmatpush1.bf16.msra.mxu1 %v25860_v56 }
 0xf56   :  { %18629 = vmatprep.subr.bf16.mxu1 %v26984_v52  ;;  %18604 = vmatpush3.bf16.msra.mxu0 %v25966_v60 }
 0xf57   :  { %18642 = vmatprep.subr.bf16.mxu0 %v25684_v7 }
 0xf59   :  { %18631 = vmatpush1.bf16.msra.mxu1 %v25888_v50 }
 0xf5a   :  { %18632 = vmatprep.subr.bf16.mxu1 %v26984_v52 }
 0xf5d   :  { %18634 = vmatpush1.bf16.msra.mxu1 %v25916_v32 }
 0xf5e   :  { %18635 = vmatprep.subr.bf16.mxu1 %v26984_v52 }
 0xf61   :  { %18637 = vmatpush1.bf16.msra.mxu1 %v25944_v16 }
 0xf62   :  { %18638 = vmatprep.subr.bf16.mxu1 %v26984_v52 }
 0xf65   :  { %18640 = vmatpush1.bf16.msra.mxu1 %v25972_v49 }
 0xf66   :  { %18673 = vmatprep.subr.bf16.mxu1 %v26984_v52 }
0x100a   :  { %v25978_v45 = vpop.f32.mrb[50].mxu0 }
0x100b   :  { %v25980_v62 = vpop.f32.mrb[46].mxu1  ;;  %v25982_v19 = vpop.f32.mrb[51].mxu0  ;;  %v12544_v11 = vmul.f32 %v25978_v45, %v25978_v45 }
0x100c   :  { %26993 = vst [vmem:[#allocation9_spill] sm:$0xff] %v25980_v62  ;;  %26994 = vst [vmem:[#allocation6_spill] sm:$0xff] %v25982_v19  ;;  %v25984_v21 = vpop.f32.mrb[47].mxu1  ;;  %v12546_v40 = vmul.f32 %v25980_v62, %v25980_v62  ;;  %v12545_v7 = vmul.f32 %v25982_v19, %v25982_v19 }
0x100d   :  { %26995 = vst [vmem:[#allocation8_spill] sm:$0xff] %v25984_v21  ;;  %v12547_v47 = vmul.f32 %v25984_v21, %v25984_v21  ;;  %v12530_v2 = vsel %vm6402_vm3, %v25984_v21, 0.0 }
0x100e   :  { %v25990_v44 = vpop.f32.mrb[60].mxu0 }
0x100f   :  { %26996 = vst [vmem:[#allocation7_spill] sm:$0xff] %v25990_v44  ;;  %v12499_v26 = vadd.f32 %v25990_v44, %v25978_v45  ;;  %v12548_v58 = vmul.f32 %v25990_v44, %v25990_v44  ;;  %v26000_v34 = vpop.f32.mrb[56].mxu1  ;;  %v26002_v4 = vpop.f32.mrb[61].mxu0  ;;  %v12590_v1 = vsel %vm6402_vm3, %v12547_v47, 0.0 }
0x1010   :  { %26997 = vst [vmem:[#allocation10_spill] sm:$0xff] %v26000_v34  ;;  %26998 = vst [vmem:[#allocation11_spill] sm:$0xff] %v26002_v4  ;;  %v12520_v15 = vadd.f32 %v26000_v34, %v25980_v62  ;;  %v12550_v24 = vmul.f32 %v26000_v34, %v26000_v34  ;;  %v12510_v46 = vadd.f32 %v26002_v4, %v25982_v19  ;;  %v26012_v35 = vpop.f32.mrb[57].mxu1 }
0x1011   :  { %v12549_v63 = vmul.f32 %v26002_v4, %v26002_v4  ;;  %26999 = vst [vmem:[#allocation12_spill] sm:$0xff] %v26012_v35  ;;  %v12560_v3 = vadd.f32 %v12548_v58, %v12544_v11  ;;  %v12531_v39 = vsel %vm6402_vm3, %v26012_v35, 0.0  ;;  %v12551_v29 = vmul.f32 %v26012_v35, %v26012_v35 }
0x1012   :  { %v12580_v22 = vadd.f32 %v12550_v24, %v12546_v40  ;;  %v12532_v6 = vadd.f32 %v12531_v39, %v12530_v2  ;;  %v26020_v0 = vpop.f32.mrb[62].mxu0 }
0x1013   :  { %v12570_v9 = vadd.f32 %v12549_v63, %v12545_v7  ;;  %27000 = vst [vmem:[#allocation13_spill] sm:$0xff] %v26020_v0  ;;  %v12591_v14 = vsel %vm6402_vm3, %v12551_v29, 0.0  ;;  %v12500_v28 = vadd.f32 %v12499_v26, %v26020_v0  ;;  %v12552_v30 = vmul.f32 %v26020_v0, %v26020_v0  ;;  %v26027_v59 = vpop.f32.mrb[58].mxu1  ;;  %v26029_v53 = vpop.f32.mrb[63].mxu0 }
0x1014   :  { %27001 = vst [vmem:[#allocation14_spill] sm:$0xff] %v26027_v59  ;;  %27002 = vst [vmem:[#allocation15_spill] sm:$0xff] %v26029_v53  ;;  %v12592_v48 = vadd.f32 %v12591_v14, %v12590_v1  ;;  %v12521_v51 = vadd.f32 %v12520_v15, %v26027_v59  ;;  %v12554_v11 = vmul.f32 %v26027_v59, %v26027_v59  ;;  %v26035_v7 = vpop.f32.mrb[59].mxu1 }
0x1015   :  { %v12511_v40 = vadd.f32 %v12510_v46, %v26029_v53  ;;  %27003 = vst [vmem:[#allocation16_spill] sm:$0xff] %v26035_v7  ;;  %v12561_v47 = vadd.f32 %v12560_v3, %v12552_v30  ;;  %v12553_v26 = vmul.f32 %v26029_v53, %v26029_v53  ;;  %v12533_v58 = vsel %vm6402_vm3, %v26035_v7, 0.0 }
0x1016   :  { %v12555_v24 = vmul.f32 %v26035_v7, %v26035_v7  ;;  %v12581_v63 = vadd.f32 %v12580_v22, %v12554_v11  ;;  %v12534_v2 = vadd.f32 %v12533_v58, %v12532_v6  ;;  %v26043_v15 = vpop.f32.mrb[64].mxu0 }
0x1017   :  { %27004 = vst [vmem:[#allocation17_spill] sm:$0xff] %v26043_v15  ;;  %v12571_v39 = vadd.f32 %v12570_v9, %v12553_v26  ;;  %v12502_v3 = vsel %vm12501_vm9, %v26043_v15, 0.0  ;;  %v12556_v29 = vmul.f32 %v26043_v15, %v26043_v15  ;;  %v26050_v1 = vpop.f32.mrb[60].mxu1  ;;  %v26052_v14 = vpop.f32.mrb[65].mxu0 }
0x1018   :  { %v12593_v46 = vsel %vm6402_vm3, %v12555_v24, 0.0  ;;  %27005 = vst [vmem:[#allocation18_spill] sm:$0xff] %v26050_v1  ;;  %27006 = vst [vmem:[#allocation19_spill] sm:$0xff] %v26052_v14  ;;  %v12503_v7 = vadd.f32 %v12502_v3, %v12500_v28  ;;  %v12522_v22 = vsel %vm12501_vm9, %v26050_v1, 0.0  ;;  %v12558_v9 = vmul.f32 %v26050_v1, %v26050_v1  ;;  %v26058_v6 = vpop.f32.mrb[61].mxu1 }
0x1019   :  { %v12594_v30 = vadd.f32 %v12593_v46, %v12592_v48  ;;  %27007 = vst [vmem:[#allocation20_spill] sm:$0xff] %v26058_v6  ;;  %v12562_v11 = vsel %vm12501_vm9, %v12556_v29, 0.0  ;;  %v12523_v26 = vadd.f32 %v12522_v22, %v12521_v51  ;;  %v12512_v58 = vsel %vm12501_vm9, %v26052_v14, 0.0 }
0x101a   :  { %v12557_v24 = vmul.f32 %v26052_v14, %v26052_v14  ;;  %v12504_v35 = vrot.slane %v12503_v7, 4  ;;  %v26065_v48 = vadd.f32 %v12562_v11, %v12561_v47  ;;  %v12582_v28 = vsel %vm12501_vm9, %v12558_v9, 0.0 }
0x101b   :  { %v12513_v46 = vadd.f32 %v12512_v58, %v12511_v40  ;;  %v12524_v3 = vrot.slane %v12523_v26, 4  ;;  %v26068_v21 = vadd.f32 %v12582_v28, %v12581_v63  ;;  %v12536_v51 = vsel %vm12535_vm10, %v26058_v6, 0.0 }
0x101c   :  { %v12572_v1 = vsel %vm12501_vm9, %v12557_v24, 0.0  ;;  %v12505_v29 = vadd.f32 %v12504_v35, %v12503_v7  ;;  %v12537_v62 = vadd.f32 %v12536_v51, %v12534_v2  ;;  %v12559_v47 = vmul.f32 %v26058_v6, %v26058_v6 }
0x101d   :  { %v12514_v22 = vrot.slane %v12513_v46, 4  ;;  %v12573_v59 = vadd.f32 %v12572_v1, %v12571_v39  ;;  %v12525_v34 = vadd.f32 %v12524_v3, %v12523_v26 }
0x101e   :  { %v12506_v11 = vrot.slane %v12505_v29, 2  ;;  %v12538_v58 = vrot.slane %v12537_v62, 4  ;;  %v12595_v63 = vsel %vm12535_vm10, %v12559_v47, 0.0 }
0x101f   :  { %v12515_v14 = vadd.f32 %v12514_v22, %v12513_v46  ;;  %v12574_v9 = vrot.slane %v12573_v59, 4  ;;  %v12526_v40 = vrot.slane %v12525_v34, 2  ;;  %v12596_v24 = vadd.f32 %v12595_v63, %v12594_v30 }
0x1020   :  { %v12507_v28 = vadd.f32 %v12506_v11, %v12505_v29  ;;  %v12539_v4 = vadd.f32 %v12538_v58, %v12537_v62 }
0x1021   :  { %v12516_v53 = vrot.slane %v12515_v14, 2  ;;  %v12575_v19 = vadd.f32 %v12574_v9, %v12573_v59  ;;  %v12527_v35 = vadd.f32 %v12526_v40, %v12525_v34  ;;  %v12597_v7 = vrot.slane %v12596_v24, 4 }
0x1022   :  { %v12508_v1 = vrot.slane %v12507_v28, 1  ;;  %v12540_v2 = vrot.slane %v12539_v4, 2 }
0x1023   :  { %v12517_v39 = vadd.f32 %v12516_v53, %v12515_v14  ;;  %v12576_v26 = vrot.slane %v12575_v19, 2  ;;  %v12598_v3 = vadd.f32 %v12597_v7, %v12596_v24  ;;  %v12528_v22 = vrot.slane %v12527_v35, 1 }
0x1024   :  { %v12541_v6 = vadd.f32 %v12540_v2, %v12539_v4  ;;  %v12509_v44 = vadd.f32 %v12508_v1, %v12507_v28  ;;  %v20755_v4 = vld [vmem:[%s26939_s15 + $0x88] sm:$0xff]  }
0x1025   :  { %v12518_v51 = vrot.slane %v12517_v39, 1  ;;  %v12577_v46 = vadd.f32 %v12576_v26, %v12575_v19  ;;  %v12599_v15 = vrot.slane %v12598_v3, 2  ;;  %v12529_v59 = vadd.f32 %v12528_v22, %v12527_v35  ;;  %v12949_v22 = vld [vmem:[%s26935_s11] sm:$0x1] }
0x1026   :  { %v12542_v47 = vrot.slane %v12541_v6, 1 }
0x1027   :  { %v12519_v0 = vadd.f32 %v12518_v51, %v12517_v39  ;;  %v12578_v29 = vrot.slane %v12577_v46, 1  ;;  %v12600_v30 = vadd.f32 %v12599_v15, %v12598_v3  ;;  %v20761_v15 = vld [vmem:[%s26939_s15 + $0x98] sm:$0xff]   ;;  %v12958_v51 = vld [vmem:[%s26937_s13 + $0x10] sm:$0xff] }
0x1028   :  { %v12543_v62 = vadd.f32 %v12542_v47, %v12541_v6  ;;  %v12967_v47 = vld [vmem:[%s26937_s13 + $0x58] sm:$0xff] }
0x1029   :  { %12726 = vmatprep.mubr.f32.mxu0 %v12519_v0  ;;  %v12579_v34 = vadd.f32 %v12578_v29, %v12577_v46  ;;  %v12601_v53 = vrot.slane %v12600_v30, 1  ;;  %v20758_v0 = vld [vmem:[%s26939_s15 + $0x90] sm:$0xff]   ;;  %v12971_v29 = vld [vmem:[%s26937_s13 + $0x78] sm:$0xff] }
0x102a   :  { %12727 = vmatmul.mubr.f32.vlgmr.msra.gmra.mrb[66].mxu0 %v12509_v44  ;;  %17553 = vmatprep.mubr.msk.f32.mxu1 %vm6402_vm3, %v12543_v62  ;;  %v20754_v44 = vld [vmem:[%s26939_s15 + $0x80] sm:$0xff]   ;;  %v12962_v46 = vld [vmem:[%s26937_s13 + $0x30] sm:$0xff] }
0x102b   :  { %18644 = vmatpush3.bf16.msra.mxu0 %v25719_v61  ;;  %12870 = vmatprep.mubr.f32.mxu0 %v12579_v34  ;;  %v12602_v19 = vadd.f32 %v12601_v53, %v12600_v30  ;;  %v12564_v61 = vrot.slane %v26065_v48, 4  ;;  %v18719_v62 = vpack.c.bf16 %v12962_v46, %v12958_v51  ;;  %v12966_v53 = vld [vmem:[%s26937_s13 + $0x50] sm:$0xff] }
0x102c   :  { %12797 = vmatmul.mubr.f32.vlgmr.msra.gmra.mrb[62].mxu1 %v12529_v59  ;;  %18646 = vmatprep.subr.bf16.mxu0 %v25787_v38  ;;  %v18721_v59 = vpack.c.bf16 %v12971_v29, %v12967_v47  ;;  %v27016_v47 = vld [vmem:[#allocation9_spill] sm:$0xff] }
0x102d   :  { %18675 = vmatpush1.bf16.msra.mxu1 %v25709_v17  ;;  %17554 = vmatprep.mubr.msk.f32.mxu1 %vm6402_vm3, %v12602_v19  ;;  %v12565_v17 = vadd.f32 %v12564_v61, %v26065_v48  ;;  %v12970_v19 = vld [vmem:[%s26937_s13 + $0x70] sm:$0xff] }
0x102e   :  { %18676 = vmatprep.subr.bf16.mxu1 %v26984_v52 }
0x102f   :  { %18648 = vmatpush3.bf16.msra.mxu0 %v25798_v42 }
0x1030   :  { %18650 = vmatprep.subr.bf16.mxu0 %v25814_v8 }
0x1031   :  { %18678 = vmatpush1.bf16.msra.mxu1 %v25729_v37  ;;  %v12566_v37 = vrot.slane %v12565_v17, 2 }
0x1032   :  { %18679 = vmatprep.subr.bf16.mxu1 %v26984_v52 }
0x1033   :  { %18652 = vmatpush3.bf16.msra.mxu0 %v25826_v20 }
0x1034   :  { %18654 = vmatprep.subr.bf16.mxu0 %v25842_v31  ;;  %v27008_v31 = vmov 0  }
0x1035   :  { %18681 = vmatpush1.bf16.msra.mxu1 %v25747_v43  ;;  %v12567_v43 = vadd.f32 %v12566_v37, %v12565_v17  ;;  %v18723_v17 = vpack.c.bf16 %v12970_v19, %v12966_v53  ;;  %v12953_v37 = vld [vmem:[%s26936_s12] sm:$0x1]  ;;  %v27019_v53 = vld [vmem:[#allocation18_spill] sm:$0xff] }
0x1036   :  { %18682 = vmatprep.subr.bf16.mxu1 %v26984_v52 }
0x1037   :  { %18656 = vmatpush3.bf16.msra.mxu0 %v25854_v25  ;;  %v12957_v25 = vld [vmem:[%s26937_s13 + $0x8] sm:$0xff] }
0x1038   :  { %18658 = vmatprep.subr.bf16.mxu0 %v25871_v23  ;;  %v12956_v23 = vld [vmem:[%s26937_s13] sm:$0xff] }
0x1039   :  { %18684 = vmatpush1.bf16.msra.mxu1 %v25764_v57  ;;  %v12568_v57 = vrot.slane %v12567_v43, 1 }
0x103a   :  { %18685 = vmatprep.subr.bf16.mxu1 %v26984_v52 }
0x103b   :  { %18660 = vmatpush3.bf16.msra.mxu0 %v25882_v33  ;;  %v12569_v38 = vadd.f32 %v12568_v57, %v12567_v43  ;;  %v20756_v57 = vld [vmem:[%s26939_s15 + $0x40] sm:$0xff]  }
0x103c   :  { %18662 = vmatprep.subr.bf16.mxu0 %v25898_v54  ;;  %v12965_v54 = vld [vmem:[%s26937_s13 + $0x48] sm:$0xff] }
0x103d   :  { %18687 = vmatpush1.bf16.msra.mxu1 %v25776_v18  ;;  %v12584_v18 = vrot.slane %v26068_v21, 4 }
0x103e   :  { %18688 = vmatprep.subr.bf16.mxu1 %v26984_v52 }
0x103f   :  { %18664 = vmatpush3.bf16.msra.mxu0 %v25910_v55  ;;  %v12585_v42 = vadd.f32 %v12584_v18, %v26068_v21  ;;  %v12969_v55 = vld [vmem:[%s26937_s13 + $0x68] sm:$0xff]  ;;  %v20757_v18 = vld [vmem:[%s26939_s15] sm:$0xff]  }
0x1040   :  { %18666 = vmatprep.subr.bf16.mxu0 %v25926_v12  ;;  %v26144_v12 = vpack.c.bf16 %v12969_v55, %v12965_v54  ;;  %v20771_v54 = vld [vmem:[%s26939_s15 + $0x68] sm:$0xff]  }
0x1041   :  { %18690 = vmatpush1.bf16.msra.mxu1 %v25804_v27  ;;  %v12586_v27 = vrot.slane %v12585_v42, 2  ;;  %v20772_v55 = vld [vmem:[%s26939_s15 + $0x28] sm:$0xff]  }
0x1042   :  { %18691 = vmatprep.subr.bf16.mxu1 %v26984_v52 }
0x1043   :  { %18668 = vmatpush3.bf16.msra.mxu0 %v25938_v36  ;;  %v12587_v8 = vadd.f32 %v12586_v27, %v12585_v42  ;;  %v12964_v36 = vld [vmem:[%s26937_s13 + $0x40] sm:$0xff]  ;;  %v20760_v42 = vld [vmem:[%s26939_s15 + $0x8] sm:$0xff]   ;;  %v20762_v27 = vld [vmem:[%s26939_s15 + $0x50] sm:$0xff]  }
0x1044   :  { %18670 = vmatprep.subr.bf16.mxu0 %v25954_v13  ;;  %v12959_v13 = vld [vmem:[%s26937_s13 + $0x18] sm:$0xff] }
0x1045   :  { %18693 = vmatpush1.bf16.msra.mxu1 %v25832_v5  ;;  %v12588_v20 = vrot.slane %v12587_v8, 1 }
0x1046   :  { %18694 = vmatprep.subr.bf16.mxu1 %v26984_v52 }
0x1047   :  { %18672 = vmatpush3.bf16.msra.mxu0 %v25966_v60  ;;  %v12589_v5 = vadd.f32 %v12588_v20, %v12587_v8  ;;  %v12963_v60 = vld [vmem:[%s26937_s13 + $0x38] sm:$0xff]  ;;  %v20763_v8 = vld [vmem:[%s26939_s15 + $0x10] sm:$0xff]   ;;  %v20764_v20 = vld [vmem:[%s26939_s15 + $0xa0] sm:$0xff]  }
0x1048   :  { %v18717_v21 = vpack.c.bf16 %v12963_v60, %v12959_v13  ;;  %v20777_v13 = vld [vmem:[%s26939_s15 + $0x78] sm:$0xff]  }
0x1049   :  { %18696 = vmatpush1.bf16.msra.mxu1 %v25860_v56  ;;  %v12961_v56 = vld [vmem:[%s26937_s13 + $0x28] sm:$0xff]  ;;  %v20778_v60 = vld [vmem:[%s26939_s15 + $0x38] sm:$0xff]  }
0x104a   :  { %12871 = vmatmul.mubr.f32.vlgmr.msra.gmra.mrb[80].mxu0 %v12569_v38  ;;  %18697 = vmatprep.subr.bf16.mxu1 %v26984_v52  ;;  %v26131_v33 = vpack.c.bf16 %v12961_v56, %v12957_v25  ;;  %v20759_v38 = vld [vmem:[%s26939_s15 + $0x48] sm:$0xff]   ;;  %v20766_v25 = vld [vmem:[%s26939_s15 + $0x18] sm:$0xff]  }
0x104b   :  { %13039 = vmatprep.mubr.f32.mxu0 %v26985_v41  ;;  %v20767_v56 = vld [vmem:[%s26939_s15 + $0xa8] sm:$0xff]  }
0x104c   :  { %18710 = vmatprep.subr.bf16.mxu0 %v26131_v33 }
0x104d   :  { %18699 = vmatpush1.bf16.msra.mxu1 %v25888_v50  ;;  %v12960_v50 = vld [vmem:[%s26937_s13 + $0x20] sm:$0xff] }
0x104e   :  { %18700 = vmatprep.subr.bf16.mxu1 %v26984_v52 }
0x1051   :  { %18702 = vmatpush1.bf16.msra.mxu1 %v25916_v32  ;;  %v26142_v32 = vpack.c.bf16 %v12960_v50, %v12956_v23  ;;  %v20768_v23 = vld [vmem:[%s26939_s15 + $0x60] sm:$0xff]   ;;  %v20770_v50 = vld [vmem:[%s26939_s15 + $0xb0] sm:$0xff]  }
0x1052   :  { %18703 = vmatprep.subr.bf16.mxu1 %v26984_v52 }
0x1053   :  { %18712 = vmatpush1.bf16.msra.mxu0 %v26142_v32 }
0x1054   :  { %18714 = vmatprep.subr.bf16.mxu0 %v26144_v12 }
0x1055   :  { %18705 = vmatpush1.bf16.msra.mxu1 %v25944_v16  ;;  %v12968_v16 = vld [vmem:[%s26937_s13 + $0x60] sm:$0xff] }
0x1056   :  { %18706 = vmatprep.subr.bf16.mxu1 %v26984_v52 }
0x1059   :  { %18708 = vmatpush1.bf16.msra.mxu1 %v25972_v49  ;;  %v18715_v49 = vpack.c.bf16 %v12968_v16, %v12964_v36  ;;  %v20775_v36 = vld [vmem:[%s26939_s15 + $0x30] sm:$0xff]   ;;  %v20776_v16 = vld [vmem:[%s26939_s15 + $0xc0] sm:$0xff]  }
0x105a   :  { %13629 = vmatprep.subr.bf16.mxu1 %v27008_v31 }
0x105b   :  { %18716 = vmatpush1.bf16.msra.mxu0 %v18715_v49 }
0x105c   :  { %12941 = vmatmul.mubr.f32.vlgmr.msra.gmra.mrb[76].mxu1 %v12589_v5  ;;  %18718 = vmatprep.subr.bf16.mxu0 %v18717_v21  ;;  %v20765_v5 = vld [vmem:[%s26939_s15 + $0x58] sm:$0xff]  }
0x105d   :  { %13630 = vmatpush1.bf16.msra.mxu1 %v20754_v44  ;;  %v20781_v44 = vld [vmem:[%s26939_s15 + $0xd0] sm:$0xff]  }
0x105e   :  { %13631 = vmatprep.subr.bf16.mxu1 %v27008_v31 }
0x1061   :  { %13632 = vmatpush1.bf16.msra.mxu1 %v20755_v4  ;;  %v20784_v4 = vld [vmem:[%s26939_s15 + $0xd8] sm:$0xff]  }
0x1062   :  { %13633 = vmatprep.subr.bf16.mxu1 %v27008_v31 }
0x1065   :  { %13634 = vmatpush1.bf16.msra.mxu1 %v20758_v0 }
0x1066   :  { %13635 = vmatprep.subr.bf16.mxu1 %v27008_v31 }
0x1069   :  { %13636 = vmatpush1.bf16.msra.mxu1 %v20761_v15 }
0x106a   :  { %13637 = vmatprep.subr.bf16.mxu1 %v27008_v31 }
0x106d   :  { %13638 = vmatpush1.bf16.msra.mxu1 %v20764_v20 }
0x106e   :  { %13639 = vmatprep.subr.bf16.mxu1 %v27008_v31 }
0x1071   :  { %13640 = vmatpush1.bf16.msra.mxu1 %v20767_v56 }
0x1072   :  { %13641 = vmatprep.subr.bf16.mxu1 %v27008_v31 }
0x1075   :  { %13642 = vmatpush1.bf16.msra.mxu1 %v20770_v50 }
0x1076   :  { %13643 = vmatprep.subr.bf16.mxu1 %v27008_v31 }
0x10fd   :  { %v18003_v14 = vpop.f32.mrb[66].mxu0 }
0x10fe   :  { %v18004_v6 = vpop.f32.mrb[67].mxu0 }
0x10ff   :  { %v18005_v48 = vadd.f32 %v18004_v6, %v18003_v14  ;;  %v12798_v11 = vpop.f32.mrb[62].mxu1 }
0x1100   :  { %v12800_v40 = vpop.f32.mrb[63].mxu1 }
0x1101   :  { %v12799_v9 = vadd.f32 %v18005_v48, %v12798_v11  ;;  %v27009_v11 = vld [vmem:[#allocation7_spill] sm:$0xff]  ;;  %v27010_v40 = vld [vmem:[#allocation13_spill] sm:$0xff] }
0x1103   :  { %v12802_v24 = vmul.f32 0.0025510204, %v12799_v9 }
0x1105   :  { %v12947_v2 = vmul.f32 %v12802_v24, %v12802_v24 }
0x111d   :  { %v18038_v58 = vpop.f32.mrb[80].mxu0 }
0x111e   :  { %v18039_v63 = vpop.f32.mrb[81].mxu0 }
0x111f   :  { %v18040_v28 = vadd.f32 %v18039_v63, %v18038_v58  ;;  %v27011_v63 = vld [vmem:[#allocation17_spill] sm:$0xff] }
0x112f   :  { %v12942_v35 = vpop.f32.mrb[76].mxu1 }
0x1130   :  { %v12943_v7 = vadd.f32 %v18040_v28, %v12942_v35  ;;  %v12944_v39 = vpop.f32.mrb[77].mxu1 }
0x1132   :  { %v12946_v1 = vmul.f32 0.0025510204, %v12943_v7  ;;  %v27013_v7 = vld [vmem:[#allocation11_spill] sm:$0xff] }
0x1134   :  { %v12948_v26 = vsub.f32 %v12946_v1, %v12947_v2  ;;  %v27014_v1 = vld [vmem:[#allocation15_spill] sm:$0xff] }
0x1136   :  { %v12950_v3 = vadd.f32 1e-05, %v12948_v26  ;;  %v27015_v26 = vld [vmem:[#allocation19_spill] sm:$0xff] }
0x1138   :  { %20868 = vrsqrt.f32 %v12950_v3 }
0x1142   :  { %v20869_v30 = vpop.eup %20868 }
0x1143   :  { %v12952_v34 = vmul.f32 %v20869_v30, %v12949_v22  ;;  %v27017_v30 = vld [vmem:[#allocation10_spill] sm:$0xff] }
0x1145   :  { %17555 = vmatmul.mubr.msk.f32.vlgmr.msra.gmra.mrb[82].mxu0 %vm339_vm0, %v12952_v34  ;;  %v12954_v61 = vmul.f32 %v12952_v34, %v12802_v24  ;;  %v27012_v24 = vld [vmem:[#allocation6_spill] sm:$0xff] }
0x1146   :  { %18720 = vmatpush1.bf16.msra.mxu0 %v18719_v62  ;;  %13110 = vmatprep.mubr.f32.mxu0 %v26985_v41 }
0x1147   :  { %18722 = vmatprep.subr.bf16.mxu0 %v18721_v59  ;;  %v12955_v43 = vsub.f32 %v12953_v37, %v12954_v61  ;;  %v27020_v61 = vld [vmem:[#allocation8_spill] sm:$0xff] }
0x1148   :  { %v27021_v37 = vld [vmem:[#allocation12_spill] sm:$0xff] }
0x114a   :  { %18724 = vmatpush1.bf16.msra.mxu0 %v18723_v17 }
0x114b   :  { %18726 = vmatprep.subr.bf16.mxu0 %v26131_v33  ;;  %v20769_v33 = vld [vmem:[%s26939_s15 + $0x20] sm:$0xff]  }
0x114d   :  { %17556 = vmatmul.mubr.msk.f32.vlgmr.msra.gmra.mrb[84].mxu0 %vm339_vm0, %v12952_v34  ;;  %v27018_v34 = vld [vmem:[#allocation14_spill] sm:$0xff] }
0x114e   :  { %18728 = vmatpush1.bf16.msra.mxu0 %v26142_v32  ;;  %13184 = vmatprep.mubr.f32.mxu0 %v26985_v41  ;;  %v20773_v32 = vld [vmem:[%s26939_s15 + $0xb8] sm:$0xff]  }
0x114f   :  { %18730 = vmatprep.subr.bf16.mxu0 %v26144_v12  ;;  %13644 = vmatpush1.bf16.msra.mxu1 %v20773_v32  ;;  %v20774_v12 = vld [vmem:[%s26939_s15 + $0x70] sm:$0xff]  }
0x1150   :  { %13645 = vmatprep.subr.bf16.mxu1 %v27008_v31 }
0x1152   :  { %18732 = vmatpush1.bf16.msra.mxu0 %v18715_v49  ;;  %v20779_v49 = vld [vmem:[%s26939_s15 + $0xc8] sm:$0xff]  }
0x1153   :  { %18734 = vmatprep.subr.bf16.mxu0 %v18717_v21  ;;  %13646 = vmatpush1.bf16.msra.mxu1 %v20776_v16  ;;  %v20780_v21 = vld [vmem:[%s26939_s15 + $0x120] sm:$0xff]  }
0x1154   :  { %13647 = vmatprep.subr.bf16.mxu1 %v27008_v31 }
0x1155   :  { %17557 = vmatmul.mubr.msk.f32.vlgmr.msra.gmra.mrb[86].mxu0 %vm339_vm0, %v12955_v43 }
0x1156   :  { %18736 = vmatpush1.bf16.msra.mxu0 %v18719_v62  ;;  %13255 = vmatprep.mubr.f32.mxu0 %v26985_v41 }
0x1157   :  { %18738 = vmatprep.subr.bf16.mxu0 %v18721_v59  ;;  %13648 = vmatpush1.bf16.msra.mxu1 %v20779_v49 }
0x1158   :  { %13649 = vmatprep.subr.bf16.mxu1 %v27008_v31 }
0x115a   :  { %18740 = vmatpush1.bf16.msra.mxu0 %v18723_v17 }
0x115b   :  { %18041 = vmatprep.subr.bf16.mxu0 %v20756_v57  ;;  %13650 = vmatpush1.bf16.msra.mxu1 %v20781_v44  ;;  %v27022_v57 = vld [vmem:[#allocation16_spill] sm:$0xff] }
0x115c   :  { %13651 = vmatprep.subr.bf16.mxu1 %v27008_v31 }
0x115d   :  { %17558 = vmatmul.mubr.msk.f32.vlgmr.msra.gmra.mrb[88].mxu0 %vm339_vm0, %v12955_v43 }
0x115e   :  { %18042 = vmatpush3.bf16.msra.mxu0 %v20757_v18 }
0x115f   :  { %18043 = vmatprep.subr.bf16.mxu0 %v20759_v38  ;;  %13652 = vmatpush1.bf16.msra.mxu1 %v20784_v4  ;;  %v27023_v38 = vld [vmem:[#allocation20_spill] sm:$0xff] }
0x1160   :  { %13959 = vmatprep.subr.bf16.mxu1 %v27008_v31 }
0x1162   :  { %18044 = vmatpush3.bf16.msra.mxu0 %v20760_v42 }
0x1163   :  { %18045 = vmatprep.subr.bf16.mxu0 %v20762_v27 }
0x1166   :  { %18046 = vmatpush3.bf16.msra.mxu0 %v20763_v8 }
0x1167   :  { %18047 = vmatprep.subr.bf16.mxu0 %v20765_v5 }
0x116a   :  { %18048 = vmatpush3.bf16.msra.mxu0 %v20766_v25 }
0x116b   :  { %18049 = vmatprep.subr.bf16.mxu0 %v20768_v23 }
0x116e   :  { %18050 = vmatpush3.bf16.msra.mxu0 %v20769_v33 }
0x116f   :  { %18051 = vmatprep.subr.bf16.mxu0 %v20771_v54 }
0x1172   :  { %18052 = vmatpush3.bf16.msra.mxu0 %v20772_v55 }
0x1173   :  { %18053 = vmatprep.subr.bf16.mxu0 %v20774_v12 }
0x1176   :  { %18054 = vmatpush3.bf16.msra.mxu0 %v20775_v36 }
0x1177   :  { %18055 = vmatprep.subr.bf16.mxu0 %v20777_v13 }
0x117a   :  { %18056 = vmatpush3.bf16.msra.mxu0 %v20778_v60 }
0x117b   :  { %18069 = vmatprep.subr.bf16.mxu0 %v20780_v21 }
0x1218   :  { %v13041_v0 = vpop.f32.mrb[82].mxu0 }
0x1219   :  { %v13265_v15 = vrot.slane %v13041_v0, %v21341_v10  ;;  %v13043_v14 = vpop.f32.mrb[83].mxu0 }
0x121a   :  { %v13269_v6 = vrot.slane %v13043_v14, %v21341_v10 }
0x121b   :  { %v13278_v48 = vmul.f32 %v13265_v15, %v25978_v45  ;;  %v13282_v9 = vmul.f32 %v13265_v15, %v27009_v11  ;;  %v13286_v58 = vmul.f32 %v13265_v15, %v27010_v40  ;;  %v13290_v28 = vmul.f32 %v13265_v15, %v27011_v63  ;;  %v20783_v40 = vld [vmem:[%s26939_s15 + $0x128] sm:$0xff]  }
0x121c   :  { %v13279_v35 = vmul.f32 %v13269_v6, %v27012_v24  ;;  %v13283_v39 = vmul.f32 %v13269_v6, %v27013_v7  ;;  %v13287_v2 = vmul.f32 %v13269_v6, %v27014_v1  ;;  %v13291_v3 = vmul.f32 %v13269_v6, %v27015_v26  ;;  %v20782_v6 = vld [vmem:[%s26939_s15 + $0xe0] sm:$0xff]   ;;  %v20785_v26 = vld [vmem:[%s26939_s15 + $0xe8] sm:$0xff]  }
0x1220   :  { %v13112_v51 = vpop.f32.mrb[84].mxu0 }
0x1221   :  { %v13273_v46 = vrot.slane %v13112_v51, %v21341_v10  ;;  %v13114_v22 = vpop.f32.mrb[85].mxu0 }
0x1222   :  { %v13277_v45 = vrot.slane %v13114_v22, %v21341_v10  ;;  %v20786_v22 = vld [vmem:[%s26939_s15 + $0x130] sm:$0xff]  }
0x1223   :  { %v13280_v29 = vmul.f32 %v13273_v46, %v27016_v47  ;;  %v13284_v62 = vmul.f32 %v13273_v46, %v27017_v30  ;;  %v13288_v59 = vmul.f32 %v13273_v46, %v27018_v34  ;;  %v13292_v19 = vmul.f32 %v13273_v46, %v27019_v53  ;;  %v20787_v53 = vld [vmem:[%s26939_s15 + $0xf0] sm:$0xff]  }
0x1224   :  { %v13281_v17 = vmul.f32 %v13277_v45, %v27020_v61  ;;  %v13285_v43 = vmul.f32 %v13277_v45, %v27021_v37  ;;  %v13289_v18 = vmul.f32 %v13277_v45, %v27022_v57  ;;  %v13293_v42 = vmul.f32 %v13277_v45, %v27023_v38  ;;  %v20790_v37 = vld [vmem:[%s26939_s15 + $0xf8] sm:$0xff]   ;;  %v20792_v57 = vld [vmem:[%s26939_s15 + $0x140] sm:$0xff]   ;;  %v20794_v38 = vld [vmem:[%s26939_s15 + $0x170] sm:$0xff]  }
0x1228   :  { %v13186_v27 = vpop.f32.mrb[86].mxu0 }
0x1229   :  { %v13297_v8 = vrot.slane %v13186_v27, %v21341_v10  ;;  %v13188_v20 = vpop.f32.mrb[87].mxu0  ;;  %v20796_v27 = vld [vmem:[%s26939_s15 + $0x108] sm:$0xff]  }
0x122a   :  { %v13301_v5 = vrot.slane %v13188_v20, %v21341_v10  ;;  %v20798_v20 = vld [vmem:[%s26939_s15 + $0x150] sm:$0xff]  }
0x122b   :  { %v13310_v25 = vadd.f32 %v13297_v8, %v13278_v48  ;;  %v13314_v56 = vadd.f32 %v13297_v8, %v13282_v9  ;;  %v13318_v23 = vadd.f32 %v13297_v8, %v13286_v58  ;;  %v13322_v33 = vadd.f32 %v13297_v8, %v13290_v28  ;;  %v20797_v8 = vld [vmem:[%s26939_s15 + $0x178] sm:$0xff]  }
0x122c   :  { %v13311_v50 = vadd.f32 %v13301_v5, %v13279_v35  ;;  %v13315_v54 = vadd.f32 %v13301_v5, %v13283_v39  ;;  %v13319_v55 = vadd.f32 %v13301_v5, %v13287_v2  ;;  %v13323_v32 = vadd.f32 %v13301_v5, %v13291_v3  ;;  %v20799_v5 = vld [vmem:[%s26939_s15 + $0x110] sm:$0xff]  }
0x122d   :  { %v13326_v12 = vmax.f32 %v13310_v25, 0.0  ;;  %v13330_v36 = vmax.f32 %v13314_v56, 0.0  ;;  %v13334_v16 = vmax.f32 %v13318_v23, 0.0  ;;  %v13338_v13 = vmax.f32 %v13322_v33, 0.0  ;;  %v20800_v25 = vld [vmem:[%s26939_s15 + $0x180] sm:$0xff]   ;;  %v20801_v56 = vld [vmem:[%s26939_s15 + $0x158] sm:$0xff]  }
0x122e   :  { %v13327_v60 = vmax.f32 %v13311_v50, 0.0  ;;  %v13331_v49 = vmax.f32 %v13315_v54, 0.0  ;;  %v13335_v21 = vmax.f32 %v13319_v55, 0.0  ;;  %v13339_v44 = vmax.f32 %v13323_v32, 0.0  ;;  %v20802_v23 = vld [vmem:[%s26939_s15 + $0x118] sm:$0xff]   ;;  %v20803_v33 = vld [vmem:[%s26939_s15 + $0x188] sm:$0xff]  }
0x122f   :  { %v26316_v4 = vpack.c.bf16 %v13330_v36, %v13326_v12  ;;  %v26318_v0 = vpack.c.bf16 %v13338_v13, %v13334_v16  ;;  %v20804_v50 = vld [vmem:[%s26939_s15 + $0x190] sm:$0xff]   ;;  %v20805_v54 = vld [vmem:[%s26939_s15 + $0x198] sm:$0xff]   ;;  %v20806_v55 = vld [vmem:[%s26939_s15 + $0x1a0] sm:$0xff]  }
0x1230   :  { %v13257_v15 = vpop.f32.mrb[88].mxu0  ;;  %v26320_v14 = vpack.c.bf16 %v13331_v49, %v13327_v60  ;;  %v26325_v48 = vpack.c.bf16 %v13339_v44, %v13335_v21  ;;  %v20807_v32 = vld [vmem:[%s26939_s15 + $0x1a8] sm:$0xff]   ;;  %v20808_v12 = vld [vmem:[%s26939_s15 + $0x1b0] sm:$0xff]   ;;  %v20809_v36 = vld [vmem:[%s26939_s15 + $0x1b8] sm:$0xff]  }
0x1231   :  { %v13305_v11 = vrot.slane %v13257_v15, %v21341_v10  ;;  %v13259_v9 = vpop.f32.mrb[89].mxu0  ;;  %v20810_v16 = vld [vmem:[%s26939_s15 + $0x200] sm:$0xff]   ;;  %v20812_v60 = vld [vmem:[%s26939_s15 + $0x208] sm:$0xff]   ;;  %v20814_v21 = vld [vmem:[%s26939_s15 + $0x210] sm:$0xff]  }
0x1232   :  { %v13309_v58 = vrot.slane %v13259_v9, %v21341_v10  ;;  %13612 = vmatprep.mubr.bf16.mxu0 %v26320_v14  ;;  %v20811_v13 = vld [vmem:[%s26939_s15 + $0x1c0] sm:$0xff]   ;;  %v20813_v49 = vld [vmem:[%s26939_s15 + $0x1c8] sm:$0xff]   ;;  %v20815_v44 = vld [vmem:[%s26939_s15 + $0x1d0] sm:$0xff]  }
0x1233   :  { %v13312_v63 = vadd.f32 %v13305_v11, %v13280_v29  ;;  %v13316_v28 = vadd.f32 %v13305_v11, %v13284_v62  ;;  %v13320_v24 = vadd.f32 %v13305_v11, %v13288_v59  ;;  %v13324_v35 = vadd.f32 %v13305_v11, %v13292_v19  ;;  %13613 = vmatmul.mubr.bf16.vlgmr.msra.gmra.mrb[92].mxu0 %v26316_v4  ;;  %v20788_v19 = vld [vmem:[%s26939_s15 + $0x160] sm:$0xff]   ;;  %v20816_v15 = vld [vmem:[%s26939_s15 + $0x218] sm:$0xff]  }
0x1234   :  { %v13313_v7 = vadd.f32 %v13309_v58, %v13281_v17  ;;  %v13317_v39 = vadd.f32 %v13309_v58, %v13285_v43  ;;  %v13321_v1 = vadd.f32 %v13309_v58, %v13289_v18  ;;  %v13325_v2 = vadd.f32 %v13309_v58, %v13293_v42  ;;  %18070 = vmatpush3.bf16.msra.mxu0 %v20782_v6  ;;  %v20789_v17 = vld [vmem:[%s26939_s15 + $0x138] sm:$0xff]   ;;  %v20791_v43 = vld [vmem:[%s26939_s15 + $0x168] sm:$0xff]   ;;  %v20793_v18 = vld [vmem:[%s26939_s15 + $0x100] sm:$0xff]  }
0x1235   :  { %v13328_v3 = vmax.f32 %v13312_v63, 0.0  ;;  %v13332_v51 = vmax.f32 %v13316_v28, 0.0  ;;  %v13336_v10 = vmax.f32 %v13320_v24, 0.0  ;;  %v13340_v46 = vmax.f32 %v13324_v35, 0.0  ;;  %13620 = vmatprep.mubr.bf16.mxu0 %v26325_v48  ;;  %18071 = vmatprep.subr.bf16.mxu0 %v20783_v40  ;;  %v20795_v42 = vld [vmem:[%s26939_s15 + $0x148] sm:$0xff]   ;;  %v20817_v6 = vld [vmem:[%s26939_s15 + $0x1d8] sm:$0xff]  }
0x1236   :  { %v13329_v45 = vmax.f32 %v13313_v7, 0.0  ;;  %v13333_v47 = vmax.f32 %v13317_v39, 0.0  ;;  %v13337_v29 = vmax.f32 %v13321_v1, 0.0  ;;  %v13341_v30 = vmax.f32 %v13325_v2, 0.0  ;;  %v20818_v11 = vld [vmem:[%s26939_s15 + $0x220] sm:$0xff]   ;;  %v20820_v40 = vld [vmem:[%s26939_s15 + $0x228] sm:$0xff]  }
0x1237   :  { %v26341_v62 = vpack.c.bf16 %v13332_v51, %v13328_v3  ;;  %v26343_v34 = vpack.c.bf16 %v13340_v46, %v13336_v10  ;;  %v20819_v9 = vld [vmem:[%s26939_s15 + $0x1e0] sm:$0xff]   ;;  %v20821_v58 = vld [vmem:[%s26939_s15 + $0x1e8] sm:$0xff]   ;;  %v20822_v63 = vld [vmem:[%s26939_s15 + $0x230] sm:$0xff]  }
0x1238   :  { %18072 = vmatpush3.bf16.msra.mxu0 %v20785_v26  ;;  %v26345_v59 = vpack.c.bf16 %v13333_v47, %v13329_v45  ;;  %v26353_v61 = vpack.c.bf16 %v13341_v30, %v13337_v29  ;;  %v20823_v28 = vld [vmem:[%s26939_s15 + $0x1f0] sm:$0xff]   ;;  %v20824_v24 = vld [vmem:[%s26939_s15 + $0x238] sm:$0xff]  }
0x1239   :  { %18073 = vmatprep.subr.bf16.mxu0 %v20786_v22  ;;  %v20825_v35 = vld [vmem:[%s26939_s15 + $0x1f8] sm:$0xff]  }
0x123a   :  { %17587 = vmatprep.mubr.msk.bf16.mxu1 %vm6402_vm3, %v26345_v59 }
0x123b   :  { %13621 = vmatmul.mubr.bf16.gmra.mrb[96].mxu0 %v26318_v0  ;;  %13662 = vmatmul.mubr.bf16.vlgmr.msra.gmra.mrb[80].mxu1 %v26341_v62 }
0x123c   :  { %18074 = vmatpush3.bf16.msra.mxu0 %v20787_v53  ;;  %13960 = vmatpush1.bf16.msra.mxu1 %v20788_v19 }
0x123d   :  { %17588 = vmatprep.mubr.msk.bf16.mxu1 %vm6402_vm3, %v26353_v61  ;;  %13942 = vmatprep.mubr.bf16.mxu0 %v26320_v14 }
0x123e   :  { %18075 = vmatprep.subr.bf16.mxu0 %v20789_v17  ;;  %13961 = vmatprep.subr.bf16.mxu1 %v27008_v31 }
0x1240   :  { %18076 = vmatpush3.bf16.msra.mxu0 %v20790_v37  ;;  %13962 = vmatpush1.bf16.msra.mxu1 %v20791_v43 }
0x1241   :  { %18077 = vmatprep.subr.bf16.mxu0 %v20792_v57  ;;  %13963 = vmatprep.subr.bf16.mxu1 %v27008_v31 }
0x1243   :  { %13670 = vmatmul.mubr.bf16.gmra.mrb[84].mxu1 %v26343_v34 }
0x1244   :  { %18078 = vmatpush3.bf16.msra.mxu0 %v20793_v18  ;;  %13964 = vmatpush1.bf16.msra.mxu1 %v20794_v38 }
0x1245   :  { %17673 = vmatprep.mubr.msk.bf16.mxu1 %vm6402_vm3, %v26345_v59  ;;  %18079 = vmatprep.subr.bf16.mxu0 %v20795_v42 }
0x1246   :  { %13965 = vmatprep.subr.bf16.mxu1 %v27008_v31 }
0x1248   :  { %18080 = vmatpush3.bf16.msra.mxu0 %v20796_v27  ;;  %13966 = vmatpush1.bf16.msra.mxu1 %v20797_v8 }
0x1249   :  { %18081 = vmatprep.subr.bf16.mxu0 %v20798_v20  ;;  %13967 = vmatprep.subr.bf16.mxu1 %v27008_v31 }
0x124c   :  { %18082 = vmatpush3.bf16.msra.mxu0 %v20799_v5  ;;  %13968 = vmatpush1.bf16.msra.mxu1 %v20800_v25 }
0x124d   :  { %18083 = vmatprep.subr.bf16.mxu0 %v20801_v56  ;;  %13969 = vmatprep.subr.bf16.mxu1 %v27008_v31 }
0x1250   :  { %18084 = vmatpush3.bf16.msra.mxu0 %v20802_v23  ;;  %13970 = vmatpush1.bf16.msra.mxu1 %v20803_v33 }
0x1251   :  { %13971 = vmatprep.subr.bf16.mxu1 %v27008_v31  ;;  %18741 = vmatprep.subr.bf16.mxu0 %v26984_v52 }
0x1253   :  { %13943 = vmatmul.mubr.bf16.vlgmr.msra.gmra.mrb[100].mxu0 %v26316_v4 }
0x1254   :  { %13950 = vmatprep.mubr.bf16.mxu0 %v26325_v48  ;;  %13972 = vmatpush1.bf16.msra.mxu1 %v20804_v50 }
0x1255   :  { %13973 = vmatprep.subr.bf16.mxu1 %v27008_v31 }
0x1258   :  { %13974 = vmatpush1.bf16.msra.mxu1 %v20805_v54 }
0x1259   :  { %13975 = vmatprep.subr.bf16.mxu1 %v27008_v31 }
0x125b   :  { %13951 = vmatmul.mubr.bf16.gmra.mrb[104].mxu0 %v26318_v0 }
0x125c   :  { %13976 = vmatpush1.bf16.msra.mxu1 %v20806_v55  ;;  %18205 = vmatprep.mubr.msk.f32.mxu0 %vm20913_vm11, %v26985_v41 }
0x125d   :  { %13977 = vmatprep.subr.bf16.mxu1 %v27008_v31 }
0x1260   :  { %13978 = vmatpush1.bf16.msra.mxu1 %v20807_v32 }
0x1261   :  { %13979 = vmatprep.subr.bf16.mxu1 %v27008_v31 }
0x1264   :  { %13980 = vmatpush1.bf16.msra.mxu1 %v20808_v12 }
0x1265   :  { %13981 = vmatprep.subr.bf16.mxu1 %v27008_v31 }
0x1268   :  { %13982 = vmatpush1.bf16.msra.mxu1 %v20809_v36 }
0x1269   :  { %18119 = vmatprep.subr.bf16.mxu1 %v20810_v16 }
0x126b   :  { %13992 = vmatmul.mubr.bf16.vlgmr.msra.gmra.mrb[88].mxu1 %v26341_v62 }
0x126c   :  { %17674 = vmatprep.mubr.msk.bf16.mxu1 %vm6402_vm3, %v26353_v61  ;;  %18120 = vmatpush3.bf16.msra.mxu1 %v20811_v13 }
0x126d   :  { %18121 = vmatprep.subr.bf16.mxu1 %v20812_v60 }
0x1270   :  { %18122 = vmatpush3.bf16.msra.mxu1 %v20813_v49 }
0x1271   :  { %18123 = vmatprep.subr.bf16.mxu1 %v20814_v21 }
0x1273   :  { %14000 = vmatmul.mubr.bf16.gmra.mrb[92].mxu1 %v26343_v34 }
0x1274   :  { %18124 = vmatpush3.bf16.msra.mxu1 %v20815_v44  ;;  %14522 = vmatprep.mubr.bf16.mxu1 %v26320_v14 }
0x1275   :  { %18125 = vmatprep.subr.bf16.mxu1 %v20816_v15 }
0x1278   :  { %18126 = vmatpush3.bf16.msra.mxu1 %v20817_v6 }
0x1279   :  { %18127 = vmatprep.subr.bf16.mxu1 %v20818_v11 }
0x127c   :  { %18128 = vmatpush3.bf16.msra.mxu1 %v20819_v9 }
0x127d   :  { %18129 = vmatprep.subr.bf16.mxu1 %v20820_v40 }
0x1280   :  { %18130 = vmatpush3.bf16.msra.mxu1 %v20821_v58 }
0x1281   :  { %18131 = vmatprep.subr.bf16.mxu1 %v20822_v63 }
0x1284   :  { %18132 = vmatpush3.bf16.msra.mxu1 %v20823_v28 }
0x1285   :  { %18133 = vmatprep.subr.bf16.mxu1 %v20824_v24  ;;  %v17887_v24 = vld [vmem:[%s26940_s16 + $0xb8] sm:$0xff] }
0x1288   :  { %18134 = vmatpush3.bf16.msra.mxu1 %v20825_v35 }
0x1289   :  { %18755 = vmatprep.subr.bf16.mxu1 %v26984_v52 }
0x128b   :  { %14523 = vmatmul.mubr.bf16.vlgmr.msra.gmra.mrb[96].mxu1 %v26316_v4 }
0x128c   :  { %14530 = vmatprep.mubr.bf16.mxu1 %v26325_v48 }
0x1293   :  { %14531 = vmatmul.mubr.bf16.gmra.mrb[100].mxu1 %v26318_v0 }
0x1294   :  { %18263 = vmatprep.mubr.msk.f32.mxu1 %vm20913_vm11, %v26985_v41 }
0x1306   :  { %v18057_v7 = vpop.f32.mrb[92].mxu0 }
0x1307   :  { %v18058_v39 = vpop.f32.mrb[93].mxu0 }
0x1308   :  { %v18059_v1 = vadd.f32 %v18058_v39, %v18057_v7  ;;  %v18060_v2 = vpop.f32.mrb[94].mxu0  ;;  %v17675_v7 = vld [vmem:[%s26940_s16 + $0x38] sm:$0xff]  ;;  %v17676_v39 = vld [vmem:[%s26940_s16 + $0x40] sm:$0xff] }
0x1309   :  { %v18061_v26 = vpop.f32.mrb[95].mxu0 }
0x130a   :  { %v18062_v3 = vadd.f32 %v18061_v26, %v18060_v2  ;;  %v17678_v2 = vld [vmem:[%s26940_s16 + $0x50] sm:$0xff]  ;;  %v17679_v26 = vld [vmem:[%s26940_s16 + $0x58] sm:$0xff] }
0x130e   :  { %v18063_v51 = vpop.f32.mrb[96].mxu0  ;;  %v13663_v10 = vpop.f32.mrb[80].mxu1 }
0x130f   :  { %v13664_v46 = vadd.f32 %v18059_v1, %v13663_v10  ;;  %v18064_v22 = vpop.f32.mrb[97].mxu0  ;;  %v13665_v45 = vpop.f32.mrb[81].mxu1  ;;  %v17677_v1 = vld [vmem:[%s26940_s16 + $0x48] sm:$0xff] }
0x1310   :  { %v18065_v47 = vadd.f32 %v18064_v22, %v18063_v51  ;;  %v18066_v29 = vpop.f32.mrb[98].mxu0  ;;  %v13666_v30 = vpop.f32.mrb[82].mxu1  ;;  %v17680_v45 = vld [vmem:[%s26940_s16 + $0x60] sm:$0xff] }
0x1311   :  { %v13667_v53 = vadd.f32 %v18062_v3, %v13666_v30  ;;  %v18067_v19 = vpop.f32.mrb[99].mxu0  ;;  %v13668_v17 = vpop.f32.mrb[83].mxu1 }
0x1312   :  { %v18068_v37 = vadd.f32 %v18067_v19, %v18066_v29  ;;  %v17681_v29 = vld [vmem:[%s26940_s16 + $0x68] sm:$0xff] }
0x1313   :  { %v18749_v43 = vpack.c.bf16 %v13667_v53, %v13664_v46 }
0x1316   :  { %v13671_v57 = vpop.f32.mrb[84].mxu1 }
0x1317   :  { %v13672_v18 = vadd.f32 %v18065_v47, %v13671_v57  ;;  %v13673_v38 = vpop.f32.mrb[85].mxu1  ;;  %v20826_v57 = vld [vmem:[%s26939_s15 + $0x240] sm:$0xff]  }
0x1318   :  { %v13674_v42 = vpop.f32.mrb[86].mxu1  ;;  %v13679_v38 = vld [vmem:[%s26940_s16 + $0x8] sm:$0xff] }
0x1319   :  { %v13675_v27 = vadd.f32 %v18068_v37, %v13674_v42  ;;  %v13676_v8 = vpop.f32.mrb[87].mxu1  ;;  %v20827_v42 = vld [vmem:[%s26939_s15 + $0x248] sm:$0xff]  }
0x131a   :  { %v20828_v8 = vld [vmem:[%s26939_s15 + $0x250] sm:$0xff]  }
0x131b   :  { %v18752_v20 = vpack.c.bf16 %v13675_v27, %v13672_v18  ;;  %v13680_v27 = vld [vmem:[%s26940_s16 + $0x10] sm:$0xff] }
0x1326   :  { %v18085_v5 = vpop.f32.mrb[100].mxu0 }
0x1327   :  { %v18086_v25 = vpop.f32.mrb[101].mxu0 }
0x1328   :  { %v18087_v56 = vadd.f32 %v18086_v25, %v18085_v5  ;;  %v18088_v23 = vpop.f32.mrb[102].mxu0  ;;  %v20829_v5 = vld [vmem:[%s26939_s15 + $0x258] sm:$0xff]   ;;  %v13682_v25 = vld [vmem:[%s26940_s16 + $0x20] sm:$0xff] }
0x1329   :  { %v18089_v33 = vpop.f32.mrb[103].mxu0 }
0x132a   :  { %v18090_v50 = vadd.f32 %v18089_v33, %v18088_v23  ;;  %v13683_v23 = vld [vmem:[%s26940_s16 + $0x28] sm:$0xff] }
0x132b   :  { %v20831_v33 = vld [vmem:[%s26939_s15 + $0x268] sm:$0xff]  }
0x132e   :  { %v18091_v54 = vpop.f32.mrb[104].mxu0 }
0x132f   :  { %v18092_v55 = vpop.f32.mrb[105].mxu0 }
0x1330   :  { %v18093_v32 = vadd.f32 %v18092_v55, %v18091_v54  ;;  %v18094_v12 = vpop.f32.mrb[106].mxu0  ;;  %v20832_v54 = vld [vmem:[%s26939_s15 + $0x270] sm:$0xff]   ;;  %v20833_v55 = vld [vmem:[%s26939_s15 + $0x278] sm:$0xff]  }
0x1331   :  { %v18095_v36 = vpop.f32.mrb[107].mxu0 }
0x1332   :  { %v18096_v16 = vadd.f32 %v18095_v36, %v18094_v12  ;;  %v20835_v12 = vld [vmem:[%s26939_s15 + $0x288] sm:$0xff]   ;;  %v20836_v36 = vld [vmem:[%s26939_s15 + $0x290] sm:$0xff]  }
0x133e   :  { %v13993_v13 = vpop.f32.mrb[88].mxu1 }
0x133f   :  { %v13994_v60 = vadd.f32 %v18087_v56, %v13993_v13  ;;  %v13995_v49 = vpop.f32.mrb[89].mxu1  ;;  %v20830_v56 = vld [vmem:[%s26939_s15 + $0x260] sm:$0xff]  }
0x1340   :  { %v13996_v21 = vpop.f32.mrb[90].mxu1  ;;  %v20838_v13 = vld [vmem:[%s26939_s15 + $0x320] sm:$0xff]   ;;  %v20840_v49 = vld [vmem:[%s26939_s15 + $0x330] sm:$0xff]  }
0x1341   :  { %v13997_v44 = vadd.f32 %v18090_v50, %v13996_v21  ;;  %v13998_v15 = vpop.f32.mrb[91].mxu1  ;;  %v13684_v50 = vld [vmem:[%s26940_s16 + $0x30] sm:$0xff]  ;;  %v20841_v21 = vld [vmem:[%s26939_s15 + $0x338] sm:$0xff]  }
0x1342   :  { %v20843_v15 = vld [vmem:[%s26939_s15 + $0x348] sm:$0xff]  }
0x1343   :  { %v18742_v6 = vpack.c.bf16 %v13997_v44, %v13994_v60  ;;  %v20839_v60 = vld [vmem:[%s26939_s15 + $0x328] sm:$0xff]   ;;  %v20842_v44 = vld [vmem:[%s26939_s15 + $0x340] sm:$0xff]  }
0x1345   :  { %18743 = vmatpush3.bf16.msra.mxu0 %v18742_v6  ;;  %v20845_v6 = vld [vmem:[%s26939_s15 + $0x358] sm:$0xff]  }
0x1346   :  { %v14001_v11 = vpop.f32.mrb[92].mxu1  ;;  %18744 = vmatprep.subr.bf16.mxu0 %v26984_v52 }
0x1347   :  { %v14002_v9 = vadd.f32 %v18093_v32, %v14001_v11  ;;  %v14003_v40 = vpop.f32.mrb[93].mxu1  ;;  %v20834_v32 = vld [vmem:[%s26939_s15 + $0x280] sm:$0xff]  }
0x1348   :  { %v14004_v58 = vpop.f32.mrb[94].mxu1  ;;  %v20846_v11 = vld [vmem:[%s26939_s15 + $0x360] sm:$0xff]   ;;  %v20848_v40 = vld [vmem:[%s26939_s15 + $0x370] sm:$0xff]  }
0x1349   :  { %v14005_v63 = vadd.f32 %v18096_v16, %v14004_v58  ;;  %v14006_v28 = vpop.f32.mrb[95].mxu1  ;;  %v20837_v16 = vld [vmem:[%s26939_s15 + $0x298] sm:$0xff]  }
0x134a   :  { %v20849_v58 = vld [vmem:[%s26939_s15 + $0x378] sm:$0xff]  }
0x134b   :  { %v18745_v35 = vpack.c.bf16 %v14005_v63, %v14002_v9  ;;  %v20847_v9 = vld [vmem:[%s26939_s15 + $0x368] sm:$0xff]  }
0x134d   :  { %18747 = vmatpush3.bf16.msk.msra.mxu0 %vm26507_vm12, %v18745_v35 }
0x134e   :  { %18748 = vmatprep.subr.bf16.mxu0 %v26984_v52 }
0x1350   :  { %18206 = vmatmul.mubr.msk.f32.vlgmr.msra.gmra.mrb[90].mxu0 %vm14016_vm13, %v17675_v7 }
0x1351   :  { %18750 = vmatpush3.bf16.msra.mxu0 %v18749_v43  ;;  %18208 = vmatprep.mubr.msk.f32.mxu0 %vm20913_vm11, %v26985_v41  ;;  %v13678_v43 = vld [vmem:[%s26940_s16] sm:$0xff] }
0x1352   :  { %18751 = vmatprep.subr.bf16.mxu0 %v26984_v52 }
0x1354   :  { %18209 = vmatmul.mubr.msk.f32.gmra.mrb[108].mxu0 %vm14016_vm13, %v17676_v39 }
0x1355   :  { %18754 = vmatpush3.bf16.msk.msra.mxu0 %vm26507_vm12, %v18752_v20  ;;  %18211 = vmatprep.mubr.msk.f32.mxu0 %vm20913_vm11, %v26985_v41  ;;  %v13681_v20 = vld [vmem:[%s26940_s16 + $0x18] sm:$0xff] }
0x1356   :  { %14539 = vmatprep.subr.bf16.mxu0 %v27008_v31 }
0x1358   :  { %18212 = vmatmul.mubr.msk.f32.gmra.mrb[110].mxu0 %vm14016_vm13, %v17677_v1 }
0x1359   :  { %18214 = vmatprep.mubr.msk.f32.mxu0 %vm20913_vm11, %v26985_v41 }
0x135c   :  { %18215 = vmatmul.mubr.msk.f32.gmra.mrb[112].mxu0 %vm14016_vm13, %v17678_v2 }
0x135d   :  { %18217 = vmatprep.mubr.msk.f32.mxu0 %vm20913_vm11, %v26985_v41 }
0x135e   :  { %v18135_v3 = vpop.f32.mrb[96].mxu1 }
0x135f   :  { %v18136_v51 = vpop.f32.mrb[97].mxu1 }
0x1360   :  { %v26545_v10 = vadd.f32 %v18136_v51, %v18135_v3  ;;  %18218 = vmatmul.mubr.msk.f32.gmra.mrb[114].mxu0 %vm14016_vm13, %v17679_v26  ;;  %v18138_v46 = vpop.f32.mrb[98].mxu1 }
0x1361   :  { %v18139_v22 = vpop.f32.mrb[99].mxu1  ;;  %18220 = vmatprep.mubr.msk.f32.mxu0 %vm20913_vm11, %v26985_v41 }
0x1362   :  { %v26553_v47 = vadd.f32 %v18139_v22, %v18138_v46 }
0x1364   :  { %18221 = vmatmul.mubr.msk.f32.gmra.mrb[116].mxu0 %vm14016_vm13, %v17680_v45 }
0x1365   :  { %18223 = vmatprep.mubr.msk.f32.mxu0 %vm20913_vm11, %v26985_v41 }
0x1366   :  { %v18141_v30 = vpop.f32.mrb[100].mxu1 }
0x1367   :  { %v18142_v53 = vpop.f32.mrb[101].mxu1 }
0x1368   :  { %v26561_v19 = vadd.f32 %v18142_v53, %v18141_v30  ;;  %18224 = vmatmul.mubr.msk.f32.gmra.mrb[118].mxu0 %vm14016_vm13, %v17681_v29  ;;  %v18144_v17 = vpop.f32.mrb[102].mxu1 }
0x1369   :  { %v18145_v37 = vpop.f32.mrb[103].mxu1  ;;  %18234 = vmatprep.mubr.msk.f32.mxu0 %vm20913_vm11, %v26985_v41 }
0x136a   :  { %v26572_v18 = vadd.f32 %v18145_v37, %v18144_v17 }
0x136c   :  { %18235 = vmatmul.mubr.msk.f32.vlgmr.msra.gmra.mrb[120].mxu0 %vm14016_vm13, %v13678_v43 }
0x136d   :  { %14540 = vmatpush1.bf16.msra.mxu0 %v20826_v57  ;;  %18237 = vmatprep.mubr.msk.f32.mxu0 %vm20913_vm11, %v26985_v41 }
0x136e   :  { %14541 = vmatprep.subr.bf16.mxu0 %v27008_v31 }
0x1370   :  { %18238 = vmatmul.mubr.msk.f32.gmra.mrb[122].mxu0 %vm14016_vm13, %v13679_v38 }
0x1371   :  { %14542 = vmatpush1.bf16.msra.mxu0 %v20827_v42  ;;  %18240 = vmatprep.mubr.msk.f32.mxu0 %vm20913_vm11, %v26985_v41 }
0x1372   :  { %14543 = vmatprep.subr.bf16.mxu0 %v27008_v31 }
0x1374   :  { %18241 = vmatmul.mubr.msk.f32.gmra.mrb[124].mxu0 %vm14016_vm13, %v13680_v27 }
0x1375   :  { %14544 = vmatpush1.bf16.msra.mxu0 %v20828_v8  ;;  %18243 = vmatprep.mubr.msk.f32.mxu0 %vm20913_vm11, %v26985_v41 }
0x1376   :  { %14545 = vmatprep.subr.bf16.mxu0 %v27008_v31 }
0x1378   :  { %18244 = vmatmul.mubr.msk.f32.gmra.mrb[126].mxu0 %vm14016_vm13, %v13681_v20 }
0x1379   :  { %14546 = vmatpush1.bf16.msra.mxu0 %v20829_v5  ;;  %18246 = vmatprep.mubr.msk.f32.mxu0 %vm20913_vm11, %v26985_v41 }
0x137a   :  { %14547 = vmatprep.subr.bf16.mxu0 %v27008_v31 }
0x137c   :  { %18247 = vmatmul.mubr.msk.f32.gmra.mrb[128].mxu0 %vm14016_vm13, %v13682_v25 }
0x137d   :  { %14548 = vmatpush1.bf16.msra.mxu0 %v20830_v56  ;;  %18249 = vmatprep.mubr.msk.f32.mxu0 %vm20913_vm11, %v26985_v41 }
0x137e   :  { %14549 = vmatprep.subr.bf16.mxu0 %v27008_v31 }
0x1380   :  { %18250 = vmatmul.mubr.msk.f32.gmra.mrb[130].mxu0 %vm14016_vm13, %v13683_v23 }
0x1381   :  { %14550 = vmatpush1.bf16.msra.mxu0 %v20831_v33  ;;  %18252 = vmatprep.mubr.msk.f32.mxu0 %vm20913_vm11, %v26985_v41 }
0x1382   :  { %14551 = vmatprep.subr.bf16.mxu0 %v27008_v31 }
0x1384   :  { %18253 = vmatmul.mubr.msk.f32.gmra.mrb[132].mxu0 %vm14016_vm13, %v13684_v50 }
0x1385   :  { %14552 = vmatpush1.bf16.msra.mxu0 %v20832_v54  ;;  %17782 = vmatprep.mubr.msk.bf16.mxu0 %vm6402_vm3, %v26345_v59 }
0x1386   :  { %14553 = vmatprep.subr.bf16.mxu0 %v27008_v31 }
0x1389   :  { %14554 = vmatpush1.bf16.msra.mxu0 %v20833_v55 }
0x138a   :  { %14555 = vmatprep.subr.bf16.mxu0 %v27008_v31 }
0x138d   :  { %14556 = vmatpush1.bf16.msra.mxu0 %v20834_v32 }
0x138e   :  { %14557 = vmatprep.subr.bf16.mxu0 %v27008_v31 }
0x1391   :  { %14558 = vmatpush1.bf16.msra.mxu0 %v20835_v12 }
0x1392   :  { %14559 = vmatprep.subr.bf16.mxu0 %v27008_v31 }
0x1395   :  { %14560 = vmatpush1.bf16.msra.mxu0 %v20836_v36 }
0x1396   :  { %14561 = vmatprep.subr.bf16.mxu0 %v27008_v31 }
0x1399   :  { %14562 = vmatpush1.bf16.msra.mxu0 %v20837_v16 }
0x139a   :  { %15001 = vmatprep.subr.bf16.mxu0 %v27008_v31 }
0x139c   :  { %14572 = vmatmul.mubr.bf16.vlgmr.msra.gmra.mrb[136].mxu0 %v26341_v62 }
0x139d   :  { %17783 = vmatprep.mubr.msk.bf16.mxu0 %vm6402_vm3, %v26353_v61  ;;  %15002 = vmatpush1.bf16.msra.mxu0 %v20838_v13 }
0x139e   :  { %15003 = vmatprep.subr.bf16.mxu0 %v27008_v31 }
0x13a1   :  { %15004 = vmatpush1.bf16.msra.mxu0 %v20839_v60 }
0x13a2   :  { %15005 = vmatprep.subr.bf16.mxu0 %v27008_v31 }
0x13a4   :  { %14580 = vmatmul.mubr.bf16.gmra.mrb[140].mxu0 %v26343_v34 }
0x13a5   :  { %15006 = vmatpush1.bf16.msra.mxu0 %v20840_v49  ;;  %17883 = vmatprep.mubr.msk.bf16.mxu0 %vm6402_vm3, %v26345_v59  ;;  %v20844_v59 = vld [vmem:[%s26939_s15 + $0x350] sm:$0xff]  }
0x13a6   :  { %15007 = vmatprep.subr.bf16.mxu0 %v27008_v31 }
0x13a9   :  { %15008 = vmatpush1.bf16.msra.mxu0 %v20841_v21 }
0x13aa   :  { %15009 = vmatprep.subr.bf16.mxu0 %v27008_v31 }
0x13ad   :  { %15010 = vmatpush1.bf16.msra.mxu0 %v20842_v44 }
0x13ae   :  { %15011 = vmatprep.subr.bf16.mxu0 %v27008_v31 }
0x13b1   :  { %15012 = vmatpush1.bf16.msra.mxu0 %v20843_v15 }
0x13b2   :  { %15013 = vmatprep.subr.bf16.mxu0 %v27008_v31 }
0x13b5   :  { %15014 = vmatpush1.bf16.msra.mxu0 %v20844_v59 }
0x13b6   :  { %15015 = vmatprep.subr.bf16.mxu0 %v27008_v31 }
0x13b9   :  { %15016 = vmatpush1.bf16.msra.mxu0 %v20845_v6 }
0x13ba   :  { %15017 = vmatprep.subr.bf16.mxu0 %v27008_v31 }
0x13bd   :  { %15018 = vmatpush1.bf16.msra.mxu0 %v20846_v11  ;;  %v17785_v11 = vld [vmem:[%s26940_s16 + $0x78] sm:$0xff] }
0x13be   :  { %15019 = vmatprep.subr.bf16.mxu0 %v27008_v31 }
0x13c1   :  { %15020 = vmatpush1.bf16.msra.mxu0 %v20847_v9  ;;  %v20853_v9 = vld [vmem:[%s26939_s15 + $0x2a8] sm:$0xff]  }
0x13c2   :  { %15021 = vmatprep.subr.bf16.mxu0 %v27008_v31 }
0x13c5   :  { %15022 = vmatpush1.bf16.msra.mxu0 %v20848_v40  ;;  %v20854_v40 = vld [vmem:[%s26939_s15 + $0x2f0] sm:$0xff]  }
0x13c6   :  { %15023 = vmatprep.subr.bf16.mxu0 %v27008_v31 }
0x13c9   :  { %15024 = vmatpush1.bf16.msra.mxu0 %v20849_v58  ;;  %v17786_v58 = vld [vmem:[%s26940_s16 + $0x80] sm:$0xff] }
0x13cc   :  { %15034 = vmatmul.mubr.bf16.vlgmr.msra.gmra.mrb[144].mxu0 %v26341_v62 }
0x13cd   :  { %17884 = vmatprep.mubr.msk.bf16.mxu0 %vm6402_vm3, %v26353_v61 }
0x13d4   :  { %15042 = vmatmul.mubr.bf16.gmra.mrb[148].mxu0 %v26343_v34 }
0x1423   :  { %v14107_v63 = vpop.f32.mrb[90].mxu0 }
0x1424   :  { %v18207_v28 = vpop.f32.mrb[91].mxu0 }
0x1425   :  { %v20856_v28 = vld [vmem:[%s26939_s15 + $0x2f8] sm:$0xff]  }
0x1427   :  { %v14112_v35 = vpop.f32.mrb[108].mxu0 }
0x1428   :  { %v18210_v7 = vpop.f32.mrb[109].mxu0 }
0x1429   :  { %v20857_v7 = vld [vmem:[%s26939_s15 + $0x2b8] sm:$0xff]  }
0x142b   :  { %v14117_v39 = vpop.f32.mrb[110].mxu0 }
0x142c   :  { %v18213_v1 = vpop.f32.mrb[111].mxu0 }
0x142d   :  { %v17788_v1 = vld [vmem:[%s26940_s16 + $0x90] sm:$0xff] }
0x142f   :  { %v14122_v2 = vpop.f32.mrb[112].mxu0 }
0x1430   :  { %v18216_v26 = vpop.f32.mrb[113].mxu0 }
0x1431   :  { %v20860_v26 = vld [vmem:[%s26939_s15 + $0x308] sm:$0xff]  }
0x1433   :  { %v14127_v3 = vpop.f32.mrb[114].mxu0 }
0x1434   :  { %v18219_v51 = vpop.f32.mrb[115].mxu0 }
0x1435   :  { %v20861_v51 = vld [vmem:[%s26939_s15 + $0x2c8] sm:$0xff]  }
0x1437   :  { %v14132_v46 = vpop.f32.mrb[116].mxu0 }
0x1438   :  { %v18222_v31 = vpop.f32.mrb[117].mxu0 }
0x1439   :  { %v17790_v31 = vld [vmem:[%s26940_s16 + $0xa0] sm:$0xff] }
0x143b   :  { %v14137_v22 = vpop.f32.mrb[118].mxu0 }
0x143c   :  { %v18225_v45 = vpop.f32.mrb[119].mxu0 }
0x143d   :  { %v20864_v45 = vld [vmem:[%s26939_s15 + $0x318] sm:$0xff]  }
0x143f   :  { %v14231_v62 = vpop.f32.mrb[120].mxu0 }
0x1440   :  { %v26715_v29 = vadd.f32 %v14231_v62, %v14107_v63  ;;  %v18236_v61 = vpop.f32.mrb[121].mxu0  ;;  %v20855_v63 = vld [vmem:[%s26939_s15 + $0x2b0] sm:$0xff]   ;;  %v20865_v62 = vld [vmem:[%s26939_s15 + $0x2d8] sm:$0xff]  }
0x1443   :  { %v14236_v30 = vpop.f32.mrb[122].mxu0 }
0x1444   :  { %v26717_v34 = vadd.f32 %v14236_v30, %v14112_v35  ;;  %v18239_v53 = vpop.f32.mrb[123].mxu0  ;;  %v17787_v35 = vld [vmem:[%s26940_s16 + $0x88] sm:$0xff] }
0x1447   :  { %v14241_v17 = vpop.f32.mrb[124].mxu0 }
0x1448   :  { %v26719_v37 = vadd.f32 %v14241_v17, %v14117_v39  ;;  %v18242_v43 = vpop.f32.mrb[125].mxu0  ;;  %v20858_v39 = vld [vmem:[%s26939_s15 + $0x300] sm:$0xff]  }
0x144b   :  { %v14246_v57 = vpop.f32.mrb[126].mxu0 }
0x144c   :  { %v26721_v38 = vadd.f32 %v14246_v57, %v14122_v2  ;;  %v18245_v42 = vpop.f32.mrb[127].mxu0  ;;  %v20859_v2 = vld [vmem:[%s26939_s15 + $0x2c0] sm:$0xff]  }
0x144f   :  { %v14251_v27 = vpop.f32.mrb[128].mxu0 }
0x1450   :  { %v26723_v8 = vadd.f32 %v14251_v27, %v14127_v3  ;;  %v18248_v20 = vpop.f32.mrb[129].mxu0  ;;  %v17789_v3 = vld [vmem:[%s26940_s16 + $0x98] sm:$0xff] }
0x1453   :  { %v14256_v5 = vpop.f32.mrb[130].mxu0 }
0x1454   :  { %v26725_v25 = vadd.f32 %v14256_v5, %v14132_v46  ;;  %v18251_v56 = vpop.f32.mrb[131].mxu0  ;;  %v20862_v46 = vld [vmem:[%s26939_s15 + $0x310] sm:$0xff]  }
0x1457   :  { %v14261_v23 = vpop.f32.mrb[132].mxu0 }
0x1458   :  { %v26727_v33 = vadd.f32 %v14261_v23, %v14137_v22  ;;  %v18254_v50 = vpop.f32.mrb[133].mxu0  ;;  %v20863_v22 = vld [vmem:[%s26939_s15 + $0x2d0] sm:$0xff]  }
0x146f   :  { %v14573_v54 = vpop.f32.mrb[136].mxu0 }
0x1470   :  { %v14574_v55 = vadd.f32 %v26545_v10, %v14573_v54  ;;  %v14575_v32 = vpop.f32.mrb[137].mxu0  ;;  %v20850_v10 = vld [vmem:[%s26939_s15 + $0x2e0] sm:$0xff]  }
0x1471   :  { %v14576_v12 = vpop.f32.mrb[138].mxu0 }
0x1472   :  { %v14577_v36 = vadd.f32 %v26553_v47, %v14576_v12  ;;  %v14578_v16 = vpop.f32.mrb[139].mxu0  ;;  %v17784_v47 = vld [vmem:[%s26940_s16 + $0x70] sm:$0xff] }
0x1474   :  { %v18756_v13 = vpack.c.bf16 %v14577_v36, %v14574_v55 }
0x1476   :  { %18757 = vmatpush3.bf16.msra.mxu1 %v18756_v13 }
0x1477   :  { %v14581_v60 = vpop.f32.mrb[140].mxu0  ;;  %18758 = vmatprep.subr.bf16.mxu1 %v26984_v52 }
0x1478   :  { %v14582_v49 = vadd.f32 %v26561_v19, %v14581_v60  ;;  %v14583_v21 = vpop.f32.mrb[141].mxu0  ;;  %v20851_v19 = vld [vmem:[%s26939_s15 + $0x2a0] sm:$0xff]  }
0x1479   :  { %v14584_v44 = vpop.f32.mrb[142].mxu0 }
0x147a   :  { %v14585_v15 = vadd.f32 %v26572_v18, %v14584_v44  ;;  %v14586_v59 = vpop.f32.mrb[143].mxu0  ;;  %v20852_v18 = vld [vmem:[%s26939_s15 + $0x2e8] sm:$0xff]  }
0x147c   :  { %v18759_v6 = vpack.c.bf16 %v14585_v15, %v14582_v49 }
0x147e   :  { %18761 = vmatpush3.bf16.msk.msra.mxu1 %vm26507_vm12, %v18759_v6 }
0x147f   :  { %18158 = vmatprep.subr.bf16.mxu1 %v20850_v10 }
0x1481   :  { %18264 = vmatmul.mubr.msk.f32.vlgmr.msra.gmra.mrb[78].mxu1 %vm14016_vm13, %v17784_v47 }
0x1482   :  { %18159 = vmatpush3.bf16.msra.mxu1 %v20851_v19  ;;  %18266 = vmatprep.mubr.msk.f32.mxu1 %vm20913_vm11, %v26985_v41 }
0x1483   :  { %18160 = vmatprep.subr.bf16.mxu1 %v20852_v18 }
0x1485   :  { %18267 = vmatmul.mubr.msk.f32.gmra.mrb[104].mxu1 %vm14016_vm13, %v17785_v11 }
0x1486   :  { %18161 = vmatpush3.bf16.msra.mxu1 %v20853_v9  ;;  %18269 = vmatprep.mubr.msk.f32.mxu1 %vm20913_vm11, %v26985_v41 }
0x1487   :  { %18162 = vmatprep.subr.bf16.mxu1 %v20854_v40 }
0x1489   :  { %18270 = vmatmul.mubr.msk.f32.gmra.mrb[106].mxu1 %vm14016_vm13, %v17786_v58 }
0x148a   :  { %18163 = vmatpush3.bf16.msra.mxu1 %v20855_v63  ;;  %18272 = vmatprep.mubr.msk.f32.mxu1 %vm20913_vm11, %v26985_v41 }
0x148b   :  { %18164 = vmatprep.subr.bf16.mxu1 %v20856_v28  ;;  %v17885_v28 = vld [vmem:[%s26940_s16 + $0xa8] sm:$0xff] }
0x148d   :  { %18273 = vmatmul.mubr.msk.f32.gmra.mrb[108].mxu1 %vm14016_vm13, %v17787_v35  ;;  %v17888_v35 = vld [vmem:[%s26940_s16 + $0xc0] sm:$0xff] }
0x148e   :  { %18165 = vmatpush3.bf16.msra.mxu1 %v20857_v7  ;;  %18275 = vmatprep.mubr.msk.f32.mxu1 %vm20913_vm11, %v26985_v41  ;;  %v17889_v7 = vld [vmem:[%s26940_s16 + $0xc8] sm:$0xff] }
0x148f   :  { %18166 = vmatprep.subr.bf16.mxu1 %v20858_v39  ;;  %v17890_v39 = vld [vmem:[%s26940_s16 + $0xd0] sm:$0xff] }
0x1491   :  { %18276 = vmatmul.mubr.msk.f32.gmra.mrb[110].mxu1 %vm14016_vm13, %v17788_v1  ;;  %v17891_v1 = vld [vmem:[%s26940_s16 + $0xd8] sm:$0xff] }
0x1492   :  { %18167 = vmatpush3.bf16.msra.mxu1 %v20859_v2  ;;  %18278 = vmatprep.mubr.msk.f32.mxu1 %vm20913_vm11, %v26985_v41 }
0x1493   :  { %18168 = vmatprep.subr.bf16.mxu1 %v20860_v26  ;;  %v17900_v26 = vld [vmem:[%s26941_s17] ss:$0 sm:$0xff] }
0x1495   :  { %18279 = vmatmul.mubr.msk.f32.gmra.mrb[112].mxu1 %vm14016_vm13, %v17789_v3 }
0x1496   :  { %18169 = vmatpush3.bf16.msra.mxu1 %v20861_v51  ;;  %18281 = vmatprep.mubr.msk.f32.mxu1 %vm20913_vm11, %v26985_v41 }
0x1497   :  { %18170 = vmatprep.subr.bf16.mxu1 %v20862_v46 }
0x1499   :  { %18282 = vmatmul.mubr.msk.f32.gmra.mrb[114].mxu1 %vm14016_vm13, %v17790_v31 }
0x149a   :  { %18171 = vmatpush3.bf16.msra.mxu1 %v20863_v22  ;;  %14984 = vmatprep.mubr.bf16.mxu1 %v26320_v14 }
0x149b   :  { %18172 = vmatprep.subr.bf16.mxu1 %v20864_v45 }
0x149e   :  { %18173 = vmatpush3.bf16.msra.mxu1 %v20865_v62 }
0x149f   :  { %v15035_v61 = vpop.f32.mrb[144].mxu0  ;;  %18762 = vmatprep.subr.bf16.mxu1 %v26984_v52 }
0x14a0   :  { %v15037_v30 = vpop.f32.mrb[145].mxu0 }
0x14a1   :  { %14985 = vmatmul.mubr.bf16.vlgmr.msra.gmra.mrb[116].mxu1 %v26316_v4  ;;  %v15038_v53 = vpop.f32.mrb[146].mxu0 }
0x14a2   :  { %14992 = vmatprep.mubr.bf16.mxu1 %v26325_v48  ;;  %v15040_v17 = vpop.f32.mrb[147].mxu0 }
0x14a7   :  { %v15043_v43 = vpop.f32.mrb[148].mxu0 }
0x14a8   :  { %v15045_v57 = vpop.f32.mrb[149].mxu0 }
0x14a9   :  { %14993 = vmatmul.mubr.bf16.gmra.mrb[120].mxu1 %v26318_v0  ;;  %v15046_v14 = vpop.f32.mrb[150].mxu0 }
0x14aa   :  { %v15048_v42 = vpop.f32.mrb[151].mxu0  ;;  %18292 = vmatprep.mubr.msk.f32.mxu1 %vm20913_vm11, %v26985_v41 }
0x1554   :  { %v14686_v27 = vpop.f32.mrb[78].mxu1 }
0x1555   :  { %v26832_v20 = vadd.f32 %v14686_v27, %v26715_v29  ;;  %v18265_v5 = vpop.f32.mrb[79].mxu1 }
0x1558   :  { %v14691_v56 = vpop.f32.mrb[104].mxu1 }
0x1559   :  { %v26835_v4 = vadd.f32 %v14691_v56, %v26717_v34  ;;  %v18268_v48 = vpop.f32.mrb[105].mxu1 }
0x155c   :  { %v14696_v23 = vpop.f32.mrb[106].mxu1 }
0x155d   :  { %v26838_v50 = vadd.f32 %v14696_v23, %v26719_v37  ;;  %v18271_v0 = vpop.f32.mrb[107].mxu1 }
0x1560   :  { %v14701_v54 = vpop.f32.mrb[108].mxu1 }
0x1561   :  { %v26841_v55 = vadd.f32 %v14701_v54, %v26721_v38  ;;  %v18274_v32 = vpop.f32.mrb[109].mxu1 }
0x1564   :  { %v14706_v12 = vpop.f32.mrb[110].mxu1 }
0x1565   :  { %v26844_v29 = vadd.f32 %v14706_v12, %v26723_v8  ;;  %v18277_v36 = vpop.f32.mrb[111].mxu1 }
0x1568   :  { %v14711_v16 = vpop.f32.mrb[112].mxu1 }
0x1569   :  { %v26847_v34 = vadd.f32 %v14711_v16, %v26725_v25  ;;  %v18280_v13 = vpop.f32.mrb[113].mxu1 }
0x156c   :  { %v14716_v60 = vpop.f32.mrb[114].mxu1 }
0x156d   :  { %v26850_v37 = vadd.f32 %v14716_v60, %v26727_v33  ;;  %v18283_v49 = vpop.f32.mrb[115].mxu1 }
0x1574   :  { %v18174_v21 = vpop.f32.mrb[116].mxu1 }
0x1575   :  { %v18175_v44 = vpop.f32.mrb[117].mxu1 }
0x1576   :  { %v18176_v38 = vadd.f32 %v18175_v44, %v18174_v21  ;;  %v18177_v15 = vpop.f32.mrb[118].mxu1 }
0x1577   :  { %v18178_v59 = vpop.f32.mrb[119].mxu1 }
0x1578   :  { %v15036_v10 = vadd.f32 %v18176_v38, %v15035_v61  ;;  %v18179_v6 = vadd.f32 %v18178_v59, %v18177_v15 }
0x157a   :  { %v15039_v8 = vadd.f32 %v18179_v6, %v15038_v53 }
0x157c   :  { %v18763_v47 = vpack.c.bf16 %v15039_v8, %v15036_v10  ;;  %v18180_v19 = vpop.f32.mrb[120].mxu1 }
0x157d   :  { %v18181_v18 = vpop.f32.mrb[121].mxu1 }
0x157e   :  { %v18182_v11 = vadd.f32 %v18181_v18, %v18180_v19  ;;  %v18183_v25 = vpop.f32.mrb[122].mxu1  ;;  %18764 = vmatpush3.bf16.msra.mxu1 %v18763_v47 }
0x157f   :  { %v18184_v9 = vpop.f32.mrb[123].mxu1  ;;  %18765 = vmatprep.subr.bf16.mxu1 %v26984_v52  ;;  %v17886_v52 = vld [vmem:[%s26940_s16 + $0xb0] sm:$0xff]  ;;  %s20914_s16 = smov [#allocation3]  }
0x1580   :  { %v15044_v33 = vadd.f32 %v18182_v11, %v15043_v43  ;;  %v18185_v40 = vadd.f32 %v18184_v9, %v18183_v25  ;;  %s15222_s17 = sshll.u32 %s20914_s16, 4  ;;  %s15223_s17 = int_to_ptr.vmem [resolvable:$true] %s15222_s17 }
0x1581   :  { %s20884_s9 = scalar_lea.vmem %s15223_s17, 896  ;;  %p20889_p1 = scmp.lt.s32.totalorder %s15223_s17, %s15223_s17 }
0x1582   :  { %v15047_v58 = vadd.f32 %v18185_v40, %v15046_v14  ;;  %p20885_p0 = scmp.ne.s32.totalorder %s15223_s17, %s20884_s9  ;;  %p20890_p2 = scmp.lt.s32.totalorder %s20884_s9, %s20884_s9 }
0x1584   :  { %v18766_v63 = vpack.c.bf16 %v15047_v58, %v15044_v33  ;;  %p20891_p3 = por %p20890_p2, %p20889_p1 }
0x1586   :  { %18768 = vmatpush3.bf16.msk.msra.mxu1 %vm26507_vm12, %v18766_v63  ;;  %p20892_p4 = pnand %p20891_p3, %p20885_p0 }
0x1589   :  { %18293 = vmatmul.mubr.msk.f32.vlgmr.msra.gmra.mrb[124].mxu1 %vm14016_vm13, %v17885_v28 }
0x158a   :  { %18295 = vmatprep.mubr.msk.f32.mxu1 %vm20913_vm11, %v26985_v41 }
0x158d   :  { %18296 = vmatmul.mubr.msk.f32.gmra.mrb[126].mxu1 %vm14016_vm13, %v17886_v52 }
0x158e   :  { %18298 = vmatprep.mubr.msk.f32.mxu1 %vm20913_vm11, %v26985_v41 }
0x1591   :  { %18299 = vmatmul.mubr.msk.f32.gmra.mrb[128].mxu1 %vm14016_vm13, %v17887_v24 }
0x1592   :  { %18301 = vmatprep.mubr.msk.f32.mxu1 %vm20913_vm11, %v26985_v41 }
0x1595   :  { %18302 = vmatmul.mubr.msk.f32.gmra.mrb[130].mxu1 %vm14016_vm13, %v17888_v35 }
0x1596   :  { %18304 = vmatprep.mubr.msk.f32.mxu1 %vm20913_vm11, %v26985_v41 }
0x1599   :  { %18305 = vmatmul.mubr.msk.f32.gmra.mrb[132].mxu1 %vm14016_vm13, %v17889_v7 }
0x159a   :  { %18307 = vmatprep.mubr.msk.f32.mxu1 %vm20913_vm11, %v26985_v41 }
0x159d   :  { %18308 = vmatmul.mubr.msk.f32.gmra.mrb[134].mxu1 %vm14016_vm13, %v17890_v39 }
0x159e   :  { %18310 = vmatprep.mubr.msk.f32.mxu1 %vm20913_vm11, %v26985_v41 }
0x15a1   :  { %18311 = vmatmul.mubr.msk.f32.gmra.mrb[136].mxu1 %vm14016_vm13, %v17891_v1 }
0x165c   :  { %v15148_v2 = vpop.f32.mrb[124].mxu1 }
0x165d   :  { %v15182_v3 = vadd.f32 %v15148_v2, %v26832_v20  ;;  %v18294_v51 = vpop.f32.mrb[125].mxu1 }
0x165f   :  { %v15196_v46 = vadd.f32 %v17900_v26, %v15182_v3 }
0x1660   :  { %v15153_v31 = vpop.f32.mrb[126].mxu1 }
0x1661   :  { %20870 = vtanh.f32 %v15196_v46  ;;  %v15183_v22 = vadd.f32 %v15153_v31, %v26835_v4  ;;  %v18297_v41 = vpop.f32.mrb[127].mxu1 }
0x1663   :  { %v15197_v45 = vadd.f32 %v17900_v26, %v15183_v22 }
0x1664   :  { %v15158_v62 = vpop.f32.mrb[128].mxu1 }
0x1665   :  { %20872 = vtanh.f32 %v15197_v45  ;;  %v15184_v61 = vadd.f32 %v15158_v62, %v26838_v50  ;;  %v18300_v30 = vpop.f32.mrb[129].mxu1 }
0x1667   :  { %v15198_v53 = vadd.f32 %v17900_v26, %v15184_v61 }
0x1668   :  { %v15163_v17 = vpop.f32.mrb[130].mxu1 }
0x1669   :  { %20874 = vtanh.f32 %v15198_v53  ;;  %v15185_v43 = vadd.f32 %v15163_v17, %v26841_v55  ;;  %v18303_v57 = vpop.f32.mrb[131].mxu1 }
0x166b   :  { %v20871_v14 = vpop.eup %20870  ;;  %v15199_v42 = vadd.f32 %v17900_v26, %v15185_v43 }
0x166c   :  { %15210 = vst.msk [vmem:[#allocation3] sm:$0xff] %vm14016_vm13, %v20871_v14  ;;  %v15168_v27 = vpop.f32.mrb[132].mxu1 }
0x166d   :  { %20876 = vtanh.f32 %v15199_v42  ;;  %v15186_v20 = vadd.f32 %v15168_v27, %v26844_v29  ;;  %v18306_v5 = vpop.f32.mrb[133].mxu1 }
0x166f   :  { %v20873_v56 = vpop.eup %20872  ;;  %v15200_v4 = vadd.f32 %v17900_v26, %v15186_v20 }
0x1670   :  { %15211 = vst.msk [vmem:[#allocation3 + $0x8] sm:$0xff] %vm14016_vm13, %v20873_v56  ;;  %v15173_v48 = vpop.f32.mrb[134].mxu1 }
0x1671   :  { %20878 = vtanh.f32 %v15200_v4  ;;  %v15187_v23 = vadd.f32 %v15173_v48, %v26847_v34  ;;  %v18309_v50 = vpop.f32.mrb[135].mxu1 }
0x1673   :  { %v20875_v0 = vpop.eup %20874  ;;  %v15201_v54 = vadd.f32 %v17900_v26, %v15187_v23 }
0x1674   :  { %15212 = vst.msk [vmem:[#allocation3 + $0x10] sm:$0xff] %vm14016_vm13, %v20875_v0  ;;  %v15178_v55 = vpop.f32.mrb[136].mxu1 }
0x1675   :  { %20880 = vtanh.f32 %v15201_v54  ;;  %v15188_v32 = vadd.f32 %v15178_v55, %v26850_v37  ;;  %v18312_v12 = vpop.f32.mrb[137].mxu1 }
0x1677   :  { %v20877_v29 = vpop.eup %20876  ;;  %v15202_v36 = vadd.f32 %v17900_v26, %v15188_v32 }
0x1678   :  { %15213 = vst.msk [vmem:[#allocation3 + $0x18] sm:$0xff] %vm14016_vm13, %v20877_v29 }
0x1679   :  { %20882 = vtanh.f32 %v15202_v36 }
0x167b   :  { %v20879_v16 = vpop.eup %20878 }
0x167c   :  { %15214 = vst.msk [vmem:[#allocation3 + $0x20] sm:$0xff] %vm14016_vm13, %v20879_v16 }
0x167f   :  { %v20881_v34 = vpop.eup %20880 }
0x1680   :  { %15215 = vst.msk [vmem:[#allocation3 + $0x28] sm:$0xff] %vm14016_vm13, %v20881_v34 }
0x1683   :  { %v20883_v13 = vpop.eup %20882 }
0x1684   :  { %15216 = vst.msk [vmem:[#allocation3 + $0x30] sm:$0xff] %vm14016_vm13, %v20883_v13 }
0x1685   :  { %20895 = shalt.err (!%p20892_p4)
}
0x1686   :  { %s20896_s30 = scalar_lea.hbm %s26942_s18, 896 }
0x1687   :  { %p20897_p5 = scmp.ne.s32.totalorder %s26942_s18, %s20896_s30  ;;  %p20900_p6 = scmp.lt.u32.totalorder %s20896_s30, %s26942_s18 }
0x1689   :  { %p20902_p7 = pnand %p20900_p6, %p20897_p5 }
0x168b   :  { %20905 = shalt.err (!%p20902_p7)
}
0x168c   :  { %s20915_s19 = smov 128   ;;  %s20916_s6 = smov 8  }
0x168d   :  { %15228 = dma.vmem_to_hbm [thread:$0]  %s15223_s17, 896, %s26942_s18, [#allocation4], %s20915_s19, %s20915_s19, %s20916_s6  }
0x168e   :  { %20906 = dma.done.wait [#allocation4], 896  }
0x168f   :  { %20907 = vsyncadd [#allocation4], 4294966400 }
0x1690   :  { %15232 = vsyncpa [#allocation4], 1 }

</bundles_post_ra>
